<compile_context>
chip_gen: v7x
topology: tpu7x:2x2x1
jax: 0.10.0
libtpu: 0.0.40
codegen_flags: <defaults>
</compile_context>

<pallas_src>
import jax
import jax.numpy as jnp
import numpy as np
from jax import lax
from jax.experimental import pallas as pl
from jax.experimental.pallas import tpu as pltpu


def _conv3x3_relu(x, w_flat, b):
    """3x3 VALID conv + bias + ReLU on (nb, H, W, Ci) via one im2col matmul.

    w_flat: (9*Ci, Co), row order (dy, dx, ci).  b: (1, Co) float32.
    Returns float32 (nb, H-2, W-2, Co).
    """
    nb, H, W, Ci = x.shape
    Co = w_flat.shape[-1]
    Ho, Wo = H - 2, W - 2
    # im2col done once: lane order (dy, dx, ci) matches w_flat's row order.
    cols = [x[:, dy:dy + Ho, dx:dx + Wo, :]
            for dy in range(3) for dx in range(3)]
    patches = jnp.concatenate(cols, axis=-1).reshape(nb * Ho * Wo, 9 * Ci)
    # Native-dtype operands into the MXU, f32 accumulate.
    acc = jnp.dot(patches, w_flat, preferred_element_type=jnp.float32)
    acc = jnp.maximum(acc + b, 0.0)
    return acc.reshape(nb, Ho, Wo, Co)


def contracting_block_kernel(x_ref, w1_ref, b1_ref, w2_ref, b2_ref, o_ref):
    x = x_ref[0]                                      # (nb, H, W, Cin)
    h1 = _conv3x3_relu(x, w1_ref[...], b1_ref[...]).astype(x.dtype)
    h2 = _conv3x3_relu(h1, w2_ref[...], b2_ref[...]).astype(o_ref.dtype)

    # MaxPool 2x2 stride 2: crop odd tail (PyTorch floor semantics), then
    # element-wise maxima on the VPU (no cross-lane/sublane reductions).
    nb, Hp, Wp, C = h2.shape
    Hc, Wc = (Hp // 2) * 2, (Wp // 2) * 2
    h2 = h2[:, :Hc, :Wc, :]
    t = h2.reshape(nb * (Hc // 2), 2, Wc, C)
    hm = jnp.maximum(t[:, 0], t[:, 1])                # (nb*Hc/2, Wc, C)
    t2 = hm.reshape(nb * (Hc // 2) * (Wc // 2), 2, C)
    pm = jnp.maximum(t2[:, 0], t2[:, 1])              # (nb*Hc/2*Wc/2, C)
    o_ref[0] = pm.reshape(nb, Hc // 2, Wc // 2, C)


def contracting_block(x_nchw, w1, b1, w2, b2, *, batch_block=None):
    """ContractingBlock forward.

    x_nchw: (N, Cin, H, W); w1: (3,3,Cin,2Cin) HWIO; b1: (2Cin,);
    w2: (3,3,2Cin,2Cin) HWIO; b2: (2Cin,).  Returns (N, 2Cin, (H-4)//2, (W-4)//2).
    """
    N, Cin, H, W = x_nchw.shape
    C1 = w1.shape[-1]
    C2 = w2.shape[-1]
    assert w1.shape == (3, 3, Cin, C1), "w1 must be HWIO (permute OIHW by (2,3,1,0))"
    assert w2.shape == (3, 3, C1, C2), "w2 must be HWIO (permute OIHW by (2,3,1,0))"
    assert H >= 6 and W >= 6, "need two valid 3x3 convs + 2x2 pool"
    Ho, Wo = (H - 4) // 2, (W - 4) // 2

    if batch_block is None:
        # Fold images into the matmul M dim (amortize ~0.35us per grid step);
        # keep >=2 parallel grid steps when N allows so both v7x TCs are used.
        batch_block = N if (N <= 2 or N % 2) else N // 2
    assert N % batch_block == 0, "batch_block must divide N"
    nb = batch_block
    G = N // nb

    x_nhwc = jnp.transpose(x_nchw, (0, 2, 3, 1)).reshape(G, nb, H, W, Cin)
    # Pre-flatten weights/biases in the wrapper: one dot per conv in-kernel.
    w1_flat = w1.reshape(9 * Cin, C1)            # row order (dy, dx, ci)
    w2_flat = w2.reshape(9 * C1, C2)
    b1_2d = b1.reshape(1, C1).astype(jnp.float32)
    b2_2d = b2.reshape(1, C2).astype(jnp.float32)

    itemsize = x_nchw.dtype.itemsize
    flops = (2 * N * (H - 2) * (W - 2) * 9 * Cin * C1
             + 2 * N * (H - 4) * (W - 4) * 9 * C1 * C2)
    bytes_accessed = int(
        itemsize * (x_nchw.size + N * Ho * Wo * C2
                    + w1_flat.size + w2_flat.size)
        + 4 * (C1 + C2))

    out = pl.pallas_call(
        contracting_block_kernel,
        out_shape=jax.ShapeDtypeStruct((G, nb, Ho, Wo, C2), x_nchw.dtype),
        grid_spec=pltpu.PrefetchScalarGridSpec(
            num_scalar_prefetch=0,
            grid=(G,),
            in_specs=[
                pl.BlockSpec((1, nb, H, W, Cin), lambda g: (g, 0, 0, 0, 0)),
                pl.BlockSpec((9 * Cin, C1), lambda g: (0, 0)),   # resident
                pl.BlockSpec((1, C1), lambda g: (0, 0)),          # resident
                pl.BlockSpec((9 * C1, C2), lambda g: (0, 0)),     # resident
                pl.BlockSpec((1, C2), lambda g: (0, 0)),          # resident
            ],
            out_specs=pl.BlockSpec((1, nb, Ho, Wo, C2),
                                   lambda g: (g, 0, 0, 0, 0)),
        ),
        compiler_params=pltpu.CompilerParams(
            dimension_semantics=("parallel",),
            # Above the 16/32 MiB scoped defaults, below v7x's 64 MiB physical.
            vmem_limit_bytes=48 * 1024 * 1024,
        ),
        cost_estimate=pl.CostEstimate(
            flops=flops, transcendentals=0, bytes_accessed=bytes_accessed),
    )(x_nhwc, w1_flat, b1_2d, w2_flat, b2_2d)

    out = out.reshape(N, Ho, Wo, C2)
    return jnp.transpose(out, (0, 3, 1, 2))           # NHWC -> NCHW


def _reference(x_nchw, w1, b1, w2, b2):
    """Pure-JAX reference (same semantics as the PyTorch module)."""
    x = jnp.transpose(x_nchw, (0, 2, 3, 1)).astype(jnp.float32)
    dn = ("NHWC", "HWIO", "NHWC")
    h = lax.conv_general_dilated(x, w1.astype(jnp.float32), (1, 1), "VALID",
                                 dimension_numbers=dn) + b1
    h = jnp.maximum(h, 0.0)
    h = lax.conv_general_dilated(h, w2.astype(jnp.float32), (1, 1), "VALID",
                                 dimension_numbers=dn) + b2
    h = jnp.maximum(h, 0.0)
    h = lax.reduce_window(h, -jnp.inf, lax.max,
                          (1, 2, 2, 1), (1, 2, 2, 1), "VALID")
    return jnp.transpose(h, (0, 3, 1, 2)).astype(x_nchw.dtype)


if __name__ == "__main__":
    N, Cin, H, W = 2, 4, 16, 16
    C1 = Cin * 2   # conv1 out channels
    C2 = Cin * 2   # conv2 out channels

    key = jax.random.PRNGKey(0)
    kx, kw1, kb1, kw2, kb2 = jax.random.split(key, 5)

    x = jax.random.normal(kx, (N, Cin, H, W), dtype=jnp.float32)

    # Deterministic "kaiming-ish" uniform init (shapes match nn.Conv2d params,
    # stored HWIO instead of PyTorch's OIHW).
    lim1 = 1.0 / np.sqrt(Cin * 9)
    lim2 = 1.0 / np.sqrt(C1 * 9)
    w1 = jax.random.uniform(kw1, (3, 3, Cin, C1), jnp.float32, -lim1, lim1)
    b1 = jax.random.uniform(kb1, (C1,), jnp.float32, -lim1, lim1)
    w2 = jax.random.uniform(kw2, (3, 3, C1, C2), jnp.float32, -lim2, lim2)
    b2 = jax.random.uniform(kb2, (C2,), jnp.float32, -lim2, lim2)

    out = contracting_block(x, w1, b1, w2, b2)
    out = jax.block_until_ready(out)

    ref = jax.block_until_ready(_reference(x, w1, b1, w2, b2))

    assert out.shape == (N, C2, (H - 4) // 2, (W - 4) // 2), out.shape
    np.testing.assert_allclose(np.asarray(out), np.asarray(ref),
                               rtol=1e-5, atol=2e-5)
    print("KERNEL_OK")
</pallas_src>

<mosaic_0001>
module attributes {stable_mosaic.version = 11 : i64} {
  func.func @contracting_block_kernel(%arg0: i32, %arg1: memref<1x2x16x16x4xf32, #tpu.memory_space<vmem>>, %arg2: memref<36x8xf32, #tpu.memory_space<vmem>>, %arg3: memref<1x8xf32, #tpu.memory_space<vmem>>, %arg4: memref<72x8xf32, #tpu.memory_space<vmem>>, %arg5: memref<1x8xf32, #tpu.memory_space<vmem>>, %arg6: memref<1x2x6x6x8xf32, #tpu.memory_space<vmem>>) attributes {dimension_semantics = [#tpu.dimension_semantics<parallel>], iteration_bounds = array<i64: 1>, scalar_prefetch = 0 : i64, scratch_operands = 0 : i64, tpu.core_type = #tpu.core_type<tc>, window_params = [{transform_indices = @transform_0, window_bounds = array<i64: 1, 2, 16, 16, 4>}, {pipeline_mode = #tpu.pipeline_mode<synchronous>, transform_indices = @transform_1, window_bounds = array<i64: 36, 8>}, {pipeline_mode = #tpu.pipeline_mode<synchronous>, transform_indices = @transform_2, window_bounds = array<i64: 1, 8>}, {pipeline_mode = #tpu.pipeline_mode<synchronous>, transform_indices = @transform_3, window_bounds = array<i64: 72, 8>}, {pipeline_mode = #tpu.pipeline_mode<synchronous>, transform_indices = @transform_4, window_bounds = array<i64: 1, 8>}, {transform_indices = @transform_5, window_bounds = array<i64: 1, 2, 6, 6, 8>}]} {
    %c0 = arith.constant 0 : index
    %c0_0 = arith.constant 0 : index
    %c0_1 = arith.constant 0 : index
    %c0_2 = arith.constant 0 : index
    %c0_3 = arith.constant 0 : index
    %0 = vector.load %arg1[%c0, %c0_0, %c0_1, %c0_2, %c0_3] : memref<1x2x16x16x4xf32, #tpu.memory_space<vmem>>, vector<1x2x16x16x4xf32>
    %1 = vector.shape_cast %0 : vector<1x2x16x16x4xf32> to vector<2x16x16x4xf32>
    %c0_4 = arith.constant 0 : index
    %c0_5 = arith.constant 0 : index
    %2 = vector.load %arg2[%c0_4, %c0_5] : memref<36x8xf32, #tpu.memory_space<vmem>>, vector<36x8xf32>
    %c0_6 = arith.constant 0 : index
    %c0_7 = arith.constant 0 : index
    %3 = vector.load %arg3[%c0_6, %c0_7] : memref<1x8xf32, #tpu.memory_space<vmem>>, vector<1x8xf32>
    %4 = vector.extract_strided_slice %1 {offsets = [0, 0, 0, 0], sizes = [2, 14, 14, 4], strides = [1, 1, 1, 1]} : vector<2x16x16x4xf32> to vector<2x14x14x4xf32>
    %5 = vector.extract_strided_slice %1 {offsets = [0, 0, 1, 0], sizes = [2, 14, 14, 4], strides = [1, 1, 1, 1]} : vector<2x16x16x4xf32> to vector<2x14x14x4xf32>
    %6 = vector.extract_strided_slice %1 {offsets = [0, 0, 2, 0], sizes = [2, 14, 14, 4], strides = [1, 1, 1, 1]} : vector<2x16x16x4xf32> to vector<2x14x14x4xf32>
    %7 = vector.extract_strided_slice %1 {offsets = [0, 1, 0, 0], sizes = [2, 14, 14, 4], strides = [1, 1, 1, 1]} : vector<2x16x16x4xf32> to vector<2x14x14x4xf32>
    %8 = vector.extract_strided_slice %1 {offsets = [0, 1, 1, 0], sizes = [2, 14, 14, 4], strides = [1, 1, 1, 1]} : vector<2x16x16x4xf32> to vector<2x14x14x4xf32>
    %9 = vector.extract_strided_slice %1 {offsets = [0, 1, 2, 0], sizes = [2, 14, 14, 4], strides = [1, 1, 1, 1]} : vector<2x16x16x4xf32> to vector<2x14x14x4xf32>
    %10 = vector.extract_strided_slice %1 {offsets = [0, 2, 0, 0], sizes = [2, 14, 14, 4], strides = [1, 1, 1, 1]} : vector<2x16x16x4xf32> to vector<2x14x14x4xf32>
    %11 = vector.extract_strided_slice %1 {offsets = [0, 2, 1, 0], sizes = [2, 14, 14, 4], strides = [1, 1, 1, 1]} : vector<2x16x16x4xf32> to vector<2x14x14x4xf32>
    %12 = vector.extract_strided_slice %1 {offsets = [0, 2, 2, 0], sizes = [2, 14, 14, 4], strides = [1, 1, 1, 1]} : vector<2x16x16x4xf32> to vector<2x14x14x4xf32>
    %13 = tpu.concatenate %4, %5, %6, %7, %8, %9, %10, %11, %12 in 3 : vector<2x14x14x4xf32>, vector<2x14x14x4xf32>, vector<2x14x14x4xf32>, vector<2x14x14x4xf32>, vector<2x14x14x4xf32>, vector<2x14x14x4xf32>, vector<2x14x14x4xf32>, vector<2x14x14x4xf32>, vector<2x14x14x4xf32> -> vector<2x14x14x36xf32>
    %14 = vector.shape_cast %13 : vector<2x14x14x36xf32> to vector<392x36xf32>
    %cst = arith.constant dense<0.000000e+00> : vector<392x8xf32>
    %15 = tpu.matmul %14, %2, %cst {dimension_numbers = #tpu.dot_dimension_numbers<[1], [0], [0], [1], [0, 0, 1, 1], [], []>} : vector<392x36xf32>, vector<36x8xf32>, vector<392x8xf32> -> vector<392x8xf32>
    %16 = vector.broadcast %3 : vector<1x8xf32> to vector<392x8xf32>
    %17 = arith.addf %15, %16 : vector<392x8xf32>
    %cst_8 = arith.constant 0.000000e+00 : f32
    %18 = vector.broadcast %cst_8 : f32 to vector<392x8xf32>
    %19 = arith.maximumf %17, %18 : vector<392x8xf32>
    %20 = vector.shape_cast %19 : vector<392x8xf32> to vector<2x14x14x8xf32>
    %c0_9 = arith.constant 0 : index
    %c0_10 = arith.constant 0 : index
    %21 = vector.load %arg4[%c0_9, %c0_10] : memref<72x8xf32, #tpu.memory_space<vmem>>, vector<72x8xf32>
    %c0_11 = arith.constant 0 : index
    %c0_12 = arith.constant 0 : index
    %22 = vector.load %arg5[%c0_11, %c0_12] : memref<1x8xf32, #tpu.memory_space<vmem>>, vector<1x8xf32>
    %23 = vector.extract_strided_slice %20 {offsets = [0, 0, 0, 0], sizes = [2, 12, 12, 8], strides = [1, 1, 1, 1]} : vector<2x14x14x8xf32> to vector<2x12x12x8xf32>
    %24 = vector.extract_strided_slice %20 {offsets = [0, 0, 1, 0], sizes = [2, 12, 12, 8], strides = [1, 1, 1, 1]} : vector<2x14x14x8xf32> to vector<2x12x12x8xf32>
    %25 = vector.extract_strided_slice %20 {offsets = [0, 0, 2, 0], sizes = [2, 12, 12, 8], strides = [1, 1, 1, 1]} : vector<2x14x14x8xf32> to vector<2x12x12x8xf32>
    %26 = vector.extract_strided_slice %20 {offsets = [0, 1, 0, 0], sizes = [2, 12, 12, 8], strides = [1, 1, 1, 1]} : vector<2x14x14x8xf32> to vector<2x12x12x8xf32>
    %27 = vector.extract_strided_slice %20 {offsets = [0, 1, 1, 0], sizes = [2, 12, 12, 8], strides = [1, 1, 1, 1]} : vector<2x14x14x8xf32> to vector<2x12x12x8xf32>
    %28 = vector.extract_strided_slice %20 {offsets = [0, 1, 2, 0], sizes = [2, 12, 12, 8], strides = [1, 1, 1, 1]} : vector<2x14x14x8xf32> to vector<2x12x12x8xf32>
    %29 = vector.extract_strided_slice %20 {offsets = [0, 2, 0, 0], sizes = [2, 12, 12, 8], strides = [1, 1, 1, 1]} : vector<2x14x14x8xf32> to vector<2x12x12x8xf32>
    %30 = vector.extract_strided_slice %20 {offsets = [0, 2, 1, 0], sizes = [2, 12, 12, 8], strides = [1, 1, 1, 1]} : vector<2x14x14x8xf32> to vector<2x12x12x8xf32>
    %31 = vector.extract_strided_slice %20 {offsets = [0, 2, 2, 0], sizes = [2, 12, 12, 8], strides = [1, 1, 1, 1]} : vector<2x14x14x8xf32> to vector<2x12x12x8xf32>
    %32 = tpu.concatenate %23, %24, %25, %26, %27, %28, %29, %30, %31 in 3 : vector<2x12x12x8xf32>, vector<2x12x12x8xf32>, vector<2x12x12x8xf32>, vector<2x12x12x8xf32>, vector<2x12x12x8xf32>, vector<2x12x12x8xf32>, vector<2x12x12x8xf32>, vector<2x12x12x8xf32>, vector<2x12x12x8xf32> -> vector<2x12x12x72xf32>
    %33 = vector.shape_cast %32 : vector<2x12x12x72xf32> to vector<288x72xf32>
    %cst_13 = arith.constant dense<0.000000e+00> : vector<288x8xf32>
    %34 = tpu.matmul %33, %21, %cst_13 {dimension_numbers = #tpu.dot_dimension_numbers<[1], [0], [0], [1], [0, 0, 1, 1], [], []>} : vector<288x72xf32>, vector<72x8xf32>, vector<288x8xf32> -> vector<288x8xf32>
    %35 = vector.broadcast %22 : vector<1x8xf32> to vector<288x8xf32>
    %36 = arith.addf %34, %35 : vector<288x8xf32>
    %cst_14 = arith.constant 0.000000e+00 : f32
    %37 = vector.broadcast %cst_14 : f32 to vector<288x8xf32>
    %38 = arith.maximumf %36, %37 : vector<288x8xf32>
    %39 = vector.shape_cast %38 : vector<288x8xf32> to vector<2x12x12x8xf32>
    %40 = vector.shape_cast %39 : vector<2x12x12x8xf32> to vector<12x2x12x8xf32>
    %41 = vector.extract_strided_slice %40 {offsets = [0, 0, 0, 0], sizes = [12, 1, 12, 8], strides = [1, 1, 1, 1]} : vector<12x2x12x8xf32> to vector<12x1x12x8xf32>
    %42 = vector.shape_cast %41 : vector<12x1x12x8xf32> to vector<12x12x8xf32>
    %43 = vector.extract_strided_slice %40 {offsets = [0, 1, 0, 0], sizes = [12, 1, 12, 8], strides = [1, 1, 1, 1]} : vector<12x2x12x8xf32> to vector<12x1x12x8xf32>
    %44 = vector.shape_cast %43 : vector<12x1x12x8xf32> to vector<12x12x8xf32>
    %45 = arith.maximumf %42, %44 : vector<12x12x8xf32>
    %46 = vector.shape_cast %45 : vector<12x12x8xf32> to vector<72x2x8xf32>
    %47 = vector.extract_strided_slice %46 {offsets = [0, 0, 0], sizes = [72, 1, 8], strides = [1, 1, 1]} : vector<72x2x8xf32> to vector<72x1x8xf32>
    %48 = vector.shape_cast %47 : vector<72x1x8xf32> to vector<72x8xf32>
    %49 = vector.extract_strided_slice %46 {offsets = [0, 1, 0], sizes = [72, 1, 8], strides = [1, 1, 1]} : vector<72x2x8xf32> to vector<72x1x8xf32>
    %50 = vector.shape_cast %49 : vector<72x1x8xf32> to vector<72x8xf32>
    %51 = arith.maximumf %48, %50 : vector<72x8xf32>
    %52 = vector.shape_cast %51 : vector<72x8xf32> to vector<2x6x6x8xf32>
    %c0_15 = arith.constant 0 : index
    %c0_16 = arith.constant 0 : index
    %c0_17 = arith.constant 0 : index
    %c0_18 = arith.constant 0 : index
    %c0_19 = arith.constant 0 : index
    %53 = vector.load %arg6[%c0_15, %c0_16, %c0_17, %c0_18, %c0_19] : memref<1x2x6x6x8xf32, #tpu.memory_space<vmem>>, vector<1x2x6x6x8xf32>
    %54 = vector.shape_cast %53 : vector<1x2x6x6x8xf32> to vector<2x6x6x8xf32>
    %55 = vector.shape_cast %52 : vector<2x6x6x8xf32> to vector<1x2x6x6x8xf32>
    tpu.vector_store %arg6[%c0_15, %c0_16, %c0_17, %c0_18, %c0_19], %55 {strides = array<i32>} : memref<1x2x6x6x8xf32, #tpu.memory_space<vmem>>, vector<1x2x6x6x8xf32>,
    return
  }
  func.func @transform_0(%arg0: i32) -> (i32, i32, i32, i32, i32) {
    %c0_i32 = arith.constant 0 : i32
    %c0_i32_0 = arith.constant 0 : i32
    %c0_i32_1 = arith.constant 0 : i32
    %c0_i32_2 = arith.constant 0 : i32
    %c0_i32_3 = arith.constant 0 : i32
    return %arg0, %c0_i32, %c0_i32_0, %c0_i32_1, %c0_i32_2 : i32, i32, i32, i32, i32
  }
  func.func @transform_1(%arg0: i32) -> (i32, i32) {
    %c0_i32 = arith.constant 0 : i32
    %c0_i32_0 = arith.constant 0 : i32
    %c0_i32_1 = arith.constant 0 : i32
    return %c0_i32, %c0_i32_0 : i32, i32
  }
  func.func @transform_2(%arg0: i32) -> (i32, i32) {
    %c0_i32 = arith.constant 0 : i32
    %c0_i32_0 = arith.constant 0 : i32
    %c0_i32_1 = arith.constant 0 : i32
    return %c0_i32, %c0_i32_0 : i32, i32
  }
  func.func @transform_3(%arg0: i32) -> (i32, i32) {
    %c0_i32 = arith.constant 0 : i32
    %c0_i32_0 = arith.constant 0 : i32
    %c0_i32_1 = arith.constant 0 : i32
    return %c0_i32, %c0_i32_0 : i32, i32
  }
  func.func @transform_4(%arg0: i32) -> (i32, i32) {
    %c0_i32 = arith.constant 0 : i32
    %c0_i32_0 = arith.constant 0 : i32
    %c0_i32_1 = arith.constant 0 : i32
    return %c0_i32, %c0_i32_0 : i32, i32
  }
  func.func @transform_5(%arg0: i32) -> (i32, i32, i32, i32, i32) {
    %c0_i32 = arith.constant 0 : i32
    %c0_i32_0 = arith.constant 0 : i32
    %c0_i32_1 = arith.constant 0 : i32
    %c0_i32_2 = arith.constant 0 : i32
    %c0_i32_3 = arith.constant 0 : i32
    return %arg0, %c0_i32, %c0_i32_0, %c0_i32_1, %c0_i32_2 : i32, i32, i32, i32, i32
  }
}

</mosaic_0001>

<bundles_post_ra>
// kernel: tpu_custom_call.1
= control target key start
LH: loop header
LB: loop body
LE: loop exit
PB: predicated region body
PF: predicated region fallthrough
CT: control target
= control target key end

     0   :  { %vm146_vm0 = vcmask 1046528   ;;  %s10957_s30 = smov 4   ;;  %vm399_vm1 = vcmask 1045504   ;;  %s10958_s10 = smov 8   ;;  %vm4066_vm2 = vcmask 1043456   ;;  %vm10967_vm3 = vmmov 0   ;;  %s20381_s0 = inlined_call_operand.vmem [shape: f32[1,2,16,16,4], index: 0, kind: input, shape index: {}]   ;;  %s20382_s1 = inlined_call_operand.vmem [shape: f32[36,8], index: 1, kind: input, shape index: {}]   ;;  %s20383_s2 = inlined_call_operand.vmem [shape: f32[1,8], index: 2, kind: input, shape index: {}]   ;;  %s20384_s3 = inlined_call_operand.vmem [shape: f32[72,8], index: 3, kind: input, shape index: {}]   ;;  %s20385_s4 = inlined_call_operand.vmem [shape: f32[1,8], index: 4, kind: input, shape index: {}]   ;;  %s20386_s5 = inlined_call_operand.vmem [shape: f32[1,2,6,6,8], index: 5, kind: output, shape index: {}]  }
   0x1   :  { %v11006_v0 = vld [vmem:[%s20381_s0 + $0x18] sm:$0xff]  ;;  %v11011_v1 = vld [vmem:[%s20381_s0 + $0x8] sm:$0xff]  ;;  %v11016_v2 = vld [vmem:[%s20381_s0 + $0x10] sm:$0xff]  ;;  %s10960_s19 = smov 16   ;;  %s10961_s20 = smov 20   ;;  %vm1692_vm4 = vcmask 31744  }
   0x2   :  { %v11019_v3 = vrot.slane %v11006_v0, 1  ;;  %v148_v4 = vrot.slane %v11011_v1, 1  ;;  %v150_v5 = vrot.slane %v11016_v2, 1  ;;  %v11026_v6 = vld [vmem:[%s20381_s0] sm:$0xff]  ;;  %v11031_v7 = vld [vmem:[%s20381_s0 + $0x28] sm:$0xff]  ;;  %v11054_v14 = vld [vmem:[%s20381_s0 + $0x38] sm:$0xff] }
   0x3   :  { %v11036_v8 = vld [vmem:[%s20381_s0 + $0x20] sm:$0xff]  ;;  %v147_v9 = vrot.slane %v11026_v6, 1  ;;  %v11048_v12 = vrot.slane %v11031_v7, 1  ;;  %v11059_v15 = vld [vmem:[%s20381_s0 + $0x30] sm:$0xff]  ;;  %v11069_v17 = vrot.slane %v11054_v14, 1  ;;  %v11075_v19 = vld [vmem:[%s20381_s0 + $0x48] sm:$0xff] }
   0x4   :  { %21002 = vst [vmem:[#allocation2_spill] sm:$0xff] %v11019_v3  ;;  %237 = vrot.lane.b32.xlu1 %v11019_v3, %s10957_s30  ;;  %233 = vrot.lane.b32.xlu0 %v148_v4, %s10957_s30  ;;  %v11044_v10 = vsel %vm146_vm0, %v150_v5, %v11019_v3  ;;  %v153_v13 = vrot.slane %v11036_v8, 1  ;;  %v156_v18 = vrot.slane %v11059_v15, 1  ;;  %v11080_v20 = vld [vmem:[%s20381_s0 + $0x40] sm:$0xff]  ;;  %v11091_v22 = vrot.slane %v11075_v19, 1  ;;  %v11097_v24 = vld [vmem:[%s20381_s0 + $0x58] sm:$0xff] }
   0x5   :  { %21003 = vst [vmem:[#allocation3_spill] sm:$0xff] %v11044_v10  ;;  %v149_v11 = vsel %vm146_vm0, %v147_v9, %v148_v4  ;;  %21004 = vst [vmem:[#allocation4_spill] sm:$0xff] %v11048_v12  ;;  %v159_v23 = vrot.slane %v11080_v20, 1  ;;  %v11102_v25 = vld [vmem:[%s20381_s0 + $0x50] sm:$0xff]  ;;  %v11113_v27 = vrot.slane %v11097_v24, 1  ;;  %v11119_v29 = vld [vmem:[%s20381_s0 + $0x68] sm:$0xff] }
   0x6   :  { %v11066_v16 = vsel %vm146_vm0, %v153_v13, %v11048_v12  ;;  %21006 = vst [vmem:[#allocation6_spill] sm:$0xff] %v11069_v17  ;;  %v11088_v21 = vsel %vm146_vm0, %v156_v18, %v11069_v17  ;;  %21008 = vst [vmem:[#allocation8_spill] sm:$0xff] %v11091_v22  ;;  %v162_v28 = vrot.slane %v11102_v25, 1  ;;  %v11124_v30 = vld [vmem:[%s20381_s0 + $0x60] sm:$0xff]  ;;  %v11135_v32 = vrot.slane %v11119_v29, 1  ;;  %v11141_v34 = vld [vmem:[%s20381_s0 + $0x78] sm:$0xff] }
   0x7   :  { %21005 = vst [vmem:[#allocation5_spill] sm:$0xff] %v11066_v16  ;;  %21007 = vst [vmem:[#allocation7_spill] sm:$0xff] %v11088_v21  ;;  %v11110_v26 = vsel %vm146_vm0, %v159_v23, %v11091_v22  ;;  %v165_v33 = vrot.slane %v11124_v30, 1  ;;  %v11146_v35 = vld [vmem:[%s20381_s0 + $0x70] sm:$0xff]  ;;  %v11157_v37 = vrot.slane %v11141_v34, 1  ;;  %v11163_v39 = vld [vmem:[%s20381_s0 + $0x88] sm:$0xff] }
   0x8   :  { %235 = vrot.lane.b32.xlu1 %v11044_v10, %s10957_s30  ;;  %231 = vrot.lane.b32.xlu0 %v149_v11, %s10957_s30  ;;  %21009 = vst [vmem:[#allocation9_spill] sm:$0xff] %v11110_v26  ;;  %21010 = vst [vmem:[#allocation10_spill] sm:$0xff] %v11113_v27  ;;  %v11132_v31 = vsel %vm146_vm0, %v162_v28, %v11113_v27  ;;  %v168_v38 = vrot.slane %v11146_v35, 1  ;;  %v11168_v40 = vld [vmem:[%s20381_s0 + $0x80] sm:$0xff]  ;;  %v11179_v42 = vrot.slane %v11163_v39, 1  ;;  %v11185_v44 = vld [vmem:[%s20381_s0 + $0x98] sm:$0xff] }
   0x9   :  { %21011 = vst [vmem:[#allocation11_spill] sm:$0xff] %v11132_v31  ;;  %21012 = vst [vmem:[#allocation12_spill] sm:$0xff] %v11135_v32  ;;  %v11154_v36 = vsel %vm146_vm0, %v165_v33, %v11135_v32  ;;  %v171_v43 = vrot.slane %v11168_v40, 1  ;;  %v11190_v45 = vld [vmem:[%s20381_s0 + $0x90] sm:$0xff]  ;;  %v11201_v47 = vrot.slane %v11185_v44, 1  ;;  %v11207_v49 = vld [vmem:[%s20381_s0 + $0xa8] sm:$0xff] }
   0xa   :  { %21013 = vst [vmem:[#allocation13_spill] sm:$0xff] %v11154_v36  ;;  %21014 = vst [vmem:[#allocation14_spill] sm:$0xff] %v11157_v37  ;;  %v11176_v41 = vsel %vm146_vm0, %v168_v38, %v11157_v37  ;;  %v174_v48 = vrot.slane %v11190_v45, 1  ;;  %v11212_v50 = vld [vmem:[%s20381_s0 + $0xa0] sm:$0xff]  ;;  %v11223_v52 = vrot.slane %v11207_v49, 1  ;;  %v11229_v54 = vld [vmem:[%s20381_s0 + $0xb8] sm:$0xff] }
   0xb   :  { %21015 = vst [vmem:[#allocation15_spill] sm:$0xff] %v11176_v41  ;;  %21016 = vst [vmem:[#allocation16_spill] sm:$0xff] %v11179_v42  ;;  %v11198_v46 = vsel %vm146_vm0, %v171_v43, %v11179_v42  ;;  %v177_v53 = vrot.slane %v11212_v50, 1  ;;  %v11234_v55 = vld [vmem:[%s20381_s0 + $0xb0] sm:$0xff]  ;;  %v11245_v57 = vrot.slane %v11229_v54, 1  ;;  %v11251_v59 = vld [vmem:[%s20381_s0 + $0xc8] sm:$0xff] }
   0xc   :  { %241 = vrot.lane.b32.xlu1 %v11048_v12, %s10957_s30  ;;  %239 = vrot.lane.b32.xlu0 %v11066_v16, %s10957_s30  ;;  %21017 = vst [vmem:[#allocation17_spill] sm:$0xff] %v11198_v46  ;;  %21018 = vst [vmem:[#allocation18_spill] sm:$0xff] %v11201_v47  ;;  %v11220_v51 = vsel %vm146_vm0, %v174_v48, %v11201_v47  ;;  %v180_v58 = vrot.slane %v11234_v55, 1  ;;  %v11256_v60 = vld [vmem:[%s20381_s0 + $0xc0] sm:$0xff]  ;;  %v11267_v62 = vrot.slane %v11251_v59, 1  ;;  %v11273_v4 = vld [vmem:[%s20381_s0 + $0xd8] sm:$0xff] }
   0xd   :  { %21019 = vst [vmem:[#allocation19_spill] sm:$0xff] %v11220_v51  ;;  %21020 = vst [vmem:[#allocation20_spill] sm:$0xff] %v11223_v52  ;;  %v11242_v56 = vsel %vm146_vm0, %v177_v53, %v11223_v52  ;;  %v183_v63 = vrot.slane %v11256_v60, 1  ;;  %v11278_v5 = vld [vmem:[%s20381_s0 + $0xd0] sm:$0xff]  ;;  %v11289_v11 = vrot.slane %v11273_v4, 1  ;;  %v11295_v18 = vld [vmem:[%s20381_s0 + $0x108] sm:$0xff] }
   0xe   :  { %21021 = vst [vmem:[#allocation21_spill] sm:$0xff] %v11242_v56  ;;  %21022 = vst [vmem:[#allocation22_spill] sm:$0xff] %v11245_v57  ;;  %v11264_v61 = vsel %vm146_vm0, %v180_v58, %v11245_v57  ;;  %v186_v13 = vrot.slane %v11278_v5, 1  ;;  %v11300_v23 = vld [vmem:[%s20381_s0 + $0x100] sm:$0xff]  ;;  %v190_v33 = vrot.slane %v11295_v18, 1  ;;  %v11315_v43 = vld [vmem:[%s20381_s0 + $0x118] sm:$0xff] }
   0xf   :  { %21023 = vst [vmem:[#allocation23_spill] sm:$0xff] %v11264_v61  ;;  %21024 = vst [vmem:[#allocation24_spill] sm:$0xff] %v11267_v62  ;;  %v11286_v9 = vsel %vm146_vm0, %v183_v63, %v11267_v62  ;;  %v189_v38 = vrot.slane %v11300_v23, 1  ;;  %v11320_v48 = vld [vmem:[%s20381_s0 + $0x110] sm:$0xff]  ;;  %v11328_v58 = vrot.slane %v11315_v43, 1  ;;  %v11574_v12 = vld [vmem:[%s20381_s0 + $0x1d8] sm:$0xff] }
  0x10   :  { %245 = vrot.lane.b32.xlu1 %v11069_v17, %s10957_s30  ;;  %243 = vrot.lane.b32.xlu0 %v11088_v21, %s10957_s30  ;;  %21025 = vst [vmem:[#allocation25_spill] sm:$0xff] %v11278_v5  ;;  %21026 = vst [vmem:[#allocation26_spill] sm:$0xff] %v11286_v9  ;;  %v11308_v28 = vsel %vm146_vm0, %v186_v13, %v11289_v11  ;;  %v192_v63 = vrot.slane %v11320_v48, 1  ;;  %v11334_v13 = vld [vmem:[%s20381_s0 + $0x128] sm:$0xff]  ;;  %v11609_v3 = vrot.slane %v11006_v0, 2  ;;  %s10962_s23 = smov 24  }
  0x11   :  { %21027 = vst [vmem:[#allocation27_spill] sm:$0xff] %v11289_v11  ;;  %21028 = vst [vmem:[#allocation28_spill] sm:$0xff] %v11308_v28  ;;  %v191_v53 = vsel %vm146_vm0, %v189_v38, %v190_v33  ;;  %v11552_v17 = vld [vmem:[%s20381_s0 + $0x1c8] sm:$0xff]  ;;  %s10963_s14 = smov 28   ;;  %s10965_s25 = smov 32   ;;  %vm1749_vm5 = vcmask 64512  }
  0x12   :  { %21029 = vst [vmem:[#allocation29_spill] sm:$0xff] %v11328_v58  ;;  %v11345_v38 = vsel %vm146_vm0, %v192_v63, %v11328_v58  ;;  %21055 = vst [vmem:[#allocation55_spill] sm:$0xff] %v11609_v3  ;;  %vm1806_vm6 = vcmask 97280   ;;  %vm1863_vm7 = vcmask 130048   ;;  %vm1920_vm8 = vcmask 162816   ;;  %s10970_s28 = smov 48  }
  0x13   :  { %21030 = vst [vmem:[#allocation30_spill] sm:$0xff] %v11345_v38  ;;  %vm1977_vm9 = vcmask 195584   ;;  %vm2034_vm10 = vcmask 228352   ;;  %vm2091_vm11 = vcmask 261120   ;;  %vm3967_vm12 = vcmask 293888   ;;  %s10971_s9 = smov 64  }
  0x14   :  { %249 = vrot.lane.b32.xlu1 %v11091_v22, %s10957_s30  ;;  %247 = vrot.lane.b32.xlu0 %v11110_v26, %s10957_s30  ;;  %v11530_v22 = vld [vmem:[%s20381_s0 + $0x1b8] sm:$0xff]  ;;  %vm8421_vm13 = vcmask 326656   ;;  %vm8470_vm14 = vcmask 392192   ;;  %vm8519_vm15 = vcmask 457728  }
  0x18   :  { %253 = vrot.lane.b32.xlu1 %v11113_v27, %s10957_s30  ;;  %251 = vrot.lane.b32.xlu0 %v11132_v31, %s10957_s30  ;;  %v11508_v27 = vld [vmem:[%s20381_s0 + $0x1a8] sm:$0xff] }
  0x1c   :  { %257 = vrot.lane.b32.xlu1 %v11135_v32, %s10957_s30  ;;  %255 = vrot.lane.b32.xlu0 %v11154_v36, %s10957_s30  ;;  %v11486_v32 = vld [vmem:[%s20381_s0 + $0x198] sm:$0xff] }
  0x20   :  { %261 = vrot.lane.b32.xlu1 %v11157_v37, %s10957_s30  ;;  %259 = vrot.lane.b32.xlu0 %v11176_v41, %s10957_s30  ;;  %v11464_v37 = vld [vmem:[%s20381_s0 + $0x188] sm:$0xff] }
  0x24   :  { %265 = vrot.lane.b32.xlu1 %v11179_v42, %s10957_s30  ;;  %263 = vrot.lane.b32.xlu0 %v11198_v46, %s10957_s30  ;;  %v11442_v42 = vld [vmem:[%s20381_s0 + $0x178] sm:$0xff] }
  0x28   :  { %269 = vrot.lane.b32.xlu1 %v11201_v47, %s10957_s30  ;;  %267 = vrot.lane.b32.xlu0 %v11220_v51, %s10957_s30  ;;  %v11420_v47 = vld [vmem:[%s20381_s0 + $0x168] sm:$0xff] }
  0x2c   :  { %273 = vrot.lane.b32.xlu1 %v11223_v52, %s10957_s30  ;;  %271 = vrot.lane.b32.xlu0 %v11242_v56, %s10957_s30  ;;  %v11398_v52 = vld [vmem:[%s20381_s0 + $0x158] sm:$0xff] }
  0x30   :  { %277 = vrot.lane.b32.xlu1 %v11245_v57, %s10957_s30  ;;  %275 = vrot.lane.b32.xlu0 %v11264_v61, %s10957_s30  ;;  %v11376_v57 = vld [vmem:[%s20381_s0 + $0x148] sm:$0xff] }
  0x34   :  { %281 = vrot.lane.b32.xlu1 %v11267_v62, %s10957_s30  ;;  %279 = vrot.lane.b32.xlu0 %v11286_v9, %s10957_s30  ;;  %v11339_v9 = vld [vmem:[%s20381_s0 + $0x120] sm:$0xff]  ;;  %v11354_v62 = vld [vmem:[%s20381_s0 + $0x138] sm:$0xff] }
  0x35   :  { %v11370_v63 = vrot.slane %v11354_v62, 1 }
  0x37   :  { %21033 = vst [vmem:[#allocation33_spill] sm:$0xff] %v11370_v63 }
  0x38   :  { %285 = vrot.lane.b32.xlu1 %v11289_v11, %s10957_s30  ;;  %283 = vrot.lane.b32.xlu0 %v11308_v28, %s10957_s30  ;;  %v11348_v28 = vrot.slane %v11334_v13, 1  ;;  %v195_v11 = vrot.slane %v11339_v9, 1 }
  0x3a   :  { %21031 = vst [vmem:[#allocation31_spill] sm:$0xff] %v11348_v28 }
  0x3c   :  { %289 = vrot.lane.b32.xlu1 %v190_v33, %s10957_s30  ;;  %287 = vrot.lane.b32.xlu0 %v191_v53, %s10957_s30  ;;  %v11359_v33 = vld [vmem:[%s20381_s0 + $0x130] sm:$0xff]  ;;  %v11367_v53 = vsel %vm146_vm0, %v195_v11, %v11348_v28 }
  0x3d   :  { %21032 = vst [vmem:[#allocation32_spill] sm:$0xff] %v11367_v53  ;;  %v198_v61 = vrot.slane %v11359_v33, 1 }
  0x3f   :  { %v11389_v11 = vsel %vm146_vm0, %v198_v61, %v11370_v63 }
  0x40   :  { %293 = vrot.lane.b32.xlu1 %v11328_v58, %s10957_s30  ;;  %291 = vrot.lane.b32.xlu0 %v11345_v38, %s10957_s30  ;;  %v11381_v58 = vld [vmem:[%s20381_s0 + $0x140] sm:$0xff]  ;;  %21034 = vst [vmem:[#allocation34_spill] sm:$0xff] %v11389_v11  ;;  %v11392_v38 = vrot.slane %v11376_v57, 1 }
  0x41   :  { %v201_v56 = vrot.slane %v11381_v58, 1 }
  0x42   :  { %21035 = vst [vmem:[#allocation35_spill] sm:$0xff] %v11392_v38 }
  0x43   :  { %v11411_v61 = vsel %vm146_vm0, %v201_v56, %v11392_v38 }
  0x44   :  { %297 = vrot.lane.b32.xlu1 %v11348_v28, %s10957_s30  ;;  %295 = vrot.lane.b32.xlu0 %v11367_v53, %s10957_s30  ;;  %v11403_v28 = vld [vmem:[%s20381_s0 + $0x150] sm:$0xff]  ;;  %21036 = vst [vmem:[#allocation36_spill] sm:$0xff] %v11411_v61  ;;  %v11414_v53 = vrot.slane %v11398_v52, 1 }
  0x45   :  { %v204_v51 = vrot.slane %v11403_v28, 1 }
  0x46   :  { %21037 = vst [vmem:[#allocation37_spill] sm:$0xff] %v11414_v53 }
  0x47   :  { %v11433_v56 = vsel %vm146_vm0, %v204_v51, %v11414_v53 }
  0x48   :  { %301 = vrot.lane.b32.xlu1 %v11370_v63, %s10957_s30  ;;  %299 = vrot.lane.b32.xlu0 %v11389_v11, %s10957_s30  ;;  %v11425_v63 = vld [vmem:[%s20381_s0 + $0x160] sm:$0xff]  ;;  %21038 = vst [vmem:[#allocation38_spill] sm:$0xff] %v11433_v56  ;;  %v11436_v11 = vrot.slane %v11420_v47, 1 }
  0x49   :  { %v207_v46 = vrot.slane %v11425_v63, 1 }
  0x4a   :  { %21039 = vst [vmem:[#allocation39_spill] sm:$0xff] %v11436_v11 }
  0x4b   :  { %v11455_v51 = vsel %vm146_vm0, %v207_v46, %v11436_v11 }
  0x4c   :  { %305 = vrot.lane.b32.xlu1 %v11392_v38, %s10957_s30  ;;  %303 = vrot.lane.b32.xlu0 %v11411_v61, %s10957_s30  ;;  %v11447_v38 = vld [vmem:[%s20381_s0 + $0x170] sm:$0xff]  ;;  %21040 = vst [vmem:[#allocation40_spill] sm:$0xff] %v11455_v51  ;;  %v11458_v61 = vrot.slane %v11442_v42, 1 }
  0x4d   :  { %v210_v41 = vrot.slane %v11447_v38, 1 }
  0x4e   :  { %21041 = vst [vmem:[#allocation41_spill] sm:$0xff] %v11458_v61 }
  0x4f   :  { %v11477_v46 = vsel %vm146_vm0, %v210_v41, %v11458_v61 }
  0x50   :  { %309 = vrot.lane.b32.xlu1 %v11414_v53, %s10957_s30  ;;  %307 = vrot.lane.b32.xlu0 %v11433_v56, %s10957_s30  ;;  %v11469_v53 = vld [vmem:[%s20381_s0 + $0x180] sm:$0xff]  ;;  %21042 = vst [vmem:[#allocation42_spill] sm:$0xff] %v11477_v46  ;;  %v11480_v56 = vrot.slane %v11464_v37, 1 }
  0x51   :  { %v213_v36 = vrot.slane %v11469_v53, 1 }
  0x52   :  { %21043 = vst [vmem:[#allocation43_spill] sm:$0xff] %v11480_v56 }
  0x53   :  { %v11499_v41 = vsel %vm146_vm0, %v213_v36, %v11480_v56 }
  0x54   :  { %313 = vrot.lane.b32.xlu1 %v11436_v11, %s10957_s30  ;;  %311 = vrot.lane.b32.xlu0 %v11455_v51, %s10957_s30  ;;  %v11491_v11 = vld [vmem:[%s20381_s0 + $0x190] sm:$0xff]  ;;  %21044 = vst [vmem:[#allocation44_spill] sm:$0xff] %v11499_v41  ;;  %v11502_v51 = vrot.slane %v11486_v32, 1 }
  0x55   :  { %v216_v31 = vrot.slane %v11491_v11, 1 }
  0x56   :  { %21045 = vst [vmem:[#allocation45_spill] sm:$0xff] %v11502_v51 }
  0x57   :  { %v11521_v36 = vsel %vm146_vm0, %v216_v31, %v11502_v51 }
  0x58   :  { %317 = vrot.lane.b32.xlu1 %v11458_v61, %s10957_s30  ;;  %315 = vrot.lane.b32.xlu0 %v11477_v46, %s10957_s30  ;;  %v11513_v61 = vld [vmem:[%s20381_s0 + $0x1a0] sm:$0xff]  ;;  %21046 = vst [vmem:[#allocation46_spill] sm:$0xff] %v11521_v36  ;;  %v11524_v46 = vrot.slane %v11508_v27, 1 }
  0x59   :  { %v219_v26 = vrot.slane %v11513_v61, 1 }
  0x5a   :  { %21047 = vst [vmem:[#allocation47_spill] sm:$0xff] %v11524_v46 }
  0x5b   :  { %v11543_v31 = vsel %vm146_vm0, %v219_v26, %v11524_v46 }
  0x5c   :  { %321 = vrot.lane.b32.xlu1 %v11480_v56, %s10957_s30  ;;  %319 = vrot.lane.b32.xlu0 %v11499_v41, %s10957_s30  ;;  %v11535_v56 = vld [vmem:[%s20381_s0 + $0x1b0] sm:$0xff]  ;;  %21048 = vst [vmem:[#allocation48_spill] sm:$0xff] %v11543_v31  ;;  %v11546_v41 = vrot.slane %v11530_v22, 1 }
  0x5d   :  { %v222_v21 = vrot.slane %v11535_v56, 1 }
  0x5e   :  { %21049 = vst [vmem:[#allocation49_spill] sm:$0xff] %v11546_v41 }
  0x5f   :  { %v11565_v26 = vsel %vm146_vm0, %v222_v21, %v11546_v41 }
  0x60   :  { %325 = vrot.lane.b32.xlu1 %v11502_v51, %s10957_s30  ;;  %323 = vrot.lane.b32.xlu0 %v11521_v36, %s10957_s30  ;;  %v11557_v51 = vld [vmem:[%s20381_s0 + $0x1c0] sm:$0xff]  ;;  %21050 = vst [vmem:[#allocation50_spill] sm:$0xff] %v11565_v26  ;;  %v11568_v36 = vrot.slane %v11552_v17, 1 }
  0x61   :  { %v225_v16 = vrot.slane %v11557_v51, 1 }
  0x62   :  { %21051 = vst [vmem:[#allocation51_spill] sm:$0xff] %v11568_v36 }
  0x63   :  { %v11587_v21 = vsel %vm146_vm0, %v225_v16, %v11568_v36  ;;  %v400_v16 = vrot.slane %v11026_v6, 2  ;;  %v11619_v6 = vrot.slane %v11031_v7, 2 }
  0x64   :  { %329 = vrot.lane.b32.xlu1 %v11524_v46, %s10957_s30  ;;  %327 = vrot.lane.b32.xlu0 %v11543_v31, %s10957_s30  ;;  %v11579_v46 = vld [vmem:[%s20381_s0 + $0x1d0] sm:$0xff]  ;;  %21052 = vst [vmem:[#allocation52_spill] sm:$0xff] %v11587_v21  ;;  %v11590_v31 = vrot.slane %v11574_v12, 1 }
  0x65   :  { %v228_v10 = vrot.slane %v11579_v46, 1  ;;  %21057 = vst [vmem:[#allocation57_spill] sm:$0xff] %v11619_v6 }
  0x66   :  { %21053 = vst [vmem:[#allocation53_spill] sm:$0xff] %v11590_v31 }
  0x68   :  { %333 = vrot.lane.b32.xlu1 %v11546_v41, %s10957_s30  ;;  %331 = vrot.lane.b32.xlu0 %v11565_v26, %s10957_s30  ;;  %v11599_v41 = vsel %vm146_vm0, %v228_v10, %v11590_v31  ;;  %v401_v26 = vrot.slane %v11011_v1, 2  ;;  %v406_v10 = vrot.slane %v11036_v8, 2 }
  0x69   :  { %21054 = vst [vmem:[#allocation54_spill] sm:$0xff] %v11599_v41 }
  0x6c   :  { %337 = vrot.lane.b32.xlu1 %v11568_v36, %s10957_s30  ;;  %335 = vrot.lane.b32.xlu0 %v11587_v21, %s10957_s30  ;;  %v402_v36 = vsel %vm399_vm1, %v400_v16, %v401_v26  ;;  %v403_v21 = vrot.slane %v11016_v2, 2 }
  0x6e   :  { %v11616_v1 = vsel %vm399_vm1, %v403_v21, %v11609_v3  ;;  %v409_v21 = vrot.slane %v11059_v15, 2 }
  0x6f   :  { %21056 = vst [vmem:[#allocation56_spill] sm:$0xff] %v11616_v1 }
  0x70   :  { %341 = vrot.lane.b32.xlu1 %v11590_v31, %s10957_s30  ;;  %339 = vrot.lane.b32.xlu0 %v11599_v41, %s10957_s30  ;;  %s10959_s30 = smov 12  }
  0x74   :  { %486 = vrot.lane.b32.xlu1 %v401_v26, %s10958_s10  ;;  %484 = vrot.lane.b32.xlu0 %v402_v36, %s10958_s10  ;;  %v11632_v36 = vsel %vm399_vm1, %v406_v10, %v11619_v6  ;;  %v11635_v26 = vrot.slane %v11054_v14, 2  ;;  %v11651_v10 = vrot.slane %v11075_v19, 2 }
  0x75   :  { %21060 = vst [vmem:[#allocation60_spill] sm:$0xff] %v11632_v36 }
  0x76   :  { %v11622_v16 = vpop.permute.xlu1 %237  ;;  %v11624_v41 = vpop.permute.xlu0 %233  ;;  %21061 = vst [vmem:[#allocation61_spill] sm:$0xff] %v11635_v26  ;;  %21065 = vst [vmem:[#allocation65_spill] sm:$0xff] %v11651_v10 }
  0x77   :  { %21058 = vst [vmem:[#allocation58_spill] sm:$0xff] %v11622_v16  ;;  %21059 = vst [vmem:[#allocation59_spill] sm:$0xff] %v11624_v41  ;;  %v11648_v41 = vsel %vm399_vm1, %v409_v21, %v11635_v26  ;;  %v11667_v21 = vrot.slane %v11097_v24, 2 }
  0x78   :  { %490 = vrot.lane.b32.xlu1 %v11609_v3, %s10958_s10  ;;  %488 = vrot.lane.b32.xlu0 %v11616_v1, %s10958_s10  ;;  %21064 = vst [vmem:[#allocation64_spill] sm:$0xff] %v11648_v41  ;;  %v412_v1 = vrot.slane %v11080_v20, 2 }
  0x79   :  { %21069 = vst [vmem:[#allocation69_spill] sm:$0xff] %v11667_v21 }
  0x7a   :  { %v11638_v31 = vpop.permute.xlu1 %235  ;;  %v11640_v16 = vpop.permute.xlu0 %231 }
  0x7b   :  { %21062 = vst [vmem:[#allocation62_spill] sm:$0xff] %v11638_v31  ;;  %21063 = vst [vmem:[#allocation63_spill] sm:$0xff] %v11640_v16  ;;  %v11664_v16 = vsel %vm399_vm1, %v412_v1, %v11651_v10  ;;  %v11683_v1 = vrot.slane %v11119_v29, 2 }
  0x7c   :  { %494 = vrot.lane.b32.xlu1 %v11619_v6, %s10958_s10  ;;  %492 = vrot.lane.b32.xlu0 %v11632_v36, %s10958_s10  ;;  %21068 = vst [vmem:[#allocation68_spill] sm:$0xff] %v11664_v16  ;;  %v415_v36 = vrot.slane %v11102_v25, 2 }
  0x7d   :  { %21073 = vst [vmem:[#allocation73_spill] sm:$0xff] %v11683_v1 }
  0x7e   :  { %v11654_v3 = vpop.permute.xlu1 %241  ;;  %v11656_v31 = vpop.permute.xlu0 %239 }
  0x7f   :  { %21066 = vst [vmem:[#allocation66_spill] sm:$0xff] %v11654_v3  ;;  %21067 = vst [vmem:[#allocation67_spill] sm:$0xff] %v11656_v31  ;;  %v11680_v31 = vsel %vm399_vm1, %v415_v36, %v11667_v21  ;;  %v11699_v36 = vrot.slane %v11141_v34, 2 }
  0x80   :  { %498 = vrot.lane.b32.xlu1 %v11635_v26, %s10958_s10  ;;  %496 = vrot.lane.b32.xlu0 %v11648_v41, %s10958_s10  ;;  %21072 = vst [vmem:[#allocation72_spill] sm:$0xff] %v11680_v31  ;;  %v418_v41 = vrot.slane %v11124_v30, 2 }
  0x81   :  { %21077 = vst [vmem:[#allocation77_spill] sm:$0xff] %v11699_v36 }
  0x82   :  { %v11670_v6 = vpop.permute.xlu1 %245  ;;  %v11672_v3 = vpop.permute.xlu0 %243 }
  0x83   :  { %21070 = vst [vmem:[#allocation70_spill] sm:$0xff] %v11670_v6  ;;  %21071 = vst [vmem:[#allocation71_spill] sm:$0xff] %v11672_v3  ;;  %v11696_v3 = vsel %vm399_vm1, %v418_v41, %v11683_v1  ;;  %v11715_v41 = vrot.slane %v11163_v39, 2 }
  0x84   :  { %502 = vrot.lane.b32.xlu1 %v11651_v10, %s10958_s10  ;;  %500 = vrot.lane.b32.xlu0 %v11664_v16, %s10958_s10  ;;  %21076 = vst [vmem:[#allocation76_spill] sm:$0xff] %v11696_v3  ;;  %v421_v16 = vrot.slane %v11146_v35, 2 }
  0x85   :  { %21081 = vst [vmem:[#allocation81_spill] sm:$0xff] %v11715_v41 }
  0x86   :  { %v11686_v26 = vpop.permute.xlu1 %249  ;;  %v11688_v6 = vpop.permute.xlu0 %247 }
  0x87   :  { %21074 = vst [vmem:[#allocation74_spill] sm:$0xff] %v11686_v26  ;;  %21075 = vst [vmem:[#allocation75_spill] sm:$0xff] %v11688_v6  ;;  %v11712_v6 = vsel %vm399_vm1, %v421_v16, %v11699_v36  ;;  %v11731_v16 = vrot.slane %v11185_v44, 2 }
  0x88   :  { %506 = vrot.lane.b32.xlu1 %v11667_v21, %s10958_s10  ;;  %504 = vrot.lane.b32.xlu0 %v11680_v31, %s10958_s10  ;;  %21080 = vst [vmem:[#allocation80_spill] sm:$0xff] %v11712_v6  ;;  %v424_v31 = vrot.slane %v11168_v40, 2 }
  0x89   :  { %21085 = vst [vmem:[#allocation85_spill] sm:$0xff] %v11731_v16 }
  0x8a   :  { %v11702_v10 = vpop.permute.xlu1 %253  ;;  %v11704_v26 = vpop.permute.xlu0 %251 }
  0x8b   :  { %21078 = vst [vmem:[#allocation78_spill] sm:$0xff] %v11702_v10  ;;  %21079 = vst [vmem:[#allocation79_spill] sm:$0xff] %v11704_v26  ;;  %v11728_v26 = vsel %vm399_vm1, %v424_v31, %v11715_v41  ;;  %v11747_v31 = vrot.slane %v11207_v49, 2 }
  0x8c   :  { %510 = vrot.lane.b32.xlu1 %v11683_v1, %s10958_s10  ;;  %508 = vrot.lane.b32.xlu0 %v11696_v3, %s10958_s10  ;;  %21084 = vst [vmem:[#allocation84_spill] sm:$0xff] %v11728_v26  ;;  %v427_v3 = vrot.slane %v11190_v45, 2 }
  0x8d   :  { %21089 = vst [vmem:[#allocation89_spill] sm:$0xff] %v11747_v31 }
  0x8e   :  { %v11718_v21 = vpop.permute.xlu1 %257  ;;  %v11720_v10 = vpop.permute.xlu0 %255 }
  0x8f   :  { %21082 = vst [vmem:[#allocation82_spill] sm:$0xff] %v11718_v21  ;;  %21083 = vst [vmem:[#allocation83_spill] sm:$0xff] %v11720_v10  ;;  %v11744_v10 = vsel %vm399_vm1, %v427_v3, %v11731_v16  ;;  %v11763_v3 = vrot.slane %v11229_v54, 2 }
  0x90   :  { %514 = vrot.lane.b32.xlu1 %v11699_v36, %s10958_s10  ;;  %512 = vrot.lane.b32.xlu0 %v11712_v6, %s10958_s10  ;;  %21088 = vst [vmem:[#allocation88_spill] sm:$0xff] %v11744_v10  ;;  %v430_v6 = vrot.slane %v11212_v50, 2 }
  0x91   :  { %21093 = vst [vmem:[#allocation93_spill] sm:$0xff] %v11763_v3 }
  0x92   :  { %v11734_v1 = vpop.permute.xlu1 %261  ;;  %v11736_v21 = vpop.permute.xlu0 %259 }
  0x93   :  { %21086 = vst [vmem:[#allocation86_spill] sm:$0xff] %v11734_v1  ;;  %21087 = vst [vmem:[#allocation87_spill] sm:$0xff] %v11736_v21  ;;  %v11760_v21 = vsel %vm399_vm1, %v430_v6, %v11747_v31  ;;  %v11779_v6 = vrot.slane %v11251_v59, 2 }
  0x94   :  { %518 = vrot.lane.b32.xlu1 %v11715_v41, %s10958_s10  ;;  %516 = vrot.lane.b32.xlu0 %v11728_v26, %s10958_s10  ;;  %21092 = vst [vmem:[#allocation92_spill] sm:$0xff] %v11760_v21  ;;  %v433_v26 = vrot.slane %v11234_v55, 2 }
  0x95   :  { %21097 = vst [vmem:[#allocation97_spill] sm:$0xff] %v11779_v6 }
  0x96   :  { %v11750_v36 = vpop.permute.xlu1 %265  ;;  %v11752_v1 = vpop.permute.xlu0 %263 }
  0x97   :  { %21090 = vst [vmem:[#allocation90_spill] sm:$0xff] %v11750_v36  ;;  %21091 = vst [vmem:[#allocation91_spill] sm:$0xff] %v11752_v1  ;;  %v11776_v1 = vsel %vm399_vm1, %v433_v26, %v11763_v3  ;;  %v11795_v26 = vrot.slane %v11273_v4, 2 }
  0x98   :  { %522 = vrot.lane.b32.xlu1 %v11731_v16, %s10958_s10  ;;  %520 = vrot.lane.b32.xlu0 %v11744_v10, %s10958_s10  ;;  %21096 = vst [vmem:[#allocation96_spill] sm:$0xff] %v11776_v1  ;;  %v436_v10 = vrot.slane %v11256_v60, 2 }
  0x99   :  { %21101 = vst [vmem:[#allocation101_spill] sm:$0xff] %v11795_v26 }
  0x9a   :  { %v11766_v41 = vpop.permute.xlu1 %269  ;;  %v11768_v36 = vpop.permute.xlu0 %267 }
  0x9b   :  { %21094 = vst [vmem:[#allocation94_spill] sm:$0xff] %v11766_v41  ;;  %21095 = vst [vmem:[#allocation95_spill] sm:$0xff] %v11768_v36  ;;  %v11792_v36 = vsel %vm399_vm1, %v436_v10, %v11779_v6  ;;  %v443_v10 = vrot.slane %v11295_v18, 2 }
  0x9c   :  { %526 = vrot.lane.b32.xlu1 %v11747_v31, %s10958_s10  ;;  %524 = vrot.lane.b32.xlu0 %v11760_v21, %s10958_s10  ;;  %21100 = vst [vmem:[#allocation100_spill] sm:$0xff] %v11792_v36  ;;  %v439_v21 = vrot.slane %v11278_v5, 2 }
  0x9e   :  { %v11782_v16 = vpop.permute.xlu1 %273  ;;  %v11784_v41 = vpop.permute.xlu0 %271 }
  0x9f   :  { %21098 = vst [vmem:[#allocation98_spill] sm:$0xff] %v11782_v16  ;;  %21099 = vst [vmem:[#allocation99_spill] sm:$0xff] %v11784_v41  ;;  %v11808_v41 = vsel %vm399_vm1, %v439_v21, %v11795_v26  ;;  %v445_v21 = vrot.slane %v11320_v48, 2 }
  0xa0   :  { %530 = vrot.lane.b32.xlu1 %v11763_v3, %s10958_s10  ;;  %528 = vrot.lane.b32.xlu0 %v11776_v1, %s10958_s10  ;;  %21104 = vst [vmem:[#allocation104_spill] sm:$0xff] %v11808_v41  ;;  %v442_v1 = vrot.slane %v11300_v23, 2 }
  0xa2   :  { %v11798_v31 = vpop.permute.xlu1 %277  ;;  %v11800_v16 = vpop.permute.xlu0 %275 }
  0xa3   :  { %21102 = vst [vmem:[#allocation102_spill] sm:$0xff] %v11798_v31  ;;  %21103 = vst [vmem:[#allocation103_spill] sm:$0xff] %v11800_v16  ;;  %v444_v16 = vsel %vm399_vm1, %v442_v1, %v443_v10  ;;  %v11822_v31 = vrot.slane %v11315_v43, 2  ;;  %v448_v1 = vrot.slane %v11339_v9, 2 }
  0xa4   :  { %534 = vrot.lane.b32.xlu1 %v11779_v6, %s10958_s10  ;;  %532 = vrot.lane.b32.xlu0 %v11792_v36, %s10958_s10 }
  0xa6   :  { %v11812_v3 = vpop.permute.xlu1 %281  ;;  %v11814_v5 = vpop.permute.xlu0 %279 }
  0xa7   :  { %21105 = vst [vmem:[#allocation105_spill] sm:$0xff] %v11812_v3  ;;  %21106 = vst [vmem:[#allocation106_spill] sm:$0xff] %v11814_v5  ;;  %v11833_v5 = vsel %vm399_vm1, %v445_v21, %v11822_v31  ;;  %v11836_v3 = vrot.slane %v11334_v13, 2  ;;  %v451_v21 = vrot.slane %v11359_v33, 2 }
  0xa8   :  { %538 = vrot.lane.b32.xlu1 %v11795_v26, %s10958_s10  ;;  %536 = vrot.lane.b32.xlu0 %v11808_v41, %s10958_s10  ;;  %21109 = vst [vmem:[#allocation109_spill] sm:$0xff] %v11833_v5 }
  0xa9   :  { %21110 = vst [vmem:[#allocation110_spill] sm:$0xff] %v11836_v3 }
  0xaa   :  { %v11825_v18 = vpop.permute.xlu1 %285  ;;  %v11827_v23 = vpop.permute.xlu0 %283 }
  0xab   :  { %21107 = vst [vmem:[#allocation107_spill] sm:$0xff] %v11825_v18  ;;  %21108 = vst [vmem:[#allocation108_spill] sm:$0xff] %v11827_v23  ;;  %v454_v18 = vrot.slane %v11381_v58, 2 }
  0xac   :  { %542 = vrot.lane.b32.xlu1 %v443_v10, %s10958_s10  ;;  %540 = vrot.lane.b32.xlu0 %v444_v16, %s10958_s10  ;;  %v11849_v16 = vsel %vm399_vm1, %v448_v1, %v11836_v3  ;;  %v11852_v10 = vrot.slane %v11354_v62, 2  ;;  %v11868_v1 = vrot.slane %v11376_v57, 2 }
  0xad   :  { %21113 = vst [vmem:[#allocation113_spill] sm:$0xff] %v11849_v16 }
  0xae   :  { %v11839_v41 = vpop.permute.xlu1 %289  ;;  %v11841_v26 = vpop.permute.xlu0 %287  ;;  %21114 = vst [vmem:[#allocation114_spill] sm:$0xff] %v11852_v10  ;;  %21118 = vst [vmem:[#allocation118_spill] sm:$0xff] %v11868_v1 }
  0xaf   :  { %21111 = vst [vmem:[#allocation111_spill] sm:$0xff] %v11839_v41  ;;  %21112 = vst [vmem:[#allocation112_spill] sm:$0xff] %v11841_v26  ;;  %v11865_v26 = vsel %vm399_vm1, %v451_v21, %v11852_v10  ;;  %v11884_v21 = vrot.slane %v11398_v52, 2 }
  0xb0   :  { %546 = vrot.lane.b32.xlu1 %v11822_v31, %s10958_s10  ;;  %544 = vrot.lane.b32.xlu0 %v11833_v5, %s10958_s10  ;;  %21117 = vst [vmem:[#allocation117_spill] sm:$0xff] %v11865_v26 }
  0xb1   :  { %21122 = vst [vmem:[#allocation122_spill] sm:$0xff] %v11884_v21 }
  0xb2   :  { %v11855_v23 = vpop.permute.xlu1 %293  ;;  %v11857_v41 = vpop.permute.xlu0 %291 }
  0xb3   :  { %21115 = vst [vmem:[#allocation115_spill] sm:$0xff] %v11855_v23  ;;  %21116 = vst [vmem:[#allocation116_spill] sm:$0xff] %v11857_v41  ;;  %v11881_v41 = vsel %vm399_vm1, %v454_v18, %v11868_v1  ;;  %v11900_v18 = vrot.slane %v11420_v47, 2 }
  0xb4   :  { %550 = vrot.lane.b32.xlu1 %v11836_v3, %s10958_s10  ;;  %548 = vrot.lane.b32.xlu0 %v11849_v16, %s10958_s10  ;;  %21121 = vst [vmem:[#allocation121_spill] sm:$0xff] %v11881_v41  ;;  %v457_v16 = vrot.slane %v11403_v28, 2 }
  0xb5   :  { %21126 = vst [vmem:[#allocation126_spill] sm:$0xff] %v11900_v18 }
  0xb6   :  { %v11871_v5 = vpop.permute.xlu1 %297  ;;  %v11873_v23 = vpop.permute.xlu0 %295 }
  0xb7   :  { %21119 = vst [vmem:[#allocation119_spill] sm:$0xff] %v11871_v5  ;;  %21120 = vst [vmem:[#allocation120_spill] sm:$0xff] %v11873_v23  ;;  %v11897_v23 = vsel %vm399_vm1, %v457_v16, %v11884_v21  ;;  %v11916_v16 = vrot.slane %v11442_v42, 2 }
  0xb8   :  { %554 = vrot.lane.b32.xlu1 %v11852_v10, %s10958_s10  ;;  %552 = vrot.lane.b32.xlu0 %v11865_v26, %s10958_s10  ;;  %21125 = vst [vmem:[#allocation125_spill] sm:$0xff] %v11897_v23  ;;  %v460_v26 = vrot.slane %v11425_v63, 2 }
  0xb9   :  { %21130 = vst [vmem:[#allocation130_spill] sm:$0xff] %v11916_v16 }
  0xba   :  { %v11887_v3 = vpop.permute.xlu1 %301  ;;  %v11889_v5 = vpop.permute.xlu0 %299 }
  0xbb   :  { %21123 = vst [vmem:[#allocation123_spill] sm:$0xff] %v11887_v3  ;;  %21124 = vst [vmem:[#allocation124_spill] sm:$0xff] %v11889_v5  ;;  %v11913_v5 = vsel %vm399_vm1, %v460_v26, %v11900_v18  ;;  %v11932_v26 = vrot.slane %v11464_v37, 2 }
  0xbc   :  { %558 = vrot.lane.b32.xlu1 %v11868_v1, %s10958_s10  ;;  %556 = vrot.lane.b32.xlu0 %v11881_v41, %s10958_s10  ;;  %21129 = vst [vmem:[#allocation129_spill] sm:$0xff] %v11913_v5  ;;  %v463_v41 = vrot.slane %v11447_v38, 2 }
  0xbd   :  { %21134 = vst [vmem:[#allocation134_spill] sm:$0xff] %v11932_v26 }
  0xbe   :  { %v11903_v10 = vpop.permute.xlu1 %305  ;;  %v11905_v3 = vpop.permute.xlu0 %303 }
  0xbf   :  { %21127 = vst [vmem:[#allocation127_spill] sm:$0xff] %v11903_v10  ;;  %21128 = vst [vmem:[#allocation128_spill] sm:$0xff] %v11905_v3  ;;  %v11929_v3 = vsel %vm399_vm1, %v463_v41, %v11916_v16  ;;  %v11948_v41 = vrot.slane %v11486_v32, 2 }
  0xc0   :  { %562 = vrot.lane.b32.xlu1 %v11884_v21, %s10958_s10  ;;  %560 = vrot.lane.b32.xlu0 %v11897_v23, %s10958_s10  ;;  %21133 = vst [vmem:[#allocation133_spill] sm:$0xff] %v11929_v3  ;;  %v466_v23 = vrot.slane %v11469_v53, 2 }
  0xc1   :  { %21138 = vst [vmem:[#allocation138_spill] sm:$0xff] %v11948_v41 }
  0xc2   :  { %v11919_v1 = vpop.permute.xlu1 %309  ;;  %v11921_v10 = vpop.permute.xlu0 %307 }
  0xc3   :  { %21131 = vst [vmem:[#allocation131_spill] sm:$0xff] %v11919_v1  ;;  %21132 = vst [vmem:[#allocation132_spill] sm:$0xff] %v11921_v10  ;;  %v11945_v10 = vsel %vm399_vm1, %v466_v23, %v11932_v26  ;;  %v11964_v23 = vrot.slane %v11508_v27, 2 }
  0xc4   :  { %566 = vrot.lane.b32.xlu1 %v11900_v18, %s10958_s10  ;;  %564 = vrot.lane.b32.xlu0 %v11913_v5, %s10958_s10  ;;  %21137 = vst [vmem:[#allocation137_spill] sm:$0xff] %v11945_v10  ;;  %v469_v5 = vrot.slane %v11491_v11, 2 }
  0xc5   :  { %21142 = vst [vmem:[#allocation142_spill] sm:$0xff] %v11964_v23 }
  0xc6   :  { %v11935_v21 = vpop.permute.xlu1 %313  ;;  %v11937_v1 = vpop.permute.xlu0 %311 }
  0xc7   :  { %21135 = vst [vmem:[#allocation135_spill] sm:$0xff] %v11935_v21  ;;  %21136 = vst [vmem:[#allocation136_spill] sm:$0xff] %v11937_v1  ;;  %v11961_v1 = vsel %vm399_vm1, %v469_v5, %v11948_v41  ;;  %v11980_v5 = vrot.slane %v11530_v22, 2 }
  0xc8   :  { %570 = vrot.lane.b32.xlu1 %v11916_v16, %s10958_s10  ;;  %568 = vrot.lane.b32.xlu0 %v11929_v3, %s10958_s10  ;;  %21141 = vst [vmem:[#allocation141_spill] sm:$0xff] %v11961_v1  ;;  %v472_v3 = vrot.slane %v11513_v61, 2 }
  0xc9   :  { %21146 = vst [vmem:[#allocation146_spill] sm:$0xff] %v11980_v5 }
  0xca   :  { %v11951_v18 = vpop.permute.xlu1 %317  ;;  %v11953_v21 = vpop.permute.xlu0 %315 }
  0xcb   :  { %21139 = vst [vmem:[#allocation139_spill] sm:$0xff] %v11951_v18  ;;  %21140 = vst [vmem:[#allocation140_spill] sm:$0xff] %v11953_v21  ;;  %v11977_v21 = vsel %vm399_vm1, %v472_v3, %v11964_v23  ;;  %v11996_v3 = vrot.slane %v11552_v17, 2 }
  0xcc   :  { %574 = vrot.lane.b32.xlu1 %v11932_v26, %s10958_s10  ;;  %572 = vrot.lane.b32.xlu0 %v11945_v10, %s10958_s10  ;;  %21145 = vst [vmem:[#allocation145_spill] sm:$0xff] %v11977_v21  ;;  %v475_v10 = vrot.slane %v11535_v56, 2 }
  0xcd   :  { %21150 = vst [vmem:[#allocation150_spill] sm:$0xff] %v11996_v3 }
  0xce   :  { %v11967_v16 = vpop.permute.xlu1 %321  ;;  %v11969_v18 = vpop.permute.xlu0 %319 }
  0xcf   :  { %21143 = vst [vmem:[#allocation143_spill] sm:$0xff] %v11967_v16  ;;  %21144 = vst [vmem:[#allocation144_spill] sm:$0xff] %v11969_v18  ;;  %v11993_v18 = vsel %vm399_vm1, %v475_v10, %v11980_v5  ;;  %v12012_v10 = vrot.slane %v11574_v12, 2 }
  0xd0   :  { %578 = vrot.lane.b32.xlu1 %v11948_v41, %s10958_s10  ;;  %576 = vrot.lane.b32.xlu0 %v11961_v1, %s10958_s10  ;;  %21149 = vst [vmem:[#allocation149_spill] sm:$0xff] %v11993_v18  ;;  %v478_v1 = vrot.slane %v11557_v51, 2 }
  0xd1   :  { %21154 = vst [vmem:[#allocation154_spill] sm:$0xff] %v12012_v10 }
  0xd2   :  { %v11983_v26 = vpop.permute.xlu1 %325  ;;  %v11985_v16 = vpop.permute.xlu0 %323 }
  0xd3   :  { %21147 = vst [vmem:[#allocation147_spill] sm:$0xff] %v11983_v26  ;;  %21148 = vst [vmem:[#allocation148_spill] sm:$0xff] %v11985_v16  ;;  %v12009_v16 = vsel %vm399_vm1, %v478_v1, %v11996_v3 }
  0xd4   :  { %582 = vrot.lane.b32.xlu1 %v11964_v23, %s10958_s10  ;;  %580 = vrot.lane.b32.xlu0 %v11977_v21, %s10958_s10  ;;  %21153 = vst [vmem:[#allocation153_spill] sm:$0xff] %v12009_v16  ;;  %v481_v21 = vrot.slane %v11579_v46, 2 }
  0xd6   :  { %v11999_v41 = vpop.permute.xlu1 %329  ;;  %v12001_v26 = vpop.permute.xlu0 %327 }
  0xd7   :  { %21151 = vst [vmem:[#allocation151_spill] sm:$0xff] %v11999_v41  ;;  %21152 = vst [vmem:[#allocation152_spill] sm:$0xff] %v12001_v26  ;;  %v12025_v26 = vsel %vm399_vm1, %v481_v21, %v12012_v10 }
  0xd8   :  { %586 = vrot.lane.b32.xlu1 %v11980_v5, %s10958_s10  ;;  %584 = vrot.lane.b32.xlu0 %v11993_v18, %s10958_s10  ;;  %21157 = vst [vmem:[#allocation157_spill] sm:$0xff] %v12025_v26 }
  0xda   :  { %v12015_v23 = vpop.permute.xlu1 %333  ;;  %v12017_v41 = vpop.permute.xlu0 %331 }
  0xdb   :  { %21155 = vst [vmem:[#allocation155_spill] sm:$0xff] %v12015_v23  ;;  %21156 = vst [vmem:[#allocation156_spill] sm:$0xff] %v12017_v41 }
  0xdc   :  { %590 = vrot.lane.b32.xlu1 %v11996_v3, %s10958_s10  ;;  %588 = vrot.lane.b32.xlu0 %v12009_v16, %s10958_s10 }
  0xde   :  { %v12027_v1 = vpop.permute.xlu1 %337  ;;  %v12029_v18 = vpop.permute.xlu0 %335 }
  0xdf   :  { %21158 = vst [vmem:[#allocation158_spill] sm:$0xff] %v12027_v1  ;;  %21159 = vst [vmem:[#allocation159_spill] sm:$0xff] %v12029_v18  ;;  %v21318_v1 = vld [vmem:[#allocation52_spill] sm:$0xff] }
  0xe0   :  { %594 = vrot.lane.b32.xlu1 %v12012_v10, %s10958_s10  ;;  %592 = vrot.lane.b32.xlu0 %v12025_v26, %s10958_s10 }
  0xe2   :  { %v12035_v41 = vpop.permute.xlu1 %341  ;;  %v12037_v23 = vpop.permute.xlu0 %339 }
  0xe3   :  { %21160 = vst [vmem:[#allocation160_spill] sm:$0xff] %v12035_v41  ;;  %21161 = vst [vmem:[#allocation161_spill] sm:$0xff] %v12037_v23 }
  0xe4   :  { %658 = vrot.lane.b32.xlu1 %v11006_v0, %s10959_s30  ;;  %656 = vrot.lane.b32.xlu0 %v11016_v2, %s10959_s30 }
  0xe6   :  { %v12043_v21 = vpop.permute.xlu1 %486  ;;  %v12045_v18 = vpop.permute.xlu0 %484 }
  0xe7   :  { %21162 = vst [vmem:[#allocation162_spill] sm:$0xff] %v12043_v21  ;;  %21163 = vst [vmem:[#allocation163_spill] sm:$0xff] %v12045_v18  ;;  %v21314_v18 = vld [vmem:[#allocation50_spill] sm:$0xff] }
  0xe8   :  { %662 = vrot.lane.b32.xlu1 %v11031_v7, %s10959_s30  ;;  %660 = vrot.lane.b32.xlu0 %v11036_v8, %s10959_s30 }
  0xea   :  { %v12051_v41 = vpop.permute.xlu1 %490  ;;  %v12053_v23 = vpop.permute.xlu0 %488 }
  0xeb   :  { %21164 = vst [vmem:[#allocation164_spill] sm:$0xff] %v12051_v41  ;;  %21165 = vst [vmem:[#allocation165_spill] sm:$0xff] %v12053_v23  ;;  %v21310_v23 = vld [vmem:[#allocation48_spill] sm:$0xff] }
  0xec   :  { %666 = vrot.lane.b32.xlu1 %v11054_v14, %s10959_s30  ;;  %664 = vrot.lane.b32.xlu0 %v11059_v15, %s10959_s30 }
  0xee   :  { %v12059_v0 = vpop.permute.xlu1 %494  ;;  %v12061_v2 = vpop.permute.xlu0 %492 }
  0xef   :  { %21166 = vst [vmem:[#allocation166_spill] sm:$0xff] %v12059_v0  ;;  %21167 = vst [vmem:[#allocation167_spill] sm:$0xff] %v12061_v2  ;;  %v21306_v2 = vld [vmem:[#allocation46_spill] sm:$0xff] }
  0xf0   :  { %670 = vrot.lane.b32.xlu1 %v11075_v19, %s10959_s30  ;;  %668 = vrot.lane.b32.xlu0 %v11080_v20, %s10959_s30 }
  0xf2   :  { %v12067_v7 = vpop.permute.xlu1 %498  ;;  %v12069_v8 = vpop.permute.xlu0 %496 }
  0xf3   :  { %21168 = vst [vmem:[#allocation168_spill] sm:$0xff] %v12067_v7  ;;  %21169 = vst [vmem:[#allocation169_spill] sm:$0xff] %v12069_v8  ;;  %v21302_v8 = vld [vmem:[#allocation44_spill] sm:$0xff] }
  0xf4   :  { %674 = vrot.lane.b32.xlu1 %v11097_v24, %s10959_s30  ;;  %672 = vrot.lane.b32.xlu0 %v11102_v25, %s10959_s30 }
  0xf6   :  { %v12075_v14 = vpop.permute.xlu1 %502  ;;  %v12077_v15 = vpop.permute.xlu0 %500 }
  0xf7   :  { %21170 = vst [vmem:[#allocation170_spill] sm:$0xff] %v12075_v14  ;;  %21171 = vst [vmem:[#allocation171_spill] sm:$0xff] %v12077_v15  ;;  %v21298_v15 = vld [vmem:[#allocation42_spill] sm:$0xff] }
  0xf8   :  { %678 = vrot.lane.b32.xlu1 %v11119_v29, %s10959_s30  ;;  %676 = vrot.lane.b32.xlu0 %v11124_v30, %s10959_s30 }
  0xfa   :  { %v12083_v19 = vpop.permute.xlu1 %506  ;;  %v12085_v20 = vpop.permute.xlu0 %504 }
  0xfb   :  { %21172 = vst [vmem:[#allocation172_spill] sm:$0xff] %v12083_v19  ;;  %21173 = vst [vmem:[#allocation173_spill] sm:$0xff] %v12085_v20  ;;  %v21294_v20 = vld [vmem:[#allocation40_spill] sm:$0xff] }
  0xfc   :  { %682 = vrot.lane.b32.xlu1 %v11141_v34, %s10959_s30  ;;  %680 = vrot.lane.b32.xlu0 %v11146_v35, %s10959_s30 }
  0xfe   :  { %v12091_v24 = vpop.permute.xlu1 %510  ;;  %v12093_v25 = vpop.permute.xlu0 %508 }
  0xff   :  { %21174 = vst [vmem:[#allocation174_spill] sm:$0xff] %v12091_v24  ;;  %21175 = vst [vmem:[#allocation175_spill] sm:$0xff] %v12093_v25  ;;  %v21290_v25 = vld [vmem:[#allocation38_spill] sm:$0xff] }
 0x100   :  { %686 = vrot.lane.b32.xlu1 %v11163_v39, %s10959_s30  ;;  %684 = vrot.lane.b32.xlu0 %v11168_v40, %s10959_s30 }
 0x102   :  { %v12099_v29 = vpop.permute.xlu1 %514  ;;  %v12101_v30 = vpop.permute.xlu0 %512 }
 0x103   :  { %21176 = vst [vmem:[#allocation176_spill] sm:$0xff] %v12099_v29  ;;  %21177 = vst [vmem:[#allocation177_spill] sm:$0xff] %v12101_v30  ;;  %v21286_v30 = vld [vmem:[#allocation36_spill] sm:$0xff] }
 0x104   :  { %690 = vrot.lane.b32.xlu1 %v11185_v44, %s10959_s30  ;;  %688 = vrot.lane.b32.xlu0 %v11190_v45, %s10959_s30 }
 0x106   :  { %v12107_v34 = vpop.permute.xlu1 %518  ;;  %v12109_v35 = vpop.permute.xlu0 %516 }
 0x107   :  { %21178 = vst [vmem:[#allocation178_spill] sm:$0xff] %v12107_v34  ;;  %21179 = vst [vmem:[#allocation179_spill] sm:$0xff] %v12109_v35  ;;  %v21278_v35 = vld [vmem:[#allocation32_spill] sm:$0xff] }
 0x108   :  { %694 = vrot.lane.b32.xlu1 %v11207_v49, %s10959_s30  ;;  %692 = vrot.lane.b32.xlu0 %v11212_v50, %s10959_s30 }
 0x10a   :  { %v12115_v39 = vpop.permute.xlu1 %522  ;;  %v12117_v40 = vpop.permute.xlu0 %520 }
 0x10b   :  { %21180 = vst [vmem:[#allocation180_spill] sm:$0xff] %v12115_v39  ;;  %21181 = vst [vmem:[#allocation181_spill] sm:$0xff] %v12117_v40  ;;  %v21273_v40 = vld [vmem:[#allocation29_spill] sm:$0xff] }
 0x10c   :  { %698 = vrot.lane.b32.xlu1 %v11229_v54, %s10959_s30  ;;  %696 = vrot.lane.b32.xlu0 %v11234_v55, %s10959_s30  ;;  %v21186_v54 = vld [vmem:[#allocation25_spill] sm:$0xff]  ;;  %v12142_v55 = vld [vmem:[%s20381_s0 + $0xe8] sm:$0xff] }
 0x10e   :  { %v12123_v44 = vpop.permute.xlu1 %526  ;;  %v12125_v45 = vpop.permute.xlu0 %524 }
 0x10f   :  { %21182 = vst [vmem:[#allocation182_spill] sm:$0xff] %v12123_v44  ;;  %21183 = vst [vmem:[#allocation183_spill] sm:$0xff] %v12125_v45 }
 0x110   :  { %702 = vrot.lane.b32.xlu1 %v11251_v59, %s10959_s30  ;;  %700 = vrot.lane.b32.xlu0 %v11256_v60, %s10959_s30  ;;  %v12147_v59 = vld [vmem:[%s20381_s0 + $0xe0] sm:$0xff] }
 0x112   :  { %v12131_v49 = vpop.permute.xlu1 %530  ;;  %v12133_v50 = vpop.permute.xlu0 %528 }
 0x113   :  { %21184 = vst [vmem:[#allocation184_spill] sm:$0xff] %v12131_v49  ;;  %21185 = vst [vmem:[#allocation185_spill] sm:$0xff] %v12133_v50 }
 0x114   :  { %706 = vrot.lane.b32.xlu1 %v11273_v4, %s10959_s30  ;;  %704 = vrot.lane.b32.xlu0 %v21186_v54, %s10959_s30 }
 0x116   :  { %v12149_v60 = vpop.permute.xlu1 %534  ;;  %v12151_v49 = vpop.permute.xlu0 %532 }
 0x117   :  { %21187 = vst [vmem:[#allocation25_spill] sm:$0xff] %v12149_v60  ;;  %21188 = vst [vmem:[#allocation186_spill] sm:$0xff] %v12151_v49 }
 0x118   :  { %710 = vrot.lane.b32.xlu1 %v12142_v55, %s10959_s30  ;;  %708 = vrot.lane.b32.xlu0 %v12147_v59, %s10959_s30 }
 0x11a   :  { %v12157_v4 = vpop.permute.xlu1 %538  ;;  %v12159_v54 = vpop.permute.xlu0 %536 }
 0x11b   :  { %21189 = vst [vmem:[#allocation187_spill] sm:$0xff] %v12157_v4  ;;  %21190 = vst [vmem:[#allocation188_spill] sm:$0xff] %v12159_v54  ;;  %v21267_v54 = vld [vmem:[#allocation27_spill] sm:$0xff] }
 0x11c   :  { %714 = vrot.lane.b32.xlu1 %v11315_v43, %s10959_s30  ;;  %712 = vrot.lane.b32.xlu0 %v11320_v48, %s10959_s30 }
 0x11e   :  { %v12165_v50 = vpop.permute.xlu1 %542  ;;  %v12167_v60 = vpop.permute.xlu0 %540 }
 0x11f   :  { %21191 = vst [vmem:[#allocation189_spill] sm:$0xff] %v12165_v50  ;;  %21192 = vst [vmem:[#allocation190_spill] sm:$0xff] %v12167_v60 }
 0x120   :  { %718 = vrot.lane.b32.xlu1 %v11334_v13, %s10959_s30  ;;  %716 = vrot.lane.b32.xlu0 %v11339_v9, %s10959_s30 }
 0x122   :  { %v12173_v49 = vpop.permute.xlu1 %546  ;;  %v12175_v4 = vpop.permute.xlu0 %544 }
 0x123   :  { %21193 = vst [vmem:[#allocation191_spill] sm:$0xff] %v12173_v49  ;;  %21194 = vst [vmem:[#allocation192_spill] sm:$0xff] %v12175_v4  ;;  %v21264_v49 = vld [vmem:[#allocation26_spill] sm:$0xff] }
 0x124   :  { %722 = vrot.lane.b32.xlu1 %v11354_v62, %s10959_s30  ;;  %720 = vrot.lane.b32.xlu0 %v11359_v33, %s10959_s30 }
 0x126   :  { %v12181_v43 = vpop.permute.xlu1 %550  ;;  %v12183_v48 = vpop.permute.xlu0 %548 }
 0x127   :  { %21195 = vst [vmem:[#allocation193_spill] sm:$0xff] %v12181_v43  ;;  %21196 = vst [vmem:[#allocation194_spill] sm:$0xff] %v12183_v48  ;;  %v21260_v43 = vld [vmem:[#allocation23_spill] sm:$0xff] }
 0x128   :  { %726 = vrot.lane.b32.xlu1 %v11376_v57, %s10959_s30  ;;  %724 = vrot.lane.b32.xlu0 %v11381_v58, %s10959_s30 }
 0x12a   :  { %v12189_v9 = vpop.permute.xlu1 %554  ;;  %v12191_v13 = vpop.permute.xlu0 %552 }
 0x12b   :  { %21197 = vst [vmem:[#allocation195_spill] sm:$0xff] %v12189_v9  ;;  %21198 = vst [vmem:[#allocation196_spill] sm:$0xff] %v12191_v13  ;;  %v21256_v9 = vld [vmem:[#allocation21_spill] sm:$0xff] }
 0x12c   :  { %730 = vrot.lane.b32.xlu1 %v11398_v52, %s10959_s30  ;;  %728 = vrot.lane.b32.xlu0 %v11403_v28, %s10959_s30 }
 0x12e   :  { %v12197_v62 = vpop.permute.xlu1 %558  ;;  %v12199_v33 = vpop.permute.xlu0 %556 }
 0x12f   :  { %21199 = vst [vmem:[#allocation197_spill] sm:$0xff] %v12197_v62  ;;  %21200 = vst [vmem:[#allocation198_spill] sm:$0xff] %v12199_v33  ;;  %v21252_v62 = vld [vmem:[#allocation19_spill] sm:$0xff] }
 0x130   :  { %734 = vrot.lane.b32.xlu1 %v11420_v47, %s10959_s30  ;;  %732 = vrot.lane.b32.xlu0 %v11425_v63, %s10959_s30 }
 0x132   :  { %v12205_v57 = vpop.permute.xlu1 %562  ;;  %v12207_v58 = vpop.permute.xlu0 %560 }
 0x133   :  { %21201 = vst [vmem:[#allocation199_spill] sm:$0xff] %v12205_v57  ;;  %21202 = vst [vmem:[#allocation200_spill] sm:$0xff] %v12207_v58  ;;  %v21248_v57 = vld [vmem:[#allocation17_spill] sm:$0xff] }
 0x134   :  { %738 = vrot.lane.b32.xlu1 %v11442_v42, %s10959_s30  ;;  %736 = vrot.lane.b32.xlu0 %v11447_v38, %s10959_s30 }
 0x136   :  { %v12213_v52 = vpop.permute.xlu1 %566  ;;  %v12215_v28 = vpop.permute.xlu0 %564 }
 0x137   :  { %21203 = vst [vmem:[#allocation201_spill] sm:$0xff] %v12213_v52  ;;  %21204 = vst [vmem:[#allocation202_spill] sm:$0xff] %v12215_v28  ;;  %v21244_v52 = vld [vmem:[#allocation15_spill] sm:$0xff] }
 0x138   :  { %742 = vrot.lane.b32.xlu1 %v11464_v37, %s10959_s30  ;;  %740 = vrot.lane.b32.xlu0 %v11469_v53, %s10959_s30 }
 0x13a   :  { %v12221_v47 = vpop.permute.xlu1 %570  ;;  %v12223_v63 = vpop.permute.xlu0 %568 }
 0x13b   :  { %21205 = vst [vmem:[#allocation203_spill] sm:$0xff] %v12221_v47  ;;  %21206 = vst [vmem:[#allocation204_spill] sm:$0xff] %v12223_v63  ;;  %v21240_v47 = vld [vmem:[#allocation13_spill] sm:$0xff] }
 0x13c   :  { %746 = vrot.lane.b32.xlu1 %v11486_v32, %s10959_s30  ;;  %744 = vrot.lane.b32.xlu0 %v11491_v11, %s10959_s30 }
 0x13e   :  { %v12229_v42 = vpop.permute.xlu1 %574  ;;  %v12231_v38 = vpop.permute.xlu0 %572 }
 0x13f   :  { %21207 = vst [vmem:[#allocation205_spill] sm:$0xff] %v12229_v42  ;;  %21208 = vst [vmem:[#allocation206_spill] sm:$0xff] %v12231_v38  ;;  %v21236_v42 = vld [vmem:[#allocation11_spill] sm:$0xff] }
 0x140   :  { %750 = vrot.lane.b32.xlu1 %v11508_v27, %s10959_s30  ;;  %748 = vrot.lane.b32.xlu0 %v11513_v61, %s10959_s30 }
 0x142   :  { %v12237_v37 = vpop.permute.xlu1 %578  ;;  %v12239_v53 = vpop.permute.xlu0 %576 }
 0x143   :  { %21209 = vst [vmem:[#allocation207_spill] sm:$0xff] %v12237_v37  ;;  %21210 = vst [vmem:[#allocation208_spill] sm:$0xff] %v12239_v53  ;;  %v21227_v53 = vld [vmem:[#allocation6_spill] sm:$0xff]  ;;  %v21232_v37 = vld [vmem:[#allocation9_spill] sm:$0xff] }
 0x144   :  { %754 = vrot.lane.b32.xlu1 %v11530_v22, %s10959_s30  ;;  %752 = vrot.lane.b32.xlu0 %v11535_v56, %s10959_s30  ;;  %v12264_v22 = vld [vmem:[%s20381_s0 + $0x1e8] sm:$0xff] }
 0x146   :  { %v12245_v32 = vpop.permute.xlu1 %582  ;;  %v12247_v11 = vpop.permute.xlu0 %580 }
 0x147   :  { %21211 = vst [vmem:[#allocation209_spill] sm:$0xff] %v12245_v32  ;;  %21212 = vst [vmem:[#allocation210_spill] sm:$0xff] %v12247_v11  ;;  %v21223_v11 = vld [vmem:[#allocation4_spill] sm:$0xff]  ;;  %v21224_v32 = vld [vmem:[#allocation5_spill] sm:$0xff] }
 0x148   :  { %758 = vrot.lane.b32.xlu1 %v11552_v17, %s10959_s30  ;;  %756 = vrot.lane.b32.xlu0 %v11557_v51, %s10959_s30  ;;  %v12269_v17 = vld [vmem:[%s20381_s0 + $0x1e0] sm:$0xff] }
 0x14a   :  { %v12253_v27 = vpop.permute.xlu1 %586  ;;  %v12255_v61 = vpop.permute.xlu0 %584 }
 0x14b   :  { %21213 = vst [vmem:[#allocation211_spill] sm:$0xff] %v12253_v27  ;;  %21214 = vst [vmem:[#allocation212_spill] sm:$0xff] %v12255_v61  ;;  %v21219_v61 = vld [vmem:[#allocation2_spill] sm:$0xff]  ;;  %v21220_v27 = vld [vmem:[#allocation3_spill] sm:$0xff] }
 0x14c   :  { %762 = vrot.lane.b32.xlu1 %v11574_v12, %s10959_s30  ;;  %760 = vrot.lane.b32.xlu0 %v11579_v46, %s10959_s30 }
 0x14e   :  { %v12271_v56 = vpop.permute.xlu1 %590  ;;  %v12273_v51 = vpop.permute.xlu0 %588 }
 0x14f   :  { %21215 = vst [vmem:[#allocation213_spill] sm:$0xff] %v12271_v56  ;;  %21216 = vst [vmem:[#allocation214_spill] sm:$0xff] %v12273_v51 }
 0x150   :  { %766 = vrot.lane.b32.xlu1 %v12264_v22, %s10959_s30  ;;  %764 = vrot.lane.b32.xlu0 %v12269_v17, %s10959_s30 }
 0x152   :  { %v12279_v12 = vpop.permute.xlu1 %594  ;;  %v12281_v46 = vpop.permute.xlu0 %592 }
 0x153   :  { %21217 = vst [vmem:[#allocation215_spill] sm:$0xff] %v12279_v12  ;;  %21218 = vst [vmem:[#allocation216_spill] sm:$0xff] %v12281_v46 }
 0x154   :  { %832 = vrot.lane.b32.xlu1 %v21219_v61, %s10960_s19  ;;  %830 = vrot.lane.b32.xlu0 %v21220_v27, %s10960_s19  ;;  %v21228_v61 = vld [vmem:[#allocation7_spill] sm:$0xff] }
 0x156   :  { %v12287_v56 = vpop.permute.xlu1 %658  ;;  %v12289_v51 = vpop.permute.xlu0 %656 }
 0x157   :  { %21221 = vst [vmem:[#allocation2_spill] sm:$0xff] %v12287_v56  ;;  %21222 = vst [vmem:[#allocation3_spill] sm:$0xff] %v12289_v51  ;;  %v21231_v51 = vld [vmem:[#allocation8_spill] sm:$0xff] }
 0x158   :  { %836 = vrot.lane.b32.xlu1 %v21223_v11, %s10960_s19  ;;  %834 = vrot.lane.b32.xlu0 %v21224_v32, %s10960_s19 }
 0x15a   :  { %v12295_v12 = vpop.permute.xlu1 %662  ;;  %v12297_v46 = vpop.permute.xlu0 %660 }
 0x15b   :  { %21225 = vst [vmem:[#allocation4_spill] sm:$0xff] %v12295_v12  ;;  %21226 = vst [vmem:[#allocation5_spill] sm:$0xff] %v12297_v46  ;;  %v21235_v46 = vld [vmem:[#allocation10_spill] sm:$0xff] }
 0x15c   :  { %840 = vrot.lane.b32.xlu1 %v21227_v53, %s10960_s19  ;;  %838 = vrot.lane.b32.xlu0 %v21228_v61, %s10960_s19 }
 0x15e   :  { %v12303_v27 = vpop.permute.xlu1 %666  ;;  %v12305_v56 = vpop.permute.xlu0 %664 }
 0x15f   :  { %21229 = vst [vmem:[#allocation6_spill] sm:$0xff] %v12303_v27  ;;  %21230 = vst [vmem:[#allocation7_spill] sm:$0xff] %v12305_v56  ;;  %v21239_v56 = vld [vmem:[#allocation12_spill] sm:$0xff] }
 0x160   :  { %844 = vrot.lane.b32.xlu1 %v21231_v51, %s10960_s19  ;;  %842 = vrot.lane.b32.xlu0 %v21232_v37, %s10960_s19 }
 0x162   :  { %v12311_v38 = vpop.permute.xlu1 %670  ;;  %v12313_v12 = vpop.permute.xlu0 %668 }
 0x163   :  { %21233 = vst [vmem:[#allocation8_spill] sm:$0xff] %v12311_v38  ;;  %21234 = vst [vmem:[#allocation9_spill] sm:$0xff] %v12313_v12  ;;  %v21243_v12 = vld [vmem:[#allocation14_spill] sm:$0xff] }
 0x164   :  { %848 = vrot.lane.b32.xlu1 %v21235_v46, %s10960_s19  ;;  %846 = vrot.lane.b32.xlu0 %v21236_v42, %s10960_s19 }
 0x166   :  { %v12319_v63 = vpop.permute.xlu1 %674  ;;  %v12321_v27 = vpop.permute.xlu0 %672 }
 0x167   :  { %21237 = vst [vmem:[#allocation10_spill] sm:$0xff] %v12319_v63  ;;  %21238 = vst [vmem:[#allocation11_spill] sm:$0xff] %v12321_v27  ;;  %v21247_v27 = vld [vmem:[#allocation16_spill] sm:$0xff] }
 0x168   :  { %852 = vrot.lane.b32.xlu1 %v21239_v56, %s10960_s19  ;;  %850 = vrot.lane.b32.xlu0 %v21240_v47, %s10960_s19 }
 0x16a   :  { %v12327_v28 = vpop.permute.xlu1 %678  ;;  %v12329_v38 = vpop.permute.xlu0 %676 }
 0x16b   :  { %21241 = vst [vmem:[#allocation12_spill] sm:$0xff] %v12327_v28  ;;  %21242 = vst [vmem:[#allocation13_spill] sm:$0xff] %v12329_v38  ;;  %v21251_v38 = vld [vmem:[#allocation18_spill] sm:$0xff] }
 0x16c   :  { %856 = vrot.lane.b32.xlu1 %v21243_v12, %s10960_s19  ;;  %854 = vrot.lane.b32.xlu0 %v21244_v52, %s10960_s19 }
 0x16e   :  { %v12335_v58 = vpop.permute.xlu1 %682  ;;  %v12337_v63 = vpop.permute.xlu0 %680 }
 0x16f   :  { %21245 = vst [vmem:[#allocation14_spill] sm:$0xff] %v12335_v58  ;;  %21246 = vst [vmem:[#allocation15_spill] sm:$0xff] %v12337_v63  ;;  %v21255_v63 = vld [vmem:[#allocation20_spill] sm:$0xff] }
 0x170   :  { %860 = vrot.lane.b32.xlu1 %v21247_v27, %s10960_s19  ;;  %858 = vrot.lane.b32.xlu0 %v21248_v57, %s10960_s19 }
 0x172   :  { %v12343_v33 = vpop.permute.xlu1 %686  ;;  %v12345_v28 = vpop.permute.xlu0 %684 }
 0x173   :  { %21249 = vst [vmem:[#allocation16_spill] sm:$0xff] %v12343_v33  ;;  %21250 = vst [vmem:[#allocation17_spill] sm:$0xff] %v12345_v28  ;;  %v21259_v28 = vld [vmem:[#allocation22_spill] sm:$0xff] }
 0x174   :  { %864 = vrot.lane.b32.xlu1 %v21251_v38, %s10960_s19  ;;  %862 = vrot.lane.b32.xlu0 %v21252_v62, %s10960_s19 }
 0x176   :  { %v12351_v13 = vpop.permute.xlu1 %690  ;;  %v12353_v58 = vpop.permute.xlu0 %688 }
 0x177   :  { %21253 = vst [vmem:[#allocation18_spill] sm:$0xff] %v12351_v13  ;;  %21254 = vst [vmem:[#allocation19_spill] sm:$0xff] %v12353_v58  ;;  %v21263_v58 = vld [vmem:[#allocation24_spill] sm:$0xff] }
 0x178   :  { %868 = vrot.lane.b32.xlu1 %v21255_v63, %s10960_s19  ;;  %866 = vrot.lane.b32.xlu0 %v21256_v9, %s10960_s19 }
 0x17a   :  { %v12359_v48 = vpop.permute.xlu1 %694  ;;  %v12361_v33 = vpop.permute.xlu0 %692 }
 0x17b   :  { %21257 = vst [vmem:[#allocation20_spill] sm:$0xff] %v12359_v48  ;;  %21258 = vst [vmem:[#allocation21_spill] sm:$0xff] %v12361_v33  ;;  %v824_v48 = vrot.slane %v12147_v59, 1  ;;  %v12377_v33 = vrot.slane %v12142_v55, 1 }
 0x17c   :  { %872 = vrot.lane.b32.xlu1 %v21259_v28, %s10960_s19  ;;  %870 = vrot.lane.b32.xlu0 %v21260_v43, %s10960_s19 }
 0x17e   :  { %v12367_v4 = vpop.permute.xlu1 %698  ;;  %v12369_v13 = vpop.permute.xlu0 %696 }
 0x17f   :  { %21261 = vst [vmem:[#allocation22_spill] sm:$0xff] %v12367_v4  ;;  %21262 = vst [vmem:[#allocation23_spill] sm:$0xff] %v12369_v13  ;;  %v21268_v13 = vld [vmem:[#allocation28_spill] sm:$0xff]  ;;  %v12389_v4 = vsel %vm146_vm0, %v824_v48, %v12377_v33  ;;  %v21274_v48 = vld [vmem:[#allocation30_spill] sm:$0xff] }
 0x180   :  { %876 = vrot.lane.b32.xlu1 %v21263_v58, %s10960_s19  ;;  %874 = vrot.lane.b32.xlu0 %v21264_v49, %s10960_s19 }
 0x182   :  { %v12379_v60 = vpop.permute.xlu1 %702  ;;  %v12381_v50 = vpop.permute.xlu0 %700 }
 0x183   :  { %21265 = vst [vmem:[#allocation24_spill] sm:$0xff] %v12379_v60  ;;  %21266 = vst [vmem:[#allocation26_spill] sm:$0xff] %v12381_v50 }
 0x184   :  { %880 = vrot.lane.b32.xlu1 %v21267_v54, %s10960_s19  ;;  %878 = vrot.lane.b32.xlu0 %v21268_v13, %s10960_s19 }
 0x186   :  { %v12391_v45 = vpop.permute.xlu1 %706  ;;  %v12393_v44 = vpop.permute.xlu0 %704 }
 0x187   :  { %21269 = vst [vmem:[#allocation27_spill] sm:$0xff] %v12391_v45  ;;  %21270 = vst [vmem:[#allocation28_spill] sm:$0xff] %v12393_v44  ;;  %v21277_v44 = vld [vmem:[#allocation31_spill] sm:$0xff] }
 0x188   :  { %884 = vrot.lane.b32.xlu1 %v12377_v33, %s10960_s19  ;;  %882 = vrot.lane.b32.xlu0 %v12389_v4, %s10960_s19 }
 0x18a   :  { %v12399_v50 = vpop.permute.xlu1 %710  ;;  %v12401_v60 = vpop.permute.xlu0 %708 }
 0x18b   :  { %21271 = vst [vmem:[#allocation217_spill] sm:$0xff] %v12399_v50  ;;  %21272 = vst [vmem:[#allocation218_spill] sm:$0xff] %v12401_v60  ;;  %v21281_v60 = vld [vmem:[#allocation33_spill] sm:$0xff] }
 0x18c   :  { %888 = vrot.lane.b32.xlu1 %v21273_v40, %s10960_s19  ;;  %886 = vrot.lane.b32.xlu0 %v21274_v48, %s10960_s19  ;;  %v21282_v40 = vld [vmem:[#allocation34_spill] sm:$0xff] }
 0x18e   :  { %v12407_v39 = vpop.permute.xlu1 %714  ;;  %v12409_v45 = vpop.permute.xlu0 %712 }
 0x18f   :  { %21275 = vst [vmem:[#allocation29_spill] sm:$0xff] %v12407_v39  ;;  %21276 = vst [vmem:[#allocation30_spill] sm:$0xff] %v12409_v45  ;;  %v21285_v45 = vld [vmem:[#allocation35_spill] sm:$0xff] }
 0x190   :  { %892 = vrot.lane.b32.xlu1 %v21277_v44, %s10960_s19  ;;  %890 = vrot.lane.b32.xlu0 %v21278_v35, %s10960_s19 }
 0x192   :  { %v12415_v34 = vpop.permute.xlu1 %718  ;;  %v12417_v50 = vpop.permute.xlu0 %716 }
 0x193   :  { %21279 = vst [vmem:[#allocation31_spill] sm:$0xff] %v12415_v34  ;;  %21280 = vst [vmem:[#allocation32_spill] sm:$0xff] %v12417_v50  ;;  %v21289_v50 = vld [vmem:[#allocation37_spill] sm:$0xff] }
 0x194   :  { %896 = vrot.lane.b32.xlu1 %v21281_v60, %s10960_s19  ;;  %894 = vrot.lane.b32.xlu0 %v21282_v40, %s10960_s19 }
 0x196   :  { %v12423_v48 = vpop.permute.xlu1 %722  ;;  %v12425_v39 = vpop.permute.xlu0 %720 }
 0x197   :  { %21283 = vst [vmem:[#allocation33_spill] sm:$0xff] %v12423_v48  ;;  %21284 = vst [vmem:[#allocation34_spill] sm:$0xff] %v12425_v39  ;;  %v21293_v39 = vld [vmem:[#allocation39_spill] sm:$0xff] }
 0x198   :  { %900 = vrot.lane.b32.xlu1 %v21285_v45, %s10960_s19  ;;  %898 = vrot.lane.b32.xlu0 %v21286_v30, %s10960_s19 }
 0x19a   :  { %v12431_v29 = vpop.permute.xlu1 %726  ;;  %v12433_v34 = vpop.permute.xlu0 %724 }
 0x19b   :  { %21287 = vst [vmem:[#allocation35_spill] sm:$0xff] %v12431_v29  ;;  %21288 = vst [vmem:[#allocation36_spill] sm:$0xff] %v12433_v34  ;;  %v21297_v34 = vld [vmem:[#allocation41_spill] sm:$0xff] }
 0x19c   :  { %904 = vrot.lane.b32.xlu1 %v21289_v50, %s10960_s19  ;;  %902 = vrot.lane.b32.xlu0 %v21290_v25, %s10960_s19 }
 0x19e   :  { %v12439_v24 = vpop.permute.xlu1 %730  ;;  %v12441_v48 = vpop.permute.xlu0 %728 }
 0x19f   :  { %21291 = vst [vmem:[#allocation37_spill] sm:$0xff] %v12439_v24  ;;  %21292 = vst [vmem:[#allocation38_spill] sm:$0xff] %v12441_v48  ;;  %v21301_v48 = vld [vmem:[#allocation43_spill] sm:$0xff] }
 0x1a0   :  { %908 = vrot.lane.b32.xlu1 %v21293_v39, %s10960_s19  ;;  %906 = vrot.lane.b32.xlu0 %v21294_v20, %s10960_s19 }
 0x1a2   :  { %v12447_v19 = vpop.permute.xlu1 %734  ;;  %v12449_v29 = vpop.permute.xlu0 %732 }
 0x1a3   :  { %21295 = vst [vmem:[#allocation39_spill] sm:$0xff] %v12447_v19  ;;  %21296 = vst [vmem:[#allocation40_spill] sm:$0xff] %v12449_v29  ;;  %v21305_v29 = vld [vmem:[#allocation45_spill] sm:$0xff] }
 0x1a4   :  { %912 = vrot.lane.b32.xlu1 %v21297_v34, %s10960_s19  ;;  %910 = vrot.lane.b32.xlu0 %v21298_v15, %s10960_s19 }
 0x1a6   :  { %v12455_v14 = vpop.permute.xlu1 %738  ;;  %v12457_v24 = vpop.permute.xlu0 %736 }
 0x1a7   :  { %21299 = vst [vmem:[#allocation41_spill] sm:$0xff] %v12455_v14  ;;  %21300 = vst [vmem:[#allocation42_spill] sm:$0xff] %v12457_v24  ;;  %v21309_v24 = vld [vmem:[#allocation47_spill] sm:$0xff] }
 0x1a8   :  { %916 = vrot.lane.b32.xlu1 %v21301_v48, %s10960_s19  ;;  %914 = vrot.lane.b32.xlu0 %v21302_v8, %s10960_s19 }
 0x1aa   :  { %v12463_v7 = vpop.permute.xlu1 %742  ;;  %v12465_v19 = vpop.permute.xlu0 %740 }
 0x1ab   :  { %21303 = vst [vmem:[#allocation43_spill] sm:$0xff] %v12463_v7  ;;  %21304 = vst [vmem:[#allocation44_spill] sm:$0xff] %v12465_v19  ;;  %v21313_v19 = vld [vmem:[#allocation49_spill] sm:$0xff] }
 0x1ac   :  { %920 = vrot.lane.b32.xlu1 %v21305_v29, %s10960_s19  ;;  %918 = vrot.lane.b32.xlu0 %v21306_v2, %s10960_s19 }
 0x1ae   :  { %v12471_v0 = vpop.permute.xlu1 %746  ;;  %v12473_v14 = vpop.permute.xlu0 %744 }
 0x1af   :  { %21307 = vst [vmem:[#allocation45_spill] sm:$0xff] %v12471_v0  ;;  %21308 = vst [vmem:[#allocation46_spill] sm:$0xff] %v12473_v14  ;;  %v21317_v14 = vld [vmem:[#allocation51_spill] sm:$0xff] }
 0x1b0   :  { %924 = vrot.lane.b32.xlu1 %v21309_v24, %s10960_s19  ;;  %922 = vrot.lane.b32.xlu0 %v21310_v23, %s10960_s19 }
 0x1b2   :  { %v12479_v41 = vpop.permute.xlu1 %750  ;;  %v12481_v7 = vpop.permute.xlu0 %748 }
 0x1b3   :  { %21311 = vst [vmem:[#allocation47_spill] sm:$0xff] %v12479_v41  ;;  %21312 = vst [vmem:[#allocation219_spill] sm:$0xff] %v12481_v7  ;;  %v827_v41 = vrot.slane %v12269_v17, 1  ;;  %v12497_v7 = vrot.slane %v12264_v22, 1 }
 0x1b4   :  { %928 = vrot.lane.b32.xlu1 %v21313_v19, %s10960_s19  ;;  %926 = vrot.lane.b32.xlu0 %v21314_v18, %s10960_s19  ;;  %v21322_v18 = vld [vmem:[#allocation53_spill] sm:$0xff] }
 0x1b5   :  { %21319 = vst [vmem:[#allocation222_spill] sm:$0xff] %v12497_v7 }
 0x1b6   :  { %v12487_v21 = vpop.permute.xlu1 %754  ;;  %v12489_v0 = vpop.permute.xlu0 %752 }
 0x1b7   :  { %21315 = vst [vmem:[#allocation220_spill] sm:$0xff] %v12487_v21  ;;  %21316 = vst [vmem:[#allocation221_spill] sm:$0xff] %v12489_v0  ;;  %v21323_v0 = vld [vmem:[#allocation54_spill] sm:$0xff]  ;;  %v12509_v21 = vsel %vm146_vm0, %v827_v41, %v12497_v7  ;;  %v21330_v41 = vld [vmem:[#allocation56_spill] sm:$0xff] }
 0x1b8   :  { %932 = vrot.lane.b32.xlu1 %v21317_v14, %s10960_s19  ;;  %930 = vrot.lane.b32.xlu0 %v21318_v1, %s10960_s19  ;;  %21324 = vst [vmem:[#allocation225_spill] sm:$0xff] %v12509_v21 }
 0x1ba   :  { %v12499_v23 = vpop.permute.xlu1 %758  ;;  %v12501_v19 = vpop.permute.xlu0 %756 }
 0x1bb   :  { %21320 = vst [vmem:[#allocation223_spill] sm:$0xff] %v12499_v23  ;;  %21321 = vst [vmem:[#allocation224_spill] sm:$0xff] %v12501_v19 }
 0x1bc   :  { %936 = vrot.lane.b32.xlu1 %v21322_v18, %s10960_s19  ;;  %934 = vrot.lane.b32.xlu0 %v21323_v0, %s10960_s19  ;;  %v21329_v0 = vld [vmem:[#allocation55_spill] sm:$0xff]  ;;  %v21337_v18 = vld [vmem:[#allocation61_spill] sm:$0xff] }
 0x1be   :  { %v12511_v1 = vpop.permute.xlu1 %762  ;;  %v12513_v14 = vpop.permute.xlu0 %760 }
 0x1bf   :  { %21325 = vst [vmem:[#allocation226_spill] sm:$0xff] %v12511_v1  ;;  %21326 = vst [vmem:[#allocation227_spill] sm:$0xff] %v12513_v14 }
 0x1c0   :  { %940 = vrot.lane.b32.xlu1 %v12497_v7, %s10960_s19  ;;  %938 = vrot.lane.b32.xlu0 %v12509_v21, %s10960_s19  ;;  %v21333_v7 = vld [vmem:[#allocation57_spill] sm:$0xff]  ;;  %v21334_v21 = vld [vmem:[#allocation60_spill] sm:$0xff] }
 0x1c2   :  { %v12519_v19 = vpop.permute.xlu1 %766  ;;  %v12521_v23 = vpop.permute.xlu0 %764 }
 0x1c3   :  { %21327 = vst [vmem:[#allocation228_spill] sm:$0xff] %v12519_v19  ;;  %21328 = vst [vmem:[#allocation229_spill] sm:$0xff] %v12521_v23 }
 0x1c4   :  { %1006 = vrot.lane.b32.xlu1 %v21329_v0, %s10961_s20  ;;  %1004 = vrot.lane.b32.xlu0 %v21330_v41, %s10961_s20  ;;  %v21338_v0 = vld [vmem:[#allocation64_spill] sm:$0xff] }
 0x1c6   :  { %v12527_v1 = vpop.permute.xlu1 %832  ;;  %v12529_v14 = vpop.permute.xlu0 %830 }
 0x1c7   :  { %21331 = vst [vmem:[#allocation55_spill] sm:$0xff] %v12527_v1  ;;  %21332 = vst [vmem:[#allocation56_spill] sm:$0xff] %v12529_v14  ;;  %v21341_v14 = vld [vmem:[#allocation65_spill] sm:$0xff] }
 0x1c8   :  { %1010 = vrot.lane.b32.xlu1 %v21333_v7, %s10961_s20  ;;  %1008 = vrot.lane.b32.xlu0 %v21334_v21, %s10961_s20  ;;  %v21342_v7 = vld [vmem:[#allocation68_spill] sm:$0xff] }
 0x1ca   :  { %v12535_v19 = vpop.permute.xlu1 %836  ;;  %v12537_v23 = vpop.permute.xlu0 %834 }
 0x1cb   :  { %21335 = vst [vmem:[#allocation230_spill] sm:$0xff] %v12535_v19  ;;  %21336 = vst [vmem:[#allocation231_spill] sm:$0xff] %v12537_v23  ;;  %v21345_v23 = vld [vmem:[#allocation69_spill] sm:$0xff] }
 0x1cc   :  { %1014 = vrot.lane.b32.xlu1 %v21337_v18, %s10961_s20  ;;  %1012 = vrot.lane.b32.xlu0 %v21338_v0, %s10961_s20  ;;  %v21346_v18 = vld [vmem:[#allocation72_spill] sm:$0xff] }
 0x1ce   :  { %v12543_v41 = vpop.permute.xlu1 %840  ;;  %v12545_v1 = vpop.permute.xlu0 %838 }
 0x1cf   :  { %21339 = vst [vmem:[#allocation232_spill] sm:$0xff] %v12543_v41  ;;  %21340 = vst [vmem:[#allocation233_spill] sm:$0xff] %v12545_v1  ;;  %v21349_v1 = vld [vmem:[#allocation73_spill] sm:$0xff] }
 0x1d0   :  { %1018 = vrot.lane.b32.xlu1 %v21341_v14, %s10961_s20  ;;  %1016 = vrot.lane.b32.xlu0 %v21342_v7, %s10961_s20  ;;  %v21350_v14 = vld [vmem:[#allocation76_spill] sm:$0xff] }
 0x1d2   :  { %v12551_v21 = vpop.permute.xlu1 %844  ;;  %v12553_v19 = vpop.permute.xlu0 %842 }
 0x1d3   :  { %21343 = vst [vmem:[#allocation234_spill] sm:$0xff] %v12551_v21  ;;  %21344 = vst [vmem:[#allocation235_spill] sm:$0xff] %v12553_v19  ;;  %v21353_v19 = vld [vmem:[#allocation77_spill] sm:$0xff] }
 0x1d4   :  { %1022 = vrot.lane.b32.xlu1 %v21345_v23, %s10961_s20  ;;  %1020 = vrot.lane.b32.xlu0 %v21346_v18, %s10961_s20  ;;  %v21354_v23 = vld [vmem:[#allocation80_spill] sm:$0xff] }
 0x1d6   :  { %v12559_v0 = vpop.permute.xlu1 %848  ;;  %v12561_v41 = vpop.permute.xlu0 %846 }
 0x1d7   :  { %21347 = vst [vmem:[#allocation236_spill] sm:$0xff] %v12559_v0  ;;  %21348 = vst [vmem:[#allocation237_spill] sm:$0xff] %v12561_v41  ;;  %v21357_v41 = vld [vmem:[#allocation81_spill] sm:$0xff] }
 0x1d8   :  { %1026 = vrot.lane.b32.xlu1 %v21349_v1, %s10961_s20  ;;  %1024 = vrot.lane.b32.xlu0 %v21350_v14, %s10961_s20  ;;  %v21358_v1 = vld [vmem:[#allocation84_spill] sm:$0xff] }
 0x1da   :  { %v12567_v7 = vpop.permute.xlu1 %852  ;;  %v12569_v21 = vpop.permute.xlu0 %850 }
 0x1db   :  { %21351 = vst [vmem:[#allocation238_spill] sm:$0xff] %v12567_v7  ;;  %21352 = vst [vmem:[#allocation239_spill] sm:$0xff] %v12569_v21  ;;  %v21361_v21 = vld [vmem:[#allocation85_spill] sm:$0xff] }
 0x1dc   :  { %1030 = vrot.lane.b32.xlu1 %v21353_v19, %s10961_s20  ;;  %1028 = vrot.lane.b32.xlu0 %v21354_v23, %s10961_s20  ;;  %v21362_v19 = vld [vmem:[#allocation88_spill] sm:$0xff] }
 0x1de   :  { %v12575_v18 = vpop.permute.xlu1 %856  ;;  %v12577_v0 = vpop.permute.xlu0 %854 }
 0x1df   :  { %21355 = vst [vmem:[#allocation240_spill] sm:$0xff] %v12575_v18  ;;  %21356 = vst [vmem:[#allocation241_spill] sm:$0xff] %v12577_v0  ;;  %v21365_v0 = vld [vmem:[#allocation89_spill] sm:$0xff] }
 0x1e0   :  { %1034 = vrot.lane.b32.xlu1 %v21357_v41, %s10961_s20  ;;  %1032 = vrot.lane.b32.xlu0 %v21358_v1, %s10961_s20  ;;  %v21366_v41 = vld [vmem:[#allocation92_spill] sm:$0xff] }
 0x1e2   :  { %v12583_v14 = vpop.permute.xlu1 %860  ;;  %v12585_v7 = vpop.permute.xlu0 %858 }
 0x1e3   :  { %21359 = vst [vmem:[#allocation242_spill] sm:$0xff] %v12583_v14  ;;  %21360 = vst [vmem:[#allocation243_spill] sm:$0xff] %v12585_v7  ;;  %v21369_v7 = vld [vmem:[#allocation93_spill] sm:$0xff] }
 0x1e4   :  { %1038 = vrot.lane.b32.xlu1 %v21361_v21, %s10961_s20  ;;  %1036 = vrot.lane.b32.xlu0 %v21362_v19, %s10961_s20  ;;  %v21370_v21 = vld [vmem:[#allocation96_spill] sm:$0xff] }
 0x1e6   :  { %v12591_v23 = vpop.permute.xlu1 %864  ;;  %v12593_v18 = vpop.permute.xlu0 %862 }
 0x1e7   :  { %21363 = vst [vmem:[#allocation244_spill] sm:$0xff] %v12591_v23  ;;  %21364 = vst [vmem:[#allocation245_spill] sm:$0xff] %v12593_v18 }
 0x1e8   :  { %1042 = vrot.lane.b32.xlu1 %v21365_v0, %s10961_s20  ;;  %1040 = vrot.lane.b32.xlu0 %v21366_v41, %s10961_s20 }
 0x1ea   :  { %v12599_v1 = vpop.permute.xlu1 %868  ;;  %v12601_v14 = vpop.permute.xlu0 %866 }
 0x1eb   :  { %21367 = vst [vmem:[#allocation89_spill] sm:$0xff] %v12599_v1  ;;  %21368 = vst [vmem:[#allocation92_spill] sm:$0xff] %v12601_v14  ;;  %v998_v1 = vrot.slane %v12147_v59, 2  ;;  %v12617_v14 = vrot.slane %v12142_v55, 2 }
 0x1ec   :  { %1046 = vrot.lane.b32.xlu1 %v21369_v7, %s10961_s20  ;;  %1044 = vrot.lane.b32.xlu0 %v21370_v21, %s10961_s20  ;;  %v21376_v21 = vld [vmem:[#allocation101_spill] sm:$0xff] }
 0x1ed   :  { %21373 = vst [vmem:[#allocation248_spill] sm:$0xff] %v12617_v14 }
 0x1ee   :  { %v12607_v19 = vpop.permute.xlu1 %872  ;;  %v12609_v23 = vpop.permute.xlu0 %870 }
 0x1ef   :  { %21371 = vst [vmem:[#allocation246_spill] sm:$0xff] %v12607_v19  ;;  %21372 = vst [vmem:[#allocation247_spill] sm:$0xff] %v12609_v23  ;;  %v21377_v23 = vld [vmem:[#allocation104_spill] sm:$0xff]  ;;  %v12629_v19 = vsel %vm399_vm1, %v998_v1, %v12617_v14  ;;  %v21383_v1 = vld [vmem:[#allocation109_spill] sm:$0xff] }
 0x1f0   :  { %1050 = vrot.lane.b32.xlu1 %v11779_v6, %s10961_s20  ;;  %1048 = vrot.lane.b32.xlu0 %v11792_v36, %s10961_s20  ;;  %21378 = vst [vmem:[#allocation251_spill] sm:$0xff] %v12629_v19 }
 0x1f2   :  { %v12619_v18 = vpop.permute.xlu1 %876  ;;  %v12621_v7 = vpop.permute.xlu0 %874 }
 0x1f3   :  { %21374 = vst [vmem:[#allocation249_spill] sm:$0xff] %v12619_v18  ;;  %21375 = vst [vmem:[#allocation250_spill] sm:$0xff] %v12621_v7 }
 0x1f4   :  { %1054 = vrot.lane.b32.xlu1 %v21376_v21, %s10961_s20  ;;  %1052 = vrot.lane.b32.xlu0 %v21377_v23, %s10961_s20 }
 0x1f6   :  { %v12631_v36 = vpop.permute.xlu1 %880  ;;  %v12633_v6 = vpop.permute.xlu0 %878 }
 0x1f7   :  { %21379 = vst [vmem:[#allocation252_spill] sm:$0xff] %v12631_v36  ;;  %21380 = vst [vmem:[#allocation253_spill] sm:$0xff] %v12633_v6  ;;  %v21386_v6 = vld [vmem:[#allocation110_spill] sm:$0xff] }
 0x1f8   :  { %1058 = vrot.lane.b32.xlu1 %v12617_v14, %s10961_s20  ;;  %1056 = vrot.lane.b32.xlu0 %v12629_v19, %s10961_s20  ;;  %v21387_v14 = vld [vmem:[#allocation113_spill] sm:$0xff] }
 0x1fa   :  { %v12639_v7 = vpop.permute.xlu1 %884  ;;  %v12641_v18 = vpop.permute.xlu0 %882 }
 0x1fb   :  { %21381 = vst [vmem:[#allocation254_spill] sm:$0xff] %v12639_v7  ;;  %21382 = vst [vmem:[#allocation255_spill] sm:$0xff] %v12641_v18  ;;  %v21390_v18 = vld [vmem:[#allocation114_spill] sm:$0xff] }
 0x1fc   :  { %1062 = vrot.lane.b32.xlu1 %v11822_v31, %s10961_s20  ;;  %1060 = vrot.lane.b32.xlu0 %v21383_v1, %s10961_s20  ;;  %v21391_v31 = vld [vmem:[#allocation117_spill] sm:$0xff] }
 0x1fe   :  { %v12647_v23 = vpop.permute.xlu1 %888  ;;  %v12649_v36 = vpop.permute.xlu0 %886 }
 0x1ff   :  { %21384 = vst [vmem:[#allocation109_spill] sm:$0xff] %v12647_v23  ;;  %21385 = vst [vmem:[#allocation256_spill] sm:$0xff] %v12649_v36  ;;  %v21394_v36 = vld [vmem:[#allocation118_spill] sm:$0xff] }
 0x200   :  { %1066 = vrot.lane.b32.xlu1 %v21386_v6, %s10961_s20  ;;  %1064 = vrot.lane.b32.xlu0 %v21387_v14, %s10961_s20  ;;  %v21395_v6 = vld [vmem:[#allocation121_spill] sm:$0xff] }
 0x202   :  { %v12655_v19 = vpop.permute.xlu1 %892  ;;  %v12657_v7 = vpop.permute.xlu0 %890 }
 0x203   :  { %21388 = vst [vmem:[#allocation257_spill] sm:$0xff] %v12655_v19  ;;  %21389 = vst [vmem:[#allocation258_spill] sm:$0xff] %v12657_v7  ;;  %v21398_v7 = vld [vmem:[#allocation122_spill] sm:$0xff] }
 0x204   :  { %1070 = vrot.lane.b32.xlu1 %v21390_v18, %s10961_s20  ;;  %1068 = vrot.lane.b32.xlu0 %v21391_v31, %s10961_s20  ;;  %v21399_v18 = vld [vmem:[#allocation125_spill] sm:$0xff] }
 0x206   :  { %v12663_v1 = vpop.permute.xlu1 %896  ;;  %v12665_v23 = vpop.permute.xlu0 %894 }
 0x207   :  { %21392 = vst [vmem:[#allocation259_spill] sm:$0xff] %v12663_v1  ;;  %21393 = vst [vmem:[#allocation260_spill] sm:$0xff] %v12665_v23  ;;  %v21402_v23 = vld [vmem:[#allocation126_spill] sm:$0xff] }
 0x208   :  { %1074 = vrot.lane.b32.xlu1 %v21394_v36, %s10961_s20  ;;  %1072 = vrot.lane.b32.xlu0 %v21395_v6, %s10961_s20  ;;  %v21403_v36 = vld [vmem:[#allocation129_spill] sm:$0xff] }
 0x20a   :  { %v12671_v14 = vpop.permute.xlu1 %900  ;;  %v12673_v19 = vpop.permute.xlu0 %898 }
 0x20b   :  { %21396 = vst [vmem:[#allocation261_spill] sm:$0xff] %v12671_v14  ;;  %21397 = vst [vmem:[#allocation262_spill] sm:$0xff] %v12673_v19  ;;  %v21406_v19 = vld [vmem:[#allocation130_spill] sm:$0xff] }
 0x20c   :  { %1078 = vrot.lane.b32.xlu1 %v21398_v7, %s10961_s20  ;;  %1076 = vrot.lane.b32.xlu0 %v21399_v18, %s10961_s20  ;;  %v21407_v7 = vld [vmem:[#allocation133_spill] sm:$0xff] }
 0x20e   :  { %v12679_v31 = vpop.permute.xlu1 %904  ;;  %v12681_v1 = vpop.permute.xlu0 %902 }
 0x20f   :  { %21400 = vst [vmem:[#allocation263_spill] sm:$0xff] %v12679_v31  ;;  %21401 = vst [vmem:[#allocation264_spill] sm:$0xff] %v12681_v1  ;;  %v21410_v1 = vld [vmem:[#allocation134_spill] sm:$0xff] }
 0x210   :  { %1082 = vrot.lane.b32.xlu1 %v21402_v23, %s10961_s20  ;;  %1080 = vrot.lane.b32.xlu0 %v21403_v36, %s10961_s20  ;;  %v21411_v23 = vld [vmem:[#allocation137_spill] sm:$0xff] }
 0x212   :  { %v12687_v6 = vpop.permute.xlu1 %908  ;;  %v12689_v14 = vpop.permute.xlu0 %906 }
 0x213   :  { %21404 = vst [vmem:[#allocation265_spill] sm:$0xff] %v12687_v6  ;;  %21405 = vst [vmem:[#allocation266_spill] sm:$0xff] %v12689_v14  ;;  %v21414_v14 = vld [vmem:[#allocation138_spill] sm:$0xff] }
 0x214   :  { %1086 = vrot.lane.b32.xlu1 %v21406_v19, %s10961_s20  ;;  %1084 = vrot.lane.b32.xlu0 %v21407_v7, %s10961_s20  ;;  %v21415_v19 = vld [vmem:[#allocation141_spill] sm:$0xff] }
 0x216   :  { %v12695_v18 = vpop.permute.xlu1 %912  ;;  %v12697_v31 = vpop.permute.xlu0 %910 }
 0x217   :  { %21408 = vst [vmem:[#allocation267_spill] sm:$0xff] %v12695_v18  ;;  %21409 = vst [vmem:[#allocation268_spill] sm:$0xff] %v12697_v31  ;;  %v21418_v31 = vld [vmem:[#allocation142_spill] sm:$0xff] }
 0x218   :  { %1090 = vrot.lane.b32.xlu1 %v21410_v1, %s10961_s20  ;;  %1088 = vrot.lane.b32.xlu0 %v21411_v23, %s10961_s20  ;;  %v21419_v1 = vld [vmem:[#allocation145_spill] sm:$0xff] }
 0x21a   :  { %v12703_v36 = vpop.permute.xlu1 %916  ;;  %v12705_v6 = vpop.permute.xlu0 %914 }
 0x21b   :  { %21412 = vst [vmem:[#allocation269_spill] sm:$0xff] %v12703_v36  ;;  %21413 = vst [vmem:[#allocation270_spill] sm:$0xff] %v12705_v6  ;;  %v21422_v6 = vld [vmem:[#allocation149_spill] sm:$0xff] }
 0x21c   :  { %1094 = vrot.lane.b32.xlu1 %v21414_v14, %s10961_s20  ;;  %1092 = vrot.lane.b32.xlu0 %v21415_v19, %s10961_s20  ;;  %v12863_v14 = vld [vmem:[%s20381_s0 + $0x70] sm:$0xff] }
 0x21d   :  { %21444 = vst [vmem:[#allocation296_spill] sm:$0xff] %v12863_v14 }
 0x21e   :  { %v12711_v7 = vpop.permute.xlu1 %920  ;;  %v12713_v18 = vpop.permute.xlu0 %918 }
 0x21f   :  { %21416 = vst [vmem:[#allocation271_spill] sm:$0xff] %v12711_v7  ;;  %21417 = vst [vmem:[#allocation272_spill] sm:$0xff] %v12713_v18 }
 0x220   :  { %1098 = vrot.lane.b32.xlu1 %v21418_v31, %s10961_s20  ;;  %1096 = vrot.lane.b32.xlu0 %v21419_v1, %s10961_s20  ;;  %v12845_v1 = vld [vmem:[%s20381_s0 + $0x60] sm:$0xff] }
 0x222   :  { %v12719_v23 = vpop.permute.xlu1 %924  ;;  %v12721_v36 = vpop.permute.xlu0 %922 }
 0x223   :  { %21420 = vst [vmem:[#allocation273_spill] sm:$0xff] %v12719_v23  ;;  %21421 = vst [vmem:[#allocation274_spill] sm:$0xff] %v12721_v36  ;;  %v1001_v23 = vrot.slane %v12269_v17, 2  ;;  %v12737_v36 = vrot.slane %v12264_v22, 2 }
 0x224   :  { %1102 = vrot.lane.b32.xlu1 %v11980_v5, %s10961_s20  ;;  %1100 = vrot.lane.b32.xlu0 %v21422_v6, %s10961_s20  ;;  %v12827_v6 = vld [vmem:[%s20381_s0 + $0x50] sm:$0xff] }
 0x225   :  { %21425 = vst [vmem:[#allocation277_spill] sm:$0xff] %v12737_v36 }
 0x226   :  { %v12727_v19 = vpop.permute.xlu1 %928  ;;  %v12729_v7 = vpop.permute.xlu0 %926 }
 0x227   :  { %21423 = vst [vmem:[#allocation275_spill] sm:$0xff] %v12727_v19  ;;  %21424 = vst [vmem:[#allocation276_spill] sm:$0xff] %v12729_v7 }
 0x228   :  { %1106 = vrot.lane.b32.xlu1 %v11996_v3, %s10961_s20  ;;  %1104 = vrot.lane.b32.xlu0 %v12009_v16, %s10961_s20  ;;  %v12749_v3 = vsel %vm399_vm1, %v1001_v23, %v12737_v36  ;;  %v12773_v23 = vld [vmem:[%s20381_s0 + $0x20] sm:$0xff] }
 0x229   :  { %21428 = vst [vmem:[#allocation280_spill] sm:$0xff] %v12749_v3 }
 0x22a   :  { %v12739_v18 = vpop.permute.xlu1 %932  ;;  %v12741_v5 = vpop.permute.xlu0 %930 }
 0x22b   :  { %21426 = vst [vmem:[#allocation278_spill] sm:$0xff] %v12739_v18  ;;  %21427 = vst [vmem:[#allocation279_spill] sm:$0xff] %v12741_v5 }
 0x22c   :  { %1110 = vrot.lane.b32.xlu1 %v12012_v10, %s10961_s20  ;;  %1108 = vrot.lane.b32.xlu0 %v12025_v26, %s10961_s20  ;;  %v12766_v26 = vld [vmem:[%s20381_s0 + $0x28] sm:$0xff] }
 0x22e   :  { %v12751_v16 = vpop.permute.xlu1 %936  ;;  %v12753_v7 = vpop.permute.xlu0 %934 }
 0x22f   :  { %21429 = vst [vmem:[#allocation281_spill] sm:$0xff] %v12751_v16  ;;  %21430 = vst [vmem:[#allocation282_spill] sm:$0xff] %v12753_v7  ;;  %v12809_v16 = vld [vmem:[%s20381_s0 + $0x40] sm:$0xff] }
 0x230   :  { %1114 = vrot.lane.b32.xlu1 %v12737_v36, %s10961_s20  ;;  %1112 = vrot.lane.b32.xlu0 %v12749_v3, %s10961_s20 }
 0x232   :  { %v12759_v5 = vpop.permute.xlu1 %940  ;;  %v12761_v10 = vpop.permute.xlu0 %938 }
 0x233   :  { %21431 = vst [vmem:[#allocation283_spill] sm:$0xff] %v12759_v5  ;;  %21432 = vst [vmem:[#allocation284_spill] sm:$0xff] %v12761_v10  ;;  %v12784_v10 = vld [vmem:[%s20381_s0 + $0x38] sm:$0xff]  ;;  %v12791_v5 = vld [vmem:[%s20381_s0 + $0x30] sm:$0xff] }
 0x234   :  { %1178 = vrot.lane.b32.xlu1 %v12766_v26, %s10962_s23  ;;  %1176 = vrot.lane.b32.xlu0 %v12773_v23, %s10962_s23 }
 0x236   :  { %v12777_v3 = vpop.permute.xlu1 %1006  ;;  %v12779_v36 = vpop.permute.xlu0 %1004 }
 0x237   :  { %21433 = vst [vmem:[#allocation285_spill] sm:$0xff] %v12777_v3  ;;  %21434 = vst [vmem:[#allocation286_spill] sm:$0xff] %v12779_v36  ;;  %v12802_v36 = vld [vmem:[%s20381_s0 + $0x48] sm:$0xff] }
 0x238   :  { %1182 = vrot.lane.b32.xlu1 %v12784_v10, %s10962_s23  ;;  %1180 = vrot.lane.b32.xlu0 %v12791_v5, %s10962_s23 }
 0x23a   :  { %v12795_v7 = vpop.permute.xlu1 %1010  ;;  %v12797_v3 = vpop.permute.xlu0 %1008 }
 0x23b   :  { %21435 = vst [vmem:[#allocation287_spill] sm:$0xff] %v12795_v7  ;;  %21436 = vst [vmem:[#allocation288_spill] sm:$0xff] %v12797_v3  ;;  %v12820_v3 = vld [vmem:[%s20381_s0 + $0x58] sm:$0xff] }
 0x23c   :  { %1186 = vrot.lane.b32.xlu1 %v12802_v36, %s10962_s23  ;;  %1184 = vrot.lane.b32.xlu0 %v12809_v16, %s10962_s23 }
 0x23e   :  { %v12813_v18 = vpop.permute.xlu1 %1014  ;;  %v12815_v7 = vpop.permute.xlu0 %1012 }
 0x23f   :  { %21437 = vst [vmem:[#allocation289_spill] sm:$0xff] %v12813_v18  ;;  %21438 = vst [vmem:[#allocation290_spill] sm:$0xff] %v12815_v7  ;;  %v12838_v7 = vld [vmem:[%s20381_s0 + $0x68] sm:$0xff] }
 0x240   :  { %1190 = vrot.lane.b32.xlu1 %v12820_v3, %s10962_s23  ;;  %1188 = vrot.lane.b32.xlu0 %v12827_v6, %s10962_s23 }
 0x242   :  { %v12831_v19 = vpop.permute.xlu1 %1018  ;;  %v12833_v18 = vpop.permute.xlu0 %1016 }
 0x243   :  { %21439 = vst [vmem:[#allocation291_spill] sm:$0xff] %v12831_v19  ;;  %21440 = vst [vmem:[#allocation292_spill] sm:$0xff] %v12833_v18  ;;  %v12856_v18 = vld [vmem:[%s20381_s0 + $0x78] sm:$0xff] }
 0x244   :  { %1194 = vrot.lane.b32.xlu1 %v12838_v7, %s10962_s23  ;;  %1192 = vrot.lane.b32.xlu0 %v12845_v1, %s10962_s23  ;;  %21443 = vst [vmem:[#allocation295_spill] sm:$0xff] %v12856_v18 }
 0x246   :  { %v12849_v31 = vpop.permute.xlu1 %1022  ;;  %v12851_v19 = vpop.permute.xlu0 %1020 }
 0x247   :  { %21441 = vst [vmem:[#allocation293_spill] sm:$0xff] %v12849_v31  ;;  %21442 = vst [vmem:[#allocation294_spill] sm:$0xff] %v12851_v19  ;;  %v12874_v19 = vld [vmem:[%s20381_s0 + $0x88] sm:$0xff] }
 0x248   :  { %1198 = vrot.lane.b32.xlu1 %v12856_v18, %s10962_s23  ;;  %1196 = vrot.lane.b32.xlu0 %v12863_v14, %s10962_s23  ;;  %21447 = vst [vmem:[#allocation299_spill] sm:$0xff] %v12874_v19  ;;  %v12881_v18 = vld [vmem:[%s20381_s0 + $0x80] sm:$0xff] }
 0x249   :  { %21448 = vst [vmem:[#allocation300_spill] sm:$0xff] %v12881_v18 }
 0x24a   :  { %v12867_v21 = vpop.permute.xlu1 %1026  ;;  %v12869_v31 = vpop.permute.xlu0 %1024 }
 0x24b   :  { %21445 = vst [vmem:[#allocation297_spill] sm:$0xff] %v12867_v21  ;;  %21446 = vst [vmem:[#allocation298_spill] sm:$0xff] %v12869_v31  ;;  %v12892_v31 = vld [vmem:[%s20381_s0 + $0x98] sm:$0xff] }
 0x24c   :  { %1202 = vrot.lane.b32.xlu1 %v12874_v19, %s10962_s23  ;;  %1200 = vrot.lane.b32.xlu0 %v12881_v18, %s10962_s23  ;;  %21451 = vst [vmem:[#allocation303_spill] sm:$0xff] %v12892_v31  ;;  %v12899_v19 = vld [vmem:[%s20381_s0 + $0x90] sm:$0xff] }
 0x24d   :  { %21452 = vst [vmem:[#allocation304_spill] sm:$0xff] %v12899_v19 }
 0x24e   :  { %v12885_v14 = vpop.permute.xlu1 %1030  ;;  %v12887_v21 = vpop.permute.xlu0 %1028 }
 0x24f   :  { %21449 = vst [vmem:[#allocation301_spill] sm:$0xff] %v12885_v14  ;;  %21450 = vst [vmem:[#allocation302_spill] sm:$0xff] %v12887_v21  ;;  %v12910_v21 = vld [vmem:[%s20381_s0 + $0xa8] sm:$0xff] }
 0x250   :  { %1206 = vrot.lane.b32.xlu1 %v12892_v31, %s10962_s23  ;;  %1204 = vrot.lane.b32.xlu0 %v12899_v19, %s10962_s23  ;;  %21455 = vst [vmem:[#allocation307_spill] sm:$0xff] %v12910_v21  ;;  %v12917_v31 = vld [vmem:[%s20381_s0 + $0xa0] sm:$0xff] }
 0x251   :  { %21456 = vst [vmem:[#allocation308_spill] sm:$0xff] %v12917_v31 }
 0x252   :  { %v12903_v18 = vpop.permute.xlu1 %1034  ;;  %v12905_v14 = vpop.permute.xlu0 %1032 }
 0x253   :  { %21453 = vst [vmem:[#allocation305_spill] sm:$0xff] %v12903_v18  ;;  %21454 = vst [vmem:[#allocation306_spill] sm:$0xff] %v12905_v14  ;;  %v12928_v14 = vld [vmem:[%s20381_s0 + $0xb8] sm:$0xff] }
 0x254   :  { %1210 = vrot.lane.b32.xlu1 %v12910_v21, %s10962_s23  ;;  %1208 = vrot.lane.b32.xlu0 %v12917_v31, %s10962_s23  ;;  %21459 = vst [vmem:[#allocation311_spill] sm:$0xff] %v12928_v14  ;;  %v12935_v21 = vld [vmem:[%s20381_s0 + $0xb0] sm:$0xff] }
 0x255   :  { %21460 = vst [vmem:[#allocation312_spill] sm:$0xff] %v12935_v21 }
 0x256   :  { %v12921_v19 = vpop.permute.xlu1 %1038  ;;  %v12923_v18 = vpop.permute.xlu0 %1036 }
 0x257   :  { %21457 = vst [vmem:[#allocation309_spill] sm:$0xff] %v12921_v19  ;;  %21458 = vst [vmem:[#allocation310_spill] sm:$0xff] %v12923_v18  ;;  %v12946_v18 = vld [vmem:[%s20381_s0 + $0xc8] sm:$0xff] }
 0x258   :  { %1214 = vrot.lane.b32.xlu1 %v12928_v14, %s10962_s23  ;;  %1212 = vrot.lane.b32.xlu0 %v12935_v21, %s10962_s23  ;;  %21463 = vst [vmem:[#allocation315_spill] sm:$0xff] %v12946_v18  ;;  %v12953_v14 = vld [vmem:[%s20381_s0 + $0xc0] sm:$0xff] }
 0x259   :  { %21464 = vst [vmem:[#allocation316_spill] sm:$0xff] %v12953_v14 }
 0x25a   :  { %v12939_v31 = vpop.permute.xlu1 %1042  ;;  %v12941_v19 = vpop.permute.xlu0 %1040 }
 0x25b   :  { %21461 = vst [vmem:[#allocation313_spill] sm:$0xff] %v12939_v31  ;;  %21462 = vst [vmem:[#allocation314_spill] sm:$0xff] %v12941_v19  ;;  %v12964_v19 = vld [vmem:[%s20381_s0 + $0xd8] sm:$0xff] }
 0x25c   :  { %1218 = vrot.lane.b32.xlu1 %v12946_v18, %s10962_s23  ;;  %1216 = vrot.lane.b32.xlu0 %v12953_v14, %s10962_s23  ;;  %21467 = vst [vmem:[#allocation319_spill] sm:$0xff] %v12964_v19  ;;  %v12971_v18 = vld [vmem:[%s20381_s0 + $0xd0] sm:$0xff] }
 0x25d   :  { %21468 = vst [vmem:[#allocation320_spill] sm:$0xff] %v12971_v18 }
 0x25e   :  { %v12957_v21 = vpop.permute.xlu1 %1046  ;;  %v12959_v31 = vpop.permute.xlu0 %1044 }
 0x25f   :  { %21465 = vst [vmem:[#allocation317_spill] sm:$0xff] %v12957_v21  ;;  %21466 = vst [vmem:[#allocation318_spill] sm:$0xff] %v12959_v31  ;;  %v12986_v31 = vld [vmem:[%s20381_s0 + $0xf8] sm:$0xff] }
 0x260   :  { %1222 = vrot.lane.b32.xlu1 %v12964_v19, %s10962_s23  ;;  %1220 = vrot.lane.b32.xlu0 %v12971_v18, %s10962_s23  ;;  %v12991_v19 = vld [vmem:[%s20381_s0 + $0xf0] sm:$0xff] }
 0x262   :  { %v12975_v14 = vpop.permute.xlu1 %1050  ;;  %v12977_v21 = vpop.permute.xlu0 %1048 }
 0x263   :  { %21469 = vst [vmem:[#allocation321_spill] sm:$0xff] %v12975_v14  ;;  %21470 = vst [vmem:[#allocation322_spill] sm:$0xff] %v12977_v21  ;;  %v13008_v21 = vld [vmem:[%s20381_s0 + $0x128] sm:$0xff] }
 0x264   :  { %1226 = vrot.lane.b32.xlu1 %v12142_v55, %s10962_s23  ;;  %1224 = vrot.lane.b32.xlu0 %v12147_v59, %s10962_s23  ;;  %21475 = vst [vmem:[#allocation327_spill] sm:$0xff] %v13008_v21 }
 0x266   :  { %v12993_v18 = vpop.permute.xlu1 %1054  ;;  %v12995_v14 = vpop.permute.xlu0 %1052 }
 0x267   :  { %21471 = vst [vmem:[#allocation323_spill] sm:$0xff] %v12993_v18  ;;  %21472 = vst [vmem:[#allocation324_spill] sm:$0xff] %v12995_v14  ;;  %v13015_v14 = vld [vmem:[%s20381_s0 + $0x120] sm:$0xff] }
 0x268   :  { %1230 = vrot.lane.b32.xlu1 %v12986_v31, %s10962_s23  ;;  %1228 = vrot.lane.b32.xlu0 %v12991_v19, %s10962_s23  ;;  %21476 = vst [vmem:[#allocation328_spill] sm:$0xff] %v13015_v14 }
 0x26a   :  { %v13001_v55 = vpop.permute.xlu1 %1058  ;;  %v13003_v59 = vpop.permute.xlu0 %1056 }
 0x26b   :  { %21473 = vst [vmem:[#allocation325_spill] sm:$0xff] %v13001_v55  ;;  %21474 = vst [vmem:[#allocation326_spill] sm:$0xff] %v13003_v59  ;;  %v13026_v59 = vld [vmem:[%s20381_s0 + $0x138] sm:$0xff] }
 0x26c   :  { %1234 = vrot.lane.b32.xlu1 %v13008_v21, %s10962_s23  ;;  %1232 = vrot.lane.b32.xlu0 %v13015_v14, %s10962_s23  ;;  %21479 = vst [vmem:[#allocation331_spill] sm:$0xff] %v13026_v59  ;;  %v13033_v21 = vld [vmem:[%s20381_s0 + $0x130] sm:$0xff] }
 0x26d   :  { %21480 = vst [vmem:[#allocation332_spill] sm:$0xff] %v13033_v21 }
 0x26e   :  { %v13019_v18 = vpop.permute.xlu1 %1062  ;;  %v13021_v55 = vpop.permute.xlu0 %1060 }
 0x26f   :  { %21477 = vst [vmem:[#allocation329_spill] sm:$0xff] %v13019_v18  ;;  %21478 = vst [vmem:[#allocation330_spill] sm:$0xff] %v13021_v55  ;;  %v13044_v55 = vld [vmem:[%s20381_s0 + $0x148] sm:$0xff] }
 0x270   :  { %1238 = vrot.lane.b32.xlu1 %v13026_v59, %s10962_s23  ;;  %1236 = vrot.lane.b32.xlu0 %v13033_v21, %s10962_s23  ;;  %21483 = vst [vmem:[#allocation335_spill] sm:$0xff] %v13044_v55  ;;  %v13051_v59 = vld [vmem:[%s20381_s0 + $0x140] sm:$0xff] }
 0x271   :  { %21484 = vst [vmem:[#allocation336_spill] sm:$0xff] %v13051_v59 }
 0x272   :  { %v13037_v14 = vpop.permute.xlu1 %1066  ;;  %v13039_v18 = vpop.permute.xlu0 %1064 }
 0x273   :  { %21481 = vst [vmem:[#allocation333_spill] sm:$0xff] %v13037_v14  ;;  %21482 = vst [vmem:[#allocation334_spill] sm:$0xff] %v13039_v18  ;;  %v13062_v18 = vld [vmem:[%s20381_s0 + $0x158] sm:$0xff] }
 0x274   :  { %1242 = vrot.lane.b32.xlu1 %v13044_v55, %s10962_s23  ;;  %1240 = vrot.lane.b32.xlu0 %v13051_v59, %s10962_s23  ;;  %21487 = vst [vmem:[#allocation339_spill] sm:$0xff] %v13062_v18  ;;  %v13069_v55 = vld [vmem:[%s20381_s0 + $0x150] sm:$0xff] }
 0x275   :  { %21488 = vst [vmem:[#allocation340_spill] sm:$0xff] %v13069_v55 }
 0x276   :  { %v13055_v21 = vpop.permute.xlu1 %1070  ;;  %v13057_v14 = vpop.permute.xlu0 %1068 }
 0x277   :  { %21485 = vst [vmem:[#allocation337_spill] sm:$0xff] %v13055_v21  ;;  %21486 = vst [vmem:[#allocation338_spill] sm:$0xff] %v13057_v14  ;;  %v13080_v14 = vld [vmem:[%s20381_s0 + $0x168] sm:$0xff] }
 0x278   :  { %1246 = vrot.lane.b32.xlu1 %v13062_v18, %s10962_s23  ;;  %1244 = vrot.lane.b32.xlu0 %v13069_v55, %s10962_s23  ;;  %21491 = vst [vmem:[#allocation343_spill] sm:$0xff] %v13080_v14  ;;  %v13087_v18 = vld [vmem:[%s20381_s0 + $0x160] sm:$0xff] }
 0x279   :  { %21492 = vst [vmem:[#allocation344_spill] sm:$0xff] %v13087_v18 }
 0x27a   :  { %v13073_v59 = vpop.permute.xlu1 %1074  ;;  %v13075_v21 = vpop.permute.xlu0 %1072 }
 0x27b   :  { %21489 = vst [vmem:[#allocation341_spill] sm:$0xff] %v13073_v59  ;;  %21490 = vst [vmem:[#allocation342_spill] sm:$0xff] %v13075_v21  ;;  %v13098_v21 = vld [vmem:[%s20381_s0 + $0x178] sm:$0xff] }
 0x27c   :  { %1250 = vrot.lane.b32.xlu1 %v13080_v14, %s10962_s23  ;;  %1248 = vrot.lane.b32.xlu0 %v13087_v18, %s10962_s23  ;;  %21495 = vst [vmem:[#allocation347_spill] sm:$0xff] %v13098_v21  ;;  %v13105_v14 = vld [vmem:[%s20381_s0 + $0x170] sm:$0xff] }
 0x27d   :  { %21496 = vst [vmem:[#allocation348_spill] sm:$0xff] %v13105_v14 }
 0x27e   :  { %v13091_v55 = vpop.permute.xlu1 %1078  ;;  %v13093_v59 = vpop.permute.xlu0 %1076 }
 0x27f   :  { %21493 = vst [vmem:[#allocation345_spill] sm:$0xff] %v13091_v55  ;;  %21494 = vst [vmem:[#allocation346_spill] sm:$0xff] %v13093_v59  ;;  %v13116_v59 = vld [vmem:[%s20381_s0 + $0x188] sm:$0xff] }
 0x280   :  { %1254 = vrot.lane.b32.xlu1 %v13098_v21, %s10962_s23  ;;  %1252 = vrot.lane.b32.xlu0 %v13105_v14, %s10962_s23  ;;  %21499 = vst [vmem:[#allocation351_spill] sm:$0xff] %v13116_v59  ;;  %v13123_v21 = vld [vmem:[%s20381_s0 + $0x180] sm:$0xff] }
 0x281   :  { %21500 = vst [vmem:[#allocation352_spill] sm:$0xff] %v13123_v21 }
 0x282   :  { %v13109_v18 = vpop.permute.xlu1 %1082  ;;  %v13111_v55 = vpop.permute.xlu0 %1080 }
 0x283   :  { %21497 = vst [vmem:[#allocation349_spill] sm:$0xff] %v13109_v18  ;;  %21498 = vst [vmem:[#allocation350_spill] sm:$0xff] %v13111_v55  ;;  %v13134_v55 = vld [vmem:[%s20381_s0 + $0x198] sm:$0xff] }
 0x284   :  { %1258 = vrot.lane.b32.xlu1 %v13116_v59, %s10962_s23  ;;  %1256 = vrot.lane.b32.xlu0 %v13123_v21, %s10962_s23  ;;  %21503 = vst [vmem:[#allocation355_spill] sm:$0xff] %v13134_v55  ;;  %v13141_v59 = vld [vmem:[%s20381_s0 + $0x190] sm:$0xff] }
 0x285   :  { %21504 = vst [vmem:[#allocation356_spill] sm:$0xff] %v13141_v59 }
 0x286   :  { %v13127_v14 = vpop.permute.xlu1 %1086  ;;  %v13129_v18 = vpop.permute.xlu0 %1084 }
 0x287   :  { %21501 = vst [vmem:[#allocation353_spill] sm:$0xff] %v13127_v14  ;;  %21502 = vst [vmem:[#allocation354_spill] sm:$0xff] %v13129_v18  ;;  %v13152_v18 = vld [vmem:[%s20381_s0 + $0x1a8] sm:$0xff] }
 0x288   :  { %1262 = vrot.lane.b32.xlu1 %v13134_v55, %s10962_s23  ;;  %1260 = vrot.lane.b32.xlu0 %v13141_v59, %s10962_s23  ;;  %21507 = vst [vmem:[#allocation359_spill] sm:$0xff] %v13152_v18  ;;  %v13159_v55 = vld [vmem:[%s20381_s0 + $0x1a0] sm:$0xff] }
 0x289   :  { %21508 = vst [vmem:[#allocation360_spill] sm:$0xff] %v13159_v55 }
 0x28a   :  { %v13145_v21 = vpop.permute.xlu1 %1090  ;;  %v13147_v14 = vpop.permute.xlu0 %1088 }
 0x28b   :  { %21505 = vst [vmem:[#allocation357_spill] sm:$0xff] %v13145_v21  ;;  %21506 = vst [vmem:[#allocation358_spill] sm:$0xff] %v13147_v14  ;;  %v13170_v14 = vld [vmem:[%s20381_s0 + $0x1b8] sm:$0xff] }
 0x28c   :  { %1266 = vrot.lane.b32.xlu1 %v13152_v18, %s10962_s23  ;;  %1264 = vrot.lane.b32.xlu0 %v13159_v55, %s10962_s23  ;;  %21511 = vst [vmem:[#allocation363_spill] sm:$0xff] %v13170_v14  ;;  %v13177_v18 = vld [vmem:[%s20381_s0 + $0x1b0] sm:$0xff] }
 0x28d   :  { %21512 = vst [vmem:[#allocation364_spill] sm:$0xff] %v13177_v18 }
 0x28e   :  { %v13163_v59 = vpop.permute.xlu1 %1094  ;;  %v13165_v21 = vpop.permute.xlu0 %1092 }
 0x28f   :  { %21509 = vst [vmem:[#allocation361_spill] sm:$0xff] %v13163_v59  ;;  %21510 = vst [vmem:[#allocation362_spill] sm:$0xff] %v13165_v21  ;;  %v13188_v21 = vld [vmem:[%s20381_s0 + $0x1c8] sm:$0xff] }
 0x290   :  { %1270 = vrot.lane.b32.xlu1 %v13170_v14, %s10962_s23  ;;  %1268 = vrot.lane.b32.xlu0 %v13177_v18, %s10962_s23  ;;  %21515 = vst [vmem:[#allocation367_spill] sm:$0xff] %v13188_v21  ;;  %v13195_v14 = vld [vmem:[%s20381_s0 + $0x1c0] sm:$0xff] }
 0x291   :  { %21516 = vst [vmem:[#allocation368_spill] sm:$0xff] %v13195_v14 }
 0x292   :  { %v13181_v55 = vpop.permute.xlu1 %1098  ;;  %v13183_v59 = vpop.permute.xlu0 %1096 }
 0x293   :  { %21513 = vst [vmem:[#allocation365_spill] sm:$0xff] %v13181_v55  ;;  %21514 = vst [vmem:[#allocation366_spill] sm:$0xff] %v13183_v59  ;;  %v13206_v59 = vld [vmem:[%s20381_s0 + $0x1d8] sm:$0xff] }
 0x294   :  { %1274 = vrot.lane.b32.xlu1 %v13188_v21, %s10962_s23  ;;  %1272 = vrot.lane.b32.xlu0 %v13195_v14, %s10962_s23  ;;  %21519 = vst [vmem:[#allocation371_spill] sm:$0xff] %v13206_v59  ;;  %v13213_v21 = vld [vmem:[%s20381_s0 + $0x1d0] sm:$0xff] }
 0x295   :  { %21520 = vst [vmem:[#allocation372_spill] sm:$0xff] %v13213_v21 }
 0x296   :  { %v13199_v18 = vpop.permute.xlu1 %1102  ;;  %v13201_v55 = vpop.permute.xlu0 %1100 }
 0x297   :  { %21517 = vst [vmem:[#allocation369_spill] sm:$0xff] %v13199_v18  ;;  %21518 = vst [vmem:[#allocation370_spill] sm:$0xff] %v13201_v55  ;;  %v13228_v55 = vld [vmem:[%s20381_s0 + $0x1f8] sm:$0xff] }
 0x298   :  { %1278 = vrot.lane.b32.xlu1 %v13206_v59, %s10962_s23  ;;  %1276 = vrot.lane.b32.xlu0 %v13213_v21, %s10962_s23  ;;  %21523 = vst [vmem:[#allocation375_spill] sm:$0xff] %v13228_v55  ;;  %v13233_v59 = vld [vmem:[%s20381_s0 + $0x1f0] sm:$0xff] }
 0x299   :  { %21524 = vst [vmem:[#allocation376_spill] sm:$0xff] %v13233_v59 }
 0x29a   :  { %v13217_v14 = vpop.permute.xlu1 %1106  ;;  %v13219_v18 = vpop.permute.xlu0 %1104 }
 0x29b   :  { %21521 = vst [vmem:[#allocation373_spill] sm:$0xff] %v13217_v14  ;;  %21522 = vst [vmem:[#allocation374_spill] sm:$0xff] %v13219_v18  ;;  %v21724_v18 = vld [vmem:[#allocation363_spill] sm:$0xff] }
 0x29c   :  { %1282 = vrot.lane.b32.xlu1 %v12264_v22, %s10962_s23  ;;  %1280 = vrot.lane.b32.xlu0 %v12269_v17, %s10962_s23 }
 0x29e   :  { %v13235_v21 = vpop.permute.xlu1 %1110  ;;  %v13237_v14 = vpop.permute.xlu0 %1108 }
 0x29f   :  { %21525 = vst [vmem:[#allocation377_spill] sm:$0xff] %v13235_v21  ;;  %21526 = vst [vmem:[#allocation378_spill] sm:$0xff] %v13237_v14 }
 0x2a0   :  { %1286 = vrot.lane.b32.xlu1 %v13228_v55, %s10962_s23  ;;  %1284 = vrot.lane.b32.xlu0 %v13233_v59, %s10962_s23 }
 0x2a2   :  { %v13243_v22 = vpop.permute.xlu1 %1114  ;;  %v13245_v17 = vpop.permute.xlu0 %1112 }
 0x2a3   :  { %21527 = vst [vmem:[#allocation379_spill] sm:$0xff] %v13243_v22  ;;  %21528 = vst [vmem:[#allocation380_spill] sm:$0xff] %v13245_v17 }
 0x2a4   :  { %1352 = vrot.lane.b32.xlu1 %v21223_v11, %s10963_s14  ;;  %1350 = vrot.lane.b32.xlu0 %v21224_v32, %s10963_s14 }
 0x2a6   :  { %v13251_v21 = vpop.permute.xlu1 %1178  ;;  %v13253_v14 = vpop.permute.xlu0 %1176 }
 0x2a7   :  { %21529 = vst [vmem:[#allocation381_spill] sm:$0xff] %v13251_v21  ;;  %21530 = vst [vmem:[#allocation382_spill] sm:$0xff] %v13253_v14 }
 0x2a8   :  { %1356 = vrot.lane.b32.xlu1 %v21227_v53, %s10963_s14  ;;  %1354 = vrot.lane.b32.xlu0 %v21228_v61, %s10963_s14 }
 0x2aa   :  { %v13259_v22 = vpop.permute.xlu1 %1182  ;;  %v13261_v17 = vpop.permute.xlu0 %1180 }
 0x2ab   :  { %21531 = vst [vmem:[#allocation383_spill] sm:$0xff] %v13259_v22  ;;  %21532 = vst [vmem:[#allocation384_spill] sm:$0xff] %v13261_v17 }
 0x2ac   :  { %1360 = vrot.lane.b32.xlu1 %v21231_v51, %s10963_s14  ;;  %1358 = vrot.lane.b32.xlu0 %v21232_v37, %s10963_s14 }
 0x2ae   :  { %v13267_v32 = vpop.permute.xlu1 %1186  ;;  %v13269_v11 = vpop.permute.xlu0 %1184 }
 0x2af   :  { %21533 = vst [vmem:[#allocation385_spill] sm:$0xff] %v13267_v32  ;;  %21534 = vst [vmem:[#allocation386_spill] sm:$0xff] %v13269_v11 }
 0x2b0   :  { %1364 = vrot.lane.b32.xlu1 %v21235_v46, %s10963_s14  ;;  %1362 = vrot.lane.b32.xlu0 %v21236_v42, %s10963_s14 }
 0x2b2   :  { %v13275_v53 = vpop.permute.xlu1 %1190  ;;  %v13277_v61 = vpop.permute.xlu0 %1188 }
 0x2b3   :  { %21535 = vst [vmem:[#allocation387_spill] sm:$0xff] %v13275_v53  ;;  %21536 = vst [vmem:[#allocation388_spill] sm:$0xff] %v13277_v61  ;;  %v21705_v61 = vld [vmem:[#allocation347_spill] sm:$0xff]  ;;  %v21707_v53 = vld [vmem:[#allocation348_spill] sm:$0xff] }
 0x2b4   :  { %1368 = vrot.lane.b32.xlu1 %v21239_v56, %s10963_s14  ;;  %1366 = vrot.lane.b32.xlu0 %v21240_v47, %s10963_s14 }
 0x2b6   :  { %v13283_v37 = vpop.permute.xlu1 %1194  ;;  %v13285_v51 = vpop.permute.xlu0 %1192 }
 0x2b7   :  { %21537 = vst [vmem:[#allocation389_spill] sm:$0xff] %v13283_v37  ;;  %21538 = vst [vmem:[#allocation390_spill] sm:$0xff] %v13285_v51  ;;  %v21702_v51 = vld [vmem:[#allocation136_spill] sm:$0xff]  ;;  %v21704_v37 = vld [vmem:[#allocation139_spill] sm:$0xff] }
 0x2b8   :  { %1372 = vrot.lane.b32.xlu1 %v21243_v12, %s10963_s14  ;;  %1370 = vrot.lane.b32.xlu0 %v21244_v52, %s10963_s14 }
 0x2ba   :  { %v13291_v42 = vpop.permute.xlu1 %1198  ;;  %v13293_v46 = vpop.permute.xlu0 %1196 }
 0x2bb   :  { %21539 = vst [vmem:[#allocation391_spill] sm:$0xff] %v13291_v42  ;;  %21540 = vst [vmem:[#allocation392_spill] sm:$0xff] %v13293_v46  ;;  %v21695_v46 = vld [vmem:[#allocation339_spill] sm:$0xff]  ;;  %v21697_v42 = vld [vmem:[#allocation340_spill] sm:$0xff] }
 0x2bc   :  { %1376 = vrot.lane.b32.xlu1 %v21247_v27, %s10963_s14  ;;  %1374 = vrot.lane.b32.xlu0 %v21248_v57, %s10963_s14 }
 0x2be   :  { %v13299_v47 = vpop.permute.xlu1 %1202  ;;  %v13301_v56 = vpop.permute.xlu0 %1200 }
 0x2bf   :  { %21541 = vst [vmem:[#allocation393_spill] sm:$0xff] %v13299_v47  ;;  %21542 = vst [vmem:[#allocation394_spill] sm:$0xff] %v13301_v56  ;;  %v21693_v47 = vld [vmem:[#allocation336_spill] sm:$0xff] }
 0x2c0   :  { %1380 = vrot.lane.b32.xlu1 %v21251_v38, %s10963_s14  ;;  %1378 = vrot.lane.b32.xlu0 %v21252_v62, %s10963_s14 }
 0x2c2   :  { %v13307_v52 = vpop.permute.xlu1 %1206  ;;  %v13309_v12 = vpop.permute.xlu0 %1204 }
 0x2c3   :  { %21543 = vst [vmem:[#allocation395_spill] sm:$0xff] %v13307_v52  ;;  %21544 = vst [vmem:[#allocation396_spill] sm:$0xff] %v13309_v12  ;;  %v21686_v12 = vld [vmem:[#allocation123_spill] sm:$0xff] }
 0x2c4   :  { %1384 = vrot.lane.b32.xlu1 %v21255_v63, %s10963_s14  ;;  %1382 = vrot.lane.b32.xlu0 %v21256_v9, %s10963_s14  ;;  %v21687_v52 = vld [vmem:[#allocation331_spill] sm:$0xff] }
 0x2c5   :  { %v13771_v56 = vsel %vm1692_vm4, %v21687_v52, %v21686_v12  ;;  %v21696_v12 = vld [vmem:[#allocation132_spill] sm:$0xff] }
 0x2c6   :  { %v13315_v57 = vpop.permute.xlu1 %1210  ;;  %v13317_v27 = vpop.permute.xlu0 %1208 }
 0x2c7   :  { %21545 = vst [vmem:[#allocation397_spill] sm:$0xff] %v13315_v57  ;;  %21546 = vst [vmem:[#allocation398_spill] sm:$0xff] %v13317_v27  ;;  %v21684_v57 = vld [vmem:[#allocation120_spill] sm:$0xff] }
 0x2c8   :  { %1388 = vrot.lane.b32.xlu1 %v21259_v28, %s10963_s14  ;;  %1386 = vrot.lane.b32.xlu0 %v21260_v43, %s10963_s14  ;;  %v1345_v43 = vrot.slane %v12986_v31, 1  ;;  %v1344_v28 = vrot.slane %v12991_v19, 1 }
 0x2ca   :  { %v13323_v62 = vpop.permute.xlu1 %1214  ;;  %v13325_v38 = vpop.permute.xlu0 %1212 }
 0x2cb   :  { %21547 = vst [vmem:[#allocation399_spill] sm:$0xff] %v13323_v62  ;;  %21548 = vst [vmem:[#allocation400_spill] sm:$0xff] %v13325_v38  ;;  %v21681_v62 = vld [vmem:[#allocation327_spill] sm:$0xff] }
 0x2cc   :  { %1392 = vrot.lane.b32.xlu1 %v21263_v58, %s10963_s14  ;;  %1390 = vrot.lane.b32.xlu0 %v21264_v49, %s10963_s14  ;;  %v1346_v49 = vsel %vm146_vm0, %v1344_v28, %v1345_v43 }
 0x2ce   :  { %v13331_v9 = vpop.permute.xlu1 %1218  ;;  %v13333_v63 = vpop.permute.xlu0 %1216 }
 0x2cf   :  { %21549 = vst [vmem:[#allocation401_spill] sm:$0xff] %v13331_v9  ;;  %21550 = vst [vmem:[#allocation402_spill] sm:$0xff] %v13333_v63  ;;  %v21680_v9 = vld [vmem:[#allocation119_spill] sm:$0xff] }
 0x2d0   :  { %1396 = vrot.lane.b32.xlu1 %v21267_v54, %s10963_s14  ;;  %1394 = vrot.lane.b32.xlu0 %v21268_v13, %s10963_s14 }
 0x2d2   :  { %v13341_v38 = vpop.permute.xlu1 %1222  ;;  %v13343_v58 = vpop.permute.xlu0 %1220 }
 0x2d3   :  { %21551 = vst [vmem:[#allocation403_spill] sm:$0xff] %v13341_v38  ;;  %21552 = vst [vmem:[#allocation404_spill] sm:$0xff] %v13343_v58 }
 0x2d4   :  { %1400 = vrot.lane.b32.xlu1 %v12377_v33, %s10963_s14  ;;  %1398 = vrot.lane.b32.xlu0 %v12389_v4, %s10963_s14 }
 0x2d6   :  { %v13350_v54 = vpop.permute.xlu1 %1226  ;;  %v13352_v63 = vpop.permute.xlu0 %1224 }
 0x2d7   :  { %21553 = vst [vmem:[#allocation405_spill] sm:$0xff] %v13350_v54  ;;  %21554 = vst [vmem:[#allocation406_spill] sm:$0xff] %v13352_v63  ;;  %v21667_v63 = vld [vmem:[#allocation315_spill] sm:$0xff] }
 0x2d8   :  { %1404 = vrot.lane.b32.xlu1 %v1345_v43, %s10963_s14  ;;  %1402 = vrot.lane.b32.xlu0 %v1346_v49, %s10963_s14  ;;  %v21673_v54 = vld [vmem:[#allocation319_spill] sm:$0xff] }
 0x2da   :  { %v13356_v13 = vpop.permute.xlu1 %1230  ;;  %v13358_v38 = vpop.permute.xlu0 %1228 }
 0x2db   :  { %21555 = vst [vmem:[#allocation407_spill] sm:$0xff] %v13356_v13  ;;  %21556 = vst [vmem:[#allocation408_spill] sm:$0xff] %v13358_v38  ;;  %v21663_v38 = vld [vmem:[#allocation311_spill] sm:$0xff]  ;;  %v21665_v13 = vld [vmem:[#allocation312_spill] sm:$0xff] }
 0x2dc   :  { %1408 = vrot.lane.b32.xlu1 %v21277_v44, %s10963_s14  ;;  %1406 = vrot.lane.b32.xlu0 %v21278_v35, %s10963_s14 }
 0x2de   :  { %v13364_v4 = vpop.permute.xlu1 %1234  ;;  %v13366_v33 = vpop.permute.xlu0 %1232 }
 0x2df   :  { %21557 = vst [vmem:[#allocation409_spill] sm:$0xff] %v13364_v4  ;;  %21558 = vst [vmem:[#allocation410_spill] sm:$0xff] %v13366_v33 }
 0x2e0   :  { %1412 = vrot.lane.b32.xlu1 %v21281_v60, %s10963_s14  ;;  %1410 = vrot.lane.b32.xlu0 %v21282_v40, %s10963_s14 }
 0x2e2   :  { %v13372_v43 = vpop.permute.xlu1 %1238  ;;  %v13374_v28 = vpop.permute.xlu0 %1236 }
 0x2e3   :  { %21559 = vst [vmem:[#allocation411_spill] sm:$0xff] %v13372_v43  ;;  %21560 = vst [vmem:[#allocation412_spill] sm:$0xff] %v13374_v28 }
 0x2e4   :  { %1416 = vrot.lane.b32.xlu1 %v21285_v45, %s10963_s14  ;;  %1414 = vrot.lane.b32.xlu0 %v21286_v30, %s10963_s14 }
 0x2e6   :  { %v13380_v35 = vpop.permute.xlu1 %1242  ;;  %v13382_v44 = vpop.permute.xlu0 %1240 }
 0x2e7   :  { %21561 = vst [vmem:[#allocation413_spill] sm:$0xff] %v13380_v35  ;;  %21562 = vst [vmem:[#allocation414_spill] sm:$0xff] %v13382_v44  ;;  %v21649_v44 = vld [vmem:[#allocation299_spill] sm:$0xff]  ;;  %v21651_v35 = vld [vmem:[#allocation300_spill] sm:$0xff] }
 0x2e8   :  { %1420 = vrot.lane.b32.xlu1 %v21289_v50, %s10963_s14  ;;  %1418 = vrot.lane.b32.xlu0 %v21290_v25, %s10963_s14 }
 0x2ea   :  { %v13388_v60 = vpop.permute.xlu1 %1246  ;;  %v13390_v40 = vpop.permute.xlu0 %1244 }
 0x2eb   :  { %21563 = vst [vmem:[#allocation415_spill] sm:$0xff] %v13388_v60  ;;  %21564 = vst [vmem:[#allocation416_spill] sm:$0xff] %v13390_v40  ;;  %v21645_v40 = vld [vmem:[#allocation295_spill] sm:$0xff]  ;;  %v21647_v60 = vld [vmem:[#allocation296_spill] sm:$0xff] }
 0x2ec   :  { %1424 = vrot.lane.b32.xlu1 %v21293_v39, %s10963_s14  ;;  %1422 = vrot.lane.b32.xlu0 %v21294_v20, %s10963_s14 }
 0x2ee   :  { %v13396_v30 = vpop.permute.xlu1 %1250  ;;  %v13398_v45 = vpop.permute.xlu0 %1248 }
 0x2ef   :  { %21565 = vst [vmem:[#allocation417_spill] sm:$0xff] %v13396_v30  ;;  %21566 = vst [vmem:[#allocation418_spill] sm:$0xff] %v13398_v45  ;;  %v21633_v30 = vld [vmem:[#allocation67_spill] sm:$0xff] }
 0x2f0   :  { %1428 = vrot.lane.b32.xlu1 %v21297_v34, %s10963_s14  ;;  %1426 = vrot.lane.b32.xlu0 %v21298_v15, %s10963_s14 }
 0x2f2   :  { %v13404_v25 = vpop.permute.xlu1 %1254  ;;  %v13406_v50 = vpop.permute.xlu0 %1252 }
 0x2f3   :  { %21567 = vst [vmem:[#allocation419_spill] sm:$0xff] %v13404_v25  ;;  %21568 = vst [vmem:[#allocation420_spill] sm:$0xff] %v13406_v50 }
 0x2f4   :  { %1432 = vrot.lane.b32.xlu1 %v21301_v48, %s10963_s14  ;;  %1430 = vrot.lane.b32.xlu0 %v21302_v8, %s10963_s14  ;;  %v21573_v48 = vld [vmem:[#allocation48_spill] sm:$0xff] }
 0x2f6   :  { %v13412_v20 = vpop.permute.xlu1 %1258  ;;  %v13414_v39 = vpop.permute.xlu0 %1256 }
 0x2f7   :  { %21569 = vst [vmem:[#allocation421_spill] sm:$0xff] %v13412_v20  ;;  %21570 = vst [vmem:[#allocation422_spill] sm:$0xff] %v13414_v39  ;;  %v21576_v39 = vld [vmem:[#allocation49_spill] sm:$0xff] }
 0x2f8   :  { %1436 = vrot.lane.b32.xlu1 %v21305_v29, %s10963_s14  ;;  %1434 = vrot.lane.b32.xlu0 %v21306_v2, %s10963_s14  ;;  %v21577_v29 = vld [vmem:[#allocation50_spill] sm:$0xff]  ;;  %v21589_v20 = vld [vmem:[#allocation225_spill] sm:$0xff] }
 0x2fa   :  { %v13420_v15 = vpop.permute.xlu1 %1262  ;;  %v13422_v34 = vpop.permute.xlu0 %1260 }
 0x2fb   :  { %21571 = vst [vmem:[#allocation423_spill] sm:$0xff] %v13420_v15  ;;  %21572 = vst [vmem:[#allocation424_spill] sm:$0xff] %v13422_v34  ;;  %v21580_v34 = vld [vmem:[#allocation51_spill] sm:$0xff] }
 0x2fc   :  { %1440 = vrot.lane.b32.xlu1 %v21309_v24, %s10963_s14  ;;  %1438 = vrot.lane.b32.xlu0 %v21573_v48, %s10963_s14  ;;  %v21581_v24 = vld [vmem:[#allocation52_spill] sm:$0xff] }
 0x2fe   :  { %v13428_v8 = vpop.permute.xlu1 %1266  ;;  %v13430_v49 = vpop.permute.xlu0 %1264 }
 0x2ff   :  { %21574 = vst [vmem:[#allocation48_spill] sm:$0xff] %v13428_v8  ;;  %21575 = vst [vmem:[#allocation425_spill] sm:$0xff] %v13430_v49  ;;  %v21584_v49 = vld [vmem:[#allocation53_spill] sm:$0xff] }
 0x300   :  { %1444 = vrot.lane.b32.xlu1 %v21576_v39, %s10963_s14  ;;  %1442 = vrot.lane.b32.xlu0 %v21577_v29, %s10963_s14  ;;  %v21585_v39 = vld [vmem:[#allocation54_spill] sm:$0xff]  ;;  %v1348_v29 = vrot.slane %v13228_v55, 1  ;;  %v21730_v55 = vld [vmem:[#allocation367_spill] sm:$0xff] }
 0x302   :  { %v13436_v2 = vpop.permute.xlu1 %1270  ;;  %v13438_v15 = vpop.permute.xlu0 %1268 }
 0x303   :  { %21578 = vst [vmem:[#allocation49_spill] sm:$0xff] %v13436_v2  ;;  %21579 = vst [vmem:[#allocation50_spill] sm:$0xff] %v13438_v15  ;;  %v1347_v15 = vrot.slane %v13233_v59, 1  ;;  %v21727_v59 = vld [vmem:[#allocation364_spill] sm:$0xff] }
 0x304   :  { %1448 = vrot.lane.b32.xlu1 %v21580_v34, %s10963_s14  ;;  %1446 = vrot.lane.b32.xlu0 %v21581_v24, %s10963_s14  ;;  %v84_v34 = vld [vmem:[%s20382_s1] sm:$0xff]  ;;  %v85_v24 = vld [vmem:[%s20382_s1 + $0x8] sm:$0xff] }
 0x305   :  { %v10856_v2 = vpack.c.bf16 %v85_v24, %v84_v34  ;;  %v1349_v50 = vsel %vm146_vm0, %v1347_v15, %v1348_v29  ;;  %v86_v34 = vld [vmem:[%s20382_s1 + $0x10] sm:$0xff]  ;;  %v87_v24 = vld [vmem:[%s20382_s1 + $0x18] sm:$0xff] }
 0x306   :  { %v13444_v48 = vpop.permute.xlu1 %1274  ;;  %v13446_v8 = vpop.permute.xlu0 %1272 }
 0x307   :  { %21582 = vst [vmem:[#allocation51_spill] sm:$0xff] %v13444_v48  ;;  %21583 = vst [vmem:[#allocation52_spill] sm:$0xff] %v13446_v8 }
 0x308   :  { %1452 = vrot.lane.b32.xlu1 %v21584_v49, %s10963_s14  ;;  %1450 = vrot.lane.b32.xlu0 %v21585_v39, %s10963_s14  ;;  %v10964_v49 = vmov 0.0|0.0   ;;  %v21588_v39 = vld [vmem:[#allocation222_spill] sm:$0xff] }
 0x309   :  { %10855 = vmatprep.subr.bf16.mxu0 %v10964_v49  ;;  %10877 = vmatprep.subr.bf16.mxu1 %v10964_v49 }
 0x30a   :  { %v13460_v48 = vpop.permute.xlu1 %1278  ;;  %v13462_v8 = vpop.permute.xlu0 %1276  ;;  %10857 = vmatpush3.bf16.msra.mxu0 %v10856_v2  ;;  %10880 = vmatpush3.bf16.msra.mxu1 %v10856_v2  ;;  %v21594_v2 = vld [vmem:[#allocation57_spill] sm:$0xff] }
 0x30b   :  { %21586 = vst [vmem:[#allocation53_spill] sm:$0xff] %v13460_v48  ;;  %21587 = vst [vmem:[#allocation54_spill] sm:$0xff] %v13462_v8  ;;  %10858 = vmatprep.subr.bf16.mxu0 %v10964_v49  ;;  %10878 = vmatprep.subr.bf16.mxu1 %v10964_v49  ;;  %v21610_v48 = vld [vmem:[#allocation73_spill] sm:$0xff] }
 0x30c   :  { %1456 = vrot.lane.b32.xlu1 %v21588_v39, %s10963_s14  ;;  %1454 = vrot.lane.b32.xlu0 %v21589_v20, %s10963_s14  ;;  %v10859_v39 = vpack.c.bf16 %v87_v24, %v86_v34  ;;  %v21599_v34 = vld [vmem:[#allocation64_spill] sm:$0xff] }
 0x30e   :  { %v13469_v25 = vpop.permute.xlu1 %1282  ;;  %v13471_v45 = vpop.permute.xlu0 %1280  ;;  %10860 = vmatpush3.bf16.msra.mxu0 %v10859_v39  ;;  %10881 = vmatpush3.bf16.msra.mxu1 %v10859_v39 }
 0x30f   :  { %21590 = vst [vmem:[#allocation222_spill] sm:$0xff] %v13469_v25  ;;  %21591 = vst [vmem:[#allocation225_spill] sm:$0xff] %v13471_v45  ;;  %v21595_v45 = vld [vmem:[#allocation60_spill] sm:$0xff]  ;;  %v20624_v25 = vmov 0.0  }
 0x310   :  { %1460 = vrot.lane.b32.xlu1 %v1348_v29, %s10963_s14  ;;  %1458 = vrot.lane.b32.xlu0 %v1349_v50, %s10963_s14  ;;  %v88_v50 = vld [vmem:[%s20382_s1 + $0x20] sm:$0xf]  ;;  %s10972_s14 = smov 56  }
 0x311   :  { %10634 = vmatprep.subr.mxu0 %v20624_v25  ;;  %10879 = vmatprep.subr.mxu1 %v20624_v25 }
 0x312   :  { %v13481_v20 = vpop.permute.xlu1 %1286  ;;  %v13483_v15 = vpop.permute.xlu0 %1284  ;;  %10635 = vmatpush3.msk.msra.mxu0 %vm4066_vm2, %v88_v50  ;;  %10636 = vmatprep.mubr.msk.f32.mxu0 %vm10967_vm3, %v20624_v25 }
 0x313   :  { %21592 = vst [vmem:[#allocation426_spill] sm:$0xff] %v13481_v20  ;;  %21593 = vst [vmem:[#allocation427_spill] sm:$0xff] %v13483_v15  ;;  %10882 = vmatpush3.msk.msra.mxu1 %vm4066_vm2, %v88_v50  ;;  %10738 = vmatprep.mubr.msk.f32.mxu1 %vm10967_vm3, %v20624_v25  ;;  %v21603_v15 = vld [vmem:[#allocation68_spill] sm:$0xff]  ;;  %v21606_v25 = vld [vmem:[#allocation69_spill] sm:$0xff]  ;;  %vm10273_vm2 = vcmask 1041409  }
 0x314   :  { %1526 = vrot.lane.b32.xlu1 %v21594_v2, %s10965_s25  ;;  %1524 = vrot.lane.b32.xlu0 %v21595_v45, %s10965_s25  ;;  %v21598_v45 = vld [vmem:[#allocation61_spill] sm:$0xff] }
 0x315   :  { %v21602_v2 = vld [vmem:[#allocation65_spill] sm:$0xff] }
 0x316   :  { %v13494_v29 = vpop.permute.xlu1 %1352  ;;  %v13496_v49 = vpop.permute.xlu0 %1350 }
 0x317   :  { %21596 = vst [vmem:[#allocation57_spill] sm:$0xff] %v13494_v29  ;;  %21597 = vst [vmem:[#allocation60_spill] sm:$0xff] %v13496_v49  ;;  %v21675_v29 = vld [vmem:[#allocation320_spill] sm:$0xff] }
 0x318   :  { %1530 = vrot.lane.b32.xlu1 %v21598_v45, %s10965_s25  ;;  %1528 = vrot.lane.b32.xlu0 %v21599_v34, %s10965_s25  ;;  %v21607_v45 = vld [vmem:[#allocation72_spill] sm:$0xff] }
 0x31a   :  { %v13506_v24 = vpop.permute.xlu1 %1356  ;;  %v13508_v39 = vpop.permute.xlu0 %1354 }
 0x31b   :  { %21600 = vst [vmem:[#allocation61_spill] sm:$0xff] %v13506_v24  ;;  %21601 = vst [vmem:[#allocation64_spill] sm:$0xff] %v13508_v39  ;;  %v21671_v39 = vld [vmem:[#allocation316_spill] sm:$0xff] }
 0x31c   :  { %1534 = vrot.lane.b32.xlu1 %v21602_v2, %s10965_s25  ;;  %1532 = vrot.lane.b32.xlu0 %v21603_v15, %s10965_s25  ;;  %v21611_v2 = vld [vmem:[#allocation76_spill] sm:$0xff] }
 0x31e   :  { %v13514_v50 = vpop.permute.xlu1 %1360  ;;  %v13516_v20 = vpop.permute.xlu0 %1358 }
 0x31f   :  { %21604 = vst [vmem:[#allocation65_spill] sm:$0xff] %v13514_v50  ;;  %21605 = vst [vmem:[#allocation68_spill] sm:$0xff] %v13516_v20  ;;  %v21614_v20 = vld [vmem:[#allocation77_spill] sm:$0xff] }
 0x320   :  { %1538 = vrot.lane.b32.xlu1 %v21606_v25, %s10965_s25  ;;  %1536 = vrot.lane.b32.xlu0 %v21607_v45, %s10965_s25  ;;  %v21615_v25 = vld [vmem:[#allocation80_spill] sm:$0xff] }
 0x322   :  { %v13522_v34 = vpop.permute.xlu1 %1364  ;;  %v13524_v8 = vpop.permute.xlu0 %1362 }
 0x323   :  { %21608 = vst [vmem:[#allocation69_spill] sm:$0xff] %v13522_v34  ;;  %21609 = vst [vmem:[#allocation72_spill] sm:$0xff] %v13524_v8  ;;  %v21618_v8 = vld [vmem:[#allocation81_spill] sm:$0xff] }
 0x324   :  { %1542 = vrot.lane.b32.xlu1 %v21610_v48, %s10965_s25  ;;  %1540 = vrot.lane.b32.xlu0 %v21611_v2, %s10965_s25  ;;  %v21619_v48 = vld [vmem:[#allocation84_spill] sm:$0xff] }
 0x326   :  { %v13530_v15 = vpop.permute.xlu1 %1368  ;;  %v13532_v50 = vpop.permute.xlu0 %1366 }
 0x327   :  { %21612 = vst [vmem:[#allocation73_spill] sm:$0xff] %v13530_v15  ;;  %21613 = vst [vmem:[#allocation76_spill] sm:$0xff] %v13532_v50  ;;  %v21622_v50 = vld [vmem:[#allocation85_spill] sm:$0xff] }
 0x328   :  { %1546 = vrot.lane.b32.xlu1 %v21614_v20, %s10965_s25  ;;  %1544 = vrot.lane.b32.xlu0 %v21615_v25, %s10965_s25  ;;  %v21623_v20 = vld [vmem:[#allocation88_spill] sm:$0xff] }
 0x32a   :  { %v13538_v45 = vpop.permute.xlu1 %1372  ;;  %v13540_v34 = vpop.permute.xlu0 %1370 }
 0x32b   :  { %21616 = vst [vmem:[#allocation77_spill] sm:$0xff] %v13538_v45  ;;  %21617 = vst [vmem:[#allocation80_spill] sm:$0xff] %v13540_v34  ;;  %v21631_v34 = vld [vmem:[#allocation63_spill] sm:$0xff] }
 0x32c   :  { %1550 = vrot.lane.b32.xlu1 %v21618_v8, %s10965_s25  ;;  %1548 = vrot.lane.b32.xlu0 %v21619_v48, %s10965_s25  ;;  %v10947_v8 = vld [vmem:[%s20381_s0 + $0x18] sm:$0xff]  ;;  %v21626_v48 = vld [vmem:[#allocation58_spill] sm:$0xff] }
 0x32e   :  { %v13546_v2 = vpop.permute.xlu1 %1376  ;;  %v13548_v15 = vpop.permute.xlu0 %1374 }
 0x32f   :  { %21620 = vst [vmem:[#allocation81_spill] sm:$0xff] %v13546_v2  ;;  %21621 = vst [vmem:[#allocation84_spill] sm:$0xff] %v13548_v15 }
 0x330   :  { %1554 = vrot.lane.b32.xlu1 %v21622_v50, %s10965_s25  ;;  %1552 = vrot.lane.b32.xlu0 %v21623_v20, %s10965_s25  ;;  %v13567_v50 = vsel %vm1692_vm4, %v10947_v8, %v21626_v48  ;;  %v10948_v20 = vld [vmem:[%s20381_s0 + $0x8] sm:$0xff]  ;;  %v10950_v48 = vld [vmem:[%s20381_s0] sm:$0xff] }
 0x332   :  { %v13554_v25 = vpop.permute.xlu1 %1380  ;;  %v13556_v45 = vpop.permute.xlu0 %1378 }
 0x333   :  { %21624 = vst [vmem:[#allocation85_spill] sm:$0xff] %v13554_v25  ;;  %21625 = vst [vmem:[#allocation88_spill] sm:$0xff] %v13556_v45  ;;  %v21627_v45 = vld [vmem:[#allocation59_spill] sm:$0xff] }
 0x334   :  { %1558 = vrot.lane.b32.xlu1 %v21365_v0, %s10965_s25  ;;  %1556 = vrot.lane.b32.xlu0 %v21366_v41, %s10965_s25  ;;  %v13574_v25 = vsel %vm1692_vm4, %v10948_v20, %v21627_v45  ;;  %v10949_v0 = vld [vmem:[%s20381_s0 + $0x10] sm:$0xff]  ;;  %v21628_v41 = vld [vmem:[#allocation62_spill] sm:$0xff]  ;;  %v13592_v45 = vsel %vm1692_vm4, %v10950_v48, %v21631_v34 }
 0x335   :  { %v13581_v15 = vsel %vm1692_vm4, %v10949_v0, %v21628_v41  ;;  %v21632_v20 = vld [vmem:[#allocation66_spill] sm:$0xff]  ;;  %v13602_v0 = vsel %vm1692_vm4, %v12773_v23, %v21633_v30  ;;  %v21638_v30 = vld [vmem:[#allocation93_spill] sm:$0xff] }
 0x336   :  { %v13583_v2 = vpop.permute.xlu1 %1384  ;;  %v13585_v8 = vpop.permute.xlu0 %1382  ;;  %v13597_v24 = vsel %vm1692_vm4, %v12766_v26, %v21632_v20  ;;  %v21634_v41 = vld [vmem:[#allocation70_spill] sm:$0xff]  ;;  %v21637_v20 = vld [vmem:[#allocation75_spill] sm:$0xff] }
 0x337   :  { %21629 = vst [vmem:[#allocation58_spill] sm:$0xff] %v13583_v2  ;;  %21630 = vst [vmem:[#allocation59_spill] sm:$0xff] %v13585_v8  ;;  %v13607_v8 = vsel %vm1692_vm4, %v12784_v10, %v21634_v41  ;;  %v21635_v2 = vld [vmem:[#allocation71_spill] sm:$0xff]  ;;  %v21636_v48 = vld [vmem:[#allocation74_spill] sm:$0xff]  ;;  %v13622_v23 = vsel %vm1692_vm4, %v12809_v16, %v21637_v20 }
 0x338   :  { %v13612_v34 = vsel %vm1692_vm4, %v12791_v5, %v21635_v2  ;;  %v13617_v26 = vsel %vm1692_vm4, %v12802_v36, %v21636_v48  ;;  %1562 = vrot.lane.b32.xlu1 %v21638_v30, %s10965_s25  ;;  %v21639_v10 = vld [vmem:[#allocation96_spill] sm:$0xff]  ;;  %v21640_v41 = vld [vmem:[#allocation78_spill] sm:$0xff]  ;;  %v21641_v2 = vld [vmem:[#allocation79_spill] sm:$0xff] }
 0x339   :  { %1560 = vrot.lane.b32.xlu0 %v21639_v10, %s10965_s25  ;;  %v13631_v5 = vsel %vm1692_vm4, %v12820_v3, %v21640_v41  ;;  %v13636_v36 = vsel %vm1692_vm4, %v12827_v6, %v21641_v2  ;;  %v21642_v48 = vld [vmem:[#allocation82_spill] sm:$0xff]  ;;  %v21643_v20 = vld [vmem:[#allocation83_spill] sm:$0xff] }
 0x33a   :  { %v13641_v16 = vsel %vm1692_vm4, %v12838_v7, %v21642_v48  ;;  %v13646_v30 = vsel %vm1692_vm4, %v12845_v1, %v21643_v20  ;;  %v21644_v10 = vld [vmem:[#allocation86_spill] sm:$0xff]  ;;  %v21646_v41 = vld [vmem:[#allocation87_spill] sm:$0xff]  ;;  %v13668_v20 = vpop.permute.xlu1 %1388  ;;  %v13670_v28 = vpop.permute.xlu0 %1386 }
 0x33b   :  { %v13651_v3 = vsel %vm1692_vm4, %v21645_v40, %v21644_v10  ;;  %v13656_v6 = vsel %vm1692_vm4, %v21647_v60, %v21646_v41  ;;  %v21648_v2 = vld [vmem:[#allocation90_spill] sm:$0xff]  ;;  %v21650_v48 = vld [vmem:[#allocation91_spill] sm:$0xff]  ;;  %21652 = vst [vmem:[#allocation62_spill] sm:$0xff] %v13668_v20  ;;  %21653 = vst [vmem:[#allocation63_spill] sm:$0xff] %v13670_v28 }
 0x33c   :  { %v13661_v7 = vsel %vm1692_vm4, %v21649_v44, %v21648_v2  ;;  %v13666_v1 = vsel %vm1692_vm4, %v21651_v35, %v21650_v48  ;;  %v21654_v40 = vld [vmem:[#allocation94_spill] sm:$0xff]  ;;  %v21655_v10 = vld [vmem:[#allocation303_spill] sm:$0xff]  ;;  %v21657_v41 = vld [vmem:[#allocation304_spill] sm:$0xff] }
 0x33d   :  { %v13675_v43 = vsel %vm1692_vm4, %v21655_v10, %v21654_v40  ;;  %v21656_v60 = vld [vmem:[#allocation95_spill] sm:$0xff]  ;;  %v21658_v44 = vld [vmem:[#allocation98_spill] sm:$0xff]  ;;  %v21661_v48 = vld [vmem:[#allocation308_spill] sm:$0xff] }
 0x33e   :  { %v13680_v33 = vsel %vm1692_vm4, %v21657_v41, %v21656_v60  ;;  %v21659_v2 = vld [vmem:[#allocation307_spill] sm:$0xff]  ;;  %v21662_v28 = vld [vmem:[#allocation102_spill] sm:$0xff]  ;;  %v21666_v41 = vld [vmem:[#allocation105_spill] sm:$0xff]  ;;  %v13761_v27 = vpop.permute.xlu0 %1390 }
 0x33f   :  { %v13685_v4 = vsel %vm1692_vm4, %v21659_v2, %v21658_v44  ;;  %v21660_v35 = vld [vmem:[#allocation99_spill] sm:$0xff]  ;;  %v13695_v40 = vsel %vm1692_vm4, %v21663_v38, %v21662_v28  ;;  %v13705_v44 = vsel %vm1692_vm4, %v21667_v63, %v21666_v41  ;;  %v21668_v2 = vld [vmem:[#allocation97_spill] sm:$0xff]  ;;  %21683 = vst [vmem:[#allocation67_spill] sm:$0xff] %v13761_v27  ;;  %v21692_v27 = vld [vmem:[#allocation128_spill] sm:$0xff] }
 0x340   :  { %v13690_v20 = vsel %vm1692_vm4, %v21661_v48, %v21660_v35  ;;  %v21664_v10 = vld [vmem:[#allocation103_spill] sm:$0xff]  ;;  %1566 = vrot.lane.b32.xlu1 %v21668_v2, %s10965_s25  ;;  %v21669_v35 = vld [vmem:[#allocation100_spill] sm:$0xff]  ;;  %v21670_v48 = vld [vmem:[#allocation106_spill] sm:$0xff] }
 0x341   :  { %v13700_v60 = vsel %vm1692_vm4, %v21665_v13, %v21664_v10  ;;  %1564 = vrot.lane.b32.xlu0 %v21669_v35, %s10965_s25  ;;  %v13714_v38 = vsel %vm1692_vm4, %v21671_v39, %v21670_v48  ;;  %v21672_v28 = vld [vmem:[#allocation107_spill] sm:$0xff]  ;;  %v21674_v10 = vld [vmem:[#allocation108_spill] sm:$0xff]  ;;  %v10952_v39 = vld [vmem:[%s20381_s0 + $0x100] sm:$0xff] }
 0x342   :  { %v13719_v13 = vsel %vm1692_vm4, %v21673_v54, %v21672_v28  ;;  %v13724_v63 = vsel %vm1692_vm4, %v21675_v29, %v21674_v10  ;;  %v10951_v41 = vld [vmem:[%s20381_s0 + $0x108] sm:$0xff]  ;;  %v21677_v48 = vld [vmem:[#allocation112_spill] sm:$0xff]  ;;  %v10953_v29 = vld [vmem:[%s20381_s0 + $0x118] sm:$0xff]  ;;  %v13836_v17 = vpop.permute.xlu0 %1394 }
 0x343   :  { %v21676_v2 = vld [vmem:[#allocation111_spill] sm:$0xff]  ;;  %v13738_v54 = vsel %vm1692_vm4, %v10952_v39, %v21677_v48  ;;  %v13757_v39 = vsel %vm1692_vm4, %v21681_v62, %v21680_v9  ;;  %v13759_v48 = vpop.permute.xlu1 %1392  ;;  %21713 = vst [vmem:[#allocation71_spill] sm:$0xff] %v13836_v17 }
 0x344   :  { %v13731_v35 = vsel %vm1692_vm4, %v10951_v41, %v21676_v2  ;;  %v21678_v28 = vld [vmem:[#allocation115_spill] sm:$0xff]  ;;  %v10954_v41 = vld [vmem:[%s20381_s0 + $0x110] sm:$0xff]  ;;  %21682 = vst [vmem:[#allocation66_spill] sm:$0xff] %v13759_v48 }
 0x345   :  { %v13745_v10 = vsel %vm1692_vm4, %v10953_v29, %v21678_v28  ;;  %v21679_v2 = vld [vmem:[#allocation116_spill] sm:$0xff]  ;;  %v21690_v62 = vld [vmem:[#allocation127_spill] sm:$0xff] }
 0x346   :  { %v13752_v58 = vsel %vm1692_vm4, %v10954_v41, %v21679_v2  ;;  %v21685_v29 = vld [vmem:[#allocation328_spill] sm:$0xff]  ;;  %v21691_v9 = vld [vmem:[#allocation335_spill] sm:$0xff] }
 0x347   :  { %v13766_v28 = vsel %vm1692_vm4, %v21685_v29, %v21684_v57  ;;  %v21688_v41 = vld [vmem:[#allocation124_spill] sm:$0xff]  ;;  %v13781_v48 = vsel %vm1692_vm4, %v21691_v9, %v21690_v62  ;;  %v13786_v57 = vsel %vm1692_vm4, %v21693_v47, %v21692_v27  ;;  %v21694_v29 = vld [vmem:[#allocation131_spill] sm:$0xff] }
 0x348   :  { %v21689_v2 = vld [vmem:[#allocation332_spill] sm:$0xff]  ;;  %v13791_v52 = vsel %vm1692_vm4, %v21695_v46, %v21694_v29  ;;  %v21700_v9 = vld [vmem:[#allocation135_spill] sm:$0xff] }
 0x349   :  { %v13776_v49 = vsel %vm1692_vm4, %v21689_v2, %v21688_v41  ;;  %v13796_v41 = vsel %vm1692_vm4, %v21697_v42, %v21696_v12  ;;  %v21698_v2 = vld [vmem:[#allocation101_spill] sm:$0xff]  ;;  %v21699_v62 = vld [vmem:[#allocation104_spill] sm:$0xff]  ;;  %v21701_v47 = vld [vmem:[#allocation343_spill] sm:$0xff]  ;;  %v1519_v42 = vrot.slane %v12986_v31, 2  ;;  %v1518_v12 = vrot.slane %v12991_v19, 2  ;;  %v13834_v19 = vpop.permute.xlu1 %1396 }
 0x34a   :  { %1570 = vrot.lane.b32.xlu1 %v21698_v2, %s10965_s25  ;;  %1568 = vrot.lane.b32.xlu0 %v21699_v62, %s10965_s25  ;;  %v13805_v27 = vsel %vm1692_vm4, %v21701_v47, %v21700_v9  ;;  %v21703_v46 = vld [vmem:[#allocation344_spill] sm:$0xff]  ;;  %v13817_v2 = vsel %vm1692_vm4, %v21705_v61, %v21704_v37  ;;  %v21708_v9 = vld [vmem:[#allocation143_spill] sm:$0xff]  ;;  %21712 = vst [vmem:[#allocation70_spill] sm:$0xff] %v13834_v19 }
 0x34b   :  { %v13810_v29 = vsel %vm1692_vm4, %v21703_v46, %v21702_v51  ;;  %v21706_v62 = vld [vmem:[#allocation140_spill] sm:$0xff]  ;;  %v21709_v47 = vld [vmem:[#allocation351_spill] sm:$0xff] }
 0x34c   :  { %v13822_v11 = vsel %vm1692_vm4, %v21707_v53, %v21706_v62  ;;  %v13827_v32 = vsel %vm1692_vm4, %v21709_v47, %v21708_v9  ;;  %v21710_v51 = vld [vmem:[#allocation144_spill] sm:$0xff]  ;;  %v21714_v61 = vld [vmem:[#allocation147_spill] sm:$0xff] }
 0x34d   :  { %v21711_v46 = vld [vmem:[#allocation352_spill] sm:$0xff]  ;;  %v21715_v37 = vld [vmem:[#allocation355_spill] sm:$0xff] }
 0x34e   :  { %v13832_v31 = vsel %vm1692_vm4, %v21711_v46, %v21710_v51  ;;  %v13841_v22 = vsel %vm1692_vm4, %v21715_v37, %v21714_v61  ;;  %v21716_v53 = vld [vmem:[#allocation148_spill] sm:$0xff]  ;;  %v21718_v9 = vld [vmem:[#allocation151_spill] sm:$0xff] }
 0x34f   :  { %v21717_v62 = vld [vmem:[#allocation356_spill] sm:$0xff]  ;;  %v21719_v47 = vld [vmem:[#allocation359_spill] sm:$0xff] }
 0x350   :  { %v13846_v14 = vsel %vm1692_vm4, %v21717_v62, %v21716_v53  ;;  %v13851_v21 = vsel %vm1692_vm4, %v21719_v47, %v21718_v9  ;;  %v21720_v51 = vld [vmem:[#allocation152_spill] sm:$0xff]  ;;  %v21723_v17 = vld [vmem:[#allocation155_spill] sm:$0xff]  ;;  %v21729_v62 = vld [vmem:[#allocation158_spill] sm:$0xff] }
 0x351   :  { %v21721_v46 = vld [vmem:[#allocation360_spill] sm:$0xff]  ;;  %v13861_v61 = vsel %vm1692_vm4, %v21724_v18, %v21723_v17  ;;  %v13871_v9 = vsel %vm1692_vm4, %v21730_v55, %v21729_v62  ;;  %v1520_v62 = vsel %vm399_vm1, %v1518_v12, %v1519_v42  ;;  %v13913_v12 = vpop.permute.xlu1 %1400 }
 0x352   :  { %v13856_v19 = vsel %vm1692_vm4, %v21721_v46, %v21720_v51  ;;  %21725 = vst [vmem:[#allocation75_spill] sm:$0xff] %v13861_v61  ;;  %v21726_v37 = vld [vmem:[#allocation156_spill] sm:$0xff]  ;;  %21731 = vst [vmem:[#allocation96_spill] sm:$0xff] %v13871_v9  ;;  %v21733_v51 = vld [vmem:[#allocation251_spill] sm:$0xff] }
 0x353   :  { %21722 = vst [vmem:[#allocation74_spill] sm:$0xff] %v13856_v19  ;;  %v13866_v53 = vsel %vm1692_vm4, %v21727_v59, %v21726_v37  ;;  %v21732_v47 = vld [vmem:[#allocation248_spill] sm:$0xff]  ;;  %1572 = vrot.lane.b32.xlu0 %v21733_v51, %s10965_s25  ;;  %v21734_v46 = vld [vmem:[#allocation159_spill] sm:$0xff]  ;;  %v21738_v37 = vld [vmem:[#allocation161_spill] sm:$0xff] }
 0x354   :  { %21728 = vst [vmem:[#allocation93_spill] sm:$0xff] %v13866_v53  ;;  %1574 = vrot.lane.b32.xlu1 %v21732_v47, %s10965_s25  ;;  %v21735_v19 = vld [vmem:[#allocation368_spill] sm:$0xff]  ;;  %v21737_v61 = vld [vmem:[#allocation371_spill] sm:$0xff]  ;;  %v21740_v47 = vld [vmem:[#allocation162_spill] sm:$0xff] }
 0x355   :  { %v13880_v18 = vsel %vm1692_vm4, %v21735_v19, %v21734_v46  ;;  %v21736_v17 = vld [vmem:[#allocation160_spill] sm:$0xff]  ;;  %v13896_v51 = vsel %vm1749_vm5, %v13574_v25, %v21740_v47  ;;  %v21741_v9 = vld [vmem:[#allocation163_spill] sm:$0xff]  ;;  %21744 = vst [vmem:[#allocation78_spill] sm:$0xff] %v13913_v12  ;;  %v21746_v25 = vld [vmem:[#allocation166_spill] sm:$0xff] }
 0x356   :  { %v13885_v59 = vsel %vm1692_vm4, %v21737_v61, %v21736_v17  ;;  %v21739_v53 = vld [vmem:[#allocation372_spill] sm:$0xff]  ;;  %v13901_v19 = vsel %vm1749_vm5, %v13592_v45, %v21741_v9  ;;  %v21743_v17 = vld [vmem:[#allocation165_spill] sm:$0xff]  ;;  %v13920_v47 = vsel %vm1749_vm5, %v13597_v24, %v21746_v25  ;;  %v21747_v45 = vld [vmem:[#allocation167_spill] sm:$0xff] }
 0x357   :  { %v13890_v55 = vsel %vm1692_vm4, %v21739_v53, %v21738_v37  ;;  %v21742_v46 = vld [vmem:[#allocation164_spill] sm:$0xff]  ;;  %v13911_v53 = vsel %vm1749_vm5, %v13581_v15, %v21743_v17  ;;  %v13915_v37 = vpop.permute.xlu0 %1398  ;;  %v13925_v9 = vsel %vm1749_vm5, %v13602_v0, %v21747_v45  ;;  %v21749_v15 = vld [vmem:[#allocation169_spill] sm:$0xff]  ;;  %v21751_v25 = vld [vmem:[#allocation171_spill] sm:$0xff]  ;;  %1576 = vrot.lane.b32.xlu0 %v1520_v62, %s10965_s25  ;;  %vm10277_vm4 = vcmask 1043459  }
 0x358   :  { %v13906_v61 = vsel %vm1749_vm5, %v13567_v50, %v21742_v46  ;;  %21745 = vst [vmem:[#allocation79_spill] sm:$0xff] %v13915_v37  ;;  %v21748_v50 = vld [vmem:[#allocation168_spill] sm:$0xff]  ;;  %v13935_v17 = vsel %vm1749_vm5, %v13612_v34, %v21749_v15  ;;  %v21750_v37 = vld [vmem:[#allocation170_spill] sm:$0xff]  ;;  %v13945_v0 = vsel %vm1749_vm5, %v13622_v23, %v21751_v25  ;;  %1578 = vrot.lane.b32.xlu1 %v1519_v42, %s10965_s25  ;;  %v21753_v34 = vld [vmem:[#allocation173_spill] sm:$0xff] }
 0x359   :  { %v13930_v46 = vsel %vm1749_vm5, %v13607_v8, %v21748_v50  ;;  %v13940_v24 = vsel %vm1749_vm5, %v13617_v26, %v21750_v37  ;;  %v21752_v45 = vld [vmem:[#allocation172_spill] sm:$0xff]  ;;  %v13957_v50 = vsel %vm1749_vm5, %v13636_v36, %v21753_v34  ;;  %v21754_v26 = vld [vmem:[#allocation174_spill] sm:$0xff]  ;;  %v21755_v23 = vld [vmem:[#allocation175_spill] sm:$0xff] }
 0x35a   :  { %v13950_v8 = vsel %vm1749_vm5, %v13631_v5, %v21752_v45  ;;  %v13962_v37 = vsel %vm1749_vm5, %v13641_v16, %v21754_v26  ;;  %v13967_v15 = vsel %vm1749_vm5, %v13646_v30, %v21755_v23  ;;  %v21756_v5 = vld [vmem:[#allocation176_spill] sm:$0xff]  ;;  %v21757_v62 = vld [vmem:[#allocation177_spill] sm:$0xff]  ;;  %v21758_v25 = vld [vmem:[#allocation178_spill] sm:$0xff]  ;;  %v13994_v26 = vpop.permute.xlu1 %1404 }
 0x35b   :  { %v13972_v42 = vsel %vm1749_vm5, %v13651_v3, %v21756_v5  ;;  %v13977_v36 = vsel %vm1749_vm5, %v13656_v6, %v21757_v62  ;;  %v13982_v16 = vsel %vm1749_vm5, %v13661_v7, %v21758_v25  ;;  %v21759_v45 = vld [vmem:[#allocation179_spill] sm:$0xff]  ;;  %v21760_v34 = vld [vmem:[#allocation180_spill] sm:$0xff]  ;;  %21761 = vst [vmem:[#allocation82_spill] sm:$0xff] %v13994_v26  ;;  %v13996_v23 = vpop.permute.xlu0 %1402  ;;  %v21763_v6 = vld [vmem:[#allocation181_spill] sm:$0xff] }
 0x35c   :  { %v13987_v30 = vsel %vm1749_vm5, %v13666_v1, %v21759_v45  ;;  %v13992_v3 = vsel %vm1749_vm5, %v13675_v43, %v21760_v34  ;;  %21762 = vst [vmem:[#allocation83_spill] sm:$0xff] %v13996_v23  ;;  %v14001_v5 = vsel %vm1749_vm5, %v13680_v33, %v21763_v6  ;;  %v21764_v7 = vld [vmem:[#allocation182_spill] sm:$0xff]  ;;  %v21765_v1 = vld [vmem:[#allocation183_spill] sm:$0xff]  ;;  %v21766_v43 = vld [vmem:[#allocation184_spill] sm:$0xff] }
 0x35d   :  { %v14006_v62 = vsel %vm1749_vm5, %v13685_v4, %v21764_v7  ;;  %v14011_v25 = vsel %vm1749_vm5, %v13690_v20, %v21765_v1  ;;  %v14016_v45 = vsel %vm1749_vm5, %v13695_v40, %v21766_v43  ;;  %v21767_v34 = vld [vmem:[#allocation185_spill] sm:$0xff]  ;;  %v21769_v7 = vld [vmem:[#allocation186_spill] sm:$0xff]  ;;  %v21772_v43 = vld [vmem:[#allocation187_spill] sm:$0xff] }
 0x35e   :  { %v14021_v33 = vsel %vm1749_vm5, %v13700_v60, %v21767_v34  ;;  %v21768_v6 = vld [vmem:[#allocation25_spill] sm:$0xff]  ;;  %v14031_v20 = vsel %vm1749_vm5, %v13714_v38, %v21769_v7  ;;  %v21770_v1 = vld [vmem:[#allocation110_spill] sm:$0xff]  ;;  %v14040_v60 = vsel %vm1749_vm5, %v13719_v13, %v21772_v43  ;;  %v21773_v34 = vld [vmem:[#allocation188_spill] sm:$0xff] }
 0x35f   :  { %v14026_v4 = vsel %vm1749_vm5, %v13705_v44, %v21768_v6  ;;  %1582 = vrot.lane.b32.xlu1 %v21770_v1, %s10965_s25  ;;  %v21771_v40 = vld [vmem:[#allocation113_spill] sm:$0xff]  ;;  %v14045_v44 = vsel %vm1749_vm5, %v13724_v63, %v21773_v34  ;;  %v21775_v7 = vld [vmem:[#allocation190_spill] sm:$0xff]  ;;  %v21777_v43 = vld [vmem:[#allocation192_spill] sm:$0xff]  ;;  %v14079_v23 = vpop.permute.xlu0 %1406 }
 0x360   :  { %1580 = vrot.lane.b32.xlu0 %v21771_v40, %s10965_s25  ;;  %v21774_v6 = vld [vmem:[#allocation189_spill] sm:$0xff]  ;;  %v14055_v1 = vsel %vm1749_vm5, %v13738_v54, %v21775_v7  ;;  %v21776_v40 = vld [vmem:[#allocation191_spill] sm:$0xff]  ;;  %v14065_v63 = vsel %vm1749_vm5, %v13752_v58, %v21777_v43  ;;  %v14077_v7 = vpop.permute.xlu1 %1408  ;;  %21781 = vst [vmem:[#allocation295_spill] sm:$0xff] %v14079_v23  ;;  %v21783_v58 = vld [vmem:[#allocation196_spill] sm:$0xff] }
 0x361   :  { %v14050_v38 = vsel %vm1749_vm5, %v13731_v35, %v21774_v6  ;;  %v14060_v13 = vsel %vm1749_vm5, %v13745_v10, %v21776_v40  ;;  %v21778_v34 = vld [vmem:[#allocation193_spill] sm:$0xff]  ;;  %v21779_v6 = vld [vmem:[#allocation194_spill] sm:$0xff]  ;;  %21780 = vst [vmem:[#allocation86_spill] sm:$0xff] %v14077_v7  ;;  %v21782_v10 = vld [vmem:[#allocation195_spill] sm:$0xff]  ;;  %v14089_v43 = vsel %vm1749_vm5, %v13776_v49, %v21783_v58 }
 0x362   :  { %v14070_v35 = vsel %vm1749_vm5, %v13757_v39, %v21778_v34  ;;  %v14075_v54 = vsel %vm1749_vm5, %v13766_v28, %v21779_v6  ;;  %v14084_v40 = vsel %vm1749_vm5, %v13771_v56, %v21782_v10  ;;  %v21784_v39 = vld [vmem:[#allocation197_spill] sm:$0xff]  ;;  %v21785_v28 = vld [vmem:[#allocation198_spill] sm:$0xff]  ;;  %v21786_v23 = vld [vmem:[#allocation199_spill] sm:$0xff] }
 0x363   :  { %v14094_v34 = vsel %vm1749_vm5, %v13781_v48, %v21784_v39  ;;  %v14099_v6 = vsel %vm1749_vm5, %v13786_v57, %v21785_v28  ;;  %v14104_v56 = vsel %vm1749_vm5, %v13791_v52, %v21786_v23  ;;  %v21787_v10 = vld [vmem:[#allocation200_spill] sm:$0xff]  ;;  %v21788_v58 = vld [vmem:[#allocation201_spill] sm:$0xff]  ;;  %v21789_v39 = vld [vmem:[#allocation114_spill] sm:$0xff]  ;;  %v14162_v7 = vpop.permute.xlu0 %1410 }
 0x364   :  { %v14109_v49 = vsel %vm1749_vm5, %v13796_v41, %v21787_v10  ;;  %v14114_v48 = vsel %vm1749_vm5, %v13805_v27, %v21788_v58  ;;  %1586 = vrot.lane.b32.xlu1 %v21789_v39, %s10965_s25  ;;  %v21790_v57 = vld [vmem:[#allocation117_spill] sm:$0xff]  ;;  %v21791_v28 = vld [vmem:[#allocation202_spill] sm:$0xff]  ;;  %v21792_v23 = vld [vmem:[#allocation203_spill] sm:$0xff]  ;;  %21801 = vst [vmem:[#allocation90_spill] sm:$0xff] %v14162_v7 }
 0x365   :  { %1584 = vrot.lane.b32.xlu0 %v21790_v57, %s10965_s25  ;;  %v14123_v52 = vsel %vm1749_vm5, %v13810_v29, %v21791_v28  ;;  %v14128_v41 = vsel %vm1749_vm5, %v13817_v2, %v21792_v23  ;;  %v21793_v10 = vld [vmem:[#allocation204_spill] sm:$0xff]  ;;  %v21794_v58 = vld [vmem:[#allocation205_spill] sm:$0xff]  ;;  %v21795_v57 = vld [vmem:[#allocation206_spill] sm:$0xff] }
 0x366   :  { %v14133_v27 = vsel %vm1749_vm5, %v13822_v11, %v21793_v10  ;;  %v14138_v39 = vsel %vm1749_vm5, %v13827_v32, %v21794_v58  ;;  %v14143_v29 = vsel %vm1749_vm5, %v13832_v31, %v21795_v57  ;;  %v21796_v28 = vld [vmem:[#allocation207_spill] sm:$0xff]  ;;  %v21797_v23 = vld [vmem:[#allocation208_spill] sm:$0xff]  ;;  %v21799_v10 = vld [vmem:[#allocation209_spill] sm:$0xff]  ;;  %v14160_v58 = vpop.permute.xlu1 %1412 }
 0x367   :  { %v14148_v2 = vsel %vm1749_vm5, %v13841_v22, %v21796_v28  ;;  %v14153_v11 = vsel %vm1749_vm5, %v13846_v14, %v21797_v23  ;;  %v14158_v32 = vsel %vm1749_vm5, %v13851_v21, %v21799_v10  ;;  %21800 = vst [vmem:[#allocation296_spill] sm:$0xff] %v14160_v58  ;;  %v21802_v31 = vld [vmem:[#allocation210_spill] sm:$0xff]  ;;  %v21804_v22 = vld [vmem:[#allocation211_spill] sm:$0xff]  ;;  %v21806_v14 = vld [vmem:[#allocation212_spill] sm:$0xff] }
 0x368   :  { %21798 = vst [vmem:[#allocation87_spill] sm:$0xff] %v14153_v11  ;;  %v21803_v57 = vld [vmem:[#allocation74_spill] sm:$0xff]  ;;  %v21805_v28 = vld [vmem:[#allocation75_spill] sm:$0xff]  ;;  %v21807_v23 = vld [vmem:[#allocation93_spill] sm:$0xff] }
 0x369   :  { %v14167_v26 = vsel %vm1749_vm5, %v21803_v57, %v21802_v31  ;;  %v14172_v12 = vsel %vm1749_vm5, %v21805_v28, %v21804_v22  ;;  %v14177_v11 = vsel %vm1749_vm5, %v21807_v23, %v21806_v14  ;;  %v21808_v21 = vld [vmem:[#allocation213_spill] sm:$0xff]  ;;  %v21809_v10 = vld [vmem:[#allocation96_spill] sm:$0xff]  ;;  %v21810_v7 = vld [vmem:[#allocation214_spill] sm:$0xff] }
 0x36a   :  { %v14182_v58 = vsel %vm1749_vm5, %v21809_v10, %v21808_v21  ;;  %v14187_v31 = vsel %vm1749_vm5, %v13880_v18, %v21810_v7  ;;  %v21811_v57 = vld [vmem:[#allocation215_spill] sm:$0xff]  ;;  %v21812_v28 = vld [vmem:[#allocation216_spill] sm:$0xff]  ;;  %v21813_v23 = vld [vmem:[#allocation118_spill] sm:$0xff] }
 0x36b   :  { %v14192_v22 = vsel %vm1749_vm5, %v13885_v59, %v21811_v57  ;;  %v14197_v14 = vsel %vm1749_vm5, %v13890_v55, %v21812_v28  ;;  %1590 = vrot.lane.b32.xlu1 %v21813_v23, %s10965_s25  ;;  %v21814_v21 = vld [vmem:[#allocation121_spill] sm:$0xff]  ;;  %v21815_v10 = vld [vmem:[#allocation2_spill] sm:$0xff]  ;;  %v21816_v7 = vld [vmem:[#allocation3_spill] sm:$0xff] }
 0x36c   :  { %1588 = vrot.lane.b32.xlu0 %v21814_v21, %s10965_s25  ;;  %v14206_v18 = vsel %vm1806_vm6, %v13896_v51, %v21815_v10  ;;  %v14211_v59 = vsel %vm1806_vm6, %v13901_v19, %v21816_v7  ;;  %v21817_v57 = vld [vmem:[#allocation4_spill] sm:$0xff]  ;;  %v21818_v28 = vld [vmem:[#allocation5_spill] sm:$0xff]  ;;  %v21820_v21 = vld [vmem:[#allocation6_spill] sm:$0xff] }
 0x36d   :  { %v14216_v55 = vsel %vm1806_vm6, %v13906_v61, %v21817_v57  ;;  %v14221_v23 = vsel %vm1806_vm6, %v13911_v53, %v21818_v28  ;;  %v14226_v51 = vsel %vm1806_vm6, %v13920_v47, %v21820_v21  ;;  %v21821_v10 = vld [vmem:[#allocation7_spill] sm:$0xff]  ;;  %v21822_v7 = vld [vmem:[#allocation8_spill] sm:$0xff]  ;;  %v21823_v57 = vld [vmem:[#allocation9_spill] sm:$0xff]  ;;  %v14243_v28 = vpop.permute.xlu1 %1416 }
 0x36e   :  { %21819 = vst [vmem:[#allocation299_spill] sm:$0xff] %v14221_v23  ;;  %v14231_v19 = vsel %vm1806_vm6, %v13925_v9, %v21821_v10  ;;  %v14236_v61 = vsel %vm1806_vm6, %v13930_v46, %v21822_v7  ;;  %v14241_v53 = vsel %vm1806_vm6, %v13935_v17, %v21823_v57  ;;  %21824 = vst [vmem:[#allocation91_spill] sm:$0xff] %v14243_v28  ;;  %v14245_v23 = vpop.permute.xlu0 %1414  ;;  %v21826_v47 = vld [vmem:[#allocation10_spill] sm:$0xff]  ;;  %v21827_v9 = vld [vmem:[#allocation11_spill] sm:$0xff] }
 0x36f   :  { %21825 = vst [vmem:[#allocation300_spill] sm:$0xff] %v14245_v23  ;;  %v14250_v21 = vsel %vm1806_vm6, %v13940_v24, %v21826_v47  ;;  %v14255_v10 = vsel %vm1806_vm6, %v13945_v0, %v21827_v9  ;;  %v21828_v46 = vld [vmem:[#allocation12_spill] sm:$0xff]  ;;  %v21829_v17 = vld [vmem:[#allocation13_spill] sm:$0xff]  ;;  %v21830_v23 = vld [vmem:[#allocation14_spill] sm:$0xff] }
 0x370   :  { %v14260_v7 = vsel %vm1806_vm6, %v13950_v8, %v21828_v46  ;;  %v14265_v57 = vsel %vm1806_vm6, %v13957_v50, %v21829_v17  ;;  %v14270_v24 = vsel %vm1806_vm6, %v13962_v37, %v21830_v23  ;;  %v21831_v47 = vld [vmem:[#allocation15_spill] sm:$0xff]  ;;  %v21832_v9 = vld [vmem:[#allocation16_spill] sm:$0xff]  ;;  %v21833_v46 = vld [vmem:[#allocation122_spill] sm:$0xff] }
 0x371   :  { %v14275_v0 = vsel %vm1806_vm6, %v13967_v15, %v21831_v47  ;;  %v14280_v8 = vsel %vm1806_vm6, %v13972_v42, %v21832_v9  ;;  %1594 = vrot.lane.b32.xlu1 %v21833_v46, %s10965_s25  ;;  %v21834_v50 = vld [vmem:[#allocation125_spill] sm:$0xff]  ;;  %v21836_v23 = vld [vmem:[#allocation18_spill] sm:$0xff]  ;;  %v21837_v47 = vld [vmem:[#allocation19_spill] sm:$0xff] }
 0x372   :  { %1592 = vrot.lane.b32.xlu0 %v21834_v50, %s10965_s25  ;;  %v21835_v17 = vld [vmem:[#allocation17_spill] sm:$0xff]  ;;  %v14294_v15 = vsel %vm1806_vm6, %v13982_v16, %v21836_v23  ;;  %v14299_v42 = vsel %vm1806_vm6, %v13987_v30, %v21837_v47  ;;  %v21838_v9 = vld [vmem:[#allocation20_spill] sm:$0xff]  ;;  %v21841_v23 = vld [vmem:[#allocation23_spill] sm:$0xff]  ;;  %v14328_v28 = vpop.permute.xlu0 %1418 }
 0x373   :  { %v14289_v37 = vsel %vm1806_vm6, %v13977_v36, %v21835_v17  ;;  %v14304_v46 = vsel %vm1806_vm6, %v13992_v3, %v21838_v9  ;;  %v21839_v50 = vld [vmem:[#allocation21_spill] sm:$0xff]  ;;  %v21840_v17 = vld [vmem:[#allocation22_spill] sm:$0xff]  ;;  %v14319_v30 = vsel %vm1806_vm6, %v14011_v25, %v21841_v23  ;;  %v21842_v47 = vld [vmem:[#allocation24_spill] sm:$0xff]  ;;  %v14326_v9 = vpop.permute.xlu1 %1420  ;;  %21844 = vst [vmem:[#allocation303_spill] sm:$0xff] %v14328_v28 }
 0x374   :  { %v14309_v36 = vsel %vm1806_vm6, %v14001_v5, %v21839_v50  ;;  %v14314_v16 = vsel %vm1806_vm6, %v14006_v62, %v21840_v17  ;;  %v14324_v3 = vsel %vm1806_vm6, %v14016_v45, %v21842_v47  ;;  %21843 = vst [vmem:[#allocation94_spill] sm:$0xff] %v14326_v9  ;;  %v21845_v5 = vld [vmem:[#allocation26_spill] sm:$0xff]  ;;  %v21846_v62 = vld [vmem:[#allocation27_spill] sm:$0xff]  ;;  %v21847_v25 = vld [vmem:[#allocation28_spill] sm:$0xff] }
 0x375   :  { %v14333_v50 = vsel %vm1806_vm6, %v14021_v33, %v21845_v5  ;;  %v14338_v17 = vsel %vm1806_vm6, %v14026_v4, %v21846_v62  ;;  %v14343_v23 = vsel %vm1806_vm6, %v14031_v20, %v21847_v25  ;;  %v21848_v45 = vld [vmem:[#allocation217_spill] sm:$0xff]  ;;  %v21849_v28 = vld [vmem:[#allocation218_spill] sm:$0xff] }
 0x376   :  { %v14348_v47 = vsel %vm1806_vm6, %v14040_v60, %v21848_v45  ;;  %v14353_v33 = vsel %vm1806_vm6, %v14045_v44, %v21849_v28  ;;  %v21850_v5 = vld [vmem:[#allocation29_spill] sm:$0xff]  ;;  %v21851_v62 = vld [vmem:[#allocation30_spill] sm:$0xff]  ;;  %v21854_v45 = vld [vmem:[#allocation31_spill] sm:$0xff]  ;;  %v14411_v9 = vpop.permute.xlu0 %1422 }
 0x377   :  { %v14358_v4 = vsel %vm1806_vm6, %v14050_v38, %v21850_v5  ;;  %v14363_v20 = vsel %vm1806_vm6, %v14055_v1, %v21851_v62  ;;  %v21852_v25 = vld [vmem:[#allocation126_spill] sm:$0xff]  ;;  %v21853_v60 = vld [vmem:[#allocation129_spill] sm:$0xff]  ;;  %v14372_v44 = vsel %vm1806_vm6, %v14060_v13, %v21854_v45  ;;  %v21855_v28 = vld [vmem:[#allocation32_spill] sm:$0xff]  ;;  %21863 = vst [vmem:[#allocation304_spill] sm:$0xff] %v14411_v9 }
 0x378   :  { %1598 = vrot.lane.b32.xlu1 %v21852_v25, %s10965_s25  ;;  %1596 = vrot.lane.b32.xlu0 %v21853_v60, %s10965_s25  ;;  %v14377_v38 = vsel %vm1806_vm6, %v14065_v63, %v21855_v28  ;;  %v21856_v5 = vld [vmem:[#allocation33_spill] sm:$0xff]  ;;  %v21857_v62 = vld [vmem:[#allocation34_spill] sm:$0xff]  ;;  %v21858_v60 = vld [vmem:[#allocation35_spill] sm:$0xff] }
 0x379   :  { %v14382_v1 = vsel %vm1806_vm6, %v14070_v35, %v21856_v5  ;;  %v14387_v25 = vsel %vm1806_vm6, %v14075_v54, %v21857_v62  ;;  %v14392_v13 = vsel %vm1806_vm6, %v14084_v40, %v21858_v60  ;;  %v21859_v45 = vld [vmem:[#allocation36_spill] sm:$0xff]  ;;  %v21860_v28 = vld [vmem:[#allocation37_spill] sm:$0xff]  ;;  %v21861_v5 = vld [vmem:[#allocation38_spill] sm:$0xff]  ;;  %v14409_v62 = vpop.permute.xlu1 %1424 }
 0x37a   :  { %v14397_v63 = vsel %vm1806_vm6, %v14089_v43, %v21859_v45  ;;  %v14402_v35 = vsel %vm1806_vm6, %v14094_v34, %v21860_v28  ;;  %v14407_v54 = vsel %vm1806_vm6, %v14099_v6, %v21861_v5  ;;  %21862 = vst [vmem:[#allocation95_spill] sm:$0xff] %v14409_v62  ;;  %v21864_v40 = vld [vmem:[#allocation39_spill] sm:$0xff]  ;;  %v21865_v43 = vld [vmem:[#allocation40_spill] sm:$0xff]  ;;  %v21866_v34 = vld [vmem:[#allocation41_spill] sm:$0xff] }
 0x37b   :  { %v14416_v60 = vsel %vm1806_vm6, %v14104_v56, %v21864_v40  ;;  %v14421_v45 = vsel %vm1806_vm6, %v14109_v49, %v21865_v43  ;;  %v14426_v28 = vsel %vm1806_vm6, %v14114_v48, %v21866_v34  ;;  %v21867_v6 = vld [vmem:[#allocation42_spill] sm:$0xff]  ;;  %v21868_v9 = vld [vmem:[#allocation43_spill] sm:$0xff]  ;;  %v21869_v40 = vld [vmem:[#allocation44_spill] sm:$0xff] }
 0x37c   :  { %v14431_v5 = vsel %vm1806_vm6, %v14123_v52, %v21867_v6  ;;  %v14436_v56 = vsel %vm1806_vm6, %v14128_v41, %v21868_v9  ;;  %v14441_v49 = vsel %vm1806_vm6, %v14133_v27, %v21869_v40  ;;  %v21870_v43 = vld [vmem:[#allocation45_spill] sm:$0xff]  ;;  %v21871_v34 = vld [vmem:[#allocation130_spill] sm:$0xff]  ;;  %v21874_v9 = vld [vmem:[#allocation47_spill] sm:$0xff] }
 0x37d   :  { %v14446_v48 = vsel %vm1806_vm6, %v14138_v39, %v21870_v43  ;;  %1602 = vrot.lane.b32.xlu1 %v21871_v34, %s10965_s25  ;;  %v21872_v52 = vld [vmem:[#allocation133_spill] sm:$0xff]  ;;  %v21873_v6 = vld [vmem:[#allocation46_spill] sm:$0xff]  ;;  %v14460_v27 = vsel %vm1806_vm6, %v14148_v2, %v21874_v9  ;;  %v21875_v40 = vld [vmem:[#allocation219_spill] sm:$0xff] }
 0x37e   :  { %1600 = vrot.lane.b32.xlu0 %v21872_v52, %s10965_s25  ;;  %v14455_v41 = vsel %vm1806_vm6, %v14143_v29, %v21873_v6  ;;  %v21876_v39 = vld [vmem:[#allocation87_spill] sm:$0xff]  ;;  %v21877_v62 = vld [vmem:[#allocation220_spill] sm:$0xff]  ;;  %v21879_v52 = vld [vmem:[#allocation221_spill] sm:$0xff] }
 0x37f   :  { %v14465_v43 = vsel %vm1806_vm6, %v21876_v39, %v21875_v40  ;;  %v14470_v34 = vsel %vm1806_vm6, %v14158_v32, %v21877_v62  ;;  %v14475_v29 = vsel %vm1806_vm6, %v14167_v26, %v21879_v52  ;;  %v21880_v6 = vld [vmem:[#allocation223_spill] sm:$0xff]  ;;  %v21881_v9 = vld [vmem:[#allocation224_spill] sm:$0xff]  ;;  %v21882_v39 = vld [vmem:[#allocation226_spill] sm:$0xff]  ;;  %v14492_v62 = vpop.permute.xlu1 %1428 }
 0x380   :  { %21878 = vst [vmem:[#allocation98_spill] sm:$0xff] %v14470_v34  ;;  %v14480_v2 = vsel %vm1806_vm6, %v14172_v12, %v21880_v6  ;;  %v14485_v40 = vsel %vm1806_vm6, %v14177_v11, %v21881_v9  ;;  %v14490_v32 = vsel %vm1806_vm6, %v14182_v58, %v21882_v39  ;;  %21883 = vst [vmem:[#allocation307_spill] sm:$0xff] %v14492_v62  ;;  %v14494_v34 = vpop.permute.xlu0 %1426  ;;  %v21885_v26 = vld [vmem:[#allocation227_spill] sm:$0xff]  ;;  %v21886_v12 = vld [vmem:[#allocation228_spill] sm:$0xff] }
 0x381   :  { %21884 = vst [vmem:[#allocation99_spill] sm:$0xff] %v14494_v34  ;;  %v14499_v52 = vsel %vm1806_vm6, %v14187_v31, %v21885_v26  ;;  %v14504_v6 = vsel %vm1806_vm6, %v14192_v22, %v21886_v12  ;;  %v21887_v11 = vld [vmem:[#allocation229_spill] sm:$0xff]  ;;  %v21888_v58 = vld [vmem:[#allocation55_spill] sm:$0xff]  ;;  %v21889_v34 = vld [vmem:[#allocation56_spill] sm:$0xff] }
 0x382   :  { %v14509_v9 = vsel %vm1806_vm6, %v14197_v14, %v21887_v11  ;;  %v14514_v39 = vsel %vm1863_vm7, %v14206_v18, %v21888_v58  ;;  %v14519_v31 = vsel %vm1863_vm7, %v14211_v59, %v21889_v34  ;;  %v21890_v26 = vld [vmem:[#allocation230_spill] sm:$0xff]  ;;  %v21891_v12 = vld [vmem:[#allocation231_spill] sm:$0xff]  ;;  %v21894_v18 = vld [vmem:[#allocation137_spill] sm:$0xff]  ;;  %vm10279_vm6 = vcmask 1044484  }
 0x383   :  { %v14524_v22 = vsel %vm1863_vm7, %v14216_v55, %v21890_v26  ;;  %v21892_v62 = vld [vmem:[#allocation299_spill] sm:$0xff]  ;;  %v21893_v11 = vld [vmem:[#allocation134_spill] sm:$0xff]  ;;  %1604 = vrot.lane.b32.xlu0 %v21894_v18, %s10965_s25  ;;  %v21895_v58 = vld [vmem:[#allocation232_spill] sm:$0xff] }
 0x384   :  { %v14529_v14 = vsel %vm1863_vm7, %v21892_v62, %v21891_v12  ;;  %1606 = vrot.lane.b32.xlu1 %v21893_v11, %s10965_s25  ;;  %v14538_v59 = vsel %vm1863_vm7, %v14226_v51, %v21895_v58  ;;  %v21896_v34 = vld [vmem:[#allocation233_spill] sm:$0xff]  ;;  %v21897_v26 = vld [vmem:[#allocation234_spill] sm:$0xff]  ;;  %v21898_v12 = vld [vmem:[#allocation235_spill] sm:$0xff] }
 0x385   :  { %v14543_v55 = vsel %vm1863_vm7, %v14231_v19, %v21896_v34  ;;  %v14548_v62 = vsel %vm1863_vm7, %v14236_v61, %v21897_v26  ;;  %v14553_v11 = vsel %vm1863_vm7, %v14241_v53, %v21898_v12  ;;  %v21900_v18 = vld [vmem:[#allocation236_spill] sm:$0xff]  ;;  %v21901_v58 = vld [vmem:[#allocation237_spill] sm:$0xff]  ;;  %v21902_v34 = vld [vmem:[#allocation238_spill] sm:$0xff]  ;;  %v14575_v12 = vpop.permute.xlu1 %1432 }
 0x386   :  { %21899 = vst [vmem:[#allocation308_spill] sm:$0xff] %v14553_v11  ;;  %v14558_v51 = vsel %vm1863_vm7, %v14250_v21, %v21900_v18  ;;  %v14563_v19 = vsel %vm1863_vm7, %v14255_v10, %v21901_v58  ;;  %v14568_v61 = vsel %vm1863_vm7, %v14260_v7, %v21902_v34  ;;  %v21903_v26 = vld [vmem:[#allocation239_spill] sm:$0xff]  ;;  %21904 = vst [vmem:[#allocation102_spill] sm:$0xff] %v14575_v12  ;;  %v14577_v11 = vpop.permute.xlu0 %1430  ;;  %v21906_v21 = vld [vmem:[#allocation240_spill] sm:$0xff] }
 0x387   :  { %v14573_v53 = vsel %vm1863_vm7, %v14265_v57, %v21903_v26  ;;  %21905 = vst [vmem:[#allocation311_spill] sm:$0xff] %v14577_v11  ;;  %v14582_v18 = vsel %vm1863_vm7, %v14270_v24, %v21906_v21  ;;  %v21907_v10 = vld [vmem:[#allocation241_spill] sm:$0xff]  ;;  %v21908_v7 = vld [vmem:[#allocation242_spill] sm:$0xff]  ;;  %v21909_v57 = vld [vmem:[#allocation243_spill] sm:$0xff] }
 0x388   :  { %v14587_v58 = vsel %vm1863_vm7, %v14275_v0, %v21907_v10  ;;  %v14592_v34 = vsel %vm1863_vm7, %v14280_v8, %v21908_v7  ;;  %v14597_v26 = vsel %vm1863_vm7, %v14289_v37, %v21909_v57  ;;  %v21910_v11 = vld [vmem:[#allocation244_spill] sm:$0xff]  ;;  %v21911_v21 = vld [vmem:[#allocation245_spill] sm:$0xff]  ;;  %v21913_v7 = vld [vmem:[#allocation138_spill] sm:$0xff] }
 0x389   :  { %v14602_v24 = vsel %vm1863_vm7, %v14294_v15, %v21910_v11  ;;  %v14607_v0 = vsel %vm1863_vm7, %v14299_v42, %v21911_v21  ;;  %v21912_v10 = vld [vmem:[#allocation89_spill] sm:$0xff]  ;;  %1610 = vrot.lane.b32.xlu1 %v21913_v7, %s10965_s25  ;;  %v21915_v57 = vld [vmem:[#allocation92_spill] sm:$0xff]  ;;  %v21916_v11 = vld [vmem:[#allocation246_spill] sm:$0xff] }
 0x38a   :  { %v14612_v8 = vsel %vm1863_vm7, %v14304_v46, %v21912_v10  ;;  %v21914_v37 = vld [vmem:[#allocation141_spill] sm:$0xff]  ;;  %v14621_v15 = vsel %vm1863_vm7, %v14309_v36, %v21915_v57  ;;  %v14626_v42 = vsel %vm1863_vm7, %v14314_v16, %v21916_v11  ;;  %v21917_v21 = vld [vmem:[#allocation247_spill] sm:$0xff]  ;;  %v21920_v57 = vld [vmem:[#allocation252_spill] sm:$0xff]  ;;  %v14660_v12 = vpop.permute.xlu0 %1434 }
 0x38b   :  { %1608 = vrot.lane.b32.xlu0 %v21914_v37, %s10965_s25  ;;  %v14631_v46 = vsel %vm1863_vm7, %v14319_v30, %v21917_v21  ;;  %v21918_v10 = vld [vmem:[#allocation249_spill] sm:$0xff]  ;;  %v21919_v37 = vld [vmem:[#allocation250_spill] sm:$0xff]  ;;  %v14646_v16 = vsel %vm1863_vm7, %v14338_v17, %v21920_v57  ;;  %21924 = vst [vmem:[#allocation312_spill] sm:$0xff] %v14660_v12 }
 0x38c   :  { %v14636_v7 = vsel %vm1863_vm7, %v14324_v3, %v21918_v10  ;;  %v14641_v36 = vsel %vm1863_vm7, %v14333_v50, %v21919_v37  ;;  %v21921_v11 = vld [vmem:[#allocation253_spill] sm:$0xff]  ;;  %v21922_v21 = vld [vmem:[#allocation254_spill] sm:$0xff]  ;;  %v14658_v10 = vpop.permute.xlu1 %1436  ;;  %v21925_v50 = vld [vmem:[#allocation255_spill] sm:$0xff] }
 0x38d   :  { %v14651_v30 = vsel %vm1863_vm7, %v14343_v23, %v21921_v11  ;;  %v14656_v3 = vsel %vm1863_vm7, %v14348_v47, %v21922_v21  ;;  %21923 = vst [vmem:[#allocation103_spill] sm:$0xff] %v14658_v10  ;;  %v14665_v37 = vsel %vm1863_vm7, %v14353_v33, %v21925_v50  ;;  %v21926_v17 = vld [vmem:[#allocation109_spill] sm:$0xff]  ;;  %v21927_v23 = vld [vmem:[#allocation256_spill] sm:$0xff]  ;;  %v21929_v12 = vld [vmem:[#allocation258_spill] sm:$0xff] }
 0x38e   :  { %v14670_v57 = vsel %vm1863_vm7, %v14358_v4, %v21926_v17  ;;  %v14675_v11 = vsel %vm1863_vm7, %v14363_v20, %v21927_v23  ;;  %v21928_v47 = vld [vmem:[#allocation257_spill] sm:$0xff]  ;;  %v14685_v33 = vsel %vm1863_vm7, %v14377_v38, %v21929_v12  ;;  %v21930_v50 = vld [vmem:[#allocation259_spill] sm:$0xff]  ;;  %v21931_v17 = vld [vmem:[#allocation260_spill] sm:$0xff]  ;;  %v14743_v10 = vpop.permute.xlu0 %1438 }
 0x38f   :  { %v14680_v21 = vsel %vm1863_vm7, %v14372_v44, %v21928_v47  ;;  %v14690_v4 = vsel %vm1863_vm7, %v14382_v1, %v21930_v50  ;;  %v14695_v20 = vsel %vm1863_vm7, %v14387_v25, %v21931_v17  ;;  %v21932_v23 = vld [vmem:[#allocation142_spill] sm:$0xff]  ;;  %v21933_v44 = vld [vmem:[#allocation145_spill] sm:$0xff]  ;;  %v21936_v50 = vld [vmem:[#allocation263_spill] sm:$0xff]  ;;  %21943 = vst [vmem:[#allocation315_spill] sm:$0xff] %v14743_v10 }
 0x390   :  { %1614 = vrot.lane.b32.xlu1 %v21932_v23, %s10965_s25  ;;  %1612 = vrot.lane.b32.xlu0 %v21933_v44, %s10965_s25  ;;  %v21934_v47 = vld [vmem:[#allocation261_spill] sm:$0xff]  ;;  %v21935_v12 = vld [vmem:[#allocation262_spill] sm:$0xff]  ;;  %v14714_v25 = vsel %vm1863_vm7, %v14402_v35, %v21936_v50  ;;  %v21937_v17 = vld [vmem:[#allocation264_spill] sm:$0xff] }
 0x391   :  { %v14704_v38 = vsel %vm1863_vm7, %v14392_v13, %v21934_v47  ;;  %v14709_v1 = vsel %vm1863_vm7, %v14397_v63, %v21935_v12  ;;  %v14719_v23 = vsel %vm1863_vm7, %v14407_v54, %v21937_v17  ;;  %v21938_v44 = vld [vmem:[#allocation265_spill] sm:$0xff]  ;;  %v21939_v47 = vld [vmem:[#allocation266_spill] sm:$0xff]  ;;  %v21940_v12 = vld [vmem:[#allocation267_spill] sm:$0xff]  ;;  %v14741_v17 = vpop.permute.xlu1 %1440 }
 0x392   :  { %v14724_v13 = vsel %vm1863_vm7, %v14416_v60, %v21938_v44  ;;  %v14729_v63 = vsel %vm1863_vm7, %v14421_v45, %v21939_v47  ;;  %v14734_v35 = vsel %vm1863_vm7, %v14426_v28, %v21940_v12  ;;  %v21941_v50 = vld [vmem:[#allocation268_spill] sm:$0xff]  ;;  %21942 = vst [vmem:[#allocation105_spill] sm:$0xff] %v14741_v17  ;;  %v21944_v60 = vld [vmem:[#allocation269_spill] sm:$0xff]  ;;  %v21945_v45 = vld [vmem:[#allocation270_spill] sm:$0xff] }
 0x393   :  { %v14739_v54 = vsel %vm1863_vm7, %v14431_v5, %v21941_v50  ;;  %v14748_v44 = vsel %vm1863_vm7, %v14436_v56, %v21944_v60  ;;  %v14753_v47 = vsel %vm1863_vm7, %v14441_v49, %v21945_v45  ;;  %v21946_v28 = vld [vmem:[#allocation271_spill] sm:$0xff]  ;;  %v21948_v5 = vld [vmem:[#allocation272_spill] sm:$0xff]  ;;  %v21949_v10 = vld [vmem:[#allocation273_spill] sm:$0xff] }
 0x394   :  { %v14758_v12 = vsel %vm1863_vm7, %v14446_v48, %v21946_v28  ;;  %v14763_v50 = vsel %vm1863_vm7, %v14455_v41, %v21948_v5  ;;  %v14768_v56 = vsel %vm1863_vm7, %v14460_v27, %v21949_v10  ;;  %v21950_v60 = vld [vmem:[#allocation274_spill] sm:$0xff]  ;;  %v21951_v45 = vld [vmem:[#allocation275_spill] sm:$0xff]  ;;  %v21955_v5 = vld [vmem:[#allocation149_spill] sm:$0xff] }
 0x395   :  { %21947 = vst [vmem:[#allocation97_spill] sm:$0xff] %v14758_v12  ;;  %v14773_v49 = vsel %vm1863_vm7, %v14465_v43, %v21950_v60  ;;  %v21952_v17 = vld [vmem:[#allocation98_spill] sm:$0xff]  ;;  %v21953_v28 = vld [vmem:[#allocation375_spill] sm:$0xff]  ;;  %1616 = vrot.lane.b32.xlu0 %v21955_v5, %s10965_s25  ;;  %v21956_v27 = vld [vmem:[#allocation276_spill] sm:$0xff] }
 0x396   :  { %v14778_v48 = vsel %vm1863_vm7, %v21952_v17, %v21951_v45  ;;  %v21954_v41 = vld [vmem:[#allocation146_spill] sm:$0xff]  ;;  %v14788_v10 = vsel %vm1863_vm7, %v14475_v29, %v21956_v27  ;;  %v21958_v17 = vld [vmem:[#allocation279_spill] sm:$0xff]  ;;  %v21959_v12 = vld [vmem:[#allocation281_spill] sm:$0xff] }
 0x397   :  { %1618 = vrot.lane.b32.xlu1 %v21954_v41, %s10965_s25  ;;  %v21957_v43 = vld [vmem:[#allocation278_spill] sm:$0xff]  ;;  %v14798_v45 = vsel %vm1863_vm7, %v14485_v40, %v21958_v17  ;;  %v14803_v41 = vsel %vm1863_vm7, %v14490_v32, %v21959_v12  ;;  %v21962_v27 = vld [vmem:[#allocation283_spill] sm:$0xff]  ;;  %v21964_v17 = vld [vmem:[#allocation285_spill] sm:$0xff]  ;;  %v14825_v12 = vpop.permute.xlu1 %1444 }
 0x398   :  { %v14793_v60 = vsel %vm1863_vm7, %v14480_v2, %v21957_v43  ;;  %21960 = vst [vmem:[#allocation100_spill] sm:$0xff] %v14803_v41  ;;  %v21961_v5 = vld [vmem:[#allocation282_spill] sm:$0xff]  ;;  %v14813_v2 = vsel %vm1863_vm7, %v14504_v6, %v21962_v27  ;;  %v21963_v43 = vld [vmem:[#allocation284_spill] sm:$0xff]  ;;  %v14823_v32 = vsel %vm1920_vm8, %v14514_v39, %v21964_v17  ;;  %21965 = vst [vmem:[#allocation106_spill] sm:$0xff] %v14825_v12  ;;  %v14827_v41 = vpop.permute.xlu0 %1442 }
 0x399   :  { %v14808_v29 = vsel %vm1863_vm7, %v14499_v52, %v21961_v5  ;;  %v14818_v40 = vsel %vm1863_vm7, %v14509_v9, %v21963_v43  ;;  %21966 = vst [vmem:[#allocation316_spill] sm:$0xff] %v14827_v41  ;;  %v21967_v52 = vld [vmem:[#allocation286_spill] sm:$0xff]  ;;  %v21968_v6 = vld [vmem:[#allocation287_spill] sm:$0xff]  ;;  %v21969_v9 = vld [vmem:[#allocation288_spill] sm:$0xff] }
 0x39a   :  { %v14832_v5 = vsel %vm1920_vm8, %v14519_v31, %v21967_v52  ;;  %v14837_v27 = vsel %vm1920_vm8, %v14524_v22, %v21968_v6  ;;  %v14842_v43 = vsel %vm1920_vm8, %v14529_v14, %v21969_v9  ;;  %v21971_v39 = vld [vmem:[#allocation289_spill] sm:$0xff]  ;;  %v21972_v41 = vld [vmem:[#allocation290_spill] sm:$0xff]  ;;  %v21973_v52 = vld [vmem:[#allocation291_spill] sm:$0xff] }
 0x39b   :  { %21970 = vst [vmem:[#allocation107_spill] sm:$0xff] %v14842_v43  ;;  %v14847_v17 = vsel %vm1920_vm8, %v14538_v59, %v21971_v39  ;;  %v14852_v31 = vsel %vm1920_vm8, %v14543_v55, %v21972_v41  ;;  %v14857_v22 = vsel %vm1920_vm8, %v14548_v62, %v21973_v52  ;;  %v21974_v6 = vld [vmem:[#allocation292_spill] sm:$0xff]  ;;  %v21977_v59 = vld [vmem:[#allocation150_spill] sm:$0xff]  ;;  %v21978_v39 = vld [vmem:[#allocation153_spill] sm:$0xff] }
 0x39c   :  { %v21975_v12 = vld [vmem:[#allocation308_spill] sm:$0xff]  ;;  %1622 = vrot.lane.b32.xlu1 %v21977_v59, %s10965_s25  ;;  %1620 = vrot.lane.b32.xlu0 %v21978_v39, %s10965_s25  ;;  %v21979_v55 = vld [vmem:[#allocation293_spill] sm:$0xff]  ;;  %v21980_v62 = vld [vmem:[#allocation294_spill] sm:$0xff] }
 0x39d   :  { %v14862_v14 = vsel %vm1920_vm8, %v21975_v12, %v21974_v6  ;;  %v21976_v9 = vld [vmem:[#allocation376_spill] sm:$0xff]  ;;  %v14872_v41 = vsel %vm1920_vm8, %v14558_v51, %v21979_v55  ;;  %v14877_v52 = vsel %vm1920_vm8, %v14563_v19, %v21980_v62  ;;  %v21981_v12 = vld [vmem:[#allocation297_spill] sm:$0xff]  ;;  %v21985_v55 = vld [vmem:[#allocation302_spill] sm:$0xff] }
 0x39e   :  { %v1521_v43 = vrot.slane %v21976_v9, 2  ;;  %v14882_v6 = vsel %vm1920_vm8, %v14568_v61, %v21981_v12  ;;  %v21982_v9 = vld [vmem:[#allocation298_spill] sm:$0xff]  ;;  %v21984_v39 = vld [vmem:[#allocation301_spill] sm:$0xff]  ;;  %v14897_v19 = vsel %vm1920_vm8, %v14587_v58, %v21985_v55 }
 0x39f   :  { %v14887_v59 = vsel %vm1920_vm8, %v14573_v53, %v21982_v9  ;;  %v14892_v51 = vsel %vm1920_vm8, %v14582_v18, %v21984_v39  ;;  %v21986_v62 = vld [vmem:[#allocation305_spill] sm:$0xff]  ;;  %v21987_v12 = vld [vmem:[#allocation306_spill] sm:$0xff]  ;;  %v14909_v9 = vpop.permute.xlu1 %1448 }
 0x3a0   :  { %21983 = vst [vmem:[#allocation319_spill] sm:$0xff] %v14887_v59  ;;  %v14902_v61 = vsel %vm1920_vm8, %v14592_v34, %v21986_v62  ;;  %v14907_v53 = vsel %vm1920_vm8, %v14597_v26, %v21987_v12  ;;  %21988 = vst [vmem:[#allocation108_spill] sm:$0xff] %v14909_v9  ;;  %v14911_v59 = vpop.permute.xlu0 %1446  ;;  %v21990_v18 = vld [vmem:[#allocation309_spill] sm:$0xff]  ;;  %v21991_v58 = vld [vmem:[#allocation310_spill] sm:$0xff] }
 0x3a1   :  { %21989 = vst [vmem:[#allocation320_spill] sm:$0xff] %v14911_v59  ;;  %v14916_v39 = vsel %vm1920_vm8, %v14602_v24, %v21990_v18  ;;  %v14921_v55 = vsel %vm1920_vm8, %v14607_v0, %v21991_v58  ;;  %v21992_v34 = vld [vmem:[#allocation313_spill] sm:$0xff]  ;;  %v21993_v26 = vld [vmem:[#allocation314_spill] sm:$0xff] }
 0x3a2   :  { %v14926_v62 = vsel %vm1920_vm8, %v14612_v8, %v21992_v34  ;;  %v14931_v12 = vsel %vm1920_vm8, %v14621_v15, %v21993_v26  ;;  %v21994_v59 = vld [vmem:[#allocation317_spill] sm:$0xff]  ;;  %v21995_v18 = vld [vmem:[#allocation318_spill] sm:$0xff] }
 0x3a3   :  { %v14936_v24 = vsel %vm1920_vm8, %v14626_v42, %v21994_v59  ;;  %v14941_v0 = vsel %vm1920_vm8, %v14631_v46, %v21995_v18  ;;  %v21996_v58 = vld [vmem:[#allocation321_spill] sm:$0xff]  ;;  %v21997_v34 = vld [vmem:[#allocation154_spill] sm:$0xff]  ;;  %v22000_v59 = vld [vmem:[#allocation323_spill] sm:$0xff] }
 0x3a4   :  { %v14946_v8 = vsel %vm1920_vm8, %v14636_v7, %v21996_v58  ;;  %1626 = vrot.lane.b32.xlu1 %v21997_v34, %s10965_s25  ;;  %v21998_v15 = vld [vmem:[#allocation157_spill] sm:$0xff]  ;;  %v21999_v26 = vld [vmem:[#allocation322_spill] sm:$0xff]  ;;  %v14960_v46 = vsel %vm1920_vm8, %v14646_v16, %v22000_v59  ;;  %v22001_v18 = vld [vmem:[#allocation324_spill] sm:$0xff]  ;;  %v14989_v9 = vpop.permute.xlu0 %1450 }
 0x3a5   :  { %1624 = vrot.lane.b32.xlu0 %v21998_v15, %s10965_s25  ;;  %v14955_v42 = vsel %vm1920_vm8, %v14641_v36, %v21999_v26  ;;  %v14965_v7 = vsel %vm1920_vm8, %v14651_v30, %v22001_v18  ;;  %v22002_v58 = vld [vmem:[#allocation325_spill] sm:$0xff]  ;;  %v22003_v15 = vld [vmem:[#allocation326_spill] sm:$0xff]  ;;  %v14987_v18 = vpop.permute.xlu1 %1452  ;;  %22007 = vst [vmem:[#allocation112_spill] sm:$0xff] %v14989_v9 }
 0x3a6   :  { %v14970_v34 = vsel %vm1920_vm8, %v14656_v3, %v22002_v58  ;;  %v14975_v36 = vsel %vm1920_vm8, %v14665_v37, %v22003_v15  ;;  %v22004_v26 = vld [vmem:[#allocation329_spill] sm:$0xff]  ;;  %v22005_v59 = vld [vmem:[#allocation330_spill] sm:$0xff]  ;;  %22006 = vst [vmem:[#allocation111_spill] sm:$0xff] %v14987_v18 }
 0x3a7   :  { %v14980_v16 = vsel %vm1920_vm8, %v14670_v57, %v22004_v26  ;;  %v14985_v30 = vsel %vm1920_vm8, %v14675_v11, %v22005_v59  ;;  %v22008_v3 = vld [vmem:[#allocation333_spill] sm:$0xff]  ;;  %v22009_v37 = vld [vmem:[#allocation334_spill] sm:$0xff] }
 0x3a8   :  { %v14994_v58 = vsel %vm1920_vm8, %v14680_v21, %v22008_v3  ;;  %v14999_v15 = vsel %vm1920_vm8, %v14685_v33, %v22009_v37  ;;  %v22010_v57 = vld [vmem:[#allocation337_spill] sm:$0xff]  ;;  %v22011_v11 = vld [vmem:[#allocation338_spill] sm:$0xff] }
 0x3a9   :  { %v15004_v26 = vsel %vm1920_vm8, %v14690_v4, %v22010_v57  ;;  %v15009_v59 = vsel %vm1920_vm8, %v14695_v20, %v22011_v11  ;;  %v22013_v9 = vld [vmem:[#allocation341_spill] sm:$0xff]  ;;  %v22014_v3 = vld [vmem:[#allocation342_spill] sm:$0xff]  ;;  %v22017_v4 = vld [vmem:[#allocation280_spill] sm:$0xff]  ;;  %v10968_v57 = vmov 1983009808   ;;  %v2208_v20 = vlaneseq }
 0x3aa   :  { %22012 = vst [vmem:[#allocation115_spill] sm:$0xff] %v15009_v59  ;;  %v15014_v21 = vsel %vm1920_vm8, %v14704_v38, %v22013_v9  ;;  %v15019_v33 = vsel %vm1920_vm8, %v14709_v1, %v22014_v3  ;;  %v22016_v37 = vld [vmem:[#allocation277_spill] sm:$0xff]  ;;  %1628 = vrot.lane.b32.xlu0 %v22017_v4, %s10965_s25  ;;  %v2206_v18 = vunpack.c.l.s4 %v10968_v57  ;;  %v22019_v38 = vld [vmem:[#allocation346_spill] sm:$0xff] }
 0x3ab   :  { %22015 = vst [vmem:[#allocation116_spill] sm:$0xff] %v15019_v33  ;;  %1630 = vrot.lane.b32.xlu1 %v22016_v37, %s10965_s25  ;;  %v22018_v11 = vld [vmem:[#allocation345_spill] sm:$0xff]  ;;  %v15033_v9 = vsel %vm1920_vm8, %v14719_v23, %v22019_v38  ;;  %v22021_v37 = vrot.slane %v21953_v28, 2  ;;  %v22022_v57 = vld [vmem:[#allocation350_spill] sm:$0xff] }
 0x3ac   :  { %v15028_v59 = vsel %vm1920_vm8, %v14714_v25, %v22018_v11  ;;  %v22020_v1 = vld [vmem:[#allocation349_spill] sm:$0xff]  ;;  %v15046_v33 = vsel %vm1920_vm8, %v14729_v63, %v22022_v57  ;;  %v22025_v23 = vld [vmem:[#allocation354_spill] sm:$0xff] }
 0x3ad   :  { %v15038_v3 = vsel %vm1920_vm8, %v14724_v13, %v22020_v1  ;;  %v1523_v4 = vsel %vm399_vm1, %v1521_v43, %v22021_v37  ;;  %v22023_v25 = vld [vmem:[#allocation353_spill] sm:$0xff]  ;;  %v15056_v38 = vsel %vm1920_vm8, %v14739_v54, %v22025_v23  ;;  %v15063_v43 = vpop.permute.xlu1 %1456  ;;  %v15065_v37 = vpop.permute.xlu0 %1454  ;;  %v22029_v63 = vld [vmem:[#allocation358_spill] sm:$0xff]  ;;  %vm8731_vm1 = vcmask 588800  }
 0x3ae   :  { %v15051_v11 = vsel %vm1920_vm8, %v14734_v35, %v22023_v25  ;;  %v22026_v13 = vld [vmem:[#allocation357_spill] sm:$0xff]  ;;  %22027 = vst [vmem:[#allocation327_spill] sm:$0xff] %v15063_v43  ;;  %22028 = vst [vmem:[#allocation120_spill] sm:$0xff] %v15065_v37  ;;  %v15070_v57 = vsel %vm1920_vm8, %v14753_v47, %v22029_v63  ;;  %v22032_v54 = vld [vmem:[#allocation362_spill] sm:$0xff]  ;;  %v22035_v63 = vrot.slane %v21953_v28, 2  ;;  %1632 = vrot.lane.b32.xlu0 %v1523_v4, %s10965_s25 }
 0x3af   :  { %22024 = vst [vmem:[#allocation119_spill] sm:$0xff] %v15051_v11  ;;  %v15061_v1 = vsel %vm1920_vm8, %v14748_v44, %v22026_v13  ;;  %v22030_v35 = vld [vmem:[#allocation361_spill] sm:$0xff]  ;;  %v15080_v23 = vsel %vm1920_vm8, %v14763_v50, %v22032_v54  ;;  %v22034_v37 = vld [vmem:[#allocation366_spill] sm:$0xff]  ;;  %v15096_v50 = vshrl.u32 %v2208_v20, 7  ;;  %v22042_v4 = vld [vmem:[#allocation100_spill] sm:$0xff] }
 0x3b0   :  { %v22031_v25 = vld [vmem:[#allocation97_spill] sm:$0xff]  ;;  %v15090_v47 = vsel %vm1920_vm8, %v14773_v49, %v22034_v37  ;;  %1634 = vrot.lane.b32.xlu1 %v22035_v63, %s10965_s25  ;;  %v22038_v54 = vld [vmem:[#allocation370_spill] sm:$0xff]  ;;  %v22051_v43 = vld [vmem:[#allocation383_spill] sm:$0xff] }
 0x3b1   :  { %v15075_v11 = vsel %vm1920_vm8, %v22031_v25, %v22030_v35  ;;  %v22033_v44 = vld [vmem:[#allocation365_spill] sm:$0xff]  ;;  %v2207_v35 = vunpack.c.0.s8 %v2206_v18  ;;  %22036 = vst [vmem:[#allocation328_spill] sm:$0xff] %v15096_v50  ;;  %v15106_v49 = vsel %vm1920_vm8, %v14788_v10, %v22038_v54  ;;  %v22043_v63 = vld [vmem:[#allocation378_spill] sm:$0xff]  ;;  %v22045_v54 = vld [vmem:[#allocation380_spill] sm:$0xff] }
 0x3b2   :  { %v15085_v13 = vsel %vm1920_vm8, %v14768_v56, %v22033_v44  ;;  %v22037_v25 = vld [vmem:[#allocation369_spill] sm:$0xff]  ;;  %v22040_v44 = vld [vmem:[#allocation374_spill] sm:$0xff]  ;;  %v15126_v10 = vsel %vm1920_vm8, %v14808_v29, %v22043_v63 }
 0x3b3   :  { %v15101_v56 = vsel %vm1920_vm8, %v14778_v48, %v22037_v25  ;;  %v22039_v37 = vld [vmem:[#allocation373_spill] sm:$0xff]  ;;  %v15116_v18 = vsel %vm1920_vm8, %v14798_v45, %v22040_v44  ;;  %v22044_v25 = vld [vmem:[#allocation379_spill] sm:$0xff]  ;;  %v15136_v45 = vsel %vm1920_vm8, %v14818_v40, %v22045_v54  ;;  %v15140_v44 = vpop.permute.xlu0 %1458  ;;  %v22050_v29 = vld [vmem:[#allocation382_spill] sm:$0xff] }
 0x3b4   :  { %v15111_v28 = vsel %vm1920_vm8, %v14793_v60, %v22039_v37  ;;  %v22041_v20 = vld [vmem:[#allocation377_spill] sm:$0xff]  ;;  %v15131_v60 = vsel %vm1920_vm8, %v14813_v2, %v22044_v25  ;;  %22046 = vst [vmem:[#allocation123_spill] sm:$0xff] %v15136_v45  ;;  %v15138_v37 = vpop.permute.xlu1 %1460  ;;  %22048 = vst [vmem:[#allocation124_spill] sm:$0xff] %v15140_v44  ;;  %v1978_v63 = vsel %vm1977_vm9, %v14832_v5, %v22050_v29  ;;  %v22052_v25 = vld [vmem:[#allocation384_spill] sm:$0xff] }
 0x3b5   :  { %v15121_v48 = vsel %vm1920_vm8, %v22042_v4, %v22041_v20  ;;  %22047 = vst [vmem:[#allocation331_spill] sm:$0xff] %v15138_v37  ;;  %v22049_v20 = vld [vmem:[#allocation381_spill] sm:$0xff]  ;;  %v15151_v2 = vsel %vm1977_vm9, %v14837_v27, %v22051_v43  ;;  %v22053_v40 = vld [vmem:[#allocation107_spill] sm:$0xff]  ;;  %v22055_v45 = vld [vmem:[#allocation386_spill] sm:$0xff]  ;;  %v15167_v5 = vsub.s32 %v2207_v35, %v15096_v50  ;;  %vm10281_vm8 = vcmask 1045509  }
 0x3b6   :  { %v1979_v4 = vsel %vm1977_vm9, %v14823_v32, %v22049_v20  ;;  %v1980_v54 = vsel %vm1977_vm9, %v22053_v40, %v22052_v25  ;;  %v22054_v37 = vld [vmem:[#allocation385_spill] sm:$0xff]  ;;  %v15164_v32 = vsel %vm1977_vm9, %v14852_v31, %v22055_v45  ;;  %v22056_v27 = vld [vmem:[#allocation387_spill] sm:$0xff]  ;;  %v22057_v20 = vld [vmem:[#allocation388_spill] sm:$0xff] }
 0x3b7   :  { %v15159_v44 = vsel %vm1977_vm9, %v14847_v17, %v22054_v37  ;;  %v15172_v43 = vsel %vm1977_vm9, %v14857_v22, %v22056_v27  ;;  %v15177_v29 = vsel %vm1977_vm9, %v14862_v14, %v22057_v20  ;;  %v22058_v17 = vld [vmem:[#allocation389_spill] sm:$0xff]  ;;  %v22059_v31 = vld [vmem:[#allocation390_spill] sm:$0xff]  ;;  %v22060_v45 = vld [vmem:[#allocation391_spill] sm:$0xff] }
 0x3b8   :  { %v15182_v37 = vsel %vm1977_vm9, %v14872_v41, %v22058_v17  ;;  %v15187_v35 = vsel %vm1977_vm9, %v14877_v52, %v22059_v31  ;;  %v15192_v22 = vsel %vm1977_vm9, %v14882_v6, %v22060_v45  ;;  %v22061_v25 = vld [vmem:[#allocation392_spill] sm:$0xff]  ;;  %v22062_v40 = vld [vmem:[#allocation319_spill] sm:$0xff]  ;;  %v22063_v27 = vld [vmem:[#allocation393_spill] sm:$0xff]  ;;  %v1527_v52 = vpop.permute.xlu1 %1526  ;;  %v1525_v31 = vpop.permute.xlu0 %1524 }
 0x3b9   :  { %v15197_v14 = vsel %vm1977_vm9, %v22062_v40, %v22061_v25  ;;  %v15202_v41 = vsel %vm1977_vm9, %v14892_v51, %v22063_v27  ;;  %v22065_v20 = vld [vmem:[#allocation60_spill] sm:$0xff]  ;;  %v22066_v50 = vld [vmem:[#allocation394_spill] sm:$0xff]  ;;  %v22067_v45 = vld [vmem:[#allocation395_spill] sm:$0xff] }
 0x3ba   :  { %22064 = vst [vmem:[#allocation332_spill] sm:$0xff] %v15202_v41  ;;  %v2035_v17 = vsel %vm2034_vm10, %v1978_v63, %v22065_v20  ;;  %v15209_v6 = vsel %vm1977_vm9, %v14897_v19, %v22066_v50  ;;  %v15214_v25 = vsel %vm1977_vm9, %v14902_v61, %v22067_v45  ;;  %v22068_v40 = vld [vmem:[#allocation396_spill] sm:$0xff]  ;;  %v22069_v63 = vld [vmem:[#allocation397_spill] sm:$0xff]  ;;  %v22070_v41 = vld [vmem:[#allocation398_spill] sm:$0xff] }
 0x3bb   :  { %v15219_v51 = vsel %vm1977_vm9, %v14907_v53, %v22068_v40  ;;  %v2092_v27 = vsel %vm2091_vm11, %v2035_v17, %v1525_v31  ;;  %v15225_v20 = vsel %vm1977_vm9, %v14916_v39, %v22069_v63  ;;  %v15230_v19 = vsel %vm1977_vm9, %v14921_v55, %v22070_v41  ;;  %v22071_v45 = vld [vmem:[#allocation399_spill] sm:$0xff]  ;;  %v22072_v40 = vld [vmem:[#allocation400_spill] sm:$0xff]  ;;  %v22074_v39 = vld [vmem:[#allocation401_spill] sm:$0xff] }
 0x3bc   :  { %v2204_v50 = vcombine.high %v2092_v27, %v2092_v27  ;;  %v2211_v61 = vrot.slane %v2092_v27, %v15167_v5  ;;  %v15236_v53 = vsel %vm1977_vm9, %v14926_v62, %v22071_v45  ;;  %v15241_v17 = vsel %vm1977_vm9, %v14931_v12, %v22072_v40  ;;  %v22076_v55 = vld [vmem:[#allocation402_spill] sm:$0xff]  ;;  %v22077_v27 = vld [vmem:[#allocation403_spill] sm:$0xff]  ;;  %v22079_v63 = vld [vmem:[#allocation404_spill] sm:$0xff] }
 0x3bd   :  { %22073 = vst [vmem:[#allocation127_spill] sm:$0xff] %v15241_v17  ;;  %v15246_v31 = vsel %vm1977_vm9, %v14936_v24, %v22074_v39  ;;  %v15251_v41 = vsel %vm1977_vm9, %v14941_v0, %v22076_v55  ;;  %v15256_v62 = vsel %vm1977_vm9, %v14946_v8, %v22077_v27  ;;  %v15261_v12 = vsel %vm1977_vm9, %v14955_v42, %v22079_v63  ;;  %v22080_v45 = vld [vmem:[#allocation57_spill] sm:$0xff]  ;;  %v1531_v39 = vpop.permute.xlu1 %1530  ;;  %v22082_v55 = vld [vmem:[#allocation64_spill] sm:$0xff]  ;;  %v22083_v42 = vld [vmem:[#allocation406_spill] sm:$0xff] }
 0x3be   :  { %22075 = vst [vmem:[#allocation335_spill] sm:$0xff] %v15246_v31  ;;  %22078 = vst [vmem:[#allocation128_spill] sm:$0xff] %v15256_v62  ;;  %v2036_v40 = vsel %vm2034_vm10, %v1979_v4, %v22080_v45  ;;  %v2218_v24 = vrot.slane %v2204_v50, %v15167_v5  ;;  %v1529_v31 = vpop.permute.xlu0 %1528  ;;  %v22081_v17 = vld [vmem:[#allocation405_spill] sm:$0xff]  ;;  %v2037_v8 = vsel %vm2034_vm10, %v1980_v54, %v22082_v55  ;;  %v22084_v4 = vld [vmem:[#allocation407_spill] sm:$0xff] }
 0x3bf   :  { %v15269_v0 = vsel %vm1977_vm9, %v14960_v46, %v22081_v17  ;;  %v2093_v27 = vsel %vm2091_vm11, %v2036_v40, %v1527_v52  ;;  %v2219_v62 = vcombine.high %v2211_v61, %v2211_v61  ;;  %v15277_v63 = vsel %vm1977_vm9, %v14965_v7, %v22083_v42  ;;  %v22085_v17 = vld [vmem:[#allocation408_spill] sm:$0xff]  ;;  %v22086_v52 = vld [vmem:[#allocation409_spill] sm:$0xff]  ;;  %v22088_v7 = vld [vmem:[#allocation410_spill] sm:$0xff] }
 0x3c0   :  { %v15282_v50 = vsel %vm1977_vm9, %v14970_v34, %v22084_v4  ;;  %v2220_v45 = vcombine.high %v2218_v24, %v2218_v24  ;;  %v2094_v46 = vsel %vm2091_vm11, %v2037_v8, %v1529_v31  ;;  %v15288_v54 = vsel %vm1977_vm9, %v14975_v36, %v22085_v17  ;;  %v22090_v34 = vld [vmem:[#allocation411_spill] sm:$0xff]  ;;  %v22092_v31 = vld [vmem:[#allocation412_spill] sm:$0xff]  ;;  %v22093_v8 = vld [vmem:[#allocation413_spill] sm:$0xff] }
 0x3c1   :  { %v15293_v40 = vsel %vm1977_vm9, %v14980_v16, %v22086_v52  ;;  %v15298_v55 = vsel %vm1977_vm9, %v14985_v30, %v22088_v7  ;;  %v15303_v42 = vsel %vm1977_vm9, %v14994_v58, %v22090_v34  ;;  %v15308_v36 = vsel %vm1977_vm9, %v14999_v15, %v22092_v31  ;;  %v1535_v52 = vpop.permute.xlu1 %1534  ;;  %v22095_v7 = vld [vmem:[#allocation414_spill] sm:$0xff]  ;;  %v22097_v15 = vld [vmem:[#allocation415_spill] sm:$0xff] }
 0x3c2   :  { %22087 = vst [vmem:[#allocation336_spill] sm:$0xff] %v15293_v40  ;;  %22089 = vst [vmem:[#allocation131_spill] sm:$0xff] %v15298_v55  ;;  %v15313_v16 = vsel %vm1977_vm9, %v15004_v26, %v22093_v8  ;;  %v2221_v4 = vcombine.high %v2093_v27, %v2093_v27  ;;  %v3135_v17 = vcombine.low %v2218_v24, %v2220_v45  ;;  %v1533_v30 = vpop.permute.xlu0 %1532  ;;  %v22096_v55 = vld [vmem:[#allocation115_spill] sm:$0xff]  ;;  %v22098_v26 = vld [vmem:[#allocation416_spill] sm:$0xff] }
 0x3c3   :  { %22091 = vst [vmem:[#allocation339_spill] sm:$0xff] %v15303_v42  ;;  %22094 = vst [vmem:[#allocation132_spill] sm:$0xff] %v15313_v16  ;;  %v15318_v40 = vsel %vm1977_vm9, %v22096_v55, %v22095_v7  ;;  %v2228_v58 = vrot.slane %v2093_v27, %v15167_v5  ;;  %v3134_v34 = vcombine.low %v2211_v61, %v2219_v62  ;;  %v22099_v8 = vld [vmem:[#allocation116_spill] sm:$0xff]  ;;  %v22100_v45 = vld [vmem:[#allocation417_spill] sm:$0xff] }
 0x3c4   :  { %v2237_v42 = vcombine.high %v2094_v46, %v2094_v46  ;;  %v15324_v31 = vsel %vm1977_vm9, %v15014_v21, %v22097_v15  ;;  %v15329_v24 = vsel %vm1977_vm9, %v22099_v8, %v22098_v26  ;;  %v15334_v16 = vsel %vm1977_vm9, %v15028_v59, %v22100_v45  ;;  %v22101_v55 = vld [vmem:[#allocation418_spill] sm:$0xff]  ;;  %v22102_v62 = vld [vmem:[#allocation419_spill] sm:$0xff]  ;;  %v22104_v27 = vld [vmem:[#allocation420_spill] sm:$0xff] }
 0x3c5   :  { %v15339_v61 = vsel %vm1977_vm9, %v15033_v9, %v22101_v55  ;;  %v15344_v21 = vsel %vm1977_vm9, %v15038_v3, %v22102_v62  ;;  %v15349_v7 = vsel %vm1977_vm9, %v15046_v33, %v22104_v27  ;;  %v3149_v15 = vrot.slane %v3135_v17, %v15167_v5  ;;  %v22106_v26 = vld [vmem:[#allocation421_spill] sm:$0xff]  ;;  %v22107_v8 = vld [vmem:[#allocation119_spill] sm:$0xff]  ;;  %v22109_v3 = vld [vmem:[#allocation68_spill] sm:$0xff]  ;;  %v15365_v27 = vpop.permute.xlu1 %1538 }
 0x3c6   :  { %22103 = vst [vmem:[#allocation340_spill] sm:$0xff] %v15344_v21  ;;  %22105 = vst [vmem:[#allocation101_spill] sm:$0xff] %v15349_v7  ;;  %v2244_v59 = vrot.slane %v2094_v46, %v15167_v5  ;;  %v15356_v45 = vsel %vm1977_vm9, %v22107_v8, %v22106_v26  ;;  %v22108_v9 = vld [vmem:[#allocation61_spill] sm:$0xff]  ;;  %v2039_v62 = vsel %vm2034_vm10, %v15164_v32, %v22109_v3  ;;  %v1537_v17 = vpop.permute.xlu0 %1536  ;;  %v22110_v8 = vld [vmem:[#allocation422_spill] sm:$0xff] }
 0x3c7   :  { %v2038_v55 = vsel %vm2034_vm10, %v15151_v2, %v22108_v9  ;;  %v2235_v33 = vrot.slane %v2221_v4, %v15167_v5  ;;  %v2236_v7 = vcombine.high %v2228_v58, %v2228_v58  ;;  %v3142_v46 = vrot.slane %v3134_v34, %v15167_v5  ;;  %v22111_v9 = vld [vmem:[#allocation423_spill] sm:$0xff]  ;;  %v22112_v3 = vld [vmem:[#allocation424_spill] sm:$0xff] }
 0x3c8   :  { %v2251_v21 = vrot.slane %v2237_v42, %v15167_v5  ;;  %v2096_v26 = vsel %vm2091_vm11, %v2039_v62, %v1533_v30  ;;  %v15373_v2 = vsel %vm1977_vm9, %v15056_v38, %v22110_v8  ;;  %v15378_v32 = vsel %vm1977_vm9, %v15061_v1, %v22111_v9  ;;  %v22114_v42 = vld [vmem:[#allocation48_spill] sm:$0xff]  ;;  %v22115_v8 = vld [vmem:[#allocation425_spill] sm:$0xff] }
 0x3c9   :  { %v2095_v4 = vsel %vm2091_vm11, %v2038_v55, %v1531_v39  ;;  %v15384_v34 = vsel %vm1977_vm9, %v15070_v57, %v22112_v3  ;;  %v15389_v30 = vsel %vm1977_vm9, %v15075_v11, %v22114_v42  ;;  %v3152_v38 = vcombine.low %v2235_v33, %v2244_v59  ;;  %v22116_v9 = vld [vmem:[#allocation49_spill] sm:$0xff]  ;;  %v15402_v3 = vpop.permute.xlu1 %1542 }
 0x3ca   :  { %22113 = vst [vmem:[#allocation104_spill] sm:$0xff] %v15384_v34  ;;  %v3150_v62 = vcombine.low %v3142_v46, %v3149_v15  ;;  %v15394_v1 = vsel %vm1977_vm9, %v15080_v23, %v22115_v8  ;;  %v15399_v39 = vsel %vm1977_vm9, %v15085_v13, %v22116_v9  ;;  %v2270_v55 = vcombine.high %v2096_v26, %v2096_v26  ;;  %v1541_v34 = vpop.permute.xlu0 %1540  ;;  %v22117_v23 = vld [vmem:[#allocation50_spill] sm:$0xff]  ;;  %v22118_v13 = vld [vmem:[#allocation51_spill] sm:$0xff] }
 0x3cb   :  { %v2277_v57 = vrot.slane %v2096_v26, %v15167_v5  ;;  %v3151_v11 = vcombine.low %v2228_v58, %v2236_v7  ;;  %v2254_v42 = vcombine.high %v2095_v4, %v2095_v4  ;;  %v2261_v15 = vrot.slane %v2095_v4, %v15167_v5  ;;  %v22119_v26 = vld [vmem:[#allocation65_spill] sm:$0xff]  ;;  %v22121_v4 = vld [vmem:[#allocation52_spill] sm:$0xff] }
 0x3cc   :  { %v2253_v33 = vcombine.high %v2251_v21, %v2251_v21  ;;  %10637 = vmatmul.mubr.msk.f32.vlgmr.msra.gmra.mrb[0].mxu0 %vm3967_vm12, %v3150_v62  ;;  %v15409_v46 = vsel %vm1977_vm9, %v15090_v47, %v22117_v23  ;;  %v15414_v8 = vsel %vm1977_vm9, %v15101_v56, %v22118_v13  ;;  %v2040_v58 = vsel %vm2034_vm10, %v15159_v44, %v22119_v26  ;;  %v22123_v47 = vld [vmem:[#allocation53_spill] sm:$0xff]  ;;  %v22125_v44 = vld [vmem:[#allocation54_spill] sm:$0xff] }
 0x3cd   :  { %v2252_v7 = vcombine.high %v2244_v59, %v2244_v59  ;;  %v22120_v9 = vmov 0.0   ;;  %v15424_v62 = vsel %vm1977_vm9, %v15106_v49, %v22121_v4  ;;  %v15429_v23 = vsel %vm1977_vm9, %v15111_v28, %v22123_v47  ;;  %v22127_v26 = vld [vmem:[#allocation222_spill] sm:$0xff]  ;;  %v15446_v28 = vpop.permute.xlu1 %1546 }
 0x3ce   :  { %10639 = vmatprep.mubr.msk.f32.mxu0 %vm10967_vm3, %v22120_v9  ;;  %22122 = vst [vmem:[#allocation135_spill] sm:$0xff] %v15424_v62  ;;  %22124 = vst [vmem:[#allocation343_spill] sm:$0xff] %v15429_v23  ;;  %v3166_v56 = vrot.slane %v3152_v38, %v15167_v5  ;;  %v15433_v13 = vsel %vm2091_vm11, %v2040_v58, %v1535_v52  ;;  %v15438_v59 = vsel %vm1977_vm9, %v15116_v18, %v22125_v44  ;;  %v15448_v47 = vpop.permute.xlu0 %1544  ;;  %v22129_v18 = vld [vmem:[#allocation225_spill] sm:$0xff] }
 0x3cf   :  { %22126 = vst [vmem:[#allocation136_spill] sm:$0xff] %v15438_v59  ;;  %v15443_v49 = vsel %vm1977_vm9, %v15121_v48, %v22127_v26  ;;  %v2284_v4 = vrot.slane %v2270_v55, %v15167_v5  ;;  %v2285_v62 = vcombine.high %v2277_v57, %v2277_v57  ;;  %v3159_v52 = vrot.slane %v3151_v11, %v15167_v5  ;;  %v22131_v48 = vld [vmem:[#allocation72_spill] sm:$0xff]  ;;  %v22132_v59 = vld [vmem:[#allocation426_spill] sm:$0xff] }
 0x3d0   :  { %22128 = vst [vmem:[#allocation344_spill] sm:$0xff] %v15443_v49  ;;  %v2268_v38 = vrot.slane %v2254_v42, %v15167_v5  ;;  %v2269_v58 = vcombine.high %v2261_v15, %v2261_v15  ;;  %v3169_v23 = vcombine.low %v2253_v33, %v2261_v15  ;;  %v15455_v44 = vsel %vm1977_vm9, %v15126_v10, %v22129_v18  ;;  %v22134_v42 = vld [vmem:[#allocation427_spill] sm:$0xff] }
 0x3d1   :  { %22130 = vst [vmem:[#allocation139_spill] sm:$0xff] %v15455_v44  ;;  %v2041_v55 = vsel %vm2034_vm10, %v15177_v29, %v22131_v48  ;;  %v3168_v26 = vcombine.low %v2252_v7, %v2251_v21  ;;  %v2294_v49 = vrot.slane %v15433_v13, %v15167_v5  ;;  %v15465_v11 = vsel %vm1977_vm9, %v15131_v60, %v22132_v59  ;;  %v22135_v15 = vld [vmem:[#allocation123_spill] sm:$0xff]  ;;  %v22136_v44 = vld [vmem:[#allocation69_spill] sm:$0xff]  ;;  %v15481_v59 = vpop.permute.xlu1 %1550 }
 0x3d2   :  { %22133 = vst [vmem:[#allocation347_spill] sm:$0xff] %v15465_v11  ;;  %v15470_v33 = vsel %vm1977_vm9, %v22135_v15, %v22134_v42  ;;  %v2098_v10 = vsel %vm2091_vm11, %v2041_v55, %v1537_v17  ;;  %v3167_v18 = vcombine.low %v3159_v52, %v3166_v56  ;;  %v2042_v29 = vsel %vm2034_vm10, %v15172_v43, %v22136_v44  ;;  %v22137_v21 = vld [vmem:[#allocation73_spill] sm:$0xff]  ;;  %v15483_v11 = vpop.permute.xlu0 %1548  ;;  %v22138_v42 = vld [vmem:[#allocation76_spill] sm:$0xff] }
 0x3d3   :  { %v15479_v7 = vsel %vm2034_vm10, %v15182_v37, %v22137_v21  ;;  %v2286_v48 = vcombine.high %v2284_v4, %v2284_v4  ;;  %v3186_v60 = vcombine.low %v2277_v57, %v2285_v62  ;;  %v2043_v17 = vsel %vm2034_vm10, %v15187_v35, %v22138_v42  ;;  %v22139_v56 = vld [vmem:[#allocation77_spill] sm:$0xff]  ;;  %v22140_v35 = vld [vmem:[#allocation80_spill] sm:$0xff] }
 0x3d4   :  { %v15491_v52 = vsel %vm2034_vm10, %v15192_v22, %v22139_v56  ;;  %v3185_v43 = vcombine.low %v2269_v58, %v2268_v38  ;;  %10640 = vmatmul.mubr.msk.f32.gmra.mrb[2].mxu0 %vm3967_vm12, %v3167_v18  ;;  %v3183_v37 = vrot.slane %v3169_v23, %v15167_v5  ;;  %v3176_v57 = vrot.slane %v3168_v26, %v15167_v5  ;;  %v22141_v38 = vld [vmem:[#allocation81_spill] sm:$0xff]  ;;  %v22142_v58 = vld [vmem:[#allocation332_spill] sm:$0xff] }
 0x3d5   :  { %v2302_v62 = vcombine.high %v2294_v49, %v2294_v49  ;;  %v2303_v44 = vcombine.high %v2098_v10, %v2098_v10  ;;  %v15497_v55 = vrot.slane %v2098_v10, %v15167_v5  ;;  %10642 = vmatprep.mubr.msk.f32.mxu0 %vm10967_vm3, %v22120_v9  ;;  %v15504_v22 = vsel %vm2034_vm10, %v15197_v14, %v22140_v35  ;;  %v22143_v23 = vld [vmem:[#allocation84_spill] sm:$0xff]  ;;  %v15520_v56 = vpop.permute.xlu1 %1554 }
 0x3d6   :  { %v15509_v15 = vsel %vm2034_vm10, %v22142_v58, %v22141_v38  ;;  %v15514_v26 = vsel %vm2034_vm10, %v15209_v6, %v22143_v23  ;;  %v2099_v10 = vsel %vm2091_vm11, %v2042_v29, %v15365_v27  ;;  %v3200_v18 = vrot.slane %v3186_v60, %v15167_v5  ;;  %v15522_v35 = vpop.permute.xlu0 %1552  ;;  %v22144_v38 = vld [vmem:[#allocation85_spill] sm:$0xff]  ;;  %v22145_v6 = vld [vmem:[#allocation88_spill] sm:$0xff]  ;;  %v22146_v27 = vld [vmem:[#allocation58_spill] sm:$0xff] }
 0x3d7   :  { %v3202_v21 = vcombine.low %v2284_v4, %v2286_v48  ;;  %v2100_v42 = vsel %vm2091_vm11, %v2043_v17, %v1541_v34  ;;  %v3184_v14 = vcombine.low %v3176_v57, %v3183_v37  ;;  %v15527_v58 = vsel %vm2034_vm10, %v15214_v25, %v22144_v38  ;;  %v22151_v57 = vld [vmem:[#allocation127_spill] sm:$0xff] }
 0x3d8   :  { %v15532_v23 = vsel %vm2034_vm10, %v15219_v51, %v22145_v6  ;;  %v15537_v4 = vsel %vm2034_vm10, %v15225_v20, %v22146_v27  ;;  %v2287_v34 = vcombine.high %v15433_v13, %v15433_v13  ;;  %v3193_v29 = vrot.slane %v3185_v43, %v15167_v5  ;;  %v22147_v51 = vld [vmem:[#allocation59_spill] sm:$0xff]  ;;  %v22148_v20 = vld [vmem:[#allocation62_spill] sm:$0xff] }
 0x3d9   :  { %v3203_v48 = vcombine.low %v2294_v49, %v2302_v62  ;;  %v2317_v60 = vrot.slane %v2303_v44, %v15167_v5  ;;  %v2318_v25 = vcombine.high %v15497_v55, %v15497_v55  ;;  %10643 = vmatmul.mubr.msk.f32.gmra.mrb[4].mxu0 %vm3967_vm12, %v3184_v14  ;;  %v15549_v17 = vsel %vm2034_vm10, %v15230_v19, %v22147_v51  ;;  %v22150_v49 = vld [vmem:[#allocation63_spill] sm:$0xff]  ;;  %v15565_v38 = vpop.permute.xlu1 %1558 }
 0x3da   :  { %v15554_v37 = vsel %vm2034_vm10, %v15236_v53, %v22148_v20  ;;  %v2320_v13 = vcombine.high %v2099_v10, %v2099_v10  ;;  %v2336_v43 = vcombine.high %v2100_v42, %v2100_v42  ;;  %10645 = vmatprep.mubr.msk.f32.mxu0 %vm10967_vm3, %v22120_v9  ;;  %v15561_v62 = vsel %vm2034_vm10, %v22151_v57, %v22150_v49  ;;  %v15567_v6 = vpop.permute.xlu0 %1556  ;;  %v22152_v53 = vld [vmem:[#allocation66_spill] sm:$0xff]  ;;  %v22153_v27 = vld [vmem:[#allocation335_spill] sm:$0xff]  ;;  %v22157_v57 = vld [vmem:[#allocation128_spill] sm:$0xff] }
 0x3db   :  { %22149 = vst [vmem:[#allocation140_spill] sm:$0xff] %v15554_v37  ;;  %v3210_v44 = vrot.slane %v3202_v21, %v15167_v5  ;;  %v2327_v19 = vrot.slane %v2099_v10, %v15167_v5  ;;  %v3201_v14 = vcombine.low %v3193_v29, %v3200_v18  ;;  %v15572_v51 = vsel %vm2034_vm10, %v22153_v27, %v22152_v53  ;;  %v22154_v20 = vld [vmem:[#allocation67_spill] sm:$0xff]  ;;  %v22156_v49 = vld [vmem:[#allocation70_spill] sm:$0xff] }
 0x3dc   :  { %v15577_v37 = vsel %vm2034_vm10, %v15251_v41, %v22154_v20  ;;  %v15582_v21 = vsel %vm2034_vm10, %v22157_v57, %v22156_v49  ;;  %v22158_v10 = vld [vmem:[#allocation71_spill] sm:$0xff]  ;;  %v22159_v29 = vld [vmem:[#allocation78_spill] sm:$0xff]  ;;  %v2301_v27 = vrot.slane %v2287_v34, %v15167_v5  ;;  %v3217_v41 = vrot.slane %v3203_v48, %v15167_v5 }
 0x3dd   :  { %22155 = vst [vmem:[#allocation348_spill] sm:$0xff] %v15577_v37  ;;  %v15587_v18 = vsel %vm2034_vm10, %v15261_v12, %v22158_v10  ;;  %v15592_v53 = vsel %vm2034_vm10, %v15269_v0, %v22159_v29  ;;  %v3220_v20 = vcombine.low %v2318_v25, %v2317_v60  ;;  %10646 = vmatmul.mubr.msk.f32.gmra.mrb[6].mxu0 %vm3967_vm12, %v3201_v14  ;;  %v22161_v37 = vld [vmem:[#allocation79_spill] sm:$0xff]  ;;  %v22163_v57 = vld [vmem:[#allocation82_spill] sm:$0xff]  ;;  %v15612_v29 = vpop.permute.xlu1 %1562 }
 0x3de   :  { %22160 = vst [vmem:[#allocation143_spill] sm:$0xff] %v15592_v53  ;;  %v15600_v49 = vsel %vm2034_vm10, %v15277_v63, %v22161_v37  ;;  %v15605_v12 = vsel %vm2034_vm10, %v15282_v50, %v22163_v57  ;;  %v2334_v0 = vrot.slane %v2320_v13, %v15167_v5  ;;  %v2350_v10 = vrot.slane %v2336_v43, %v15167_v5  ;;  %v15614_v63 = vpop.permute.xlu0 %1560  ;;  %v22165_v37 = vld [vmem:[#allocation83_spill] sm:$0xff]  ;;  %v22166_v13 = vld [vmem:[#allocation86_spill] sm:$0xff]  ;;  %v22167_v57 = vld [vmem:[#allocation336_spill] sm:$0xff] }
 0x3df   :  { %22162 = vst [vmem:[#allocation351_spill] sm:$0xff] %v15600_v49  ;;  %22164 = vst [vmem:[#allocation144_spill] sm:$0xff] %v15605_v12  ;;  %10648 = vmatprep.mubr.msk.f32.mxu0 %vm10967_vm3, %v22120_v9  ;;  %v2335_v34 = vcombine.high %v2327_v19, %v2327_v19  ;;  %v2319_v48 = vcombine.high %v2317_v60, %v2317_v60  ;;  %v3219_v25 = vcombine.low %v2301_v27, %v15497_v55  ;;  %v22168_v12 = vld [vmem:[#allocation295_spill] sm:$0xff]  ;;  %v22172_v49 = vld [vmem:[#allocation90_spill] sm:$0xff] }
 0x3e0   :  { %v3218_v14 = vcombine.low %v3210_v44, %v3217_v41  ;;  %v15619_v50 = vsel %vm2034_vm10, %v15288_v54, %v22165_v37  ;;  %v15624_v43 = vsel %vm2034_vm10, %v22167_v57, %v22166_v13  ;;  %v22169_v53 = vld [vmem:[#allocation131_spill] sm:$0xff]  ;;  %v2343_v55 = vrot.slane %v2100_v42, %v15167_v5  ;;  %v22170_v44 = vld [vmem:[#allocation296_spill] sm:$0xff] }
 0x3e1   :  { %v15629_v60 = vsel %vm2034_vm10, %v22169_v53, %v22168_v12  ;;  %v22171_v27 = vld [vmem:[#allocation339_spill] sm:$0xff]  ;;  %v15640_v54 = vsel %vm2034_vm10, %v15308_v36, %v22172_v49  ;;  %v3234_v37 = vrot.slane %v3220_v20, %v15167_v5  ;;  %v2101_v13 = vsel %vm2091_vm11, %v15479_v7, %v15402_v3  ;;  %v22174_v42 = vld [vmem:[#allocation132_spill] sm:$0xff]  ;;  %v22177_v36 = vld [vmem:[#allocation94_spill] sm:$0xff] }
 0x3e2   :  { %v15635_v41 = vsel %vm2034_vm10, %v22171_v27, %v22170_v44  ;;  %10649 = vmatmul.mubr.msk.f32.gmra.mrb[8].mxu0 %vm3967_vm12, %v3218_v14  ;;  %v22173_v53 = vld [vmem:[#allocation91_spill] sm:$0xff]  ;;  %v22175_v57 = vld [vmem:[#allocation300_spill] sm:$0xff]  ;;  %v15660_v20 = vsel %vm2034_vm10, %v15324_v31, %v22177_v36  ;;  %v2352_v49 = vcombine.high %v2350_v10, %v2350_v10  ;;  %v3237_v3 = vcombine.low %v2335_v34, %v2334_v0 }
 0x3e3   :  { %v15650_v12 = vsel %vm2034_vm10, %v22174_v42, %v22173_v53  ;;  %v15655_v44 = vsel %vm2034_vm10, %v15318_v40, %v22175_v57  ;;  %22178 = vst [vmem:[#allocation147_spill] sm:$0xff] %v15660_v20  ;;  %10651 = vmatprep.mubr.msk.f32.mxu0 %vm10967_vm3, %v22120_v9  ;;  %v3227_v7 = vrot.slane %v3219_v25, %v15167_v5  ;;  %v15668_v53 = vpop.permute.xlu1 %1566  ;;  %v15670_v40 = vpop.permute.xlu0 %1564  ;;  %v22179_v42 = vld [vmem:[#allocation303_spill] sm:$0xff]  ;;  %v22186_v25 = vld [vmem:[#allocation340_spill] sm:$0xff] }
 0x3e4   :  { %22176 = vst [vmem:[#allocation352_spill] sm:$0xff] %v15655_v44  ;;  %v3236_v14 = vcombine.low %v2319_v48, %v2327_v19  ;;  %v2102_v27 = vsel %vm2091_vm11, %v15504_v22, %v15448_v47  ;;  %v15675_v31 = vsel %vm2034_vm10, %v15329_v24, %v22179_v42  ;;  %v2353_v57 = vcombine.high %v2101_v13, %v2101_v13  ;;  %v22181_v34 = vld [vmem:[#allocation95_spill] sm:$0xff]  ;;  %v22183_v48 = vld [vmem:[#allocation304_spill] sm:$0xff]  ;;  %v22189_v44 = vld [vmem:[#allocation102_spill] sm:$0xff] }
 0x3e5   :  { %22180 = vst [vmem:[#allocation355_spill] sm:$0xff] %v15675_v31  ;;  %v2360_v36 = vrot.slane %v2101_v13, %v15167_v5  ;;  %v2351_v0 = vcombine.high %v2343_v55, %v2343_v55  ;;  %v15681_v19 = vsel %vm2034_vm10, %v15334_v16, %v22181_v34  ;;  %v15686_v47 = vsel %vm2034_vm10, %v15339_v61, %v22183_v48  ;;  %v22185_v22 = vld [vmem:[#allocation307_spill] sm:$0xff]  ;;  %v22188_v31 = vld [vmem:[#allocation101_spill] sm:$0xff] }
 0x3e6   :  { %22182 = vst [vmem:[#allocation148_spill] sm:$0xff] %v15681_v19  ;;  %22184 = vst [vmem:[#allocation356_spill] sm:$0xff] %v15686_v47  ;;  %v15691_v20 = vsel %vm2034_vm10, %v22186_v25, %v22185_v22  ;;  %v3235_v24 = vcombine.low %v3227_v7, %v3234_v37  ;;  %v22187_v42 = vld [vmem:[#allocation99_spill] sm:$0xff]  ;;  %v15701_v16 = vsel %vm2034_vm10, %v15356_v45, %v22189_v44 }
 0x3e7   :  { %v15696_v13 = vsel %vm2034_vm10, %v22188_v31, %v22187_v42  ;;  %v3254_v34 = vcombine.low %v2350_v10, %v2352_v49  ;;  %v2376_v61 = vrot.slane %v2102_v27, %v15167_v5  ;;  %v22190_v48 = vld [vmem:[#allocation311_spill] sm:$0xff]  ;;  %v3251_v37 = vrot.slane %v3237_v3, %v15167_v5  ;;  %v15712_v22 = vpop.permute.xlu1 %1570  ;;  %v15714_v25 = vpop.permute.xlu0 %1568  ;;  %v22192_v3 = vld [vmem:[#allocation312_spill] sm:$0xff] }
 0x3e8   :  { %v15707_v47 = vsel %vm2034_vm10, %v15373_v2, %v22190_v48  ;;  %v2369_v7 = vcombine.high %v2102_v27, %v2102_v27  ;;  %10652 = vmatmul.mubr.msk.f32.gmra.mrb[10].mxu0 %vm3967_vm12, %v3235_v24  ;;  %v3244_v31 = vrot.slane %v3236_v14, %v15167_v5  ;;  %v22191_v45 = vld [vmem:[#allocation103_spill] sm:$0xff]  ;;  %v2367_v44 = vrot.slane %v2353_v57, %v15167_v5  ;;  %v22193_v27 = vld [vmem:[#allocation104_spill] sm:$0xff]  ;;  %v22194_v24 = vld [vmem:[#allocation105_spill] sm:$0xff] }
 0x3e9   :  { %v15719_v10 = vsel %vm2034_vm10, %v15378_v32, %v22191_v45  ;;  %v2368_v2 = vcombine.high %v2360_v36, %v2360_v36  ;;  %v3253_v49 = vcombine.low %v2343_v55, %v2351_v0  ;;  %10654 = vmatprep.mubr.msk.f32.mxu0 %vm10967_vm3, %v22120_v9  ;;  %v15727_v14 = vsel %vm2034_vm10, %v22193_v27, %v22192_v3  ;;  %v22195_v48 = vld [vmem:[#allocation315_spill] sm:$0xff]  ;;  %v22196_v27 = vld [vmem:[#allocation106_spill] sm:$0xff] }
 0x3ea   :  { %v15732_v42 = vsel %vm2034_vm10, %v15389_v30, %v22194_v24  ;;  %v2104_v32 = vsel %vm2091_vm11, %v15514_v26, %v15483_v11  ;;  %v3252_v57 = vcombine.low %v3244_v31, %v3251_v37  ;;  %v15740_v55 = vsel %vm2034_vm10, %v15394_v1, %v22195_v48  ;;  %v22198_v24 = vld [vmem:[#allocation316_spill] sm:$0xff] }
 0x3eb   :  { %v3268_v0 = vrot.slane %v3254_v34, %v15167_v5  ;;  %v2103_v45 = vsel %vm2091_vm11, %v15491_v52, %v15446_v28  ;;  %v3271_v3 = vcombine.low %v2367_v44, %v2376_v61  ;;  %v15749_v30 = vsel %vm2034_vm10, %v15399_v39, %v22196_v27  ;;  %v15761_v28 = vpop.permute.xlu1 %1574  ;;  %v15763_v52 = vpop.permute.xlu0 %1572  ;;  %v22199_v34 = vld [vmem:[#allocation108_spill] sm:$0xff] }
 0x3ec   :  { %22197 = vst [vmem:[#allocation151_spill] sm:$0xff] %v15749_v30  ;;  %v15754_v11 = vsel %vm2034_vm10, %v15409_v46, %v22198_v24  ;;  %v2383_v1 = vrot.slane %v2369_v7, %v15167_v5  ;;  %v2105_v26 = vsel %vm2091_vm11, %v15509_v15, %v15481_v59  ;;  %10655 = vmatmul.mubr.msk.f32.gmra.mrb[12].mxu0 %vm3967_vm12, %v3252_v57  ;;  %v22201_v7 = vld [vmem:[#allocation320_spill] sm:$0xff]  ;;  %v22202_v59 = vld [vmem:[#allocation135_spill] sm:$0xff] }
 0x3ed   :  { %v15768_v39 = vsel %vm2034_vm10, %v15414_v8, %v22199_v34  ;;  %v3270_v37 = vcombine.low %v2360_v36, %v2368_v2  ;;  %v3261_v46 = vrot.slane %v3253_v49, %v15167_v5  ;;  %v2402_v31 = vcombine.high %v2104_v32, %v2104_v32  ;;  %10657 = vmatprep.mubr.msk.f32.mxu0 %vm10967_vm3, %v22120_v9  ;;  %v22204_v49 = vld [vmem:[#allocation111_spill] sm:$0xff]  ;;  %v22208_v30 = vld [vmem:[#allocation136_spill] sm:$0xff] }
 0x3ee   :  { %22200 = vst [vmem:[#allocation359_spill] sm:$0xff] %v15768_v39  ;;  %v15776_v15 = vsel %vm2034_vm10, %v22202_v59, %v22201_v7  ;;  %v2386_v44 = vcombine.high %v2103_v45, %v2103_v45  ;;  %v2393_v57 = vrot.slane %v2103_v45, %v15167_v5  ;;  %v2409_v48 = vrot.slane %v2104_v32, %v15167_v5  ;;  %v22205_v24 = vld [vmem:[#allocation343_spill] sm:$0xff]  ;;  %v22207_v39 = vld [vmem:[#allocation112_spill] sm:$0xff] }
 0x3ef   :  { %22203 = vst [vmem:[#allocation152_spill] sm:$0xff] %v15776_v15  ;;  %v2384_v27 = vcombine.high %v2376_v61, %v2376_v61  ;;  %v3285_v8 = vrot.slane %v3271_v3, %v15167_v5  ;;  %v2426_v36 = vrot.slane %v2105_v26, %v15167_v5  ;;  %v3269_v2 = vcombine.low %v3261_v46, %v3268_v0  ;;  %v22210_v59 = vld [vmem:[#allocation327_spill] sm:$0xff]  ;;  %v22211_v45 = vld [vmem:[#allocation344_spill] sm:$0xff]  ;;  %v15797_v3 = vpop.permute.xlu0 %1576 }
 0x3f0   :  { %v15785_v34 = vsel %vm2034_vm10, %v22205_v24, %v22204_v49  ;;  %v15790_v7 = vsel %vm2034_vm10, %v22208_v30, %v22207_v39  ;;  %v15795_v32 = vsel %vm2034_vm10, %v22211_v45, %v22210_v59  ;;  %v2385_v61 = vcombine.high %v2383_v1, %v2383_v1  ;;  %v22213_v15 = vld [vmem:[#allocation120_spill] sm:$0xff]  ;;  %v22214_v0 = vld [vmem:[#allocation139_spill] sm:$0xff] }
 0x3f1   :  { %22206 = vst [vmem:[#allocation360_spill] sm:$0xff] %v15785_v34  ;;  %22209 = vst [vmem:[#allocation155_spill] sm:$0xff] %v15790_v7  ;;  %v15802_v46 = vsel %vm2034_vm10, %v22214_v0, %v22213_v15  ;;  %v3278_v49 = vrot.slane %v3270_v37, %v15167_v5  ;;  %v2416_v24 = vrot.slane %v2402_v31, %v15167_v5  ;;  %10658 = vmatmul.mubr.msk.f32.gmra.mrb[14].mxu0 %vm3967_vm12, %v3269_v2  ;;  %v15816_v37 = vpop.permute.xlu1 %1578 }
 0x3f2   :  { %22212 = vst [vmem:[#allocation363_spill] sm:$0xff] %v15795_v32  ;;  %22215 = vst [vmem:[#allocation156_spill] sm:$0xff] %v15802_v46  ;;  %v2107_v30 = vsel %vm2091_vm11, %v15527_v58, %v15520_v56  ;;  %v2400_v39 = vrot.slane %v2386_v44, %v15167_v5  ;;  %v2401_v59 = vcombine.high %v2393_v57, %v2393_v57  ;;  %10660 = vmatprep.mubr.msk.f32.mxu0 %vm10967_vm3, %v22120_v9  ;;  %v22216_v56 = vld [vmem:[#allocation331_spill] sm:$0xff] }
 0x3f3   :  { %v2417_v45 = vcombine.high %v2409_v48, %v2409_v48  ;;  %v2106_v32 = vsel %vm2091_vm11, %v15532_v23, %v15522_v35  ;;  %v3287_v31 = vcombine.low %v2384_v27, %v2383_v1  ;;  %v2419_v15 = vcombine.high %v2105_v26, %v2105_v26  ;;  %v22217_v58 = vld [vmem:[#allocation347_spill] sm:$0xff]  ;;  %v15833_v26 = vpop.permute.xlu0 %1580  ;;  %v22218_v27 = vld [vmem:[#allocation124_spill] sm:$0xff] }
 0x3f4   :  { %v2434_v0 = vcombine.high %v2426_v36, %v2426_v36  ;;  %v3286_v34 = vcombine.low %v3278_v49, %v3285_v8  ;;  %v15821_v2 = vsel %vm2034_vm10, %v22217_v58, %v22216_v56  ;;  %v3288_v44 = vcombine.low %v2385_v61, %v2393_v57 }
 0x3f5   :  { %v2452_v46 = vcombine.high %v2107_v30, %v2107_v30  ;;  %v2109_v35 = vsel %vm2091_vm11, %v15537_v4, %v15565_v38  ;;  %v2418_v23 = vcombine.high %v2416_v24, %v2416_v24  ;;  %v15827_v7 = vrot.slane %v2107_v30, %v15167_v5 }
 0x3f6   :  { %v2435_v19 = vcombine.high %v2106_v32, %v2106_v32  ;;  %v2108_v1 = vsel %vm2091_vm11, %v15549_v17, %v15567_v6  ;;  %10661 = vmatmul.mubr.msk.f32.gmra.mrb[16].mxu0 %vm3967_vm12, %v3286_v34  ;;  %v15838_v57 = vsel %vm2034_vm10, %v15470_v33, %v22218_v27  ;;  %v3304_v8 = vcombine.low %v2401_v59, %v2400_v39 }
 0x3f7   :  { %v3305_v4 = vcombine.low %v2409_v48, %v2417_v45  ;;  %v2442_v38 = vrot.slane %v2106_v32, %v15167_v5  ;;  %10663 = vmatprep.mubr.msk.f32.mxu0 %vm10967_vm3, %v22120_v9  ;;  %v3295_v61 = vrot.slane %v3287_v31, %v15167_v5  ;;  %v2433_v17 = vrot.slane %v2419_v15, %v15167_v5  ;;  %v15849_v48 = vpop.permute.xlu1 %1582  ;;  %v22219_v31 = vld [vmem:[#allocation140_spill] sm:$0xff] }
 0x3f8   :  { %v3322_v6 = vcombine.low %v2426_v36, %v2434_v0  ;;  %v2492_v34 = vrot.slane %v2109_v35, %v15167_v5  ;;  %v2466_v49 = vrot.slane %v2452_v46, %v15167_v5  ;;  %v2468_v30 = vcombine.high %v2108_v1, %v2108_v1 }
 0x3f9   :  { %v2475_v33 = vrot.slane %v2108_v1, %v15167_v5  ;;  %v3302_v39 = vrot.slane %v3288_v44, %v15167_v5  ;;  %v3321_v32 = vcombine.low %v2416_v24, %v2418_v23  ;;  %v2467_v59 = vcombine.high %v15827_v7, %v15827_v7  ;;  %v15863_v1 = vpop.permute.xlu0 %1584 }
 0x3fa   :  { %v2449_v45 = vrot.slane %v2435_v19, %v15167_v5  ;;  %v2111_v36 = vsel %vm2091_vm11, %v22219_v31, %v15612_v29  ;;  %v3319_v15 = vrot.slane %v3305_v4, %v15167_v5  ;;  %v2450_v46 = vcombine.high %v2442_v38, %v2442_v38 }
 0x3fb   :  { %v2110_v0 = vsel %vm2091_vm11, %v15561_v62, %v15614_v63  ;;  %v3303_v56 = vcombine.low %v3295_v61, %v3302_v39  ;;  %v3312_v58 = vrot.slane %v3304_v8, %v15167_v5  ;;  %v3336_v24 = vrot.slane %v3322_v6, %v15167_v5  ;;  %v15881_v39 = vpop.permute.xlu1 %1586 }
 0x3fc   :  { %v3338_v44 = vcombine.low %v2433_v17, %v2442_v38  ;;  %v2500_v23 = vcombine.high %v2492_v34, %v2492_v34  ;;  %v2482_v19 = vrot.slane %v2468_v30, %v15167_v5  ;;  %v2483_v27 = vcombine.high %v2475_v33, %v2475_v33  ;;  %v22220_v17 = vld [vmem:[#allocation348_spill] sm:$0xff] }
 0x3fd   :  { %v2518_v29 = vcombine.high %v2111_v36, %v2111_v36  ;;  %v2525_v4 = vrot.slane %v2111_v36, %v15167_v5  ;;  %10664 = vmatmul.mubr.msk.f32.gmra.mrb[18].mxu0 %vm3967_vm12, %v3303_v56  ;;  %v3329_v31 = vrot.slane %v3321_v32, %v15167_v5  ;;  %v15869_v62 = vcombine.low %v2467_v59, %v2466_v49 }
 0x3fe   :  { %v2485_v63 = vcombine.high %v2109_v35, %v2109_v35  ;;  %v2501_v8 = vcombine.high %v2110_v0, %v2110_v0  ;;  %10666 = vmatprep.mubr.msk.f32.mxu0 %vm10967_vm3, %v22120_v9  ;;  %v3339_v38 = vcombine.low %v2450_v46, %v2449_v45  ;;  %v15876_v61 = vsel %vm2091_vm11, %v15572_v51, %v15668_v53 }
 0x3ff   :  { %v2112_v6 = vsel %vm2091_vm11, %v22220_v17, %v15670_v40  ;;  %v3320_v30 = vcombine.low %v3312_v58, %v3319_v15  ;;  %v2451_v49 = vcombine.high %v2449_v45, %v2449_v45  ;;  %v3346_v35 = vrot.slane %v3338_v44, %v15167_v5 }
 0x400   :  { %v15884_v32 = vcombine.low %v2492_v34, %v2500_v23  ;;  %v2508_v59 = vrot.slane %v2110_v0, %v15167_v5  ;;  %v2484_v36 = vcombine.high %v2482_v19, %v2482_v19  ;;  %v15887_v46 = vcombine.low %v2475_v33, %v2483_v27  ;;  %v15897_v34 = vpop.permute.xlu0 %1588 }
 0x401   :  { %v2532_v51 = vrot.slane %v2518_v29, %v15167_v5  ;;  %v2533_v53 = vcombine.high %v2525_v4, %v2525_v4  ;;  %10667 = vmatmul.mubr.msk.f32.gmra.mrb[20].mxu0 %vm3967_vm12, %v3320_v30  ;;  %v2499_v40 = vrot.slane %v2485_v63, %v15167_v5  ;;  %v2515_v15 = vrot.slane %v2501_v8, %v15167_v5 }
 0x402   :  { %v2558_v45 = vrot.slane %v15876_v61, %v15167_v5  ;;  %v2534_v56 = vcombine.high %v2112_v6, %v2112_v6  ;;  %10669 = vmatprep.mubr.msk.f32.mxu0 %vm10967_vm3, %v22120_v9  ;;  %v3370_v33 = vrot.slane %v15869_v62, %v15167_v5  ;;  %v3353_v0 = vrot.slane %v3339_v38, %v15167_v5 }
 0x403   :  { %v2541_v58 = vrot.slane %v2112_v6, %v15167_v5  ;;  %v3337_v44 = vcombine.low %v3329_v31, %v3336_v24  ;;  %v3355_v23 = vcombine.low %v2451_v49, %v15827_v7  ;;  %v2516_v27 = vcombine.high %v2508_v59, %v2508_v59  ;;  %v15916_v24 = vpop.permute.xlu1 %1590 }
 0x404   :  { %v3390_v29 = vcombine.low %v2499_v40, %v2508_v59  ;;  %v2115_v63 = vsel %vm2091_vm11, %v15582_v21, %v15712_v22  ;;  %v15909_v17 = vcombine.low %v2482_v19, %v2484_v36  ;;  %v3380_v62 = vrot.slane %v15887_v46, %v15167_v5 }
 0x405   :  { %v15913_v38 = vcombine.low %v2533_v53, %v2532_v51  ;;  %10670 = vmatmul.mubr.msk.f32.gmra.mrb[22].mxu0 %vm3967_vm12, %v3337_v44  ;;  %v2517_v7 = vcombine.high %v2515_v15, %v2515_v15  ;;  %v2566_v31 = vcombine.high %v2558_v45, %v2558_v45  ;;  %v2548_v6 = vrot.slane %v2534_v56, %v15167_v5  ;;  %v22221_v53 = vld [vmem:[#allocation351_spill] sm:$0xff] }
 0x406   :  { %v2114_v21 = vsel %vm2091_vm11, %v15587_v18, %v15714_v25  ;;  %10672 = vmatprep.mubr.msk.f32.mxu0 %vm10967_vm3, %v22120_v9  ;;  %v2549_v22 = vcombine.high %v2541_v58, %v2541_v58  ;;  %v2584_v19 = vcombine.high %v2115_v63, %v2115_v63  ;;  %v15925_v30 = vrot.slane %v2115_v63, %v15167_v5  ;;  %v15937_v25 = vpop.permute.xlu0 %1592 }
 0x407   :  { %v3354_v49 = vcombine.low %v3346_v35, %v3353_v0  ;;  %v15928_v59 = vrot.slane %v3390_v29, %v15167_v5  ;;  %v15930_v36 = vcombine.low %v2516_v27, %v2515_v15  ;;  %v2551_v51 = vcombine.high %v15876_v61, %v15876_v61  ;;  %v22222_v0 = vld [vmem:[#allocation143_spill] sm:$0xff] }
 0x408   :  { %v2116_v18 = vsel %vm2091_vm11, %v22221_v53, %v15763_v52  ;;  %v3387_v40 = vrot.slane %v15909_v17, %v15167_v5  ;;  %v2567_v56 = vcombine.high %v2114_v21, %v2114_v21  ;;  %v2574_v35 = vrot.slane %v2114_v21, %v15167_v5  ;;  %v15959_v21 = vpop.permute.xlu1 %1594 }
 0x409   :  { %v2117_v15 = vsel %vm2091_vm11, %v22222_v0, %v15761_v28  ;;  %10673 = vmatmul.mubr.msk.f32.gmra.mrb[24].mxu0 %vm3967_vm12, %v3354_v49  ;;  %v15948_v44 = vcombine.low %v2517_v7, %v2525_v4  ;;  %v15950_v52 = vcombine.low %v2558_v45, %v2566_v31  ;;  %v2550_v27 = vcombine.high %v2548_v6, %v2548_v6  ;;  %v22223_v45 = vld [vmem:[#allocation144_spill] sm:$0xff] }
 0x40a   :  { %10675 = vmatprep.mubr.msk.f32.mxu0 %vm10967_vm3, %v22120_v9  ;;  %v15954_v29 = vcombine.low %v2541_v58, %v2549_v22  ;;  %v2598_v63 = vrot.slane %v2584_v19, %v15167_v5  ;;  %v2599_v28 = vcombine.high %v15925_v30, %v15925_v30  ;;  %v2600_v17 = vcombine.high %v2116_v18, %v2116_v18 }
 0x40b   :  { %v2624_v49 = vrot.slane %v2117_v15, %v15167_v5  ;;  %v2607_v4 = vrot.slane %v2116_v18, %v15167_v5  ;;  %v2119_v7 = vsel %vm2091_vm11, %v22223_v45, %v15816_v37  ;;  %v3363_v31 = vrot.slane %v3355_v23, %v15167_v5  ;;  %v15978_v45 = vpop.permute.xlu0 %1596 }
 0x40c   :  { %v2565_v22 = vrot.slane %v2551_v51, %v15167_v5  ;;  %v2581_v19 = vrot.slane %v2567_v56, %v15167_v5  ;;  %v2582_v53 = vcombine.high %v2574_v35, %v2574_v35  ;;  %v15973_v61 = vcombine.low %v2548_v6, %v2550_v27 }
 0x40d   :  { %v2118_v18 = vsel %vm2091_vm11, %v15619_v50, %v15797_v3  ;;  %v3371_v37 = vcombine.low %v3363_v31, %v3370_v33  ;;  %v15980_v23 = vcombine.low %v2599_v28, %v2598_v63  ;;  %v2614_v58 = vrot.slane %v2600_v17, %v15167_v5  ;;  %v15996_v28 = vpop.permute.xlu1 %1598 }
 0x40e   :  { %v2650_v51 = vcombine.high %v2119_v7, %v2119_v7  ;;  %v15984_v56 = vrot.slane %v2119_v7, %v15167_v5  ;;  %v3438_v0 = vrot.slane %v15954_v29, %v15167_v5  ;;  %v3457_v6 = vcombine.low %v2565_v22, %v2574_v35 }
 0x40f   :  { %v2632_v27 = vcombine.high %v2624_v49, %v2624_v49  ;;  %v2615_v8 = vcombine.high %v2607_v4, %v2607_v4  ;;  %10676 = vmatmul.mubr.msk.f32.gmra.mrb[26].mxu0 %vm3967_vm12, %v3371_v37  ;;  %v15989_v50 = vcombine.low %v2582_v53, %v2581_v19  ;;  %v2617_v3 = vcombine.high %v2117_v15, %v2117_v15  ;;  %v1601_v46 = vpop.permute.xlu0 %1600 }
 0x410   :  { %v2633_v33 = vcombine.high %v2118_v18, %v2118_v18  ;;  %v2121_v63 = vsel %vm2091_vm11, %v15624_v43, %v15849_v48  ;;  %10678 = vmatprep.mubr.msk.f32.mxu0 %vm10967_vm3, %v22120_v9  ;;  %v3448_v35 = vrot.slane %v15973_v61, %v15167_v5  ;;  %v2583_v17 = vcombine.high %v2581_v19, %v2581_v19 }
 0x411   :  { %v2640_v7 = vrot.slane %v2118_v18, %v15167_v5  ;;  %v3388_v15 = vcombine.low %v3380_v62, %v3387_v40  ;;  %v2616_v22 = vcombine.high %v2614_v58, %v2614_v58  ;;  %v2664_v43 = vrot.slane %v2650_v51, %v15167_v5  ;;  %v1603_v62 = vpop.permute.xlu1 %1602 }
 0x412   :  { %v2665_v48 = vcombine.high %v15984_v56, %v15984_v56  ;;  %v16010_v53 = vrot.slane %v3457_v6, %v15167_v5  ;;  %v16012_v37 = vcombine.low %v2624_v49, %v2632_v27  ;;  %v16014_v19 = vcombine.low %v2607_v4, %v2615_v8 }
 0x413   :  { %v2690_v18 = vrot.slane %v2121_v63, %v15167_v5  ;;  %10679 = vmatmul.mubr.msk.f32.gmra.mrb[28].mxu0 %vm3967_vm12, %v3388_v15  ;;  %v2631_v40 = vrot.slane %v2617_v3, %v15167_v5  ;;  %v2647_v51 = vrot.slane %v2633_v33, %v15167_v5  ;;  %v2120_v6 = vsel %vm2091_vm11, %v15629_v60, %v15833_v26 }
 0x414   :  { %10681 = vmatprep.mubr.msk.f32.mxu0 %vm10967_vm3, %v22120_v9  ;;  %v16028_v8 = vcombine.low %v2583_v17, %v15925_v30  ;;  %v2648_v49 = vcombine.high %v2640_v7, %v2640_v7  ;;  %v2683_v4 = vcombine.high %v2121_v63, %v2121_v63  ;;  %v22224_v27 = vrot.slane %v15884_v32, %v15167_v5 }
 0x415   :  { %v16034_v3 = vcombine.low %v2614_v58, %v2616_v22  ;;  %v16036_v33 = vcombine.low %v2665_v48, %v2664_v43  ;;  %v3509_v31 = vcombine.low %v2631_v40, %v2640_v7  ;;  %v16040_v60 = vsel %vm2091_vm11, %v15696_v13, %v1601_v46 }
 0x416   :  { %v3405_v15 = vcombine.low %v22224_v27, %v15928_v59  ;;  %v3516_v26 = vrot.slane %v16012_v37, %v15167_v5  ;;  %v3499_v30 = vrot.slane %v16014_v19, %v15167_v5  ;;  %v2698_v63 = vcombine.high %v2690_v18, %v2690_v18 }
 0x417   :  { %v2666_v17 = vcombine.high %v2120_v6, %v2120_v6  ;;  %v2649_v32 = vcombine.high %v2647_v51, %v2647_v51  ;;  %v2123_v59 = vsel %vm2091_vm11, %v15635_v41, %v15881_v39  ;;  %v2831_v58 = vcombine.high %v16040_v60, %v16040_v60  ;;  %v1605_v41 = vpop.permute.xlu0 %1604 }
 0x418   :  { %10682 = vmatmul.mubr.msk.f32.gmra.mrb[30].mxu0 %vm3967_vm12, %v3405_v15  ;;  %v3421_v13 = vrot.slane %v15948_v44, %v15167_v5  ;;  %v16056_v7 = vcombine.low %v2648_v49, %v2647_v51  ;;  %v16059_v22 = vrot.slane %v2683_v4, %v15167_v5  ;;  %v2673_v43 = vrot.slane %v2120_v6, %v15167_v5 }
 0x419   :  { %10684 = vmatprep.mubr.msk.f32.mxu0 %vm10967_vm3, %v22120_v9  ;;  %v2131_v48 = vsel %vm2091_vm11, %v15691_v20, %v1603_v62  ;;  %v3506_v39 = vrot.slane %v16034_v3, %v15167_v5  ;;  %v16069_v40 = vrot.slane %v3509_v31, %v15167_v5  ;;  %v22225_v44 = vrot.slane %v15930_v36, %v15167_v5 }
 0x41a   :  { %v16074_v49 = vcombine.low %v2690_v18, %v2698_v63  ;;  %v2680_v6 = vrot.slane %v2666_v17, %v15167_v5  ;;  %v2716_v4 = vcombine.high %v2123_v59, %v2123_v59  ;;  %v2122_v20 = vsel %vm2091_vm11, %v15640_v54, %v15863_v1 }
 0x41b   :  { %v3422_v51 = vcombine.low %v22225_v44, %v3421_v13  ;;  %v2848_v62 = vcombine.high %v2131_v48, %v2131_v48  ;;  %v2855_v27 = vrot.slane %v2131_v48, %v15167_v5  ;;  %v16082_v15 = vrot.slane %v2831_v58, %v15167_v5  ;;  %v1607_v13 = vpop.permute.xlu1 %1606 }
 0x41c   :  { %v2132_v36 = vsel %vm2091_vm11, %v15707_v47, %v1605_v41  ;;  %v16088_v31 = vcombine.low %v2649_v32, %v15984_v56  ;;  %v2681_v18 = vcombine.high %v2673_v43, %v2673_v43  ;;  %v16091_v63 = vrot.slane %v2123_v59, %v15167_v5 }
 0x41d   :  { %10685 = vmatmul.mubr.msk.f32.gmra.mrb[32].mxu0 %vm3967_vm12, %v3422_v51  ;;  %v2864_v17 = vcombine.high %v2132_v36, %v2132_v36  ;;  %v2699_v1 = vcombine.high %v2122_v20, %v2122_v20  ;;  %v2706_v58 = vrot.slane %v2122_v20, %v15167_v5  ;;  %v22226_v47 = vrot.slane %v15913_v38, %v15167_v5  ;;  %v1609_v38 = vpop.permute.xlu0 %1608 }
 0x41e   :  { %10687 = vmatprep.mubr.msk.f32.mxu0 %vm10967_vm3, %v22120_v9  ;;  %v2682_v59 = vcombine.high %v2680_v6, %v2680_v6  ;;  %v2871_v48 = vrot.slane %v2132_v36, %v15167_v5  ;;  %v2730_v44 = vrot.slane %v2716_v4, %v15167_v5  ;;  %v2862_v51 = vrot.slane %v2848_v62, %v15167_v5 }
 0x41f   :  { %v3439_v56 = vcombine.low %v22226_v47, %v3438_v0  ;;  %v2878_v41 = vrot.slane %v2864_v17, %v15167_v5  ;;  %v2863_v20 = vcombine.high %v2855_v27, %v2855_v27  ;;  %v2847_v29 = vcombine.high %v16082_v15, %v16082_v15 }
 0x420   :  { %v16113_v0 = vcombine.low %v2673_v43, %v2681_v18  ;;  %v2731_v47 = vcombine.high %v16091_v63, %v16091_v63  ;;  %v2133_v36 = vsel %vm2091_vm11, %v15701_v16, %v1607_v13  ;;  %v2713_v4 = vrot.slane %v2699_v1, %v15167_v5 }
 0x421   :  { %10688 = vmatmul.mubr.msk.f32.gmra.mrb[34].mxu0 %vm3967_vm12, %v3439_v56  ;;  %v2880_v17 = vcombine.high %v2878_v41, %v2878_v41  ;;  %v2714_v62 = vcombine.high %v2706_v58, %v2706_v58  ;;  %v3576_v32 = vcombine.low %v16059_v22, %v2706_v58  ;;  %v22227_v56 = vrot.slane %v15950_v52, %v15167_v5 }
 0x422   :  { %10690 = vmatprep.mubr.msk.f32.mxu0 %vm10967_vm3, %v22120_v9  ;;  %v16129_v18 = vcombine.low %v2680_v6, %v2682_v59  ;;  %v2125_v16 = vsel %vm2091_vm11, %v15650_v12, %v15916_v24  ;;  %v2879_v13 = vcombine.high %v2871_v48, %v2871_v48  ;;  %v2134_v1 = vsel %vm2091_vm11, %v15727_v14, %v1609_v38 }
 0x423   :  { %v3456_v43 = vcombine.low %v3448_v35, %v22227_v56  ;;  %v3713_v46 = vcombine.low %v2863_v20, %v2862_v51  ;;  %v3712_v54 = vcombine.low %v2847_v29, %v2855_v27  ;;  %v2881_v22 = vcombine.high %v2133_v36, %v2133_v36  ;;  %v22228_v35 = vld [vmem:[#allocation352_spill] sm:$0xff]  ;;  %v1613_v56 = vpop.permute.xlu0 %1612 }
 0x424   :  { %v2888_v58 = vrot.slane %v2133_v36, %v15167_v5  ;;  %v3557_v61 = vrot.slane %v16113_v0, %v15167_v5  ;;  %v16140_v52 = vcombine.low %v2731_v47, %v2730_v44  ;;  %v2124_v12 = vsel %vm2091_vm11, %v22228_v35, %v15897_v34 }
 0x425   :  { %10691 = vmatmul.mubr.msk.f32.gmra.mrb[36].mxu0 %vm3967_vm12, %v3456_v43  ;;  %v3730_v24 = vcombine.low %v2878_v41, %v2880_v17  ;;  %v2715_v14 = vcombine.high %v2713_v4, %v2713_v4  ;;  %v16147_v6 = vcombine.low %v2714_v62, %v2713_v4  ;;  %v16150_v27 = vrot.slane %v3576_v32, %v15167_v5  ;;  %v1611_v32 = vpop.permute.xlu1 %1610 }
 0x426   :  { %10693 = vmatprep.mubr.msk.f32.mxu0 %vm10967_vm3, %v22120_v9  ;;  %v16153_v59 = vrot.slane %v2134_v1, %v15167_v5  ;;  %v3567_v44 = vrot.slane %v16129_v18, %v15167_v5  ;;  %v2749_v51 = vcombine.high %v2125_v16, %v2125_v16  ;;  %v3729_v20 = vcombine.low %v2871_v48, %v2879_v13 }
 0x427   :  { %v22229_v34 = vrot.slane %v15989_v50, %v15167_v5  ;;  %v3727_v29 = vrot.slane %v3713_v46, %v15167_v5  ;;  %v2895_v38 = vrot.slane %v2881_v22, %v15167_v5  ;;  %v2896_v47 = vcombine.high %v2888_v58, %v2888_v58  ;;  %v22230_v22 = vld [vmem:[#allocation147_spill] sm:$0xff] }
 0x428   :  { %v3720_v36 = vrot.slane %v3712_v54, %v15167_v5  ;;  %v2756_v17 = vrot.slane %v2125_v16, %v15167_v5  ;;  %v3744_v4 = vrot.slane %v3730_v24, %v15167_v5  ;;  %v2897_v62 = vcombine.high %v2134_v1, %v2134_v1 }
 0x429   :  { %v3473_v41 = vcombine.low %v16010_v53, %v22229_v34  ;;  %v3482_v50 = vrot.slane %v16028_v8, %v15167_v5  ;;  %v2732_v53 = vcombine.high %v2124_v12, %v2124_v12  ;;  %v2739_v46 = vrot.slane %v2124_v12, %v15167_v5 }
 0x42a   :  { %v3747_v48 = vcombine.low %v2895_v38, %v16153_v59  ;;  %v3728_v43 = vcombine.low %v3720_v36, %v3727_v29  ;;  %v3608_v54 = vrot.slane %v16140_v52, %v15167_v5  ;;  %v3591_v16 = vrot.slane %v16147_v6, %v15167_v5  ;;  %v1615_v29 = vpop.permute.xlu1 %1614  ;;  %v1617_v36 = vpop.permute.xlu0 %1616 }
 0x42b   :  { %10694 = vmatmul.mubr.msk.f32.gmra.mrb[38].mxu0 %vm3967_vm12, %v3473_v41  ;;  %v16178_v13 = vcombine.low %v2715_v14, %v16091_v63  ;;  %v3737_v8 = vrot.slane %v3729_v20, %v15167_v5  ;;  %v16182_v1 = vrot.slane %v2749_v51, %v15167_v5  ;;  %v2127_v35 = vsel %vm2091_vm11, %v22230_v22, %v15959_v21 }
 0x42c   :  { %10696 = vmatprep.mubr.msk.f32.mxu0 %vm10967_vm3, %v22120_v9  ;;  %v3746_v12 = vcombine.low %v2888_v58, %v2896_v47  ;;  %v2136_v24 = vsel %vm2091_vm11, %v15740_v55, %v1613_v56  ;;  %10739 = vmatmul.mubr.msk.f32.vlgmr.msra.gmra.mrb[0].mxu1 %vm3967_vm12, %v3728_v43  ;;  %v2135_v34 = vsel %vm2091_vm11, %v15719_v10, %v1611_v32  ;;  %vm10350_vm10 = vcmask 62464  }
 0x42d   :  { %v2911_v63 = vrot.slane %v2897_v62, %v15167_v5  ;;  %10741 = vmatprep.mubr.msk.f32.mxu1 %vm10967_vm3, %v22120_v9  ;;  %v22231_v14 = vrot.slane %v15980_v23, %v15167_v5  ;;  %v3745_v20 = vcombine.low %v3737_v8, %v3744_v4  ;;  %v2764_v21 = vcombine.high %v2756_v17, %v2756_v17  ;;  %v22232_v8 = vld [vmem:[#allocation355_spill] sm:$0xff] }
 0x42e   :  { %v2746_v58 = vrot.slane %v2732_v53, %v15167_v5  ;;  %v2747_v41 = vcombine.high %v2739_v46, %v2739_v46  ;;  %v3761_v55 = vrot.slane %v3747_v48, %v15167_v5  ;;  %v2782_v38 = vcombine.high %v2127_v35, %v2127_v35 }
 0x42f   :  { %v3490_v51 = vcombine.low %v3482_v50, %v22231_v14  ;;  %v16201_v10 = vrot.slane %v2127_v35, %v15167_v5  ;;  %v2930_v47 = vcombine.high %v2136_v24, %v2136_v24  ;;  %v2937_v32 = vrot.slane %v2136_v24, %v15167_v5 }
 0x430   :  { %v3754_v23 = vrot.slane %v3746_v12, %v15167_v5  ;;  %v2914_v4 = vcombine.high %v2135_v34, %v2135_v34  ;;  %v2921_v62 = vrot.slane %v2135_v34, %v15167_v5  ;;  %v2912_v56 = vcombine.high %v16153_v59, %v16153_v59  ;;  %10742 = vmatmul.mubr.msk.f32.gmra.mrb[2].mxu1 %vm3967_vm12, %v3745_v20  ;;  %v1619_v20 = vpop.permute.xlu1 %1618 }
 0x431   :  { %10697 = vmatmul.mubr.msk.f32.gmra.mrb[40].mxu0 %vm3967_vm12, %v3490_v51  ;;  %v2913_v50 = vcombine.high %v2911_v63, %v2911_v63  ;;  %v2137_v53 = vsel %vm2091_vm11, %v15732_v42, %v1615_v29  ;;  %10744 = vmatprep.mubr.msk.f32.mxu1 %vm10967_vm3, %v22120_v9  ;;  %v3507_v48 = vcombine.low %v3499_v30, %v3506_v39 }
 0x432   :  { %10699 = vmatprep.mubr.msk.f32.mxu0 %vm10967_vm3, %v22120_v9  ;;  %v16222_v59 = vcombine.low %v2756_v17, %v2764_v21  ;;  %v2748_v43 = vcombine.high %v2746_v58, %v2746_v58  ;;  %v2126_v42 = vsel %vm2091_vm11, %v22232_v8, %v15937_v25  ;;  %v3762_v22 = vcombine.low %v3754_v23, %v3761_v55 }
 0x433   :  { %v16227_v35 = vcombine.low %v2739_v46, %v2747_v41  ;;  %v2944_v12 = vrot.slane %v2930_v47, %v15167_v5  ;;  %v2945_v24 = vcombine.high %v2937_v32, %v2937_v32  ;;  %v2138_v3 = vsel %vm2091_vm11, %v15754_v11, %v1617_v36  ;;  %v1621_v11 = vpop.permute.xlu0 %1620  ;;  %v22233_v36 = vld [vmem:[#allocation148_spill] sm:$0xff] }
 0x434   :  { %v2796_v19 = vrot.slane %v2782_v38, %v15167_v5  ;;  %v2797_v30 = vcombine.high %v16201_v10, %v16201_v10  ;;  %v2954_v39 = vrot.slane %v2137_v53, %v15167_v5  ;;  %10745 = vmatmul.mubr.msk.f32.gmra.mrb[4].mxu1 %vm3967_vm12, %v3762_v22  ;;  %v2928_v25 = vrot.slane %v2914_v4, %v15167_v5 }
 0x435   :  { %10700 = vmatmul.mubr.msk.f32.gmra.mrb[42].mxu0 %vm3967_vm12, %v3507_v48  ;;  %v2929_v17 = vcombine.high %v2921_v62, %v2921_v62  ;;  %v3763_v46 = vcombine.low %v2912_v56, %v2911_v63  ;;  %v3764_v34 = vcombine.low %v2913_v50, %v2921_v62  ;;  %10747 = vmatprep.mubr.msk.f32.mxu1 %vm10967_vm3, %v22120_v9  ;;  %v22234_v62 = vld [vmem:[#allocation152_spill] sm:$0xff] }
 0x436   :  { %10702 = vmatprep.mubr.msk.f32.mxu0 %vm10967_vm3, %v22120_v9  ;;  %v3635_v14 = vrot.slane %v16222_v59, %v15167_v5  ;;  %v2765_v51 = vcombine.high %v2126_v42, %v2126_v42  ;;  %v2963_v21 = vcombine.high %v2138_v3, %v2138_v3  ;;  %v16246_v41 = vrot.slane %v2138_v3, %v15167_v5 }
 0x437   :  { %v16249_v55 = vrot.slane %v2126_v42, %v15167_v5  ;;  %v2946_v29 = vcombine.high %v2944_v12, %v2944_v12  ;;  %v3781_v38 = vcombine.low %v2937_v32, %v2945_v24  ;;  %v3524_v63 = vcombine.low %v3516_v26, %v16069_v40  ;;  %v22235_v32 = vld [vmem:[#allocation151_spill] sm:$0xff] }
 0x438   :  { %v16255_v47 = vcombine.low %v2746_v58, %v2748_v43  ;;  %v16260_v23 = vsel %vm2091_vm11, %v22233_v36, %v15996_v28  ;;  %v2962_v4 = vcombine.high %v2954_v39, %v2954_v39  ;;  %v2140_v56 = vsel %vm2091_vm11, %v22234_v62, %v1621_v11 }
 0x439   :  { %v3780_v50 = vcombine.low %v2929_v17, %v2928_v25  ;;  %v3771_v48 = vrot.slane %v3763_v46, %v15167_v5  ;;  %v2139_v8 = vsel %vm2091_vm11, %v22235_v32, %v1619_v20  ;;  %10703 = vmatmul.mubr.msk.f32.gmra.mrb[44].mxu0 %vm3967_vm12, %v3524_v63  ;;  %v3778_v37 = vrot.slane %v3764_v34, %v15167_v5  ;;  %v1625_v46 = vpop.permute.xlu0 %1624  ;;  %v22237_v63 = vld [vmem:[#allocation155_spill] sm:$0xff] }
 0x43a   :  { %v3618_v26 = vrot.slane %v16227_v35, %v15167_v5  ;;  %v2947_v40 = vcombine.high %v2137_v53, %v2137_v53  ;;  %v2977_v28 = vrot.slane %v2963_v21, %v15167_v5  ;;  %v2978_v58 = vcombine.high %v16246_v41, %v16246_v41  ;;  %10705 = vmatprep.mubr.msk.f32.mxu0 %vm10967_vm3, %v22120_v9 }
 0x43b   :  { %v3795_v43 = vrot.slane %v3781_v38, %v15167_v5  ;;  %v3797_v42 = vcombine.low %v2944_v12, %v2946_v29  ;;  %v2996_v22 = vcombine.high %v2140_v56, %v2140_v56  ;;  %v3779_v24 = vcombine.low %v3771_v48, %v3778_v37  ;;  %v1623_v38 = vpop.permute.xlu1 %1622 }
 0x43c   :  { %v3798_v3 = vcombine.low %v2954_v39, %v2962_v4  ;;  %v2980_v25 = vcombine.high %v2139_v8, %v2139_v8  ;;  %v2987_v17 = vrot.slane %v2139_v8, %v15167_v5  ;;  %v3540_v53 = vrot.slane %v16088_v31, %v15167_v5  ;;  %v22238_v8 = vld [vmem:[#allocation359_spill] sm:$0xff] }
 0x43d   :  { %v16280_v34 = vcombine.low %v2797_v30, %v2796_v19  ;;  %v16283_v11 = vrot.slane %v2765_v51, %v15167_v5  ;;  %v2815_v20 = vcombine.high %v16260_v23, %v16260_v23  ;;  %v3788_v12 = vrot.slane %v3780_v50, %v15167_v5  ;;  %10748 = vmatmul.mubr.msk.f32.gmra.mrb[6].mxu1 %vm3967_vm12, %v3779_v24 }
 0x43e   :  { %v2961_v39 = vrot.slane %v2947_v40, %v15167_v5  ;;  %v2979_v21 = vcombine.high %v2977_v28, %v2977_v28  ;;  %v3815_v29 = vcombine.low %v2978_v58, %v2977_v28  ;;  %10750 = vmatprep.mubr.msk.f32.mxu1 %vm10967_vm3, %v22120_v9  ;;  %v22236_v31 = vrot.slane %v16056_v7, %v15167_v5 }
 0x43f   :  { %v3805_v30 = vrot.slane %v3797_v42, %v15167_v5  ;;  %v3010_v51 = vrot.slane %v2996_v22, %v15167_v5  ;;  %v2142_v36 = vsel %vm2091_vm11, %v22237_v63, %v1625_v46  ;;  %v3796_v4 = vcombine.low %v3788_v12, %v3795_v43  ;;  %v1629_v12 = vpop.permute.xlu0 %1628 }
 0x440   :  { %v3541_v19 = vcombine.low %v22236_v31, %v3540_v53  ;;  %v2780_v62 = vcombine.high %v16249_v55, %v16249_v55  ;;  %v3812_v50 = vrot.slane %v3798_v3, %v15167_v5  ;;  %v2994_v48 = vrot.slane %v2980_v25, %v15167_v5  ;;  %v22240_v3 = vld [vmem:[#allocation356_spill] sm:$0xff] }
 0x441   :  { %v2995_v32 = vcombine.high %v2987_v17, %v2987_v17  ;;  %v3814_v7 = vcombine.low %v2961_v39, %v16246_v41  ;;  %v2141_v37 = vsel %vm2091_vm11, %v22238_v8, %v1623_v38  ;;  %v3003_v40 = vrot.slane %v2140_v56, %v15167_v5  ;;  %10751 = vmatmul.mubr.msk.f32.gmra.mrb[8].mxu1 %vm3967_vm12, %v3796_v4 }
 0x442   :  { %10706 = vmatmul.mubr.msk.f32.gmra.mrb[46].mxu0 %vm3967_vm12, %v3541_v19  ;;  %v3628_v28 = vcombine.low %v16182_v1, %v16249_v55  ;;  %v16315_v58 = vrot.slane %v16260_v23, %v15167_v5  ;;  %v3029_v43 = vcombine.high %v2142_v36, %v2142_v36  ;;  %10753 = vmatprep.mubr.msk.f32.mxu1 %vm10967_vm3, %v22120_v9  ;;  %v22242_v19 = vld [vmem:[#allocation156_spill] sm:$0xff] }
 0x443   :  { %10708 = vmatprep.mubr.msk.f32.mxu0 %vm10967_vm3, %v22120_v9  ;;  %v22239_v41 = vrot.slane %v16036_v33, %v15167_v5  ;;  %v3829_v42 = vrot.slane %v3815_v29, %v15167_v5  ;;  %v3831_v22 = vcombine.low %v2979_v21, %v2987_v17  ;;  %v3012_v24 = vcombine.high %v3010_v51, %v3010_v51  ;;  %v1627_v17 = vpop.permute.xlu1 %1626 }
 0x444   :  { %v3813_v1 = vcombine.low %v3805_v30, %v3812_v50  ;;  %v3625_v55 = vrot.slane %v16255_v47, %v15167_v5  ;;  %v2128_v25 = vsel %vm2091_vm11, %v22240_v3, %v15978_v45  ;;  %v3832_v46 = vcombine.low %v2995_v32, %v2994_v48 }
 0x445   :  { %v3558_v56 = vcombine.low %v22239_v41, %v3557_v61  ;;  %v3013_v53 = vcombine.high %v2141_v37, %v2141_v37  ;;  %v3822_v33 = vrot.slane %v3814_v7, %v15167_v5  ;;  %v3020_v0 = vrot.slane %v2141_v37, %v15167_v5 }
 0x446   :  { %v3011_v61 = vcombine.high %v3003_v40, %v3003_v40  ;;  %10754 = vmatmul.mubr.msk.f32.gmra.mrb[10].mxu1 %vm3967_vm12, %v3813_v1  ;;  %v2781_v39 = vcombine.high %v16283_v11, %v16283_v11  ;;  %v3036_v45 = vrot.slane %v2142_v36, %v15167_v5  ;;  %v3043_v21 = vrot.slane %v3029_v43, %v15167_v5 }
 0x447   :  { %10709 = vmatmul.mubr.msk.f32.gmra.mrb[48].mxu0 %vm3967_vm12, %v3558_v56  ;;  %10756 = vmatprep.mubr.msk.f32.mxu1 %vm10967_vm3, %v22120_v9  ;;  %v22241_v29 = vrot.slane %v16074_v49, %v15167_v5  ;;  %v3849_v31 = vcombine.low %v3010_v51, %v3012_v24  ;;  %v2144_v30 = vsel %vm2091_vm11, %v22242_v19, %v1629_v12  ;;  %v1631_v56 = vpop.permute.xlu1 %1630 }
 0x448   :  { %10711 = vmatprep.mubr.msk.f32.mxu0 %vm10967_vm3, %v22120_v9  ;;  %v3830_v63 = vcombine.low %v3822_v33, %v3829_v42  ;;  %v3839_v4 = vrot.slane %v3831_v22, %v15167_v5  ;;  %v16353_v36 = vrot.slane %v3628_v28, %v15167_v5  ;;  %v2798_v50 = vcombine.high %v2128_v25, %v2128_v25 }
 0x449   :  { %v3575_v38 = vcombine.low %v3567_v44, %v22241_v29  ;;  %v3846_v48 = vrot.slane %v3832_v46, %v15167_v5  ;;  %v3027_v32 = vrot.slane %v3013_v53, %v15167_v5  ;;  %v3028_v49 = vcombine.high %v3020_v0, %v3020_v0  ;;  %v22243_v44 = vld [vmem:[#allocation360_spill] sm:$0xff]  ;;  %v22244_v46 = vld [vmem:[#allocation363_spill] sm:$0xff] }
 0x44a   :  { %v3848_v18 = vcombine.low %v3003_v40, %v3011_v61  ;;  %v2143_v51 = vsel %vm2091_vm11, %v22243_v44, %v1627_v17  ;;  %10757 = vmatmul.mubr.msk.f32.gmra.mrb[12].mxu1 %vm3967_vm12, %v3830_v63  ;;  %v3062_v7 = vcombine.high %v2144_v30, %v2144_v30  ;;  %v3069_v8 = vrot.slane %v2144_v30, %v15167_v5 }
 0x44b   :  { %10712 = vmatmul.mubr.msk.f32.gmra.mrb[50].mxu0 %vm3967_vm12, %v3575_v38  ;;  %10759 = vmatprep.mubr.msk.f32.mxu1 %vm10967_vm3, %v22120_v9  ;;  %v3592_v37 = vcombine.low %v16150_v27, %v3591_v16  ;;  %v3601_v40 = vrot.slane %v16178_v13, %v15167_v5  ;;  %v3863_v28 = vrot.slane %v3849_v31, %v15167_v5  ;;  %v1633_v13 = vpop.permute.xlu0 %1632 }
 0x44c   :  { %10714 = vmatprep.mubr.msk.f32.mxu0 %vm10967_vm3, %v22120_v9  ;;  %v3045_v43 = vcombine.high %v3043_v21, %v3043_v21  ;;  %v3866_v41 = vcombine.low %v3027_v32, %v3036_v45  ;;  %v3847_v42 = vcombine.low %v3839_v4, %v3846_v48  ;;  %v16374_v22 = vcombine.low %v2780_v62, %v16283_v11  ;;  %v1635_v4 = vpop.permute.xlu1 %1634 }
 0x44d   :  { %v2805_v24 = vrot.slane %v2128_v25, %v15167_v5  ;;  %v3046_v1 = vcombine.high %v2143_v51, %v2143_v51  ;;  %v3053_v3 = vrot.slane %v2143_v51, %v15167_v5  ;;  %v3865_v6 = vcombine.low %v3020_v0, %v3028_v49 }
 0x44e   :  { %v3856_v27 = vrot.slane %v3848_v18, %v15167_v5  ;;  %v3044_v16 = vcombine.high %v3036_v45, %v3036_v45  ;;  %10760 = vmatmul.mubr.msk.f32.gmra.mrb[14].mxu1 %vm3967_vm12, %v3847_v42  ;;  %v2145_v11 = vsel %vm2091_vm11, %v22244_v46, %v1631_v56  ;;  %v3076_v62 = vrot.slane %v3062_v7, %v15167_v5 }
 0x44f   :  { %10715 = vmatmul.mubr.msk.f32.gmra.mrb[52].mxu0 %vm3967_vm12, %v3592_v37  ;;  %v3077_v25 = vcombine.high %v3069_v8, %v3069_v8  ;;  %10762 = vmatprep.mubr.msk.f32.mxu1 %vm10967_vm3, %v22120_v9  ;;  %v3609_v53 = vcombine.low %v3601_v40, %v3608_v54  ;;  %v2812_v12 = vrot.slane %v2798_v50, %v15167_v5 }
 0x450   :  { %10717 = vmatprep.mubr.msk.f32.mxu0 %vm10967_vm3, %v22120_v9  ;;  %v3880_v33 = vrot.slane %v3866_v41, %v15167_v5  ;;  %v3883_v0 = vcombine.low %v3045_v43, %v3053_v3  ;;  %v3864_v61 = vcombine.low %v3856_v27, %v3863_v28  ;;  %v2813_v17 = vcombine.high %v2805_v24, %v2805_v24 }
 0x451   :  { %v3060_v45 = vrot.slane %v3046_v1, %v15167_v5  ;;  %v3061_v29 = vcombine.high %v3053_v3, %v3053_v3  ;;  %v2146_v38 = vsel %vm2091_vm11, %v15838_v57, %v1633_v13  ;;  %v3873_v31 = vrot.slane %v3865_v6, %v15167_v5 }
 0x452   :  { %v3882_v19 = vcombine.low %v3044_v16, %v3043_v21  ;;  %v3086_v52 = vrot.slane %v2145_v11, %v15167_v5  ;;  %10763 = vmatmul.mubr.msk.f32.gmra.mrb[16].mxu1 %vm3967_vm12, %v3864_v61  ;;  %v3645_v54 = vcombine.low %v2781_v39, %v16201_v10  ;;  %v3078_v30 = vcombine.high %v3076_v62, %v3076_v62 }
 0x453   :  { %10718 = vmatmul.mubr.msk.f32.gmra.mrb[54].mxu0 %vm3967_vm12, %v3609_v53  ;;  %v3900_v63 = vcombine.low %v3069_v8, %v3077_v25  ;;  %10765 = vmatprep.mubr.msk.f32.mxu1 %vm10967_vm3, %v22120_v9  ;;  %v3626_v57 = vcombine.low %v3618_v26, %v3625_v55  ;;  %v3095_v21 = vcombine.high %v2146_v38, %v2146_v38 }
 0x454   :  { %10720 = vmatprep.mubr.msk.f32.mxu0 %vm10967_vm3, %v22120_v9  ;;  %v16412_v50 = vrot.slane %v2146_v38, %v15167_v5  ;;  %v3881_v48 = vcombine.low %v3873_v31, %v3880_v33  ;;  %v3897_v10 = vrot.slane %v3883_v0, %v15167_v5  ;;  %v2814_v39 = vcombine.high %v2812_v12, %v2812_v12 }
 0x455   :  { %v3662_v32 = vcombine.low %v2805_v24, %v2813_v17  ;;  %v16417_v49 = vrot.slane %v16040_v60, %v15167_v5  ;;  %v3899_v18 = vcombine.low %v3061_v29, %v3060_v45  ;;  %v3890_v47 = vrot.slane %v3882_v19, %v15167_v5 }
 0x456   :  { %v3094_v35 = vcombine.high %v3086_v52, %v3086_v52  ;;  %v2147_v26 = vsel %vm2091_vm11, %v15821_v2, %v1635_v4  ;;  %10766 = vmatmul.mubr.msk.f32.gmra.mrb[18].mxu1 %vm3967_vm12, %v3881_v48  ;;  %v3079_v55 = vcombine.high %v2145_v11, %v2145_v11  ;;  %v3914_v44 = vrot.slane %v3900_v63, %v15167_v5  ;;  %v16497_v63 = vld [vmem:[%s20383_s2] ss:$0 sm:$0xff] }
 0x457   :  { %10721 = vmatmul.mubr.msk.f32.gmra.mrb[56].mxu0 %vm3967_vm12, %v3626_v57  ;;  %10768 = vmatprep.mubr.msk.f32.mxu1 %vm10967_vm3, %v22120_v9  ;;  %v3643_v60 = vcombine.low %v3635_v14, %v16353_v36  ;;  %v3659_v51 = vrot.slane %v3645_v54, %v15167_v5  ;;  %v3916_v7 = vcombine.low %v3076_v62, %v3078_v30 }
 0x458   :  { %10723 = vmatprep.mubr.msk.f32.mxu0 %vm10967_vm3, %v22120_v9  ;;  %v3109_v2 = vrot.slane %v3095_v21, %v15167_v5  ;;  %v3110_v8 = vcombine.high %v16412_v50, %v16412_v50  ;;  %v3898_v37 = vcombine.low %v3890_v47, %v3897_v10  ;;  %v3652_v40 = vrot.slane %v16374_v22, %v15167_v5 }
 0x459   :  { %v2830_v28 = vcombine.high %v16315_v58, %v16315_v58  ;;  %v2846_v43 = vcombine.high %v16417_v49, %v16417_v49  ;;  %v3112_v59 = vcombine.high %v2147_v26, %v2147_v26  ;;  %v3907_v14 = vrot.slane %v3899_v18, %v15167_v5 }
 0x45a   :  { %v3917_v36 = vcombine.low %v3086_v52, %v3094_v35  ;;  %v3119_v41 = vrot.slane %v2147_v26, %v15167_v5  ;;  %10769 = vmatmul.mubr.msk.f32.gmra.mrb[20].mxu1 %vm3967_vm12, %v3898_v37  ;;  %v3676_v56 = vrot.slane %v3662_v32, %v15167_v5  ;;  %v3678_v42 = vcombine.low %v2812_v12, %v2814_v39 }
 0x45b   :  { %10724 = vmatmul.mubr.msk.f32.gmra.mrb[58].mxu0 %vm3967_vm12, %v3643_v60  ;;  %v3093_v22 = vrot.slane %v3079_v55, %v15167_v5  ;;  %10771 = vmatprep.mubr.msk.f32.mxu1 %vm10967_vm3, %v22120_v9  ;;  %v3660_v24 = vcombine.low %v3652_v40, %v3659_v51  ;;  %v3924_v1 = vrot.slane %v3916_v7, %v15167_v5 }
 0x45c   :  { %10726 = vmatprep.mubr.msk.f32.mxu0 %vm10967_vm3, %v22120_v9  ;;  %v3111_v3 = vcombine.high %v3109_v2, %v3109_v2  ;;  %v3934_v6 = vcombine.low %v3110_v8, %v3109_v2  ;;  %v3915_v27 = vcombine.low %v3907_v14, %v3914_v44  ;;  %v3669_v16 = vrot.slane %v16280_v34, %v15167_v5 }
 0x45d   :  { %v3679_v13 = vcombine.low %v16315_v58, %v2830_v28  ;;  %v3126_v46 = vrot.slane %v3112_v59, %v15167_v5  ;;  %v3931_v11 = vrot.slane %v3917_v36, %v15167_v5  ;;  %v3127_v62 = vcombine.high %v3119_v41, %v3119_v41 }
 0x45e   :  { %v3933_v25 = vcombine.low %v3093_v22, %v16412_v50  ;;  %10772 = vmatmul.mubr.msk.f32.gmra.mrb[22].mxu1 %vm3967_vm12, %v3915_v27  ;;  %v2829_v34 = vrot.slane %v2815_v20, %v15167_v5  ;;  %v3686_v58 = vrot.slane %v3678_v42, %v15167_v5  ;;  %v3696_v53 = vcombine.low %v2846_v43, %v16082_v15 }
 0x45f   :  { %10727 = vmatmul.mubr.msk.f32.gmra.mrb[60].mxu0 %vm3967_vm12, %v3660_v24  ;;  %10774 = vmatprep.mubr.msk.f32.mxu1 %vm10967_vm3, %v22120_v9  ;;  %v3677_v12 = vcombine.low %v3669_v16, %v3676_v56  ;;  %v3948_v33 = vrot.slane %v3934_v6, %v15167_v5  ;;  %v3950_v0 = vcombine.low %v3111_v3, %v3119_v41 }
 0x460   :  { %10729 = vmatprep.mubr.msk.f32.mxu0 %vm10967_vm3, %v22120_v9  ;;  %v3932_v61 = vcombine.low %v3924_v1, %v3931_v11  ;;  %v3693_v17 = vrot.slane %v3679_v13, %v15167_v5  ;;  %v3695_v45 = vcombine.low %v2829_v34, %v16417_v49  ;;  %v3951_v23 = vcombine.low %v3127_v62, %v3126_v46 }
 0x461   :  { %v3941_v20 = vrot.slane %v3933_v25, %v15167_v5  ;;  %v3710_v15 = vrot.slane %v3696_v53, %v15167_v5  ;;  %v3958_v31 = vrot.slane %v3950_v0, %v15167_v5 }
 0x462   :  { %10775 = vmatmul.mubr.msk.f32.gmra.mrb[24].mxu1 %vm3967_vm12, %v3932_v61  ;;  %v3694_v29 = vcombine.low %v3686_v58, %v3693_v17  ;;  %v3703_v19 = vrot.slane %v3695_v45, %v15167_v5  ;;  %v3965_v52 = vrot.slane %v3951_v23, %v15167_v5 }
 0x463   :  { %10730 = vmatmul.mubr.msk.f32.gmra.mrb[62].mxu0 %vm3967_vm12, %v3677_v12  ;;  %10777 = vmatprep.mubr.msk.f32.mxu1 %vm10967_vm3, %v22120_v9  ;;  %v3949_v38 = vcombine.low %v3941_v20, %v3948_v33 }
 0x464   :  { %10732 = vmatprep.mubr.msk.f32.mxu0 %vm10967_vm3, %v22120_v9  ;;  %v3711_v54 = vcombine.low %v3703_v19, %v3710_v15  ;;  %v3966_v30 = vcombine.low %v3958_v31, %v3965_v52 }
 0x466   :  { %10778 = vmatmul.mubr.msk.f32.gmra.mrb[26].mxu1 %vm3967_vm12, %v3949_v38 }
 0x467   :  { %10733 = vmatmul.mubr.msk.f32.gmra.mrb[64].mxu0 %vm3967_vm12, %v3694_v29  ;;  %10780 = vmatprep.mubr.msk.f32.mxu1 %vm10967_vm3, %v22120_v9 }
 0x468   :  { %10735 = vmatprep.mubr.msk.f32.mxu0 %vm10967_vm3, %v22120_v9  ;;  %vm10275_vm3 = vcmask 1042434  }
 0x46a   :  { %10781 = vmatmul.mubr.msk.f32.gmra.mrb[28].mxu1 %vm3967_vm12, %v3966_v30 }
 0x46b   :  { %10736 = vmatmul.mubr.msk.f32.gmra.mrb[66].mxu0 %vm3967_vm12, %v3711_v54 }
 0x49f   :  { %v4136_v4 = vpop.f32.mrb[0].mxu0 }
 0x4a0   :  { %v4137_v57 = vadd.f32 %v16497_v63, %v4136_v4  ;;  %v10638_v21 = vpop.f32.mrb[1].mxu0 }
 0x4a2   :  { %v4380_v50 = vmax.f32 %v4137_v57, 0.0 }
 0x4a4   :  { %v4478_v48 = vcombine.high %v4380_v50, %v4380_v50  ;;  %v4485_v10 = vrot.slane %v4380_v50, %v15167_v5 }
 0x4a6   :  { %v4492_v9 = vrot.slane %v4478_v48, %v15167_v5  ;;  %v4493_v39 = vcombine.high %v4485_v10, %v4485_v10 }
 0x4a7   :  { %v4141_v32 = vpop.f32.mrb[2].mxu0 }
 0x4a8   :  { %v4494_v49 = vcombine.high %v4492_v9, %v4492_v9  ;;  %v6377_v18 = vcombine.low %v4493_v39, %v4492_v9  ;;  %v4142_v47 = vadd.f32 %v16497_v63, %v4141_v32  ;;  %v10641_v35 = vpop.f32.mrb[3].mxu0  ;;  %v5321_v44 = vcombine.low %v4485_v10, %v4493_v39 }
 0x4aa   :  { %v5322_v26 = vcombine.low %v4492_v9, %v4494_v49  ;;  %v4381_v55 = vmax.f32 %v4142_v47, 0.0  ;;  %v5329_v14 = vrot.slane %v5321_v44, %v15167_v5  ;;  %v16513_v36 = vrot.slane %v6377_v18, %v15167_v5 }
 0x4ac   :  { %v4495_v60 = vcombine.high %v4381_v55, %v4381_v55  ;;  %v4502_v51 = vrot.slane %v4381_v55, %v15167_v5  ;;  %v4146_v7 = vpop.f32.mrb[4].mxu0  ;;  %v5336_v37 = vrot.slane %v5322_v26, %v15167_v5  ;;  %22247 = vst [vmem:[#allocation367_spill] sm:$0xff] %v16513_v36 }
 0x4ad   :  { %v4147_v2 = vadd.f32 %v16497_v63, %v4146_v7  ;;  %v10644_v8 = vpop.f32.mrb[5].mxu0 }
 0x4ae   :  { %v16507_v40 = vrot.slane %v4495_v60, %v15167_v5  ;;  %v16509_v28 = vcombine.high %v4502_v51, %v4502_v51  ;;  %v6378_v43 = vcombine.low %v4494_v49, %v4502_v51  ;;  %v16522_v27 = vcombine.low %v5329_v14, %v5336_v37 }
 0x4af   :  { %v4382_v59 = vmax.f32 %v4147_v2, 0.0 }
 0x4b0   :  { %22245 = vst [vmem:[#allocation364_spill] sm:$0xff] %v16507_v40  ;;  %22246 = vst [vmem:[#allocation158_spill] sm:$0xff] %v16509_v28  ;;  %v5338_v41 = vcombine.low %v4502_v51, %v16509_v28  ;;  %v4511_v56 = vcombine.high %v16507_v40, %v16507_v40  ;;  %v4151_v42 = vpop.f32.mrb[6].mxu0  ;;  %v5975_v13 = vrot.slane %v16507_v40, %v15167_v5  ;;  %v6161_v19 = vrot.slane %v16522_v27, 1 }
 0x4b1   :  { %v4512_v22 = vcombine.high %v4382_v59, %v4382_v59  ;;  %v4519_v24 = vrot.slane %v4382_v59, %v15167_v5  ;;  %v4152_v1 = vadd.f32 %v16497_v63, %v4151_v42  ;;  %v10647_v3 = vpop.f32.mrb[7].mxu0  ;;  %22248 = vst [vmem:[#allocation248_spill] sm:$0xff] %v16522_v27  ;;  %v16530_v46 = vrot.slane %v6378_v43, %v15167_v5 }
 0x4b2   :  { %v16525_v16 = vrot.slane %v5338_v41, %v15167_v5 }
 0x4b3   :  { %22250 = vst [vmem:[#allocation159_spill] sm:$0xff] %v16530_v46  ;;  %v4526_v11 = vrot.slane %v4512_v22, %v15167_v5  ;;  %v4527_v62 = vcombine.high %v4519_v24, %v4519_v24  ;;  %v5346_v25 = vcombine.low %v4511_v56, %v4519_v24  ;;  %v4383_v34 = vmax.f32 %v4152_v1, 0.0 }
 0x4b4   :  { %22249 = vst [vmem:[#allocation251_spill] sm:$0xff] %v16525_v16  ;;  %v5976_v53 = vcombine.low %v16525_v16, %v5975_v13 }
 0x4b5   :  { %v4156_v58 = vpop.f32.mrb[8].mxu0  ;;  %v4528_v33 = vcombine.high %v4526_v11, %v4526_v11  ;;  %v5347_v0 = vcombine.low %v4527_v62, %v4526_v11  ;;  %v6402_v61 = vcombine.low %v4519_v24, %v4527_v62  ;;  %v4529_v45 = vcombine.high %v4383_v34, %v4383_v34 }
 0x4b6   :  { %v10650_v17 = vpop.f32.mrb[9].mxu0  ;;  %v16537_v23 = vrot.slane %v4383_v34, %v15167_v5  ;;  %v4157_v20 = vadd.f32 %v16497_v63, %v4156_v58  ;;  %v6162_v15 = vrot.slane %v5976_v53, 1  ;;  %v5354_v29 = vrot.slane %v5346_v25, %v15167_v5 }
 0x4b7   :  { %v5361_v38 = vrot.slane %v5347_v0, %v15167_v5  ;;  %v6403_v31 = vcombine.low %v4526_v11, %v4528_v33  ;;  %v4543_v52 = vrot.slane %v4529_v45, %v15167_v5  ;;  %v6410_v50 = vrot.slane %v6402_v61, %v15167_v5 }
 0x4b8   :  { %22251 = vst [vmem:[#allocation368_spill] sm:$0xff] %v16537_v23  ;;  %v16546_v54 = vcombine.high %v16537_v23, %v16537_v23  ;;  %v5363_v30 = vcombine.low %v4528_v33, %v16537_v23  ;;  %v4384_v4 = vmax.f32 %v4157_v20, 0.0  ;;  %6235 = vrot.lane.b32.xlu1 %v6162_v15, %s10958_s10  ;;  %v6163_v21 = vsel %vm146_vm0, %v6161_v19, %v6162_v15 }
 0x4b9   :  { %v16550_v57 = vcombine.low %v5354_v29, %v5361_v38  ;;  %v6417_v48 = vrot.slane %v6403_v31, %v15167_v5  ;;  %v4545_v10 = vcombine.high %v4543_v52, %v4543_v52  ;;  %6233 = vrot.lane.b32.xlu0 %v6163_v21, %s10958_s10 }
 0x4ba   :  { %22252 = vst [vmem:[#allocation160_spill] sm:$0xff] %v16546_v54  ;;  %v16556_v9 = vrot.slane %v5363_v30, %v15167_v5  ;;  %v5983_v39 = vrot.slane %v16546_v54, %v15167_v5  ;;  %v4546_v18 = vcombine.high %v4384_v4, %v4384_v4  ;;  %v4553_v47 = vrot.slane %v4384_v4, %v15167_v5 }
 0x4bb   :  { %22253 = vst [vmem:[#allocation371_spill] sm:$0xff] %v16550_v57  ;;  %v4161_v49 = vpop.f32.mrb[10].mxu0  ;;  %v5371_v55 = vcombine.low %v4543_v52, %v4545_v10  ;;  %v16566_v60 = vcombine.low %v6410_v50, %v6417_v48  ;;  %v6164_v14 = vrot.slane %v16550_v57, 1 }
 0x4bc   :  { %22254 = vst [vmem:[#allocation161_spill] sm:$0xff] %v16556_v9  ;;  %v4162_v35 = vadd.f32 %v16497_v63, %v4161_v49  ;;  %v10653_v26 = vpop.f32.mrb[11].mxu0  ;;  %v5984_v44 = vcombine.low %v16556_v9, %v5983_v39  ;;  %v4560_v51 = vrot.slane %v4546_v18, %v15167_v5  ;;  %v4561_v7 = vcombine.high %v4553_v47, %v4553_v47 }
 0x4bd   :  { %22255 = vst [vmem:[#allocation372_spill] sm:$0xff] %v16566_v60  ;;  %v6427_v2 = vcombine.low %v4545_v10, %v4553_v47  ;;  %v5379_v37 = vrot.slane %v5371_v55, %v15167_v5 }
 0x4be   :  { %v4385_v8 = vmax.f32 %v4162_v35, 0.0  ;;  %v16570_v59 = vrot.slane %v5984_v44, 1  ;;  %v16573_v41 = vcombine.high %v4560_v51, %v4560_v51  ;;  %v5372_v56 = vcombine.low %v4553_v47, %v4561_v7 }
 0x4bf   :  { %v4166_v43 = vpop.f32.mrb[12].mxu0  ;;  %v6428_v42 = vcombine.low %v4561_v7, %v4560_v51  ;;  %v6435_v11 = vrot.slane %v6427_v2, %v15167_v5 }
 0x4c0   :  { %22256 = vst [vmem:[#allocation162_spill] sm:$0xff] %v16570_v59  ;;  %22257 = vst [vmem:[#allocation163_spill] sm:$0xff] %v16573_v41  ;;  %v4563_v22 = vcombine.high %v4385_v8, %v4385_v8  ;;  %v10656_v24 = vpop.f32.mrb[13].mxu0  ;;  %v16576_v1 = vrot.slane %v4385_v8, %v15167_v5  ;;  %v4167_v3 = vadd.f32 %v16497_v63, %v4166_v43  ;;  %6239 = vrot.lane.b32.xlu1 %v16570_v59, %s10958_s10 }
 0x4c1   :  { %v16583_v13 = vsel %vm146_vm0, %v6164_v14, %v16570_v59  ;;  %v5386_v62 = vrot.slane %v5372_v56, %v15167_v5  ;;  %v5388_v25 = vcombine.low %v4560_v51, %v16573_v41  ;;  %v6442_v58 = vrot.slane %v6428_v42, %v15167_v5 }
 0x4c2   :  { %22258 = vst [vmem:[#allocation164_spill] sm:$0xff] %v16576_v1  ;;  %22259 = vst [vmem:[#allocation165_spill] sm:$0xff] %v16583_v13  ;;  %v4577_v34 = vrot.slane %v4563_v22, %v15167_v5  ;;  %6237 = vrot.lane.b32.xlu0 %v16583_v13, %s10958_s10  ;;  %v4578_v53 = vcombine.high %v16576_v1, %v16576_v1  ;;  %v5991_v33 = vrot.slane %v16576_v1, %v15167_v5 }
 0x4c3   :  { %v4386_v61 = vmax.f32 %v4167_v3, 0.0  ;;  %v16598_v17 = vcombine.low %v5379_v37, %v5386_v62  ;;  %v16601_v45 = vrot.slane %v5388_v25, %v15167_v5  ;;  %v16603_v29 = vcombine.low %v6435_v11, %v6442_v58 }
 0x4c4   :  { %v4579_v20 = vcombine.high %v4577_v34, %v4577_v34  ;;  %v4171_v15 = vpop.f32.mrb[14].mxu0  ;;  %v5396_v38 = vcombine.low %v4578_v53, %v4577_v34 }
 0x4c5   :  { %22260 = vst [vmem:[#allocation166_spill] sm:$0xff] %v16598_v17  ;;  %22261 = vst [vmem:[#allocation167_spill] sm:$0xff] %v16601_v45  ;;  %v4580_v31 = vcombine.high %v4386_v61, %v4386_v61  ;;  %v4587_v19 = vrot.slane %v4386_v61, %v15167_v5  ;;  %v4172_v52 = vadd.f32 %v16497_v63, %v4171_v15  ;;  %v10659_v30 = vpop.f32.mrb[15].mxu0  ;;  %v6167_v35 = vrot.slane %v16598_v17, 1 }
 0x4c6   :  { %22262 = vst [vmem:[#allocation168_spill] sm:$0xff] %v16603_v29  ;;  %v6452_v4 = vcombine.low %v4577_v34, %v4579_v20  ;;  %v5992_v21 = vcombine.low %v16601_v45, %v5991_v33  ;;  %v5404_v39 = vrot.slane %v5396_v38, %v15167_v5 }
 0x4c7   :  { %v16609_v50 = vrot.slane %v4580_v31, %v15167_v5  ;;  %v4595_v48 = vcombine.high %v4587_v19, %v4587_v19  ;;  %v5397_v10 = vcombine.low %v4579_v20, %v4587_v19  ;;  %v4387_v49 = vmax.f32 %v4172_v52, 0.0 }
 0x4c8   :  { %v16612_v47 = vrot.slane %v5992_v21, 1  ;;  %v6460_v34 = vrot.slane %v6452_v4, %v15167_v5 }
 0x4c9   :  { %22263 = vst [vmem:[#allocation169_spill] sm:$0xff] %v16609_v50  ;;  %v4176_v18 = vpop.f32.mrb[16].mxu0  ;;  %v16617_v26 = vcombine.high %v16609_v50, %v16609_v50  ;;  %v5411_v55 = vrot.slane %v5397_v10, %v15167_v5  ;;  %v5413_v44 = vcombine.low %v4595_v48, %v16609_v50  ;;  %v6453_v51 = vcombine.low %v4587_v19, %v4595_v48 }
 0x4ca   :  { %22264 = vst [vmem:[#allocation170_spill] sm:$0xff] %v16612_v47  ;;  %v10662_v7 = vpop.f32.mrb[17].mxu0  ;;  %v4597_v2 = vcombine.high %v4387_v49, %v4387_v49  ;;  %v4604_v8 = vrot.slane %v4387_v49, %v15167_v5  ;;  %v4177_v37 = vadd.f32 %v16497_v63, %v4176_v18  ;;  %6243 = vrot.lane.b32.xlu1 %v16612_v47, %s10958_s10 }
 0x4cb   :  { %22265 = vst [vmem:[#allocation171_spill] sm:$0xff] %v16617_v26  ;;  %v16627_v43 = vsel %vm146_vm0, %v6167_v35, %v16612_v47  ;;  %v16629_v14 = vcombine.low %v5404_v39, %v5411_v55  ;;  %v16632_v56 = vrot.slane %v5413_v44, %v15167_v5  ;;  %v5999_v42 = vrot.slane %v16617_v26, %v15167_v5 }
 0x4cc   :  { %22266 = vst [vmem:[#allocation172_spill] sm:$0xff] %v16627_v43  ;;  %6241 = vrot.lane.b32.xlu0 %v16627_v43, %s10958_s10  ;;  %v4611_v24 = vrot.slane %v4597_v2, %v15167_v5  ;;  %v4612_v3 = vcombine.high %v4604_v8, %v4604_v8  ;;  %v4388_v11 = vmax.f32 %v4177_v37, 0.0  ;;  %v6467_v62 = vrot.slane %v6453_v51, %v15167_v5 }
 0x4cd   :  { %22267 = vst [vmem:[#allocation173_spill] sm:$0xff] %v16629_v14  ;;  %22268 = vst [vmem:[#allocation174_spill] sm:$0xff] %v16632_v56  ;;  %v6000_v25 = vcombine.low %v16632_v56, %v5999_v42  ;;  %v6170_v31 = vrot.slane %v16629_v14, 1 }
 0x4ce   :  { %v4613_v58 = vcombine.high %v4611_v24, %v4611_v24  ;;  %v5421_v53 = vcombine.low %v4604_v8, %v4612_v3  ;;  %v6477_v33 = vcombine.low %v4612_v3, %v4611_v24  ;;  %v4614_v61 = vcombine.high %v4388_v11, %v4388_v11 }
 0x4cf   :  { %v4621_v20 = vrot.slane %v4388_v11, %v15167_v5  ;;  %v16645_v38 = vrot.slane %v6000_v25, 1  ;;  %v16648_v19 = vcombine.low %v6460_v34, %v6467_v62 }
 0x4d0   :  { %v4181_v15 = vpop.f32.mrb[18].mxu0  ;;  %v5422_v52 = vcombine.low %v4611_v24, %v4613_v58  ;;  %v16651_v30 = vrot.slane %v4614_v61, %v15167_v5  ;;  %v5429_v49 = vrot.slane %v5421_v53, %v15167_v5  ;;  %v6485_v8 = vrot.slane %v6477_v33, %v15167_v5 }
 0x4d1   :  { %22269 = vst [vmem:[#allocation175_spill] sm:$0xff] %v16645_v38  ;;  %22270 = vst [vmem:[#allocation176_spill] sm:$0xff] %v16648_v19  ;;  %v10665_v21 = vpop.f32.mrb[19].mxu0  ;;  %v16653_v48 = vcombine.high %v4621_v20, %v4621_v20  ;;  %v6478_v4 = vcombine.low %v4613_v58, %v4621_v20  ;;  %v4182_v10 = vadd.f32 %v16497_v63, %v4181_v15  ;;  %6247 = vrot.lane.b32.xlu1 %v16645_v38, %s10958_s10 }
 0x4d2   :  { %22271 = vst [vmem:[#allocation177_spill] sm:$0xff] %v16651_v30  ;;  %v16660_v39 = vsel %vm146_vm0, %v6170_v31, %v16645_v38  ;;  %v5436_v18 = vrot.slane %v5422_v52, %v15167_v5  ;;  %v4630_v35 = vcombine.high %v16651_v30, %v16651_v30  ;;  %v6007_v37 = vrot.slane %v16651_v30, %v15167_v5 }
 0x4d3   :  { %22272 = vst [vmem:[#allocation178_spill] sm:$0xff] %v16653_v48  ;;  %22273 = vst [vmem:[#allocation179_spill] sm:$0xff] %v16660_v39  ;;  %6245 = vrot.lane.b32.xlu0 %v16660_v39, %s10958_s10  ;;  %v5438_v55 = vcombine.low %v4621_v20, %v16653_v48  ;;  %v4389_v44 = vmax.f32 %v4182_v10, 0.0  ;;  %v6492_v2 = vrot.slane %v6478_v4, %v15167_v5 }
 0x4d4   :  { %v4186_v51 = vpop.f32.mrb[20].mxu0  ;;  %v16676_v3 = vcombine.low %v5429_v49, %v5436_v18 }
 0x4d5   :  { %v4187_v42 = vadd.f32 %v16497_v63, %v4186_v51  ;;  %v10668_v24 = vpop.f32.mrb[21].mxu0  ;;  %v16679_v11 = vrot.slane %v5438_v55, %v15167_v5  ;;  %v4631_v62 = vcombine.high %v4389_v44, %v4389_v44  ;;  %v4638_v25 = vrot.slane %v4389_v44, %v15167_v5 }
 0x4d6   :  { %22274 = vst [vmem:[#allocation180_spill] sm:$0xff] %v16676_v3  ;;  %v16682_v58 = vcombine.low %v6485_v8, %v6492_v2  ;;  %v6173_v55 = vrot.slane %v16676_v3, 1 }
 0x4d7   :  { %22275 = vst [vmem:[#allocation181_spill] sm:$0xff] %v16679_v11  ;;  %v4390_v34 = vmax.f32 %v4187_v42, 0.0  ;;  %v4645_v53 = vrot.slane %v4631_v62, %v15167_v5  ;;  %v4646_v33 = vcombine.high %v4638_v25, %v4638_v25  ;;  %v5446_v61 = vcombine.low %v4630_v35, %v4638_v25 }
 0x4d8   :  { %22276 = vst [vmem:[#allocation182_spill] sm:$0xff] %v16682_v58  ;;  %v4191_v20 = vpop.f32.mrb[22].mxu0  ;;  %v6008_v15 = vcombine.low %v16679_v11, %v6007_v37 }
 0x4d9   :  { %v4648_v31 = vcombine.high %v4390_v34, %v4390_v34  ;;  %v16687_v52 = vrot.slane %v4390_v34, %v15167_v5  ;;  %v4192_v21 = vadd.f32 %v16497_v63, %v4191_v20  ;;  %v10671_v4 = vpop.f32.mrb[23].mxu0  ;;  %v4647_v10 = vcombine.high %v4645_v53, %v4645_v53 }
 0x4da   :  { %v5447_v49 = vcombine.low %v4646_v33, %v4645_v53  ;;  %v6502_v18 = vcombine.low %v4638_v25, %v4646_v33  ;;  %v16696_v2 = vrot.slane %v6008_v15, 1  ;;  %v5454_v8 = vrot.slane %v5446_v61, %v15167_v5 }
 0x4db   :  { %22277 = vst [vmem:[#allocation183_spill] sm:$0xff] %v16687_v52  ;;  %v4662_v44 = vrot.slane %v4648_v31, %v15167_v5  ;;  %v16694_v35 = vcombine.high %v16687_v52, %v16687_v52  ;;  %v4391_v51 = vmax.f32 %v4192_v21, 0.0  ;;  %v6503_v42 = vcombine.low %v4645_v53, %v4647_v10 }
 0x4dc   :  { %22279 = vst [vmem:[#allocation185_spill] sm:$0xff] %v16696_v2  ;;  %v5461_v37 = vrot.slane %v5447_v49, %v15167_v5  ;;  %v5463_v24 = vcombine.low %v4647_v10, %v16687_v52  ;;  %v4196_v62 = vpop.f32.mrb[24].mxu0  ;;  %6251 = vrot.lane.b32.xlu1 %v16696_v2, %s10958_s10  ;;  %v16717_v49 = vsel %vm146_vm0, %v6173_v55, %v16696_v2 }
 0x4dd   :  { %22278 = vst [vmem:[#allocation184_spill] sm:$0xff] %v16694_v35  ;;  %v4664_v25 = vcombine.high %v4662_v44, %v4662_v44  ;;  %v6015_v34 = vrot.slane %v16694_v35, %v15167_v5  ;;  %v4665_v20 = vcombine.high %v4391_v51, %v4391_v51  ;;  %v10674_v15 = vpop.f32.mrb[25].mxu0  ;;  %v4672_v53 = vrot.slane %v4391_v51, %v15167_v5 }
 0x4de   :  { %v16707_v31 = vcombine.low %v5454_v8, %v5461_v37  ;;  %v16710_v61 = vrot.slane %v5463_v24, %v15167_v5  ;;  %v4197_v21 = vadd.f32 %v16497_v63, %v4196_v62  ;;  %22282 = vst [vmem:[#allocation110_spill] sm:$0xff] %v16717_v49  ;;  %6249 = vrot.lane.b32.xlu0 %v16717_v49, %s10958_s10 }
 0x4df   :  { %v5471_v4 = vcombine.low %v4662_v44, %v4664_v25  ;;  %v4679_v10 = vrot.slane %v4665_v20, %v15167_v5  ;;  %v4680_v33 = vcombine.high %v4672_v53, %v4672_v53  ;;  %v6527_v7 = vcombine.low %v4664_v25, %v4672_v53 }
 0x4e0   :  { %22280 = vst [vmem:[#allocation25_spill] sm:$0xff] %v16707_v31  ;;  %22281 = vst [vmem:[#allocation186_spill] sm:$0xff] %v16710_v61  ;;  %v4392_v22 = vmax.f32 %v4197_v21, 0.0  ;;  %v6016_v8 = vcombine.low %v16710_v61, %v6015_v34  ;;  %v6510_v44 = vrot.slane %v6502_v18, %v15167_v5  ;;  %v6517_v24 = vrot.slane %v6503_v42, %v15167_v5 }
 0x4e1   :  { %v5479_v37 = vrot.slane %v5471_v4, %v15167_v5  ;;  %v16723_v51 = vcombine.high %v4679_v10, %v4679_v10  ;;  %v5472_v62 = vcombine.low %v4672_v53, %v4680_v33  ;;  %v6528_v20 = vcombine.low %v4680_v33, %v4679_v10 }
 0x4e2   :  { %v4682_v55 = vcombine.high %v4392_v22, %v4392_v22  ;;  %v16728_v15 = vrot.slane %v4392_v22, %v15167_v5  ;;  %v4201_v21 = vpop.f32.mrb[26].mxu0  ;;  %v16731_v0 = vrot.slane %v6016_v8, 1  ;;  %v6176_v34 = vrot.slane %v16707_v31, 1 }
 0x4e3   :  { %22283 = vst [vmem:[#allocation113_spill] sm:$0xff] %v16723_v51  ;;  %v5488_v25 = vcombine.low %v4679_v10, %v16723_v51  ;;  %v16734_v4 = vcombine.low %v6510_v44, %v6517_v24  ;;  %v5486_v32 = vrot.slane %v5472_v62, %v15167_v5  ;;  %v10677_v33 = vpop.f32.mrb[27].mxu0  ;;  %v4202_v8 = vadd.f32 %v16497_v63, %v4201_v21 }
 0x4e4   :  { %22284 = vst [vmem:[#allocation187_spill] sm:$0xff] %v16728_v15  ;;  %22285 = vst [vmem:[#allocation188_spill] sm:$0xff] %v16731_v0  ;;  %v4696_v18 = vrot.slane %v4682_v55, %v15167_v5  ;;  %v4697_v42 = vcombine.high %v16728_v15, %v16728_v15  ;;  %v6023_v22 = vrot.slane %v16728_v15, %v15167_v5  ;;  %6255 = vrot.lane.b32.xlu1 %v16731_v0, %s10958_s10 }
 0x4e5   :  { %22286 = vst [vmem:[#allocation189_spill] sm:$0xff] %v16734_v4  ;;  %v16743_v53 = vrot.slane %v5488_v25, %v15167_v5  ;;  %v16752_v44 = vsel %vm146_vm0, %v6176_v34, %v16731_v0  ;;  %v16754_v24 = vcombine.low %v5479_v37, %v5486_v32  ;;  %v6542_v55 = vrot.slane %v6528_v20, %v15167_v5 }
 0x4e6   :  { %22288 = vst [vmem:[#allocation191_spill] sm:$0xff] %v16752_v44  ;;  %v4698_v62 = vcombine.high %v4696_v18, %v4696_v18  ;;  %6253 = vrot.lane.b32.xlu0 %v16752_v44, %s10958_s10  ;;  %v4393_v25 = vmax.f32 %v4202_v8, 0.0  ;;  %v4206_v33 = vpop.f32.mrb[28].mxu0  ;;  %v6535_v21 = vrot.slane %v6527_v7, %v15167_v5  ;;  %v5496_v12 = vcombine.low %v4697_v42, %v4696_v18 }
 0x4e7   :  { %22287 = vst [vmem:[#allocation190_spill] sm:$0xff] %v16743_v53  ;;  %22289 = vst [vmem:[#allocation192_spill] sm:$0xff] %v16754_v24  ;;  %v6024_v10 = vcombine.low %v16743_v53, %v6023_v22  ;;  %v4207_v16 = vadd.f32 %v16497_v63, %v4206_v33  ;;  %v10680_v34 = vpop.f32.mrb[29].mxu0  ;;  %v6179_v32 = vrot.slane %v16754_v24, 1 }
 0x4e8   :  { %v6552_v6 = vcombine.low %v4696_v18, %v4698_v62  ;;  %v4699_v37 = vcombine.high %v4393_v25, %v4393_v25  ;;  %v4706_v27 = vrot.slane %v4393_v25, %v15167_v5  ;;  %v16766_v44 = vcombine.low %v6535_v21, %v6542_v55 }
 0x4e9   :  { %v16764_v0 = vrot.slane %v6024_v10, 1  ;;  %v4394_v20 = vmax.f32 %v4207_v16, 0.0  ;;  %v5504_v25 = vrot.slane %v5496_v12, %v15167_v5 }
 0x4ea   :  { %22291 = vst [vmem:[#allocation194_spill] sm:$0xff] %v16766_v44  ;;  %v16769_v8 = vrot.slane %v4699_v37, %v15167_v5  ;;  %v4714_v22 = vcombine.high %v4706_v27, %v4706_v27  ;;  %v5497_v7 = vcombine.low %v4698_v62, %v4706_v27  ;;  %v6560_v38 = vrot.slane %v6552_v6, %v15167_v5 }
 0x4eb   :  { %22290 = vst [vmem:[#allocation193_spill] sm:$0xff] %v16764_v0  ;;  %v4211_v42 = vpop.f32.mrb[30].mxu0  ;;  %6259 = vrot.lane.b32.xlu1 %v16764_v0, %s10958_s10  ;;  %v16775_v18 = vsel %vm146_vm0, %v6179_v32, %v16764_v0  ;;  %v4716_v10 = vcombine.high %v4394_v20, %v4394_v20  ;;  %v4723_v55 = vrot.slane %v4394_v20, %v15167_v5 }
 0x4ec   :  { %22292 = vst [vmem:[#allocation195_spill] sm:$0xff] %v16769_v8  ;;  %22293 = vst [vmem:[#allocation196_spill] sm:$0xff] %v16775_v18  ;;  %v4212_v16 = vadd.f32 %v16497_v63, %v4211_v42  ;;  %v10683_v33 = vpop.f32.mrb[31].mxu0  ;;  %6257 = vrot.lane.b32.xlu0 %v16775_v18, %s10958_s10  ;;  %v16784_v62 = vcombine.high %v16769_v8, %v16769_v8  ;;  %v5511_v21 = vrot.slane %v5497_v7, %v15167_v5 }
 0x4ed   :  { %v5513_v34 = vcombine.low %v4714_v22, %v16769_v8  ;;  %v6553_v32 = vcombine.low %v4706_v27, %v4714_v22  ;;  %v4730_v12 = vrot.slane %v4716_v10, %v15167_v5  ;;  %v4731_v37 = vcombine.high %v4723_v55, %v4723_v55 }
 0x4ee   :  { %22294 = vst [vmem:[#allocation197_spill] sm:$0xff] %v16784_v62  ;;  %v4395_v0 = vmax.f32 %v4212_v16, 0.0  ;;  %v16789_v20 = vcombine.low %v5504_v25, %v5511_v21  ;;  %v6031_v33 = vrot.slane %v16784_v62, %v15167_v5 }
 0x4ef   :  { %v16792_v42 = vrot.slane %v5513_v34, %v15167_v5  ;;  %v4732_v49 = vcombine.high %v4730_v12, %v4730_v12  ;;  %v5521_v7 = vcombine.low %v4723_v55, %v4731_v37  ;;  %v6577_v2 = vcombine.low %v4731_v37, %v4730_v12 }
 0x4f0   :  { %22295 = vst [vmem:[#allocation198_spill] sm:$0xff] %v16789_v20  ;;  %v4733_v39 = vcombine.high %v4395_v0, %v4395_v0  ;;  %v4216_v27 = vpop.f32.mrb[32].mxu0  ;;  %v4740_v22 = vrot.slane %v4395_v0, %v15167_v5 }
 0x4f1   :  { %22296 = vst [vmem:[#allocation199_spill] sm:$0xff] %v16792_v42  ;;  %v4217_v10 = vadd.f32 %v16497_v63, %v4216_v27  ;;  %v10686_v25 = vpop.f32.mrb[33].mxu0  ;;  %v6032_v16 = vcombine.low %v16792_v42, %v6031_v33  ;;  %v5522_v21 = vcombine.low %v4730_v12, %v4732_v49  ;;  %v5529_v47 = vrot.slane %v5521_v7, %v15167_v5 }
 0x4f2   :  { %v16802_v34 = vrot.slane %v4733_v39, %v15167_v5  ;;  %v16805_v43 = vcombine.high %v4740_v22, %v4740_v22  ;;  %v6578_v18 = vcombine.low %v4732_v49, %v4740_v22  ;;  %v6182_v12 = vrot.slane %v16789_v20, 1 }
 0x4f3   :  { %v4396_v55 = vmax.f32 %v4217_v10, 0.0  ;;  %v16807_v37 = vrot.slane %v6032_v16, 1  ;;  %v5536_v0 = vrot.slane %v5522_v21, %v15167_v5  ;;  %v6567_v21 = vrot.slane %v6553_v32, %v15167_v5 }
 0x4f4   :  { %22297 = vst [vmem:[#allocation200_spill] sm:$0xff] %v16802_v34  ;;  %22298 = vst [vmem:[#allocation201_spill] sm:$0xff] %v16805_v43  ;;  %v4749_v27 = vcombine.high %v16802_v34, %v16802_v34  ;;  %v4221_v33 = vpop.f32.mrb[34].mxu0  ;;  %v5538_v39 = vcombine.low %v4740_v22, %v16805_v43 }
 0x4f5   :  { %22299 = vst [vmem:[#allocation114_spill] sm:$0xff] %v16807_v37  ;;  %v4750_v25 = vcombine.high %v4396_v55, %v4396_v55  ;;  %v4757_v6 = vrot.slane %v4396_v55, %v15167_v5  ;;  %v4222_v49 = vadd.f32 %v16497_v63, %v4221_v33  ;;  %6263 = vrot.lane.b32.xlu1 %v16807_v37, %s10958_s10  ;;  %v10689_v10 = vpop.f32.mrb[35].mxu0 }
 0x4f6   :  { %v16819_v7 = vcombine.low %v5529_v47, %v5536_v0  ;;  %v16823_v16 = vsel %vm146_vm0, %v6182_v12, %v16807_v37  ;;  %v16829_v13 = vrot.slane %v5538_v39, %v15167_v5  ;;  %v6585_v47 = vrot.slane %v6577_v2, %v15167_v5 }
 0x4f7   :  { %22301 = vst [vmem:[#allocation202_spill] sm:$0xff] %v16823_v16  ;;  %v4764_v55 = vrot.slane %v4750_v25, %v15167_v5  ;;  %v4765_v33 = vcombine.high %v4757_v6, %v4757_v6  ;;  %v5546_v59 = vcombine.low %v4749_v27, %v4757_v6  ;;  %6261 = vrot.lane.b32.xlu0 %v16823_v16, %s10958_s10  ;;  %v4397_v12 = vmax.f32 %v4222_v49, 0.0 }
 0x4f8   :  { %22300 = vst [vmem:[#allocation117_spill] sm:$0xff] %v16819_v7  ;;  %22302 = vst [vmem:[#allocation203_spill] sm:$0xff] %v16829_v13  ;;  %v6039_v0 = vrot.slane %v16802_v34, %v15167_v5  ;;  %v4226_v32 = vpop.f32.mrb[36].mxu0  ;;  %v16837_v10 = vcombine.low %v6560_v38, %v6567_v21  ;;  %v6185_v25 = vrot.slane %v16819_v7, 1  ;;  %v6592_v21 = vrot.slane %v6578_v18, %v15167_v5 }
 0x4f9   :  { %v4766_v22 = vcombine.high %v4764_v55, %v4764_v55  ;;  %v5547_v37 = vcombine.low %v4765_v33, %v4764_v55  ;;  %v6602_v39 = vcombine.low %v4757_v6, %v4765_v33  ;;  %v10692_v20 = vpop.f32.mrb[37].mxu0  ;;  %v4767_v42 = vcombine.high %v4397_v12, %v4397_v12 }
 0x4fa   :  { %22303 = vst [vmem:[#allocation204_spill] sm:$0xff] %v16837_v10  ;;  %v16841_v27 = vrot.slane %v4397_v12, %v15167_v5  ;;  %v4227_v16 = vadd.f32 %v16497_v63, %v4226_v32  ;;  %v6040_v2 = vcombine.low %v16829_v13, %v6039_v0  ;;  %v5554_v24 = vrot.slane %v5546_v59, %v15167_v5 }
 0x4fb   :  { %v5561_v49 = vrot.slane %v5547_v37, %v15167_v5  ;;  %v6603_v38 = vcombine.low %v4764_v55, %v4766_v22  ;;  %v4781_v6 = vrot.slane %v4767_v42, %v15167_v5  ;;  %v16858_v59 = vcombine.low %v6585_v47, %v6592_v21 }
 0x4fc   :  { %22304 = vst [vmem:[#allocation205_spill] sm:$0xff] %v16841_v27  ;;  %v16851_v20 = vcombine.high %v16841_v27, %v16841_v27  ;;  %v5563_v33 = vcombine.low %v4766_v22, %v16841_v27  ;;  %v4398_v12 = vmax.f32 %v4227_v16, 0.0  ;;  %v16856_v0 = vrot.slane %v6040_v2, 1 }
 0x4fd   :  { %v16854_v7 = vcombine.low %v5554_v24, %v5561_v49  ;;  %22308 = vst [vmem:[#allocation209_spill] sm:$0xff] %v16858_v59  ;;  %v6617_v37 = vrot.slane %v6603_v38, %v15167_v5  ;;  %v16861_v55 = vcombine.high %v4781_v6, %v4781_v6 }
 0x4fe   :  { %22305 = vst [vmem:[#allocation206_spill] sm:$0xff] %v16851_v20  ;;  %v4231_v32 = vpop.f32.mrb[38].mxu0  ;;  %22307 = vst [vmem:[#allocation208_spill] sm:$0xff] %v16856_v0  ;;  %v16864_v18 = vrot.slane %v5563_v33, %v15167_v5  ;;  %v6047_v42 = vrot.slane %v16851_v20, %v15167_v5  ;;  %v4784_v22 = vcombine.high %v4398_v12, %v4398_v12  ;;  %6267 = vrot.lane.b32.xlu1 %v16856_v0, %s10958_s10 }
 0x4ff   :  { %22306 = vst [vmem:[#allocation207_spill] sm:$0xff] %v16854_v7  ;;  %22309 = vst [vmem:[#allocation210_spill] sm:$0xff] %v16861_v55  ;;  %v10695_v24 = vpop.f32.mrb[39].mxu0  ;;  %v16871_v2 = vrot.slane %v4398_v12, %v15167_v5  ;;  %v4232_v47 = vadd.f32 %v16497_v63, %v4231_v32  ;;  %v16878_v49 = vsel %vm146_vm0, %v6185_v25, %v16856_v0  ;;  %v16881_v21 = vpop.f32.mrb[0].mxu1 }
 0x500   :  { %22310 = vst [vmem:[#allocation74_spill] sm:$0xff] %v16864_v18  ;;  %22312 = vst [vmem:[#allocation75_spill] sm:$0xff] %v16878_v49  ;;  %v5571_v38 = vcombine.low %v4781_v6, %v16861_v55  ;;  %6265 = vrot.lane.b32.xlu0 %v16878_v49, %s10958_s10  ;;  %v6048_v33 = vcombine.low %v16864_v18, %v6047_v42  ;;  %v6610_v12 = vrot.slane %v6602_v39, %v15167_v5  ;;  %v10740_v16 = vpop.f32.mrb[1].mxu1 }
 0x501   :  { %22311 = vst [vmem:[#allocation211_spill] sm:$0xff] %v16871_v2  ;;  %v16888_v32 = vrot.slane %v4784_v22, %v15167_v5  ;;  %v16892_v24 = vcombine.high %v16871_v2, %v16871_v2  ;;  %v4399_v6 = vmax.f32 %v4232_v47, 0.0  ;;  %v6188_v49 = vrot.slane %v16854_v7, 1 }
 0x502   :  { %v16896_v0 = vrot.slane %v6048_v33, 1  ;;  %v16899_v13 = vcombine.low %v6610_v12, %v6617_v37  ;;  %v5579_v7 = vrot.slane %v5571_v38, %v15167_v5 }
 0x503   :  { %22313 = vst [vmem:[#allocation212_spill] sm:$0xff] %v16888_v32  ;;  %22314 = vst [vmem:[#allocation93_spill] sm:$0xff] %v16892_v24  ;;  %v16903_v39 = vcombine.high %v16888_v32, %v16888_v32  ;;  %v5572_v42 = vcombine.low %v16871_v2, %v16892_v24  ;;  %v4801_v18 = vcombine.high %v4399_v6, %v4399_v6  ;;  %v4311_v33 = vpop.f32.mrb[2].mxu1 }
 0x504   :  { %22315 = vst [vmem:[#allocation213_spill] sm:$0xff] %v16896_v0  ;;  %22316 = vst [vmem:[#allocation96_spill] sm:$0xff] %v16899_v13  ;;  %v4236_v25 = vpop.f32.mrb[40].mxu0  ;;  %v16910_v16 = vrot.slane %v4399_v6, %v15167_v5  ;;  %6271 = vrot.lane.b32.xlu1 %v16896_v0, %s10958_s10  ;;  %v16917_v12 = vsel %vm146_vm0, %v6188_v49, %v16896_v0  ;;  %v4312_v6 = vadd.f32 %v16497_v63, %v4311_v33  ;;  %v10743_v31 = vpop.f32.mrb[3].mxu1 }
 0x505   :  { %22317 = vst [vmem:[#allocation214_spill] sm:$0xff] %v16903_v39  ;;  %v4237_v47 = vadd.f32 %v16497_v63, %v4236_v25  ;;  %v10698_v37 = vpop.f32.mrb[41].mxu0  ;;  %22319 = vst [vmem:[#allocation216_spill] sm:$0xff] %v16917_v12  ;;  %v5586_v22 = vrot.slane %v5572_v42, %v15167_v5  ;;  %v16922_v53 = vrot.slane %v4801_v18, %v15167_v5  ;;  %6269 = vrot.lane.b32.xlu0 %v16917_v12, %s10958_s10 }
 0x506   :  { %22318 = vst [vmem:[#allocation215_spill] sm:$0xff] %v16910_v16  ;;  %v4816_v25 = vcombine.high %v16910_v16, %v16910_v16  ;;  %v4415_v0 = vmax.f32 %v4312_v6, 0.0  ;;  %v5588_v49 = vcombine.low %v16888_v32, %v16903_v39 }
 0x507   :  { %22320 = vst [vmem:[#allocation118_spill] sm:$0xff] %v16922_v53  ;;  %v16931_v37 = vcombine.low %v5579_v7, %v5586_v22  ;;  %v16935_v38 = vcombine.high %v16922_v53, %v16922_v53  ;;  %v4400_v42 = vmax.f32 %v4237_v47, 0.0  ;;  %v4316_v33 = vpop.f32.mrb[4].mxu1 }
 0x508   :  { %v4241_v18 = vpop.f32.mrb[42].mxu0  ;;  %v10746_v3 = vpop.f32.mrb[5].mxu1  ;;  %v5596_v11 = vcombine.low %v4816_v25, %v16922_v53  ;;  %v4317_v22 = vadd.f32 %v16497_v63, %v4316_v33  ;;  %v5073_v47 = vcombine.high %v4415_v0, %v4415_v0  ;;  %v16948_v6 = vrot.slane %v4415_v0, %v15167_v5 }
 0x509   :  { %22321 = vst [vmem:[#allocation121_spill] sm:$0xff] %v16931_v37  ;;  %22322 = vst [vmem:[#allocation2_spill] sm:$0xff] %v16935_v38  ;;  %v10701_v31 = vpop.f32.mrb[43].mxu0  ;;  %v4242_v61 = vadd.f32 %v16497_v63, %v4241_v18  ;;  %v16942_v7 = vrot.slane %v4400_v42, %v15167_v5  ;;  %v4818_v9 = vcombine.high %v4400_v42, %v4400_v42 }
 0x50a   :  { %v16957_v18 = vrot.slane %v5073_v47, %v15167_v5  ;;  %v16961_v33 = vcombine.high %v16948_v6, %v16948_v6  ;;  %v5604_v14 = vrot.slane %v5596_v11, %v15167_v5  ;;  %v16967_v17 = vmax.f32 %v4317_v22, 0.0 }
 0x50b   :  { %22323 = vst [vmem:[#allocation3_spill] sm:$0xff] %v16942_v7  ;;  %v16952_v31 = vcombine.high %v16942_v7, %v16942_v7  ;;  %v5597_v3 = vcombine.low %v16935_v38, %v16942_v7  ;;  %v4401_v25 = vmax.f32 %v4242_v61, 0.0  ;;  %v16970_v61 = vrot.slane %v5588_v49, %v15167_v5 }
 0x50c   :  { %v4246_v12 = vpop.f32.mrb[44].mxu0  ;;  %v16983_v22 = vcombine.high %v16957_v18, %v16957_v18 }
 0x50d   :  { %22324 = vst [vmem:[#allocation4_spill] sm:$0xff] %v16952_v31  ;;  %v5611_v0 = vrot.slane %v5597_v3, %v15167_v5  ;;  %v10704_v45 = vpop.f32.mrb[45].mxu0  ;;  %22325 = vst [vmem:[#allocation5_spill] sm:$0xff] %v16970_v61  ;;  %v4835_v57 = vcombine.high %v4401_v25, %v4401_v25  ;;  %v16977_v11 = vrot.slane %v4401_v25, %v15167_v5 }
 0x50e   :  { %v6055_v3 = vrot.slane %v16910_v16, %v15167_v5  ;;  %22328 = vst [vmem:[#allocation8_spill] sm:$0xff] %v16983_v22  ;;  %v4247_v42 = vadd.f32 %v16497_v63, %v4246_v12  ;;  %v17000_v16 = vrot.slane %v4818_v9, %v15167_v5 }
 0x50f   :  { %v16974_v39 = vcombine.low %v5604_v14, %v5611_v0  ;;  %22327 = vst [vmem:[#allocation7_spill] sm:$0xff] %v16977_v11  ;;  %v16986_v45 = vrot.slane %v4835_v57, %v15167_v5  ;;  %v16990_v56 = vcombine.high %v16977_v11, %v16977_v11  ;;  %v16994_v14 = vrot.slane %v16967_v17, %v15167_v5 }
 0x510   :  { %v4321_v49 = vpop.f32.mrb[6].mxu1  ;;  %v6056_v47 = vcombine.low %v16970_v61, %v6055_v3  ;;  %22331 = vst [vmem:[#allocation11_spill] sm:$0xff] %v17000_v16  ;;  %v17010_v12 = vmax.f32 %v4247_v42, 0.0  ;;  %v5613_v57 = vcombine.low %v16952_v31, %v17000_v16  ;;  %v6191_v42 = vrot.slane %v16931_v37, 1 }
 0x511   :  { %22326 = vst [vmem:[#allocation6_spill] sm:$0xff] %v16974_v39  ;;  %22329 = vst [vmem:[#allocation9_spill] sm:$0xff] %v16986_v45  ;;  %v10749_v25 = vpop.f32.mrb[7].mxu1  ;;  %v4322_v0 = vadd.f32 %v16497_v63, %v4321_v49  ;;  %v17006_v11 = vcombine.high %v16986_v45, %v16986_v45  ;;  %v17031_v43 = vcombine.high %v17000_v16, %v17000_v16 }
 0x512   :  { %22330 = vst [vmem:[#allocation10_spill] sm:$0xff] %v16990_v56  ;;  %v17014_v9 = vrot.slane %v17010_v12, %v15167_v5  ;;  %v17016_v61 = vrot.slane %v6056_v47, 1 }
 0x513   :  { %22332 = vst [vmem:[#allocation12_spill] sm:$0xff] %v17006_v11  ;;  %v4417_v27 = vmax.f32 %v4322_v0, 0.0  ;;  %22335 = vst [vmem:[#allocation15_spill] sm:$0xff] %v17031_v43  ;;  %v6063_v44 = vrot.slane %v17031_v43, %v15167_v5 }
 0x514   :  { %v4326_v25 = vpop.f32.mrb[8].mxu1  ;;  %22333 = vst [vmem:[#allocation13_spill] sm:$0xff] %v17014_v9  ;;  %22334 = vst [vmem:[#allocation14_spill] sm:$0xff] %v17016_v61  ;;  %6275 = vrot.lane.b32.xlu1 %v17016_v61, %s10958_s10  ;;  %v17042_v0 = vsel %vm146_vm0, %v6191_v42, %v17016_v61 }
 0x515   :  { %v4251_v13 = vpop.f32.mrb[46].mxu0  ;;  %v10752_v3 = vpop.f32.mrb[9].mxu1  ;;  %v5107_v59 = vcombine.high %v4417_v27, %v4417_v27  ;;  %v17021_v34 = vrot.slane %v4417_v27, %v15167_v5  ;;  %22336 = vst [vmem:[#allocation16_spill] sm:$0xff] %v17042_v0  ;;  %6273 = vrot.lane.b32.xlu0 %v17042_v0, %s10958_s10 }
 0x516   :  { %v10707_v49 = vpop.f32.mrb[47].mxu0 }
 0x517   :  { %v4252_v49 = vadd.f32 %v16497_v63, %v4251_v13  ;;  %v17034_v27 = vrot.slane %v5107_v59, %v15167_v5  ;;  %v17038_v37 = vcombine.high %v17021_v34, %v17021_v34 }
 0x519   :  { %v4331_v47 = vpop.f32.mrb[10].mxu1  ;;  %v17046_v13 = vmax.f32 %v4252_v49, 0.0  ;;  %v17053_v59 = vcombine.high %v17034_v27, %v17034_v27 }
 0x51a   :  { %v4256_v20 = vpop.f32.mrb[48].mxu0  ;;  %v10755_v10 = vpop.f32.mrb[11].mxu1  ;;  %v4332_v8 = vadd.f32 %v16497_v63, %v4331_v47 }
 0x51b   :  { %v10710_v3 = vpop.f32.mrb[49].mxu0  ;;  %v4869_v42 = vcombine.high %v17046_v13, %v17046_v13  ;;  %v4327_v10 = vadd.f32 %v16497_v63, %v4326_v25  ;;  %v4257_v0 = vadd.f32 %v16497_v63, %v4256_v20 }
 0x51c   :  { %v17049_v3 = vrot.slane %v5613_v57, %v15167_v5  ;;  %v4419_v35 = vmax.f32 %v4332_v8, 0.0 }
 0x51d   :  { %v4336_v49 = vpop.f32.mrb[12].mxu1  ;;  %v17067_v16 = vrot.slane %v4869_v42, %v15167_v5  ;;  %v4418_v51 = vmax.f32 %v4327_v10, 0.0  ;;  %v4404_v4 = vmax.f32 %v4257_v0, 0.0 }
 0x51e   :  { %22337 = vst [vmem:[#allocation122_spill] sm:$0xff] %v17049_v3  ;;  %v4261_v62 = vpop.f32.mrb[50].mxu0  ;;  %v10758_v15 = vpop.f32.mrb[13].mxu1  ;;  %v6064_v25 = vcombine.low %v17049_v3, %v6063_v44  ;;  %v5141_v42 = vcombine.high %v4419_v35, %v4419_v35  ;;  %v17082_v44 = vrot.slane %v4419_v35, %v15167_v5 }
 0x51f   :  { %v10713_v61 = vpop.f32.mrb[51].mxu0  ;;  %22338 = vst [vmem:[#allocation125_spill] sm:$0xff] %v17067_v16  ;;  %v5124_v57 = vcombine.high %v4418_v51, %v4418_v51  ;;  %v17075_v47 = vrot.slane %v4418_v51, %v15167_v5  ;;  %v17078_v15 = vrot.slane %v4404_v4, %v15167_v5  ;;  %v4886_v0 = vcombine.high %v4404_v4, %v4404_v4 }
 0x520   :  { %v17072_v61 = vcombine.high %v17067_v16, %v17067_v16  ;;  %22342 = vst [vmem:[#allocation20_spill] sm:$0xff] %v17082_v44  ;;  %v17084_v3 = vrot.slane %v6064_v25, 1  ;;  %v17097_v4 = vrot.slane %v5141_v42, %v15167_v5  ;;  %v17101_v35 = vcombine.high %v17082_v44, %v17082_v44  ;;  %v17114_v42 = vld [vmem:[%s20383_s2] ss:$0 sm:$0xff]  ;;  %s10969_s2 = smov 40  }
 0x521   :  { %v4341_v52 = vpop.f32.mrb[14].mxu1  ;;  %22340 = vst [vmem:[#allocation18_spill] sm:$0xff] %v17075_v47  ;;  %22341 = vst [vmem:[#allocation19_spill] sm:$0xff] %v17078_v15  ;;  %v5138_v8 = vrot.slane %v5124_v57, %v15167_v5  ;;  %v17088_v43 = vcombine.high %v17075_v47, %v17075_v47  ;;  %v4307_v19 = vadd.f32 %v17114_v42, %v16881_v21 }
 0x522   :  { %v4266_v20 = vpop.f32.mrb[52].mxu0  ;;  %22339 = vst [vmem:[#allocation17_spill] sm:$0xff] %v17072_v61  ;;  %v10761_v10 = vpop.f32.mrb[15].mxu1  ;;  %22343 = vst [vmem:[#allocation21_spill] sm:$0xff] %v17084_v3  ;;  %6279 = vrot.lane.b32.xlu1 %v17084_v3, %s10958_s10  ;;  %v4262_v26 = vadd.f32 %v17114_v42, %v4261_v62  ;;  %v4337_v41 = vadd.f32 %v17114_v42, %v4336_v49 }
 0x523   :  { %v10716_v63 = vpop.f32.mrb[53].mxu0  ;;  %22344 = vst [vmem:[#allocation22_spill] sm:$0xff] %v17088_v43  ;;  %v17092_v58 = vcombine.high %v5138_v8, %v5138_v8  ;;  %22346 = vst [vmem:[#allocation24_spill] sm:$0xff] %v17101_v35  ;;  %v17109_v10 = vrot.slane %v4886_v0, %v15167_v5  ;;  %v6194_v0 = vrot.slane %v16974_v39, 1  ;;  %v4267_v62 = vadd.f32 %v17114_v42, %v4266_v20 }
 0x524   :  { %v4405_v39 = vmax.f32 %v4262_v26, 0.0  ;;  %v4414_v54 = vmax.f32 %v4307_v19, 0.0  ;;  %v4342_v20 = vadd.f32 %v17114_v42, %v4341_v52 }
 0x525   :  { %22345 = vst [vmem:[#allocation23_spill] sm:$0xff] %v17092_v58  ;;  %v4346_v57 = vpop.f32.mrb[16].mxu1  ;;  %v5821_v48 = vcombine.low %v5138_v8, %v17092_v58  ;;  %v17135_v51 = vcombine.high %v17109_v10, %v17109_v10  ;;  %v17139_v8 = vsel %vm146_vm0, %v6194_v0, %v17084_v3  ;;  %v4406_v26 = vmax.f32 %v4267_v62, 0.0 }
 0x526   :  { %v4271_v63 = vpop.f32.mrb[54].mxu0  ;;  %v10764_v30 = vpop.f32.mrb[17].mxu1  ;;  %22348 = vst [vmem:[#allocation27_spill] sm:$0xff] %v17139_v8  ;;  %6277 = vrot.lane.b32.xlu0 %v17139_v8, %s10958_s10  ;;  %v17153_v0 = vrot.slane %v4405_v39, %v15167_v5  ;;  %v5056_v46 = vcombine.high %v4414_v54, %v4414_v54  ;;  %v4347_v61 = vadd.f32 %v17114_v42, %v4346_v57 }
 0x527   :  { %v10719_v25 = vpop.f32.mrb[55].mxu0  ;;  %v5829_v21 = vrot.slane %v5821_v48, %v15167_v5  ;;  %22347 = vst [vmem:[#allocation26_spill] sm:$0xff] %v17135_v51  ;;  %v4920_v62 = vcombine.high %v4406_v26, %v4406_v26  ;;  %v17187_v36 = vrot.slane %v4406_v26, %v15167_v5  ;;  %v17202_v52 = vrot.slane %v4414_v54, %v15167_v5 }
 0x528   :  { %v5822_v25 = vcombine.low %v17082_v44, %v17101_v35  ;;  %22351 = vst [vmem:[#allocation218_spill] sm:$0xff] %v17153_v0  ;;  %v17218_v54 = vrot.slane %v5056_v46, %v15167_v5 }
 0x529   :  { %v17128_v50 = vpop.f32.mrb[18].mxu1  ;;  %22357 = vst [vmem:[#allocation32_spill] sm:$0xff] %v17187_v36  ;;  %v17198_v9 = vrot.slane %v4920_v62, %v15167_v5  ;;  %v17234_v46 = vcombine.high %v17202_v52, %v17202_v52 }
 0x52a   :  { %v17122_v30 = vpop.f32.mrb[56].mxu0  ;;  %v5836_v1 = vrot.slane %v5822_v25, %v15167_v5  ;;  %v10767_v60 = vpop.f32.mrb[19].mxu1  ;;  %v4903_v25 = vcombine.high %v4405_v39, %v4405_v39  ;;  %v17167_v39 = vcombine.high %v17153_v0, %v17153_v0  ;;  %22361 = vst [vmem:[#allocation36_spill] sm:$0xff] %v17218_v54 }
 0x52b   :  { %v10722_v29 = vpop.f32.mrb[57].mxu0  ;;  %v4420_v60 = vmax.f32 %v4337_v41, 0.0  ;;  %22359 = vst [vmem:[#allocation34_spill] sm:$0xff] %v17198_v9  ;;  %v17211_v44 = vcombine.high %v17198_v9, %v17198_v9  ;;  %22364 = vst [vmem:[#allocation39_spill] sm:$0xff] %v17234_v46 }
 0x52c   :  { %v17144_v29 = vcombine.high %v17097_v4, %v17097_v4  ;;  %v17146_v48 = vcombine.low %v5829_v21, %v5836_v1  ;;  %v4272_v21 = vadd.f32 %v17114_v42, %v4271_v63  ;;  %v17163_v41 = vrot.slane %v4903_v25, %v15167_v5  ;;  %22354 = vst [vmem:[#allocation126_spill] sm:$0xff] %v17167_v39 }
 0x52d   :  { %v17156_v19 = vpop.f32.mrb[20].mxu1  ;;  %v5158_v23 = vcombine.high %v4420_v60, %v4420_v60  ;;  %v17159_v1 = vrot.slane %v4420_v60, %v15167_v5  ;;  %22360 = vst [vmem:[#allocation35_spill] sm:$0xff] %v17211_v44 }
 0x52e   :  { %22349 = vst [vmem:[#allocation28_spill] sm:$0xff] %v17144_v29  ;;  %22350 = vst [vmem:[#allocation217_spill] sm:$0xff] %v17146_v48  ;;  %v17150_v49 = vpop.f32.mrb[58].mxu0  ;;  %v10770_v8 = vpop.f32.mrb[21].mxu1  ;;  %v17182_v25 = vcombine.high %v17163_v41, %v17163_v41  ;;  %v4407_v11 = vmax.f32 %v4272_v21, 0.0  ;;  %v4422_v21 = vmax.f32 %v4347_v61, 0.0 }
 0x52f   :  { %v10725_v3 = vpop.f32.mrb[59].mxu0  ;;  %22352 = vst [vmem:[#allocation29_spill] sm:$0xff] %v17159_v1  ;;  %22353 = vst [vmem:[#allocation30_spill] sm:$0xff] %v17163_v41  ;;  %v5173_v60 = vcombine.high %v17159_v1, %v17159_v1  ;;  %v4282_v38 = vadd.f32 %v17114_v42, %v17150_v49 }
 0x530   :  { %v17172_v3 = vrot.slane %v5158_v23, %v15167_v5  ;;  %22356 = vst [vmem:[#allocation31_spill] sm:$0xff] %v17182_v25  ;;  %v17189_v23 = vmax.f32 %v4342_v20, 0.0  ;;  %v4935_v20 = vcombine.high %v17187_v36, %v17187_v36  ;;  %v17230_v58 = vrot.slane %v4407_v11, %v15167_v5 }
 0x531   :  { %v17191_v40 = vpop.f32.mrb[22].mxu1  ;;  %v4937_v53 = vcombine.high %v4407_v11, %v4407_v11 }
 0x532   :  { %22355 = vst [vmem:[#allocation129_spill] sm:$0xff] %v17172_v3  ;;  %v17178_v8 = vpop.f32.mrb[60].mxu0  ;;  %v17195_v63 = vcombine.high %v17172_v3, %v17172_v3  ;;  %v10773_v35 = vpop.f32.mrb[23].mxu1  ;;  %v5846_v26 = vcombine.low %v5173_v60, %v17172_v3  ;;  %22363 = vst [vmem:[#allocation38_spill] sm:$0xff] %v17230_v58  ;;  %v5647_v61 = vcombine.low %v17211_v44, %v17230_v58 }
 0x533   :  { %v10728_v28 = vpop.f32.mrb[61].mxu0  ;;  %v17222_v35 = vrot.slane %v17189_v23, %v15167_v5  ;;  %v4277_v3 = vadd.f32 %v17114_v42, %v17122_v30 }
 0x534   :  { %22358 = vst [vmem:[#allocation33_spill] sm:$0xff] %v17195_v63  ;;  %v5646_v28 = vcombine.low %v4935_v20, %v17198_v9  ;;  %v5854_v31 = vrot.slane %v5846_v26, %v15167_v5  ;;  %v5661_v2 = vrot.slane %v5647_v61, %v15167_v5  ;;  %v4352_v61 = vadd.f32 %v17114_v42, %v17128_v50 }
 0x535   :  { %22362 = vst [vmem:[#allocation37_spill] sm:$0xff] %v17222_v35  ;;  %v17224_v62 = vpop.f32.mrb[24].mxu1  ;;  %v17239_v7 = vcombine.high %v17222_v35, %v17222_v35  ;;  %v5847_v20 = vcombine.low %v17195_v63, %v17222_v35  ;;  %v17257_v63 = vrot.slane %v4422_v21, %v15167_v5 }
 0x536   :  { %v17215_v57 = vpop.f32.mrb[62].mxu0  ;;  %v10776_v48 = vpop.f32.mrb[25].mxu1  ;;  %v5654_v44 = vrot.slane %v5646_v28, %v15167_v5  ;;  %v4423_v30 = vmax.f32 %v4352_v61, 0.0  ;;  %v5621_v61 = vcombine.low %v17109_v10, %v17135_v51  ;;  %v5638_v10 = vcombine.low %v17163_v41, %v17182_v25 }
 0x537   :  { %v10731_v60 = vpop.f32.mrb[63].mxu0  ;;  %v5192_v48 = vcombine.high %v4422_v21, %v4422_v21  ;;  %v5861_v26 = vrot.slane %v5847_v20, %v15167_v5  ;;  %v17272_v11 = vcombine.high %v17257_v63, %v17257_v63  ;;  %v4408_v21 = vmax.f32 %v4277_v3, 0.0 }
 0x538   :  { %v17245_v60 = vcombine.high %v17230_v58, %v17230_v58  ;;  %v17278_v28 = vcombine.low %v5654_v44, %v5661_v2  ;;  %v17374_v25 = vrot.slane %v5638_v10, %v15167_v5 }
 0x539   :  { %v17259_v32 = vpop.f32.mrb[26].mxu1  ;;  %v17265_v1 = vcombine.low %v5854_v31, %v5861_v26  ;;  %v17268_v20 = vrot.slane %v5192_v48, %v15167_v5  ;;  %v5763_v31 = vcombine.low %v17234_v46, %v17218_v54  ;;  %v17287_v48 = vrot.slane %v4937_v53, %v15167_v5 }
 0x53a   :  { %22365 = vst [vmem:[#allocation40_spill] sm:$0xff] %v17245_v60  ;;  %v17251_v9 = vpop.f32.mrb[64].mxu0  ;;  %v10779_v55 = vpop.f32.mrb[27].mxu1  ;;  %22368 = vst [vmem:[#allocation43_spill] sm:$0xff] %v17278_v28  ;;  %v4954_v3 = vcombine.high %v4408_v21, %v4408_v21  ;;  %v17296_v50 = vrot.slane %v4408_v21, %v15167_v5  ;;  %v5771_v53 = vcombine.low %v16948_v6, %v16961_v33 }
 0x53b   :  { %v10734_v24 = vpop.f32.mrb[65].mxu0  ;;  %22366 = vst [vmem:[#allocation41_spill] sm:$0xff] %v17265_v1  ;;  %22369 = vst [vmem:[#allocation44_spill] sm:$0xff] %v17287_v48  ;;  %v5622_v26 = vcombine.low %v17153_v0, %v17167_v39  ;;  %v17306_v49 = vcombine.high %v17268_v20, %v17268_v20  ;;  %v17342_v51 = vrot.slane %v5763_v31, %v15167_v5 }
 0x53c   :  { %v17276_v24 = vcombine.high %v17218_v54, %v17218_v54  ;;  %v4357_v54 = vadd.f32 %v17114_v42, %v17156_v19  ;;  %v17309_v1 = vrot.slane %v4954_v3, %v15167_v5  ;;  %v17313_v21 = vcombine.high %v17296_v50, %v17296_v50  ;;  %22378 = vst [vmem:[#allocation221_spill] sm:$0xff] %v17374_v25 }
 0x53d   :  { %v17293_v2 = vpop.f32.mrb[28].mxu1  ;;  %v5209_v19 = vcombine.high %v4423_v30, %v4423_v30  ;;  %v5636_v46 = vrot.slane %v5622_v26, %v15167_v5  ;;  %22374 = vst [vmem:[#allocation47_spill] sm:$0xff] %v17342_v51  ;;  %v5629_v26 = vrot.slane %v5621_v61, %v15167_v5 }
 0x53e   :  { %22367 = vst [vmem:[#allocation42_spill] sm:$0xff] %v17276_v24  ;;  %v17282_v55 = vpop.f32.mrb[66].mxu0  ;;  %v10782_v35 = vpop.f32.mrb[29].mxu1  ;;  %22370 = vst [vmem:[#allocation45_spill] sm:$0xff] %v17309_v1  ;;  %v17329_v58 = vcombine.high %v17309_v1, %v17309_v1  ;;  %v4424_v6 = vmax.f32 %v4357_v54, 0.0  ;;  %v5671_v61 = vcombine.low %v17296_v50, %v17313_v21 }
 0x53f   :  { %v10737_v44 = vpop.f32.mrb[67].mxu0  ;;  %22371 = vst [vmem:[#allocation130_spill] sm:$0xff] %v17313_v21  ;;  %v17316_v35 = vrot.slane %v4423_v30, %v15167_v5  ;;  %v17334_v39 = vrot.slane %v5209_v19, %v15167_v5  ;;  %v17347_v30 = vrot.slane %v5771_v53, %v15167_v5  ;;  %v6071_v19 = vrot.slane %v17187_v36, %v15167_v5 }
 0x540   :  { %v4409_v44 = vmax.f32 %v4282_v38, 0.0  ;;  %v5663_v38 = vcombine.low %v17245_v60, %v17287_v48  ;;  %22372 = vst [vmem:[#allocation133_spill] sm:$0xff] %v17329_v58  ;;  %v5226_v15 = vcombine.high %v4424_v6, %v4424_v6  ;;  %v17366_v54 = vrot.slane %v4424_v6, %v15167_v5 }
 0x541   :  { %22373 = vst [vmem:[#allocation46_spill] sm:$0xff] %v17334_v39  ;;  %v5225_v53 = vcombine.high %v17334_v39, %v17334_v39  ;;  %v17376_v31 = vcombine.low %v5629_v26, %v5636_v46  ;;  %v6072_v10 = vcombine.low %v17374_v25, %v6071_v19  ;;  %v4287_v26 = vadd.f32 %v17114_v42, %v17178_v8 }
 0x542   :  { %v17325_v3 = vrot.slane %v4409_v44, %v15167_v5  ;;  %v4971_v0 = vcombine.high %v4409_v44, %v4409_v44  ;;  %v17356_v44 = vcombine.high %v17287_v48, %v17287_v48  ;;  %v17361_v60 = vrot.slane %v5663_v38, %v15167_v5  ;;  %22377 = vst [vmem:[#allocation220_spill] sm:$0xff] %v17366_v54 }
 0x543   :  { %22379 = vst [vmem:[#allocation223_spill] sm:$0xff] %v17376_v31  ;;  %v5672_v38 = vcombine.low %v17309_v1, %v17329_v58  ;;  %v17381_v48 = vrot.slane %v5226_v15, %v15167_v5  ;;  %v17385_v6 = vcombine.high %v17366_v54, %v17366_v54  ;;  %v5896_v50 = vcombine.low %v5225_v53, %v17366_v54 }
 0x544   :  { %22375 = vst [vmem:[#allocation219_spill] sm:$0xff] %v17356_v44  ;;  %22376 = vst [vmem:[#allocation87_spill] sm:$0xff] %v17361_v60  ;;  %v17371_v36 = vrot.slane %v4971_v0, %v15167_v5  ;;  %v17390_v0 = vcombine.high %v17325_v3, %v17325_v3  ;;  %v6197_v46 = vrot.slane %v17376_v31, 1  ;;  %v6198_v39 = vrot.slane %v6072_v10, 1 }
 0x545   :  { %22380 = vst [vmem:[#allocation224_spill] sm:$0xff] %v17381_v48  ;;  %22381 = vst [vmem:[#allocation226_spill] sm:$0xff] %v17385_v6  ;;  %v17398_v15 = vcombine.high %v17381_v48, %v17381_v48  ;;  %v5897_v58 = vcombine.low %v17385_v6, %v17381_v48  ;;  %v5904_v53 = vrot.slane %v5896_v50, %v15167_v5  ;;  %v4410_v1 = vmax.f32 %v4287_v26, 0.0 }
 0x546   :  { %v4987_v19 = vcombine.high %v17371_v36, %v17371_v36  ;;  %v4362_v8 = vadd.f32 %v17114_v42, %v17191_v40  ;;  %v4292_v21 = vadd.f32 %v17114_v42, %v17215_v57  ;;  %v4367_v50 = vadd.f32 %v17114_v42, %v17224_v62  ;;  %6283 = vrot.lane.b32.xlu1 %v6198_v39, %s10958_s10 }
 0x547   :  { %v5911_v25 = vrot.slane %v5897_v58, %v15167_v5  ;;  %v6199_v10 = vsel %vm146_vm0, %v6197_v46, %v6198_v39  ;;  %v4988_v26 = vcombine.high %v4410_v1, %v4410_v1  ;;  %v17419_v41 = vrot.slane %v4410_v1, %v15167_v5 }
 0x548   :  { %v4425_v40 = vmax.f32 %v4362_v8, 0.0  ;;  %6281 = vrot.lane.b32.xlu0 %v6199_v10, %s10958_s10  ;;  %v4411_v58 = vmax.f32 %v4292_v21, 0.0  ;;  %v4426_v31 = vmax.f32 %v4367_v50, 0.0  ;;  %v6079_v57 = vrot.slane %v17356_v44, %v15167_v5 }
 0x549   :  { %22382 = vst [vmem:[#allocation227_spill] sm:$0xff] %v17419_v41  ;;  %v17421_v6 = vcombine.low %v5904_v53, %v5911_v25  ;;  %v17427_v62 = vrot.slane %v4988_v26, %v15167_v5  ;;  %v17431_v39 = vcombine.high %v17419_v41, %v17419_v41  ;;  %v5696_v1 = vcombine.low %v4987_v19, %v17419_v41 }
 0x54a   :  { %v5243_v46 = vcombine.high %v4425_v40, %v4425_v40  ;;  %v17435_v25 = vrot.slane %v4425_v40, %v15167_v5  ;;  %v5005_v53 = vcombine.high %v4411_v58, %v4411_v58  ;;  %v17438_v21 = vrot.slane %v4411_v58, %v15167_v5 }
 0x54b   :  { %22383 = vst [vmem:[#allocation228_spill] sm:$0xff] %v17421_v6  ;;  %22384 = vst [vmem:[#allocation229_spill] sm:$0xff] %v17427_v62  ;;  %v5260_v8 = vcombine.high %v4426_v31, %v4426_v31  ;;  %v17442_v50 = vcombine.high %v17427_v62, %v17427_v62  ;;  %v5697_v10 = vcombine.low %v17431_v39, %v17427_v62 }
 0x54c   :  { %22385 = vst [vmem:[#allocation55_spill] sm:$0xff] %v17431_v39  ;;  %22386 = vst [vmem:[#allocation56_spill] sm:$0xff] %v17435_v25  ;;  %v5704_v26 = vrot.slane %v5696_v1, %v15167_v5  ;;  %v17450_v40 = vrot.slane %v5243_v46, %v15167_v5  ;;  %v17454_v58 = vcombine.high %v17435_v25, %v17435_v25 }
 0x54d   :  { %22387 = vst [vmem:[#allocation230_spill] sm:$0xff] %v17438_v21  ;;  %v5019_v48 = vrot.slane %v5005_v53, %v15167_v5  ;;  %v5711_v54 = vrot.slane %v5697_v10, %v15167_v5  ;;  %v17464_v19 = vcombine.high %v17438_v21, %v17438_v21  ;;  %v22390_v39 = vcombine.low %v16961_v33, %v16957_v18 }
 0x54e   :  { %22388 = vst [vmem:[#allocation231_spill] sm:$0xff] %v17454_v58  ;;  %v5686_v53 = vrot.slane %v5672_v38, %v15167_v5  ;;  %v17477_v10 = vcombine.high %v17450_v40, %v17450_v40  ;;  %v22392_v6 = vcombine.low %v16957_v18, %v16983_v22  ;;  %v22393_v33 = vcombine.high %v16967_v17, %v16967_v17 }
 0x54f   :  { %22389 = vst [vmem:[#allocation299_spill] sm:$0xff] %v17464_v19  ;;  %v17472_v41 = vrot.slane %v22390_v39, %v15167_v5  ;;  %v17493_v38 = vcombine.low %v5704_v26, %v5711_v54  ;;  %v5679_v62 = vrot.slane %v5671_v61, %v15167_v5  ;;  %v17501_v44 = vrot.slane %v4426_v31, %v15167_v5 }
 0x550   :  { %v17485_v46 = vrot.slane %v22392_v6, %v15167_v5  ;;  %v17491_v39 = vrot.slane %v22393_v33, %v15167_v5  ;;  %v17504_v18 = vrot.slane %v5260_v8, %v15167_v5  ;;  %v5688_v17 = vcombine.low %v17325_v3, %v17390_v0 }
 0x551   :  { %22391 = vst [vmem:[#allocation134_spill] sm:$0xff] %v17472_v41  ;;  %22395 = vst [vmem:[#allocation232_spill] sm:$0xff] %v17493_v38  ;;  %v17495_v41 = vcombine.high %v5019_v48, %v5019_v48  ;;  %v6087_v54 = vrot.slane %v17371_v36, %v15167_v5  ;;  %v6080_v6 = vcombine.low %v17361_v60, %v6079_v57  ;;  %v6200_v57 = vrot.slane %v17278_v28, 1 }
 0x552   :  { %22394 = vst [vmem:[#allocation137_spill] sm:$0xff] %v17491_v39  ;;  %22396 = vst [vmem:[#allocation233_spill] sm:$0xff] %v17501_v44  ;;  %v4297_v61 = vadd.f32 %v17114_v42, %v17251_v9  ;;  %v17513_v26 = vcombine.low %v5679_v62, %v5686_v53  ;;  %v17517_v31 = vcombine.high %v17501_v44, %v17501_v44 }
 0x553   :  { %22397 = vst [vmem:[#allocation234_spill] sm:$0xff] %v17504_v18  ;;  %v4372_v33 = vadd.f32 %v17114_v42, %v17259_v32  ;;  %v5721_v1 = vcombine.low %v5019_v48, %v17495_v41  ;;  %v17524_v22 = vrot.slane %v6080_v6, 1  ;;  %v17531_v53 = vcombine.high %v17504_v18, %v17504_v18 }
 0x554   :  { %22398 = vst [vmem:[#allocation235_spill] sm:$0xff] %v17513_v26  ;;  %v4412_v60 = vmax.f32 %v4297_v61, 0.0  ;;  %v4302_v8 = vadd.f32 %v17114_v42, %v17282_v55  ;;  %v4377_v61 = vadd.f32 %v17114_v42, %v17293_v2 }
 0x555   :  { %22399 = vst [vmem:[#allocation236_spill] sm:$0xff] %v17524_v22  ;;  %v4427_v62 = vmax.f32 %v4372_v33, 0.0  ;;  %22400 = vst [vmem:[#allocation237_spill] sm:$0xff] %v17531_v53  ;;  %6287 = vrot.lane.b32.xlu1 %v17524_v22, %s10958_s10  ;;  %v17539_v32 = vsel %vm146_vm0, %v6200_v57, %v17524_v22  ;;  %v17547_v33 = vrot.slane %v5688_v17, %v15167_v5 }
 0x556   :  { %22401 = vst [vmem:[#allocation238_spill] sm:$0xff] %v17539_v32  ;;  %v5022_v48 = vcombine.high %v4412_v60, %v4412_v60  ;;  %v17542_v6 = vrot.slane %v4412_v60, %v15167_v5  ;;  %6285 = vrot.lane.b32.xlu0 %v17539_v32, %s10958_s10  ;;  %v4413_v28 = vmax.f32 %v4302_v8, 0.0  ;;  %v17563_v2 = vmax.f32 %v4377_v61, 0.0 }
 0x557   :  { %22402 = vst [vmem:[#allocation239_spill] sm:$0xff] %v17547_v33  ;;  %v5277_v55 = vcombine.high %v4427_v62, %v4427_v62  ;;  %v17552_v9 = vrot.slane %v4427_v62, %v15167_v5  ;;  %v5729_v17 = vrot.slane %v5721_v1, %v15167_v5 }
 0x558   :  { %v17555_v57 = vrot.slane %v5022_v48, %v15167_v5  ;;  %v17559_v60 = vcombine.high %v17542_v6, %v17542_v6  ;;  %22404 = vst [vmem:[#allocation241_spill] sm:$0xff] %v17563_v2  ;;  %v5039_v1 = vcombine.high %v4413_v28, %v4413_v28  ;;  %v17589_v62 = vrot.slane %v4413_v28, %v15167_v5 }
 0x559   :  { %22403 = vst [vmem:[#allocation240_spill] sm:$0xff] %v17552_v9  ;;  %v17567_v32 = vrot.slane %v5277_v55, %v15167_v5  ;;  %v5292_v8 = vcombine.high %v17552_v9, %v17552_v9  ;;  %v6088_v9 = vcombine.low %v17547_v33, %v6087_v54  ;;  %v17600_v44 = vrot.slane %v17563_v2, %v15167_v5 }
 0x55a   :  { %v17575_v48 = vcombine.high %v17555_v57, %v17555_v57  ;;  %v5722_v42 = vcombine.low %v17542_v6, %v17559_v60  ;;  %22409 = vst [vmem:[#allocation89_spill] sm:$0xff] %v17589_v62  ;;  %v17596_v61 = vrot.slane %v5039_v1, %v15167_v5  ;;  %v4852_v28 = vcombine.high %v17010_v12, %v17010_v12 }
 0x55b   :  { %22405 = vst [vmem:[#allocation242_spill] sm:$0xff] %v17567_v32  ;;  %v17583_v55 = vcombine.high %v17567_v32, %v17567_v32  ;;  %v17586_v22 = vcombine.low %v5292_v8, %v17567_v32  ;;  %v17604_v8 = vcombine.high %v16994_v14, %v16994_v14  ;;  %v5054_v54 = vcombine.high %v17589_v62, %v17589_v62 }
 0x55c   :  { %22406 = vst [vmem:[#allocation243_spill] sm:$0xff] %v17575_v48  ;;  %v5736_v53 = vrot.slane %v5722_v42, %v15167_v5  ;;  %v5738_v18 = vcombine.low %v17555_v57, %v17575_v48  ;;  %v22411_v1 = vcombine.low %v17442_v50, %v17438_v21  ;;  %v17624_v12 = vcombine.high %v17596_v61, %v17596_v61 }
 0x55d   :  { %22407 = vst [vmem:[#allocation244_spill] sm:$0xff] %v17583_v55  ;;  %22408 = vst [vmem:[#allocation245_spill] sm:$0xff] %v17586_v22  ;;  %v6095_v22 = vrot.slane %v17464_v19, %v15167_v5  ;;  %v5746_v42 = vcombine.low %v5054_v54, %v17596_v61  ;;  %v17632_v21 = vrot.slane %v6088_v9, 1  ;;  %v6203_v19 = vrot.slane %v17513_v26, 1 }
 0x55e   :  { %22410 = vst [vmem:[#allocation138_spill] sm:$0xff] %v17604_v8  ;;  %v17616_v33 = vrot.slane %v22411_v1, %v15167_v5  ;;  %v17620_v32 = vcombine.low %v5729_v17, %v5736_v53  ;;  %v17627_v2 = vrot.slane %v5738_v18, %v15167_v5  ;;  %v6119_v1 = vrot.slane %v17491_v39, %v15167_v5 }
 0x55f   :  { %22415 = vst [vmem:[#allocation247_spill] sm:$0xff] %v17632_v21  ;;  %v5747_v53 = vcombine.low %v17624_v12, %v17202_v52  ;;  %v5788_v18 = vcombine.low %v16994_v14, %v17604_v8  ;;  %v5106_v54 = vcombine.high %v17491_v39, %v17491_v39  ;;  %v5175_v9 = vcombine.high %v17189_v23, %v17189_v23 }
 0x560   :  { %22412 = vst [vmem:[#allocation141_spill] sm:$0xff] %v17616_v33  ;;  %22413 = vst [vmem:[#allocation92_spill] sm:$0xff] %v17620_v32  ;;  %v6103_v48 = vrot.slane %v17589_v62, %v15167_v5  ;;  %6291 = vrot.lane.b32.xlu1 %v17632_v21, %s10958_s10  ;;  %v5754_v55 = vrot.slane %v5746_v42, %v15167_v5  ;;  %v17655_v26 = vsel %vm146_vm0, %v6203_v19, %v17632_v21 }
 0x561   :  { %22414 = vst [vmem:[#allocation246_spill] sm:$0xff] %v17627_v2  ;;  %v5761_v17 = vrot.slane %v5747_v53, %v15167_v5  ;;  %22416 = vst [vmem:[#allocation249_spill] sm:$0xff] %v17655_v26  ;;  %v6096_v8 = vcombine.low %v17616_v33, %v6095_v22  ;;  %v17660_v39 = vcombine.low %v17347_v30, %v17485_v46  ;;  %6289 = vrot.lane.b32.xlu0 %v17655_v26, %s10958_s10 }
 0x562   :  { %v17663_v23 = vrot.slane %v4852_v28, %v15167_v5  ;;  %v5797_v62 = vcombine.low %v17038_v37, %v17034_v27  ;;  %v6104_v42 = vcombine.low %v17627_v2, %v6103_v48  ;;  %v17672_v19 = vrot.slane %v17046_v13, %v15167_v5 }
 0x563   :  { %22417 = vst [vmem:[#allocation250_spill] sm:$0xff] %v17660_v39  ;;  %v17674_v22 = vcombine.low %v5754_v55, %v5761_v17  ;;  %v17676_v53 = vrot.slane %v6096_v8, 1  ;;  %v6206_v30 = vrot.slane %v17493_v38, 1  ;;  %v17680_v46 = vrot.slane %v5788_v18, %v15167_v5 }
 0x564   :  { %22418 = vst [vmem:[#allocation252_spill] sm:$0xff] %v17663_v23  ;;  %22419 = vst [vmem:[#allocation253_spill] sm:$0xff] %v17672_v19  ;;  %v5796_v28 = vcombine.low %v5106_v54, %v17021_v34  ;;  %v17683_v21 = vrot.slane %v6104_v42, 1  ;;  %v6111_v48 = vrot.slane %v17276_v24, %v15167_v5  ;;  %v17688_v26 = vrot.slane %v5175_v9, %v15167_v5 }
 0x565   :  { %22420 = vst [vmem:[#allocation254_spill] sm:$0xff] %v17674_v22  ;;  %22421 = vst [vmem:[#allocation255_spill] sm:$0xff] %v17676_v53  ;;  %v5872_v13 = vcombine.low %v17268_v20, %v17306_v49  ;;  %6295 = vrot.lane.b32.xlu1 %v17676_v53, %s10958_s10  ;;  %v17696_v55 = vsel %vm146_vm0, %v6206_v30, %v17676_v53  ;;  %v6209_v8 = vrot.slane %v17620_v32, 1  ;;  %v6212_v53 = vrot.slane %v17674_v22, 1 }
 0x566   :  { %22422 = vst [vmem:[#allocation109_spill] sm:$0xff] %v17680_v46  ;;  %22423 = vst [vmem:[#allocation256_spill] sm:$0xff] %v17683_v21  ;;  %v5811_v17 = vrot.slane %v5797_v62, %v15167_v5  ;;  %v4868_v18 = vcombine.high %v17663_v23, %v17663_v23  ;;  %v17704_v54 = vcombine.high %v17316_v35, %v17316_v35  ;;  %6293 = vrot.lane.b32.xlu0 %v17696_v55, %s10958_s10 }
 0x567   :  { %22424 = vst [vmem:[#allocation257_spill] sm:$0xff] %v17688_v26  ;;  %22425 = vst [vmem:[#allocation258_spill] sm:$0xff] %v17696_v55  ;;  %v6112_v9 = vcombine.low %v17342_v51, %v6111_v48  ;;  %v17711_v42 = vcombine.high %v17672_v19, %v17672_v19  ;;  %v5871_v30 = vcombine.low %v17257_v63, %v17272_v11 }
 0x568   :  { %v17717_v62 = vsel %vm146_vm0, %v6209_v8, %v17683_v21  ;;  %v5804_v23 = vrot.slane %v5796_v28, %v15167_v5  ;;  %v22428_v55 = vcombine.low %v17053_v59, %v17075_v47  ;;  %v6127_v51 = vrot.slane %v17088_v43, %v15167_v5  ;;  %v22459_v47 = vld [vmem:[#allocation2_spill] sm:$0xff] }
 0x569   :  { %22426 = vst [vmem:[#allocation259_spill] sm:$0xff] %v17711_v42  ;;  %22427 = vst [vmem:[#allocation260_spill] sm:$0xff] %v17717_v62  ;;  %v5838_v63 = vcombine.low %v17097_v4, %v17144_v29  ;;  %v5863_v8 = vcombine.low %v17239_v7, %v17688_v26  ;;  %v5886_v32 = vrot.slane %v5872_v13, %v15167_v5  ;;  %6299 = vrot.lane.b32.xlu1 %v17683_v21, %s10958_s10 }
 0x56a   :  { %v17725_v48 = vrot.slane %v22428_v55, %v15167_v5  ;;  %v17736_v28 = vrot.slane %v6112_v9, 1  ;;  %v6120_v22 = vcombine.low %v17680_v46, %v6119_v1  ;;  %v22431_v55 = vcombine.low %v16990_v56, %v16986_v45  ;;  %6297 = vrot.lane.b32.xlu0 %v17717_v62, %s10958_s10  ;;  %v22434_v9 = vld [vmem:[#allocation19_spill] sm:$0xff]  ;;  %v22444_v45 = vld [vmem:[#allocation130_spill] sm:$0xff] }
 0x56b   :  { %v17745_v38 = vcombine.low %v5804_v23, %v5811_v17  ;;  %v17748_v33 = vcombine.low %v4868_v18, %v17672_v19  ;;  %v5888_v13 = vcombine.low %v17316_v35, %v17704_v54  ;;  %v17758_v21 = vcombine.high %v22434_v9, %v22434_v9  ;;  %v22438_v18 = vld [vmem:[#allocation29_spill] sm:$0xff] }
 0x56c   :  { %22429 = vst [vmem:[#allocation142_spill] sm:$0xff] %v17725_v48  ;;  %22430 = vst [vmem:[#allocation145_spill] sm:$0xff] %v17736_v28  ;;  %v17743_v2 = vrot.slane %v22431_v55, %v15167_v5  ;;  %v5879_v55 = vrot.slane %v5871_v30, %v15167_v5  ;;  %v17763_v23 = vsel %vm146_vm0, %v6212_v53, %v17736_v28  ;;  %v17788_v56 = vrot.slane %v6120_v22, 1 }
 0x56d   :  { %22433 = vst [vmem:[#allocation262_spill] sm:$0xff] %v17745_v38  ;;  %22435 = vst [vmem:[#allocation263_spill] sm:$0xff] %v17758_v21  ;;  %v17766_v17 = vrot.slane %v5838_v63, %v15167_v5  ;;  %v6135_v19 = vrot.slane %v22438_v18, %v15167_v5  ;;  %v17772_v62 = vcombine.high %v17688_v26, %v17688_v26  ;;  %6303 = vrot.lane.b32.xlu1 %v17736_v28, %s10958_s10  ;;  %v22445_v26 = vld [vmem:[#allocation45_spill] sm:$0xff]  ;;  %v22455_v18 = vld [vmem:[#allocation212_spill] sm:$0xff] }
 0x56e   :  { %22432 = vst [vmem:[#allocation261_spill] sm:$0xff] %v17743_v2  ;;  %22436 = vst [vmem:[#allocation264_spill] sm:$0xff] %v17763_v23  ;;  %v6128_v1 = vcombine.low %v17725_v48, %v6127_v51  ;;  %v17776_v46 = vrot.slane %v5863_v8, %v15167_v5  ;;  %v17778_v30 = vcombine.low %v5879_v55, %v5886_v32  ;;  %v22448_v32 = vld [vmem:[#allocation46_spill] sm:$0xff]  ;;  %6301 = vrot.lane.b32.xlu0 %v17763_v23, %s10958_s10  ;;  %v22454_v28 = vld [vmem:[#allocation93_spill] sm:$0xff] }
 0x56f   :  { %22437 = vst [vmem:[#allocation265_spill] sm:$0xff] %v17766_v17  ;;  %22439 = vst [vmem:[#allocation266_spill] sm:$0xff] %v17772_v62  ;;  %v22442_v53 = vcombine.low %v17272_v11, %v17268_v20  ;;  %v22446_v51 = vcombine.low %v22444_v45, %v22445_v26  ;;  %v17795_v8 = vrot.slane %v5888_v13, %v15167_v5  ;;  %v6215_v45 = vrot.slane %v17660_v39, 1  ;;  %v22451_v26 = vld [vmem:[#allocation210_spill] sm:$0xff]  ;;  %v22452_v13 = vld [vmem:[#allocation211_spill] sm:$0xff] }
 0x570   :  { %22440 = vst [vmem:[#allocation267_spill] sm:$0xff] %v17776_v46  ;;  %22441 = vst [vmem:[#allocation268_spill] sm:$0xff] %v17778_v30  ;;  %v6151_v55 = vrot.slane %v22448_v32, %v15167_v5  ;;  %v22449_v20 = vcombine.low %v17398_v15, %v17435_v25  ;;  %v6159_v22 = vrot.slane %v17454_v58, %v15167_v5  ;;  %v22458_v23 = vld [vmem:[#allocation118_spill] sm:$0xff]  ;;  %v22461_v39 = vld [vmem:[#allocation3_spill] sm:$0xff] }
 0x571   :  { %v17784_v63 = vrot.slane %v22442_v53, %v15167_v5  ;;  %22443 = vst [vmem:[#allocation269_spill] sm:$0xff] %v17788_v56  ;;  %v6735_v48 = vrot.slane %v22446_v51, %v15167_v5  ;;  %22447 = vst [vmem:[#allocation270_spill] sm:$0xff] %v17795_v8  ;;  %v22453_v53 = vcombine.low %v22451_v26, %v22452_v13  ;;  %v22462_v2 = vld [vmem:[#allocation4_spill] sm:$0xff]  ;;  %6307 = vrot.lane.b32.xlu1 %v17788_v56, %s10958_s10  ;;  %v22489_v13 = vld [vmem:[#allocation229_spill] sm:$0xff] }
 0x572   :  { %v17803_v11 = vrot.slane %v22449_v20, %v15167_v5  ;;  %v22456_v29 = vcombine.low %v22454_v28, %v22455_v18  ;;  %v17818_v20 = vrot.slane %v6128_v1, 1  ;;  %v6136_v43 = vcombine.low %v17766_v17, %v6135_v19  ;;  %v22471_v18 = vld [vmem:[#allocation30_spill] sm:$0xff] }
 0x573   :  { %v6635_v51 = vrot.slane %v22453_v53, %v15167_v5  ;;  %v22460_v58 = vcombine.low %v22458_v23, %v22459_v47  ;;  %v22463_v16 = vcombine.low %v22461_v39, %v22462_v2  ;;  %v6143_v19 = vrot.slane %v17772_v62, %v15167_v5  ;;  %v22467_v39 = vld [vmem:[#allocation26_spill] sm:$0xff] }
 0x574   :  { %22450 = vst [vmem:[#allocation271_spill] sm:$0xff] %v17803_v11  ;;  %v6642_v25 = vrot.slane %v22456_v29, %v15167_v5  ;;  %22457 = vst [vmem:[#allocation272_spill] sm:$0xff] %v17818_v20  ;;  %v17835_v29 = vsel %vm146_vm0, %v6215_v45, %v17788_v56  ;;  %v22468_v2 = vld [vmem:[#allocation218_spill] sm:$0xff]  ;;  %v22476_v56 = vld [vmem:[#allocation35_spill] sm:$0xff] }
 0x575   :  { %v6660_v24 = vrot.slane %v22460_v58, %v15167_v5  ;;  %v6667_v26 = vrot.slane %v22463_v16, %v15167_v5  ;;  %22464 = vst [vmem:[#allocation273_spill] sm:$0xff] %v17835_v29  ;;  %6305 = vrot.lane.b32.xlu0 %v17835_v29, %s10958_s10  ;;  %v6218_v16 = vrot.slane %v17745_v38, 1  ;;  %v22469_v28 = vcombine.low %v22467_v39, %v22468_v2  ;;  %v22470_v23 = vld [vmem:[#allocation126_spill] sm:$0xff]  ;;  %v22479_v38 = vld [vmem:[#allocation40_spill] sm:$0xff] }
 0x576   :  { %v17839_v47 = vcombine.low %v6635_v51, %v6642_v25  ;;  %v22472_v45 = vcombine.low %v22470_v23, %v22471_v18  ;;  %v22473_v25 = vld [vmem:[#allocation219_spill] sm:$0xff]  ;;  %v22474_v51 = vld [vmem:[#allocation44_spill] sm:$0xff]  ;;  %v22475_v29 = vld [vmem:[#allocation34_spill] sm:$0xff]  ;;  %v17874_v18 = vrot.slane %v6136_v43, 1  ;;  %6311 = vrot.lane.b32.xlu1 %v17818_v20, %s10958_s10 }
 0x577   :  { %v17844_v58 = vcombine.low %v6660_v24, %v6667_v26  ;;  %v17850_v1 = vrot.slane %v22469_v28, %v15167_v5  ;;  %v22477_v24 = vcombine.low %v22475_v29, %v22476_v56  ;;  %v22478_v17 = vld [vmem:[#allocation38_spill] sm:$0xff]  ;;  %v17872_v23 = vsel %vm146_vm0, %v6218_v16, %v17818_v20  ;;  %v22483_v56 = vld [vmem:[#allocation133_spill] sm:$0xff]  ;;  %v22486_v16 = vld [vmem:[#allocation227_spill] sm:$0xff] }
 0x578   :  { %22465 = vst [vmem:[#allocation274_spill] sm:$0xff] %v17839_v47  ;;  %v17856_v53 = vrot.slane %v22472_v45, %v15167_v5  ;;  %v22480_v39 = vcombine.low %v22478_v17, %v22479_v38  ;;  %22481 = vst [vmem:[#allocation98_spill] sm:$0xff] %v17872_v23  ;;  %v22484_v29 = vcombine.low %v22483_v56, %v17325_v3  ;;  %v22491_v3 = vld [vmem:[#allocation217_spill] sm:$0xff] }
 0x579   :  { %22466 = vst [vmem:[#allocation275_spill] sm:$0xff] %v17844_v58  ;;  %v6710_v26 = vrot.slane %v22477_v24, %v15167_v5  ;;  %22482 = vst [vmem:[#allocation375_spill] sm:$0xff] %v17874_v18  ;;  %v6144_v38 = vcombine.low %v17776_v46, %v6143_v19  ;;  %v22490_v45 = vcombine.low %v22489_v13, %v17442_v50  ;;  %6309 = vrot.lane.b32.xlu0 %v17872_v23, %s10958_s10 }
 0x57a   :  { %v6717_v2 = vrot.slane %v22480_v39, %v15167_v5  ;;  %v6742_v24 = vrot.slane %v22484_v29, %v15167_v5  ;;  %v22487_v39 = vld [vmem:[#allocation55_spill] sm:$0xff]  ;;  %v6221_v56 = vrot.slane %v22491_v3, 1  ;;  %v22493_v19 = vcombine.low %v17495_v41, %v17542_v6  ;;  %v22499_v6 = vld [vmem:[#allocation233_spill] sm:$0xff]  ;;  %6315 = vrot.lane.b32.xlu1 %v17874_v18, %s10958_s10 }
 0x57b   :  { %v22488_v43 = vcombine.low %v22486_v16, %v22487_v39  ;;  %v6767_v62 = vrot.slane %v22490_v45, %v15167_v5  ;;  %v6152_v50 = vcombine.low %v17795_v8, %v6151_v55  ;;  %v22496_v45 = vcombine.low %v17596_v61, %v17624_v12 }
 0x57c   :  { %v17885_v17 = vcombine.low %v6710_v26, %v6717_v2  ;;  %v17898_v29 = vcombine.low %v6735_v48, %v6742_v24  ;;  %v6785_v26 = vrot.slane %v22493_v19, %v15167_v5  ;;  %v22494_v2 = vcombine.low %v17559_v60, %v17555_v57  ;;  %v22497_v24 = vld [vmem:[#allocation39_spill] sm:$0xff] }
 0x57d   :  { %v6760_v28 = vrot.slane %v22488_v43, %v15167_v5  ;;  %v6810_v48 = vrot.slane %v22496_v45, %v15167_v5  ;;  %v22498_v39 = vcombine.low %v17202_v52, %v22497_v24  ;;  %v7147_v43 = vcombine.low %v22499_v6, %v17517_v31 }
 0x57e   :  { %22485 = vst [vmem:[#allocation146_spill] sm:$0xff] %v17885_v17  ;;  %22492 = vst [vmem:[#allocation149_spill] sm:$0xff] %v17898_v29  ;;  %v6792_v16 = vrot.slane %v22494_v2, %v15167_v5  ;;  %v17923_v57 = vsel %vm146_vm0, %v6221_v56, %v17874_v18  ;;  %v17933_v12 = vrot.slane %v6144_v38, 1  ;;  %v22507_v19 = vcombine.low %v17034_v27, %v17053_v59  ;;  %v22508_v2 = vld [vmem:[#allocation241_spill] sm:$0xff]  ;;  %v22514_v27 = vld [vmem:[#allocation23_spill] sm:$0xff] }
 0x57f   :  { %v17909_v13 = vcombine.low %v6760_v28, %v6767_v62  ;;  %v6817_v41 = vrot.slane %v22498_v39, %v15167_v5  ;;  %22500 = vst [vmem:[#allocation278_spill] sm:$0xff] %v17923_v57  ;;  %v22502_v62 = vld [vmem:[#allocation8_spill] sm:$0xff]  ;;  %v22506_v28 = vcombine.low %v17021_v34, %v17038_v37  ;;  %6313 = vrot.lane.b32.xlu0 %v17923_v57, %s10958_s10  ;;  %v22509_v38 = vld [vmem:[#allocation41_spill] sm:$0xff]  ;;  %v17954_v34 = vrot.slane %v6152_v50, 1 }
 0x580   :  { %v17925_v60 = vcombine.low %v6785_v26, %v6792_v16  ;;  %v22503_v55 = vcombine.low %v22502_v62, %v16994_v14  ;;  %22504 = vst [vmem:[#allocation281_spill] sm:$0xff] %v17933_v12  ;;  %v6867_v26 = vrot.slane %v22507_v19, %v15167_v5  ;;  %v5294_v14 = vcombine.high %v22508_v2, %v22508_v2  ;;  %v22515_v59 = vld [vmem:[#allocation20_spill] sm:$0xff]  ;;  %v22519_v19 = vld [vmem:[#allocation129_spill] sm:$0xff] }
 0x581   :  { %22495 = vst [vmem:[#allocation276_spill] sm:$0xff] %v17909_v13  ;;  %v17935_v52 = vcombine.low %v6810_v48, %v6817_v41  ;;  %v6860_v56 = vrot.slane %v22506_v28, %v15167_v5  ;;  %v6224_v16 = vrot.slane %v22509_v38, 1  ;;  %v6160_v45 = vcombine.low %v17803_v11, %v6159_v22  ;;  %v22510_v48 = vld [vmem:[#allocation134_spill] sm:$0xff]  ;;  %22512 = vst [vmem:[#allocation284_spill] sm:$0xff] %v17954_v34  ;;  %v22517_v62 = vld [vmem:[#allocation24_spill] sm:$0xff] }
 0x582   :  { %22501 = vst [vmem:[#allocation279_spill] sm:$0xff] %v17925_v60  ;;  %v6842_v61 = vrot.slane %v22503_v55, %v15167_v5  ;;  %v22516_v39 = vcombine.low %v22514_v27, %v22515_v59  ;;  %v22518_v55 = vcombine.low %v22517_v62, %v17097_v4  ;;  %v22520_v22 = vld [vmem:[#allocation33_spill] sm:$0xff]  ;;  %v22524_v27 = vcombine.low %v17306_v49, %v17316_v35  ;;  %v22528_v62 = vld [vmem:[#allocation226_spill] sm:$0xff] }
 0x583   :  { %22505 = vst [vmem:[#allocation282_spill] sm:$0xff] %v17935_v52  ;;  %v17956_v37 = vcombine.low %v6860_v56, %v6867_v26  ;;  %v22521_v2 = vcombine.low %v22519_v19, %v22520_v22  ;;  %v22522_v50 = vld [vmem:[#allocation37_spill] sm:$0xff]  ;;  %6319 = vrot.lane.b32.xlu1 %v17933_v12, %s10958_s10  ;;  %v17984_v4 = vsel %vm146_vm0, %v6224_v16, %v17933_v12  ;;  %v22530_v22 = vld [vmem:[#allocation224_spill] sm:$0xff] }
 0x584   :  { %v17952_v24 = vcombine.low %v22510_v48, %v6842_v61  ;;  %v6885_v41 = vrot.slane %v22516_v39, %v15167_v5  ;;  %v6892_v28 = vrot.slane %v22518_v55, %v15167_v5  ;;  %v22523_v56 = vcombine.low %v22522_v50, %v17239_v7  ;;  %22525 = vst [vmem:[#allocation286_spill] sm:$0xff] %v17984_v4  ;;  %v22527_v7 = vld [vmem:[#allocation220_spill] sm:$0xff]  ;;  %v22532_v35 = vld [vmem:[#allocation17_spill] sm:$0xff] }
 0x585   :  { %22513 = vst [vmem:[#allocation285_spill] sm:$0xff] %v17956_v37  ;;  %v6910_v61 = vrot.slane %v22521_v2, %v15167_v5  ;;  %v6942_v59 = vrot.slane %v22524_v27, %v15167_v5  ;;  %v22529_v55 = vcombine.low %v22527_v7, %v22528_v62  ;;  %v22531_v2 = vcombine.low %v22530_v22, %v17398_v15 }
 0x586   :  { %22511 = vst [vmem:[#allocation283_spill] sm:$0xff] %v17952_v24  ;;  %v6917_v26 = vrot.slane %v22523_v56, %v15167_v5  ;;  %v17986_v39 = vcombine.low %v6885_v41, %v6892_v28  ;;  %v22533_v50 = vcombine.low %v22532_v35, %v22434_v9  ;;  %v7875_v16 = vrot.slane %v17758_v21, %v15167_v5  ;;  %v22554_v21 = vld [vmem:[#allocation244_spill] sm:$0xff] }
 0x587   :  { %v6960_v19 = vrot.slane %v22529_v55, %v15167_v5  ;;  %v6967_v49 = vrot.slane %v22531_v2, %v15167_v5  ;;  %6317 = vrot.lane.b32.xlu0 %v17984_v4, %s10958_s10  ;;  %v18009_v28 = vcombine.low %v17784_v63, %v6942_v59  ;;  %v22537_v15 = vcombine.low %v17450_v40, %v17477_v10  ;;  %v22541_v63 = vld [vmem:[#allocation12_spill] sm:$0xff]  ;;  %v22542_v59 = vld [vmem:[#allocation13_spill] sm:$0xff] }
 0x588   :  { %22526 = vst [vmem:[#allocation287_spill] sm:$0xff] %v17986_v39  ;;  %v18000_v56 = vrot.slane %v22533_v50, %v15167_v5  ;;  %v18006_v41 = vcombine.low %v6910_v61, %v6917_v26  ;;  %v6227_v7 = vrot.slane %v17778_v30, 1  ;;  %v7161_v55 = vrot.slane %v7147_v43, %v15167_v5  ;;  %6323 = vrot.lane.b32.xlu1 %v17954_v34, %s10958_s10 }
 0x589   :  { %22536 = vst [vmem:[#allocation290_spill] sm:$0xff] %v18009_v28  ;;  %v7154_v27 = vrot.slane %v22537_v15, %v15167_v5  ;;  %v18016_v62 = vcombine.low %v6960_v19, %v6967_v49  ;;  %v18020_v22 = vrot.slane %v5294_v14, %v15167_v5  ;;  %v5309_v61 = vcombine.high %v17600_v44, %v17600_v44  ;;  %v22548_v15 = vld [vmem:[#allocation261_spill] sm:$0xff] }
 0x58a   :  { %22534 = vst [vmem:[#allocation288_spill] sm:$0xff] %v18000_v56  ;;  %22535 = vst [vmem:[#allocation289_spill] sm:$0xff] %v18006_v41  ;;  %v18024_v26 = vrot.slane %v6160_v45, 1  ;;  %v22543_v2 = vcombine.low %v22541_v63, %v22542_v59  ;;  %v18034_v19 = vsel %vm146_vm0, %v6227_v7, %v17954_v34  ;;  %v7683_v14 = vrot.slane %v17748_v33, %v15167_v5  ;;  %v22546_v45 = vld [vmem:[#allocation125_spill] sm:$0xff]  ;;  %v22551_v7 = vld [vmem:[#allocation228_spill] sm:$0xff] }
 0x58b   :  { %22538 = vst [vmem:[#allocation291_spill] sm:$0xff] %v18016_v62  ;;  %22539 = vst [vmem:[#allocation292_spill] sm:$0xff] %v18020_v22  ;;  %v18036_v43 = vcombine.low %v7154_v27, %v7161_v55  ;;  %v22547_v49 = vcombine.low %v17711_v42, %v22546_v45  ;;  %6321 = vrot.lane.b32.xlu0 %v18034_v19, %s10958_s10  ;;  %v18050_v48 = vcombine.low %v18000_v56, %v7875_v16  ;;  %v22555_v42 = vld [vmem:[#allocation242_spill] sm:$0xff]  ;;  %v22561_v56 = vld [vmem:[#allocation364_spill] sm:$0xff] }
 0x58c   :  { %22540 = vst [vmem:[#allocation308_spill] sm:$0xff] %v18024_v26  ;;  %v7496_v40 = vrot.slane %v22543_v2, %v15167_v5  ;;  %22544 = vst [vmem:[#allocation376_spill] sm:$0xff] %v18034_v19  ;;  %v6230_v27 = vrot.slane %v22551_v7, 1  ;;  %v18057_v33 = vcombine.high %v18020_v22, %v18020_v22  ;;  %v7717_v9 = vcombine.low %v5309_v61, %v18020_v22  ;;  %v22560_v22 = vld [vmem:[#allocation158_spill] sm:$0xff] }
 0x58d   :  { %22545 = vst [vmem:[#allocation150_spill] sm:$0xff] %v18036_v43  ;;  %v7690_v50 = vrot.slane %v22547_v49, %v15167_v5  ;;  %22550 = vst [vmem:[#allocation293_spill] sm:$0xff] %v18050_v48  ;;  %v8060_v45 = vcombine.low %v22555_v42, %v22554_v21  ;;  %6327 = vrot.lane.b32.xlu1 %v18024_v26, %s10958_s10  ;;  %v22558_v42 = vld [vmem:[#allocation234_spill] sm:$0xff] }
 0x58e   :  { %v18047_v2 = vcombine.low %v22548_v15, %v7496_v40  ;;  %22553 = vst [vmem:[#allocation297_spill] sm:$0xff] %v18057_v33  ;;  %v8061_v40 = vcombine.low %v17600_v44, %v5309_v61  ;;  %v18068_v16 = vsel %vm146_vm0, %v6230_v27, %v18024_v26  ;;  %v22559_v61 = vcombine.low %v17517_v31, %v22558_v42 }
 0x58f   :  { %v18053_v55 = vcombine.low %v7683_v14, %v7690_v50  ;;  %22556 = vst [vmem:[#allocation298_spill] sm:$0xff] %v18068_v16  ;;  %6325 = vrot.lane.b32.xlu0 %v18068_v16, %s10958_s10  ;;  %v22557_v50 = vcombine.low %v17477_v10, %v22499_v6  ;;  %v22562_v27 = vcombine.low %v22560_v22, %v22561_v56  ;;  %v22565_v16 = vld [vmem:[#allocation245_spill] sm:$0xff] }
 0x590   :  { %22549 = vst [vmem:[#allocation153_spill] sm:$0xff] %v18047_v2  ;;  %v7521_v49 = vrot.slane %v22559_v61, %v15167_v5  ;;  %v7708_v26 = vrot.slane %v22565_v16, %v15167_v5  ;;  %v22566_v10 = vcombine.low %v22554_v21, %v17600_v44  ;;  %v7883_v56 = vrot.slane %v18057_v33, %v15167_v5  ;;  %v22572_v44 = vld [vmem:[#allocation367_spill] sm:$0xff]  ;;  %v18176_v33 = vpop.permute.xlu0 %6233 }
 0x591   :  { %22552 = vst [vmem:[#allocation294_spill] sm:$0xff] %v18053_v55  ;;  %v7885_v14 = vrot.slane %v18053_v55, 1  ;;  %v7514_v15 = vrot.slane %v22557_v50, %v15167_v5  ;;  %v6401_v35 = vrot.slane %v22562_v27, %v15167_v5  ;;  %v22563_v55 = vrot.slane %v18050_v48, 1  ;;  %v22573_v21 = vld [vmem:[#allocation159_spill] sm:$0xff]  ;;  %v22579_v27 = vld [vmem:[#allocation372_spill] sm:$0xff]  ;;  %22597 = vst [vmem:[#allocation318_spill] sm:$0xff] %v18176_v33 }
 0x592   :  { %v7715_v6 = vrot.slane %v22566_v10, %v15167_v5  ;;  %v18099_v50 = vrot.slane %v7717_v9, %v15167_v5  ;;  %v18110_v16 = vrot.slane %v8061_v40, %v15167_v5  ;;  %v22608_v48 = vld [vmem:[#allocation197_spill] sm:$0xff] }
 0x593   :  { %v18088_v2 = vsel %vm146_vm0, %v7885_v14, %v22563_v55  ;;  %v18096_v31 = vcombine.low %v7514_v15, %v7521_v49  ;;  %6979 = vrot.lane.b32.xlu1 %v6401_v35, %s10960_s19  ;;  %v18107_v55 = vrot.slane %v8060_v45, %v15167_v5  ;;  %v22574_v49 = vcombine.low %v22572_v44, %v22573_v21  ;;  %v22576_v14 = vld [vmem:[#allocation368_spill] sm:$0xff] }
 0x594   :  { %22564 = vst [vmem:[#allocation301_spill] sm:$0xff] %v18088_v2  ;;  %22568 = vst [vmem:[#allocation305_spill] sm:$0xff] %v18099_v50  ;;  %v18104_v22 = vcombine.low %v7708_v26, %v7715_v6  ;;  %v18117_v9 = vcombine.low %v18099_v50, %v7883_v56  ;;  %v22577_v15 = vld [vmem:[#allocation160_spill] sm:$0xff]  ;;  %v22581_v6 = vld [vmem:[#allocation163_spill] sm:$0xff] }
 0x595   :  { %22567 = vst [vmem:[#allocation302_spill] sm:$0xff] %v18096_v31  ;;  %22570 = vst [vmem:[#allocation309_spill] sm:$0xff] %v18107_v55  ;;  %6977 = vrot.lane.b32.xlu0 %v22574_v49, %s10960_s19  ;;  %v22578_v35 = vcombine.low %v22576_v14, %v22577_v15  ;;  %v22582_v56 = vld [vmem:[#allocation164_spill] sm:$0xff]  ;;  %v22585_v14 = vld [vmem:[#allocation169_spill] sm:$0xff]  ;;  %v18190_v31 = vpop.permute.xlu0 %6237 }
 0x596   :  { %22569 = vst [vmem:[#allocation306_spill] sm:$0xff] %v18104_v22  ;;  %22571 = vst [vmem:[#allocation310_spill] sm:$0xff] %v18110_v16  ;;  %v7888_v40 = vrot.slane %v18104_v22, 1  ;;  %v20907_v61 = vrot.slane %v18117_v9, 1  ;;  %v22583_v44 = vcombine.low %v22581_v6, %v22582_v56  ;;  %v22584_v49 = vld [vmem:[#allocation168_spill] sm:$0xff]  ;;  %v22586_v15 = vld [vmem:[#allocation171_spill] sm:$0xff] }
 0x597   :  { %22575 = vst [vmem:[#allocation313_spill] sm:$0xff] %v18117_v9  ;;  %v18123_v26 = vrot.slane %v22578_v35, %v15167_v5  ;;  %v22587_v35 = vcombine.low %v22585_v14, %v22586_v15  ;;  %v22589_v6 = vld [vmem:[#allocation178_spill] sm:$0xff]  ;;  %v22590_v56 = vld [vmem:[#allocation177_spill] sm:$0xff]  ;;  %v18168_v14 = vpop.permute.xlu1 %6235  ;;  %v22594_v15 = vld [vmem:[#allocation183_spill] sm:$0xff] }
 0x598   :  { %v18136_v10 = vsel %vm146_vm0, %v7888_v40, %v20907_v61  ;;  %v18142_v21 = vrot.slane %v22583_v44, %v15167_v5  ;;  %v22588_v40 = vld [vmem:[#allocation176_spill] sm:$0xff]  ;;  %v22591_v44 = vcombine.low %v22589_v6, %v22590_v56  ;;  %v22592_v16 = vld [vmem:[#allocation182_spill] sm:$0xff]  ;;  %22593 = vst [vmem:[#allocation317_spill] sm:$0xff] %v18168_v14  ;;  %v22598_v6 = vld [vmem:[#allocation189_spill] sm:$0xff] }
 0x599   :  { %6983 = vrot.lane.b32.xlu1 %v18123_v26, %s10960_s19  ;;  %6981 = vrot.lane.b32.xlu0 %v22579_v27, %s10960_s19  ;;  %22580 = vst [vmem:[#allocation314_spill] sm:$0xff] %v18136_v10  ;;  %v18152_v45 = vrot.slane %v22587_v35, %v15167_v5  ;;  %v22595_v35 = vld [vmem:[#allocation184_spill] sm:$0xff]  ;;  %v22601_v50 = vld [vmem:[#allocation187_spill] sm:$0xff]  ;;  %22604 = vst [vmem:[#allocation157_spill] sm:$0xff] %v18190_v31  ;;  %v18204_v14 = vpop.permute.xlu0 %6241 }
 0x59a   :  { %v18162_v61 = vrot.slane %v22591_v44, %v15167_v5  ;;  %v22596_v55 = vcombine.low %v22594_v15, %v22595_v35  ;;  %v22600_v44 = vld [vmem:[#allocation113_spill] sm:$0xff]  ;;  %v22607_v35 = vld [vmem:[#allocation195_spill] sm:$0xff]  ;;  %22611 = vst [vmem:[#allocation324_spill] sm:$0xff] %v18204_v14  ;;  %v22615_v31 = vld [vmem:[#allocation200_spill] sm:$0xff] }
 0x59b   :  { %v18182_v56 = vpop.permute.xlu1 %6239  ;;  %v22602_v10 = vcombine.low %v22600_v44, %v22601_v50  ;;  %v22609_v2 = vcombine.low %v22607_v35, %v22608_v48  ;;  %v22612_v50 = vld [vmem:[#allocation204_spill] sm:$0xff]  ;;  %v22614_v44 = vld [vmem:[#allocation201_spill] sm:$0xff]  ;;  %v22622_v14 = vld [vmem:[#allocation206_spill] sm:$0xff] }
 0x59c   :  { %v18174_v9 = vrot.slane %v22596_v55, %v15167_v5  ;;  %22599 = vst [vmem:[#allocation321_spill] sm:$0xff] %v18182_v56  ;;  %v22605_v55 = vld [vmem:[#allocation194_spill] sm:$0xff]  ;;  %v22619_v48 = vld [vmem:[#allocation209_spill] sm:$0xff] }
 0x59d   :  { %6987 = vrot.lane.b32.xlu1 %v18142_v21, %s10960_s19  ;;  %6985 = vrot.lane.b32.xlu0 %v22584_v49, %s10960_s19  ;;  %v18188_v22 = vrot.slane %v22602_v10, %v15167_v5  ;;  %v18202_v56 = vrot.slane %v22609_v2, %v15167_v5  ;;  %v22621_v35 = vld [vmem:[#allocation205_spill] sm:$0xff] }
 0x59f   :  { %22603 = vst [vmem:[#allocation154_spill] sm:$0xff] %v18188_v22  ;;  %v18196_v15 = vpop.permute.xlu1 %6243  ;;  %22610 = vst [vmem:[#allocation323_spill] sm:$0xff] %v18202_v56 }
 0x5a0   :  { %22606 = vst [vmem:[#allocation322_spill] sm:$0xff] %v18196_v15  ;;  %v22616_v15 = vcombine.low %v22614_v44, %v22615_v31  ;;  %v22626_v31 = vld [vmem:[#allocation96_spill] sm:$0xff]  ;;  %v22628_v44 = vld [vmem:[#allocation214_spill] sm:$0xff] }
 0x5a1   :  { %6991 = vrot.lane.b32.xlu1 %v18152_v45, %s10960_s19  ;;  %6989 = vrot.lane.b32.xlu0 %v22588_v40, %s10960_s19 }
 0x5a2   :  { %v18216_v33 = vrot.slane %v22616_v15, %v15167_v5 }
 0x5a3   :  { %v18210_v10 = vpop.permute.xlu1 %6247 }
 0x5a4   :  { %22613 = vst [vmem:[#allocation325_spill] sm:$0xff] %v18210_v10  ;;  %22617 = vst [vmem:[#allocation326_spill] sm:$0xff] %v18216_v33  ;;  %v22623_v10 = vcombine.low %v22621_v35, %v22622_v14  ;;  %v22633_v14 = vld [vmem:[#allocation11_spill] sm:$0xff] }
 0x5a5   :  { %6995 = vrot.lane.b32.xlu1 %v18162_v61, %s10960_s19  ;;  %6993 = vrot.lane.b32.xlu0 %v22592_v16, %s10960_s19 }
 0x5a7   :  { %v18224_v2 = vpop.permute.xlu1 %6251 }
 0x5a8   :  { %22620 = vst [vmem:[#allocation330_spill] sm:$0xff] %v18224_v2 }
 0x5a9   :  { %6999 = vrot.lane.b32.xlu1 %v18174_v9, %s10960_s19  ;;  %6997 = vrot.lane.b32.xlu0 %v22598_v6, %s10960_s19 }
 0x5ab   :  { %v18238_v15 = vpop.permute.xlu1 %6255 }
 0x5ac   :  { %22627 = vst [vmem:[#allocation337_spill] sm:$0xff] %v18238_v15 }
 0x5ad   :  { %7003 = vrot.lane.b32.xlu1 %v18188_v22, %s10960_s19  ;;  %7001 = vrot.lane.b32.xlu0 %v22605_v55, %s10960_s19  ;;  %v18218_v22 = vpop.permute.xlu0 %6245 }
 0x5ae   :  { %22618 = vst [vmem:[#allocation329_spill] sm:$0xff] %v18218_v22  ;;  %v22629_v22 = vld [vmem:[#allocation215_spill] sm:$0xff] }
 0x5af   :  { %v22630_v2 = vcombine.low %v22628_v44, %v22629_v22 }
 0x5b1   :  { %7007 = vrot.lane.b32.xlu1 %v18202_v56, %s10960_s19  ;;  %7005 = vrot.lane.b32.xlu0 %v22612_v50, %s10960_s19  ;;  %v18230_v56 = vrot.slane %v22623_v10, %v15167_v5  ;;  %v18232_v50 = vpop.permute.xlu0 %6249 }
 0x5b2   :  { %22625 = vst [vmem:[#allocation334_spill] sm:$0xff] %v18232_v50  ;;  %v18254_v50 = vpop.permute.xlu1 %6259 }
 0x5b3   :  { %22624 = vst [vmem:[#allocation333_spill] sm:$0xff] %v18230_v56  ;;  %22635 = vst [vmem:[#allocation342_spill] sm:$0xff] %v18254_v50 }
 0x5b5   :  { %7011 = vrot.lane.b32.xlu1 %v18216_v33, %s10960_s19  ;;  %7009 = vrot.lane.b32.xlu0 %v22619_v48, %s10960_s19  ;;  %v18244_v33 = vrot.slane %v22630_v2, %v15167_v5  ;;  %v22632_v48 = vld [vmem:[#allocation15_spill] sm:$0xff]  ;;  %v18248_v35 = vpop.permute.xlu0 %6253  ;;  %v22640_v2 = vld [vmem:[#allocation32_spill] sm:$0xff] }
 0x5b6   :  { %v6669_v10 = vcombine.low %v22633_v14, %v22632_v48  ;;  %22634 = vst [vmem:[#allocation341_spill] sm:$0xff] %v18248_v35  ;;  %v18265_v22 = vpop.permute.xlu1 %6263  ;;  %v22639_v48 = vld [vmem:[#allocation31_spill] sm:$0xff] }
 0x5b7   :  { %22631 = vst [vmem:[#allocation338_spill] sm:$0xff] %v18244_v33  ;;  %22638 = vst [vmem:[#allocation345_spill] sm:$0xff] %v18265_v22  ;;  %v22641_v44 = vcombine.low %v22639_v48, %v22640_v2  ;;  %v22645_v22 = vcombine.low %v22474_v51, %v22473_v25  ;;  %v22653_v51 = vld [vmem:[#allocation230_spill] sm:$0xff] }
 0x5b8   :  { %v18257_v15 = vrot.slane %v6669_v10, %v15167_v5  ;;  %v22643_v10 = vcombine.low %v17850_v1, %v17856_v53  ;;  %v22649_v1 = vcombine.low %v17390_v0, %v17371_v36  ;;  %v22659_v0 = vld [vmem:[#allocation243_spill] sm:$0xff] }
 0x5b9   :  { %7015 = vrot.lane.b32.xlu1 %v18230_v56, %s10960_s19  ;;  %7013 = vrot.lane.b32.xlu0 %v22626_v31, %s10960_s19  ;;  %v18259_v56 = vpop.permute.xlu0 %6257  ;;  %v6701_v14 = vrot.slane %v22641_v44, %v15167_v5  ;;  %v22836_v31 = vld [vmem:[#allocation21_spill] sm:$0xff] }
 0x5ba   :  { %22636 = vst [vmem:[#allocation277_spill] sm:$0xff] %v18257_v15  ;;  %22637 = vst [vmem:[#allocation280_spill] sm:$0xff] %v18259_v56  ;;  %v18278_v50 = vpop.permute.xlu1 %6267  ;;  %v18284_v56 = vrot.slane %v22645_v22, %v15167_v5  ;;  %v18298_v53 = vrot.slane %v22649_v1, %v15167_v5  ;;  %v22654_v22 = vld [vmem:[#allocation299_spill] sm:$0xff]  ;;  %v22660_v1 = vld [vmem:[#allocation89_spill] sm:$0xff] }
 0x5bb   :  { %22644 = vst [vmem:[#allocation349_spill] sm:$0xff] %v18278_v50  ;;  %v22655_v44 = vcombine.low %v22653_v51, %v22654_v22  ;;  %v22664_v51 = vld [vmem:[#allocation36_spill] sm:$0xff]  ;;  %v22668_v50 = vld [vmem:[#allocation137_spill] sm:$0xff] }
 0x5bc   :  { %22646 = vst [vmem:[#allocation350_spill] sm:$0xff] %v18284_v56  ;;  %22650 = vst [vmem:[#allocation357_spill] sm:$0xff] %v18298_v53 }
 0x5bd   :  { %7019 = vrot.lane.b32.xlu1 %v18244_v33, %s10960_s19  ;;  %7017 = vrot.lane.b32.xlu0 %v17839_v47, %s10960_s19  ;;  %v18271_v35 = vpop.permute.xlu0 %6261  ;;  %v22828_v47 = vld [vmem:[#allocation216_spill] sm:$0xff] }
 0x5be   :  { %22642 = vst [vmem:[#allocation346_spill] sm:$0xff] %v18271_v35  ;;  %v18292_v48 = vpop.permute.xlu1 %6271  ;;  %v22731_v35 = vld [vmem:[#allocation203_spill] sm:$0xff] }
 0x5bf   :  { %22648 = vst [vmem:[#allocation354_spill] sm:$0xff] %v18292_v48 }
 0x5c1   :  { %7023 = vrot.lane.b32.xlu1 %v18257_v15, %s10960_s19  ;;  %7021 = vrot.lane.b32.xlu0 %v17844_v58, %s10960_s19  ;;  %v18286_v15 = vpop.permute.xlu0 %6265 }
 0x5c2   :  { %22647 = vst [vmem:[#allocation353_spill] sm:$0xff] %v18286_v15  ;;  %v18306_v25 = vpop.permute.xlu1 %6275 }
 0x5c3   :  { %22652 = vst [vmem:[#allocation361_spill] sm:$0xff] %v18306_v25  ;;  %v22661_v25 = vcombine.low %v22659_v0, %v22660_v1  ;;  %v22669_v0 = vld [vmem:[#allocation138_spill] sm:$0xff] }
 0x5c5   :  { %7027 = vrot.lane.b32.xlu1 %v6701_v14, %s10960_s19  ;;  %7025 = vrot.lane.b32.xlu0 %v22643_v10, %s10960_s19  ;;  %v18300_v2 = vpop.permute.xlu0 %6269  ;;  %v18312_v14 = vrot.slane %v22655_v44, %v15167_v5  ;;  %v18326_v48 = vrot.slane %v22661_v25, %v15167_v5  ;;  %v6844_v25 = vcombine.low %v22669_v0, %v22668_v50  ;;  %v22676_v0 = vld [vmem:[#allocation22_spill] sm:$0xff] }
 0x5c6   :  { %22651 = vst [vmem:[#allocation358_spill] sm:$0xff] %v18300_v2  ;;  %v18320_v36 = vpop.permute.xlu1 %6279  ;;  %v22663_v2 = vld [vmem:[#allocation42_spill] sm:$0xff] }
 0x5c7   :  { %22656 = vst [vmem:[#allocation97_spill] sm:$0xff] %v18312_v14  ;;  %22658 = vst [vmem:[#allocation365_spill] sm:$0xff] %v18320_v36  ;;  %v6819_v22 = vcombine.low %v22664_v51, %v22663_v2  ;;  %v18352_v51 = vrot.slane %v6844_v25, %v15167_v5 }
 0x5c8   :  { %22662 = vst [vmem:[#allocation366_spill] sm:$0xff] %v18326_v48 }
 0x5c9   :  { %7031 = vrot.lane.b32.xlu1 %v18284_v56, %s10960_s19  ;;  %7029 = vrot.lane.b32.xlu0 %v17885_v17, %s10960_s19  ;;  %v18314_v10 = vpop.permute.xlu0 %6273  ;;  %v18339_v36 = vrot.slane %v6819_v22, %v15167_v5  ;;  %22672 = vst [vmem:[#allocation100_spill] sm:$0xff] %v18352_v51  ;;  %v22675_v22 = vld [vmem:[#allocation18_spill] sm:$0xff]  ;;  %v22739_v17 = vld [vmem:[#allocation9_spill] sm:$0xff] }
 0x5ca   :  { %22657 = vst [vmem:[#allocation362_spill] sm:$0xff] %v18314_v10  ;;  %v18336_v10 = vpop.permute.xlu1 %6283 }
 0x5cb   :  { %22666 = vst [vmem:[#allocation370_spill] sm:$0xff] %v18336_v10  ;;  %22667 = vst [vmem:[#allocation373_spill] sm:$0xff] %v18339_v36 }
 0x5cd   :  { %7035 = vrot.lane.b32.xlu1 %v18298_v53, %s10960_s19  ;;  %7033 = vrot.lane.b32.xlu0 %v17898_v29, %s10960_s19  ;;  %v18330_v44 = vpop.permute.xlu0 %6277  ;;  %v22735_v53 = vld [vmem:[#allocation74_spill] sm:$0xff]  ;;  %v18503_v29 = vcombine.high %v22542_v59, %v22542_v59 }
 0x5ce   :  { %22665 = vst [vmem:[#allocation369_spill] sm:$0xff] %v18330_v44  ;;  %v18349_v2 = vpop.permute.xlu1 %6287 }
 0x5cf   :  { %22671 = vst [vmem:[#allocation377_spill] sm:$0xff] %v18349_v2  ;;  %22737 = vst [vmem:[#allocation407_spill] sm:$0xff] %v18503_v29  ;;  %v7138_v58 = vcombine.low %v22542_v59, %v18503_v29 }
 0x5d1   :  { %7039 = vrot.lane.b32.xlu1 %v18312_v14, %s10960_s19  ;;  %7037 = vrot.lane.b32.xlu0 %v17909_v13, %s10960_s19  ;;  %v18343_v1 = vpop.permute.xlu0 %6281  ;;  %v22736_v13 = vld [vmem:[#allocation207_spill] sm:$0xff] }
 0x5d2   :  { %22670 = vst [vmem:[#allocation374_spill] sm:$0xff] %v18343_v1  ;;  %v18360_v50 = vpop.permute.xlu1 %6291  ;;  %v22677_v1 = vcombine.low %v22675_v22, %v22676_v0  ;;  %v22686_v22 = vld [vmem:[#allocation257_spill] sm:$0xff] }
 0x5d3   :  { %22674 = vst [vmem:[#allocation379_spill] sm:$0xff] %v18360_v50 }
 0x5d4   :  { %v18366_v44 = vrot.slane %v22677_v1, %v15167_v5 }
 0x5d5   :  { %7043 = vrot.lane.b32.xlu1 %v18326_v48, %s10960_s19  ;;  %7041 = vrot.lane.b32.xlu0 %v17925_v60, %s10960_s19  ;;  %v18354_v10 = vpop.permute.xlu0 %6285  ;;  %v22732_v48 = vld [vmem:[#allocation117_spill] sm:$0xff] }
 0x5d6   :  { %22673 = vst [vmem:[#allocation378_spill] sm:$0xff] %v18354_v10  ;;  %22678 = vst [vmem:[#allocation380_spill] sm:$0xff] %v18366_v44  ;;  %v22681_v10 = vld [vmem:[#allocation28_spill] sm:$0xff] }
 0x5d7   :  { %v18374_v25 = vpop.permute.xlu1 %6295 }
 0x5d8   :  { %22680 = vst [vmem:[#allocation382_spill] sm:$0xff] %v18374_v25 }
 0x5d9   :  { %7047 = vrot.lane.b32.xlu1 %v18339_v36, %s10960_s19  ;;  %7045 = vrot.lane.b32.xlu0 %v17935_v52, %s10960_s19  ;;  %v18368_v2 = vpop.permute.xlu0 %6289  ;;  %v22685_v36 = vld [vmem:[#allocation266_spill] sm:$0xff] }
 0x5da   :  { %22679 = vst [vmem:[#allocation381_spill] sm:$0xff] %v18368_v2  ;;  %v6919_v1 = vcombine.low %v22686_v22, %v22685_v36  ;;  %v22692_v36 = vcombine.low %v17704_v54, %v22448_v32 }
 0x5db   :  { %v18390_v2 = vpop.permute.xlu1 %6299 }
 0x5dc   :  { %22688 = vst [vmem:[#allocation107_spill] sm:$0xff] %v18390_v2  ;;  %v18393_v25 = vrot.slane %v6919_v1, %v15167_v5  ;;  %v22696_v1 = vld [vmem:[#allocation56_spill] sm:$0xff]  ;;  %v22697_v2 = vld [vmem:[#allocation231_spill] sm:$0xff] }
 0x5dd   :  { %7051 = vrot.lane.b32.xlu1 %v18352_v51, %s10960_s19  ;;  %7049 = vrot.lane.b32.xlu0 %v17952_v24, %s10960_s19  ;;  %v22682_v51 = vld [vmem:[#allocation29_spill] sm:$0xff]  ;;  %v18384_v0 = vpop.permute.xlu0 %6293 }
 0x5de   :  { %v22683_v50 = vcombine.low %v22681_v10, %v22682_v51  ;;  %22687 = vst [vmem:[#allocation384_spill] sm:$0xff] %v18384_v0  ;;  %22689 = vst [vmem:[#allocation385_spill] sm:$0xff] %v18393_v25  ;;  %v18407_v51 = vrot.slane %v22692_v36, %v15167_v5  ;;  %v22703_v36 = vld [vmem:[#allocation161_spill] sm:$0xff] }
 0x5df   :  { %v18401_v10 = vpop.permute.xlu1 %6303 }
 0x5e0   :  { %v18380_v24 = vrot.slane %v22683_v50, %v15167_v5  ;;  %22691 = vst [vmem:[#allocation387_spill] sm:$0xff] %v18401_v10  ;;  %22693 = vst [vmem:[#allocation388_spill] sm:$0xff] %v18407_v51  ;;  %v22698_v10 = vcombine.low %v22696_v1, %v22697_v2  ;;  %v22707_v1 = vld [vmem:[#allocation167_spill] sm:$0xff] }
 0x5e1   :  { %7055 = vrot.lane.b32.xlu1 %v18366_v44, %s10960_s19  ;;  %7053 = vrot.lane.b32.xlu0 %v17956_v37, %s10960_s19  ;;  %v18395_v44 = vpop.permute.xlu0 %6297  ;;  %v22728_v37 = vld [vmem:[#allocation198_spill] sm:$0xff] }
 0x5e2   :  { %22684 = vst [vmem:[#allocation383_spill] sm:$0xff] %v18380_v24  ;;  %22690 = vst [vmem:[#allocation386_spill] sm:$0xff] %v18395_v44  ;;  %v18421_v44 = vrot.slane %v22698_v10, %v15167_v5 }
 0x5e3   :  { %v18415_v22 = vpop.permute.xlu1 %6307 }
 0x5e4   :  { %22695 = vst [vmem:[#allocation390_spill] sm:$0xff] %v18415_v22  ;;  %22699 = vst [vmem:[#allocation391_spill] sm:$0xff] %v18421_v44  ;;  %v22704_v22 = vld [vmem:[#allocation371_spill] sm:$0xff] }
 0x5e5   :  { %7059 = vrot.lane.b32.xlu1 %v18380_v24, %s10960_s19  ;;  %7057 = vrot.lane.b32.xlu0 %v17986_v39, %s10960_s19  ;;  %v18409_v50 = vpop.permute.xlu0 %6301  ;;  %v22724_v24 = vld [vmem:[#allocation192_spill] sm:$0xff] }
 0x5e6   :  { %22694 = vst [vmem:[#allocation389_spill] sm:$0xff] %v18409_v50 }
 0x5e8   :  { %v18429_v54 = vpop.permute.xlu1 %6311 }
 0x5e9   :  { %7063 = vrot.lane.b32.xlu1 %v18393_v25, %s10960_s19  ;;  %7061 = vrot.lane.b32.xlu0 %v18006_v41, %s10960_s19  ;;  %v18423_v0 = vpop.permute.xlu0 %6305  ;;  %22701 = vst [vmem:[#allocation319_spill] sm:$0xff] %v18429_v54  ;;  %v22720_v25 = vld [vmem:[#allocation25_spill] sm:$0xff] }
 0x5ea   :  { %22700 = vst [vmem:[#allocation392_spill] sm:$0xff] %v18423_v0  ;;  %v22708_v0 = vld [vmem:[#allocation166_spill] sm:$0xff] }
 0x5ec   :  { %v18437_v2 = vpop.permute.xlu1 %6315 }
 0x5ed   :  { %7067 = vrot.lane.b32.xlu1 %v18407_v51, %s10960_s19  ;;  %7065 = vrot.lane.b32.xlu0 %v18009_v28, %s10960_s19  ;;  %v18431_v32 = vpop.permute.xlu0 %6309  ;;  %22705 = vst [vmem:[#allocation60_spill] sm:$0xff] %v18437_v2 }
 0x5ee   :  { %22702 = vst [vmem:[#allocation393_spill] sm:$0xff] %v18431_v32  ;;  %v22711_v32 = vld [vmem:[#allocation174_spill] sm:$0xff] }
 0x5f1   :  { %7071 = vrot.lane.b32.xlu1 %v18421_v44, %s10960_s19  ;;  %7069 = vrot.lane.b32.xlu0 %v18016_v62, %s10960_s19  ;;  %v18439_v10 = vpop.permute.xlu0 %6313  ;;  %v22712_v44 = vld [vmem:[#allocation173_spill] sm:$0xff]  ;;  %v22716_v62 = vld [vmem:[#allocation180_spill] sm:$0xff] }
 0x5f2   :  { %22706 = vst [vmem:[#allocation394_spill] sm:$0xff] %v18439_v10  ;;  %v22715_v10 = vld [vmem:[#allocation181_spill] sm:$0xff] }
 0x5f5   :  { %7173 = vrot.lane.b32.xlu1 %v22703_v36, %s10962_s23  ;;  %7171 = vrot.lane.b32.xlu0 %v22704_v22, %s10962_s23  ;;  %v18445_v50 = vpop.permute.xlu1 %6319  ;;  %v22744_v36 = vld [vmem:[#allocation121_spill] sm:$0xff]  ;;  %v22824_v22 = vld [vmem:[#allocation75_spill] sm:$0xff] }
 0x5f6   :  { %22709 = vst [vmem:[#allocation395_spill] sm:$0xff] %v18445_v50 }
 0x5f9   :  { %7177 = vrot.lane.b32.xlu1 %v22707_v1, %s10962_s23  ;;  %7175 = vrot.lane.b32.xlu0 %v22708_v0, %s10962_s23  ;;  %v18447_v54 = vpop.permute.xlu0 %6317 }
 0x5fa   :  { %22710 = vst [vmem:[#allocation396_spill] sm:$0xff] %v18447_v54  ;;  %v18453_v51 = vpop.permute.xlu1 %6323  ;;  %v22719_v54 = vld [vmem:[#allocation186_spill] sm:$0xff] }
 0x5fb   :  { %22713 = vst [vmem:[#allocation397_spill] sm:$0xff] %v18453_v51 }
 0x5fd   :  { %7181 = vrot.lane.b32.xlu1 %v22711_v32, %s10962_s23  ;;  %7179 = vrot.lane.b32.xlu0 %v22712_v44, %s10962_s23  ;;  %v18455_v2 = vpop.permute.xlu0 %6321 }
 0x5fe   :  { %22714 = vst [vmem:[#allocation398_spill] sm:$0xff] %v18455_v2  ;;  %v22723_v2 = vld [vmem:[#allocation190_spill] sm:$0xff] }
 0x5ff   :  { %v18461_v28 = vpop.permute.xlu1 %6327 }
 0x600   :  { %22717 = vst [vmem:[#allocation399_spill] sm:$0xff] %v18461_v28 }
 0x601   :  { %7185 = vrot.lane.b32.xlu1 %v22715_v10, %s10962_s23  ;;  %7183 = vrot.lane.b32.xlu0 %v22716_v62, %s10962_s23  ;;  %v18463_v50 = vpop.permute.xlu0 %6325 }
 0x602   :  { %22718 = vst [vmem:[#allocation400_spill] sm:$0xff] %v18463_v50  ;;  %v22727_v50 = vld [vmem:[#allocation199_spill] sm:$0xff] }
 0x605   :  { %7189 = vrot.lane.b32.xlu1 %v22719_v54, %s10962_s23  ;;  %7187 = vrot.lane.b32.xlu0 %v22720_v25, %s10962_s23  ;;  %v18469_v41 = vpop.permute.xlu1 %6979 }
 0x606   :  { %22721 = vst [vmem:[#allocation401_spill] sm:$0xff] %v18469_v41  ;;  %v22748_v41 = vld [vmem:[#allocation6_spill] sm:$0xff] }
 0x607   :  { %v18471_v51 = vpop.permute.xlu0 %6977 }
 0x608   :  { %22722 = vst [vmem:[#allocation402_spill] sm:$0xff] %v18471_v51 }
 0x609   :  { %7193 = vrot.lane.b32.xlu1 %v22723_v2, %s10962_s23  ;;  %7191 = vrot.lane.b32.xlu0 %v22724_v24, %s10962_s23 }
 0x60b   :  { %v18477_v39 = vpop.permute.xlu1 %6983  ;;  %v18479_v28 = vpop.permute.xlu0 %6981 }
 0x60c   :  { %22725 = vst [vmem:[#allocation403_spill] sm:$0xff] %v18477_v39  ;;  %22726 = vst [vmem:[#allocation404_spill] sm:$0xff] %v18479_v28  ;;  %v22743_v39 = vld [vmem:[#allocation7_spill] sm:$0xff] }
 0x60d   :  { %7197 = vrot.lane.b32.xlu1 %v22727_v50, %s10962_s23  ;;  %7195 = vrot.lane.b32.xlu0 %v22728_v37, %s10962_s23 }
 0x60f   :  { %v18485_v52 = vpop.permute.xlu1 %6987  ;;  %v18487_v15 = vpop.permute.xlu0 %6985 }
 0x610   :  { %22729 = vst [vmem:[#allocation57_spill] sm:$0xff] %v18485_v52  ;;  %22730 = vst [vmem:[#allocation405_spill] sm:$0xff] %v18487_v15  ;;  %v7122_v52 = vcombine.low %v22739_v17, %v22541_v63  ;;  %v22747_v63 = vld [vmem:[#allocation122_spill] sm:$0xff] }
 0x611   :  { %7201 = vrot.lane.b32.xlu1 %v22731_v35, %s10962_s23  ;;  %7199 = vrot.lane.b32.xlu0 %v22732_v48, %s10962_s23 }
 0x612   :  { %v7136_v17 = vrot.slane %v7122_v52, %v15167_v5 }
 0x613   :  { %v18493_v14 = vpop.permute.xlu1 %6991  ;;  %v18495_v60 = vpop.permute.xlu0 %6989 }
 0x614   :  { %22733 = vst [vmem:[#allocation64_spill] sm:$0xff] %v18493_v14  ;;  %22734 = vst [vmem:[#allocation406_spill] sm:$0xff] %v18495_v60  ;;  %v22741_v14 = vld [vmem:[#allocation5_spill] sm:$0xff]  ;;  %v22742_v60 = vld [vmem:[#allocation10_spill] sm:$0xff] }
 0x615   :  { %7205 = vrot.lane.b32.xlu1 %v22735_v53, %s10962_s23  ;;  %7203 = vrot.lane.b32.xlu0 %v22736_v13, %s10962_s23  ;;  %v7121_v33 = vcombine.low %v22743_v39, %v22742_v60  ;;  %v18532_v39 = vrot.slane %v7138_v58, %v15167_v5  ;;  %v22755_v58 = vld [vmem:[#allocation43_spill] sm:$0xff] }
 0x617   :  { %v18505_v56 = vpop.permute.xlu1 %6995  ;;  %v18509_v15 = vpop.permute.xlu0 %6993  ;;  %22750 = vst [vmem:[#allocation413_spill] sm:$0xff] %v18532_v39 }
 0x618   :  { %22738 = vst [vmem:[#allocation408_spill] sm:$0xff] %v18505_v56  ;;  %22740 = vst [vmem:[#allocation409_spill] sm:$0xff] %v18509_v15  ;;  %v7129_v15 = vrot.slane %v7121_v33, %v15167_v5 }
 0x619   :  { %7209 = vrot.lane.b32.xlu1 %v22741_v14, %s10962_s23  ;;  %7207 = vrot.lane.b32.xlu0 %v22744_v36, %s10962_s23  ;;  %v22823_v14 = vld [vmem:[#allocation208_spill] sm:$0xff]  ;;  %v22832_v36 = vld [vmem:[#allocation14_spill] sm:$0xff] }
 0x61b   :  { %v18519_v28 = vpop.permute.xlu1 %6999  ;;  %v18521_v56 = vpop.permute.xlu0 %6997 }
 0x61c   :  { %22745 = vst [vmem:[#allocation410_spill] sm:$0xff] %v18519_v28  ;;  %22746 = vst [vmem:[#allocation411_spill] sm:$0xff] %v18521_v56  ;;  %v18536_v28 = vcombine.low %v7129_v15, %v7136_v17  ;;  %v22754_v56 = vld [vmem:[#allocation87_spill] sm:$0xff] }
 0x61d   :  { %7213 = vrot.lane.b32.xlu1 %v22747_v63, %s10962_s23  ;;  %7211 = vrot.lane.b32.xlu0 %v22748_v41, %s10962_s23  ;;  %v22758_v17 = vld [vmem:[#allocation239_spill] sm:$0xff] }
 0x61f   :  { %v18529_v60 = vpop.permute.xlu1 %7003  ;;  %v18534_v59 = vpop.permute.xlu0 %7001 }
 0x620   :  { %22749 = vst [vmem:[#allocation412_spill] sm:$0xff] %v18529_v60  ;;  %22751 = vst [vmem:[#allocation414_spill] sm:$0xff] %v18534_v59  ;;  %v22759_v59 = vld [vmem:[#allocation235_spill] sm:$0xff] }
 0x621   :  { %7217 = vrot.lane.b32.xlu1 %v18532_v39, %s10962_s23  ;;  %7215 = vrot.lane.b32.xlu0 %v18536_v28, %s10962_s23 }
 0x623   :  { %v18542_v52 = vpop.permute.xlu1 %7007  ;;  %v18544_v33 = vpop.permute.xlu0 %7005 }
 0x624   :  { %22752 = vst [vmem:[#allocation115_spill] sm:$0xff] %v18542_v52  ;;  %22753 = vst [vmem:[#allocation415_spill] sm:$0xff] %v18544_v33  ;;  %v22762_v33 = vld [vmem:[#allocation141_spill] sm:$0xff] }
 0x625   :  { %7221 = vrot.lane.b32.xlu1 %v22754_v56, %s10962_s23  ;;  %7219 = vrot.lane.b32.xlu0 %v22755_v58, %s10962_s23  ;;  %v22763_v56 = vld [vmem:[#allocation232_spill] sm:$0xff] }
 0x627   :  { %v18550_v60 = vpop.permute.xlu1 %7011  ;;  %v18552_v15 = vpop.permute.xlu0 %7009 }
 0x628   :  { %22756 = vst [vmem:[#allocation416_spill] sm:$0xff] %v18550_v60  ;;  %22757 = vst [vmem:[#allocation116_spill] sm:$0xff] %v18552_v15  ;;  %v22766_v15 = vld [vmem:[#allocation246_spill] sm:$0xff] }
 0x629   :  { %7225 = vrot.lane.b32.xlu1 %v22758_v17, %s10962_s23  ;;  %7223 = vrot.lane.b32.xlu0 %v22759_v59, %s10962_s23  ;;  %v22767_v17 = vld [vmem:[#allocation92_spill] sm:$0xff] }
 0x62b   :  { %v18558_v29 = vpop.permute.xlu1 %7015  ;;  %v18560_v52 = vpop.permute.xlu0 %7013 }
 0x62c   :  { %22760 = vst [vmem:[#allocation417_spill] sm:$0xff] %v18558_v29  ;;  %22761 = vst [vmem:[#allocation418_spill] sm:$0xff] %v18560_v52  ;;  %v22770_v52 = vld [vmem:[#allocation47_spill] sm:$0xff] }
 0x62d   :  { %7229 = vrot.lane.b32.xlu1 %v22762_v33, %s10962_s23  ;;  %7227 = vrot.lane.b32.xlu0 %v22763_v56, %s10962_s23  ;;  %v22771_v33 = vld [vmem:[#allocation254_spill] sm:$0xff] }
 0x62f   :  { %v18566_v58 = vpop.permute.xlu1 %7019  ;;  %v18568_v60 = vpop.permute.xlu0 %7017 }
 0x630   :  { %22764 = vst [vmem:[#allocation419_spill] sm:$0xff] %v18566_v58  ;;  %22765 = vst [vmem:[#allocation420_spill] sm:$0xff] %v18568_v60  ;;  %v22774_v60 = vld [vmem:[#allocation109_spill] sm:$0xff] }
 0x631   :  { %7233 = vrot.lane.b32.xlu1 %v22766_v15, %s10962_s23  ;;  %7231 = vrot.lane.b32.xlu0 %v22767_v17, %s10962_s23  ;;  %v22775_v15 = vld [vmem:[#allocation250_spill] sm:$0xff] }
 0x633   :  { %v18574_v59 = vpop.permute.xlu1 %7023  ;;  %v18576_v29 = vpop.permute.xlu0 %7021 }
 0x634   :  { %22768 = vst [vmem:[#allocation421_spill] sm:$0xff] %v18574_v59  ;;  %22769 = vst [vmem:[#allocation119_spill] sm:$0xff] %v18576_v29  ;;  %v22778_v29 = vld [vmem:[#allocation142_spill] sm:$0xff] }
 0x635   :  { %7237 = vrot.lane.b32.xlu1 %v22770_v52, %s10962_s23  ;;  %7235 = vrot.lane.b32.xlu0 %v22771_v33, %s10962_s23  ;;  %v22779_v52 = vld [vmem:[#allocation262_spill] sm:$0xff] }
 0x637   :  { %v18582_v56 = vpop.permute.xlu1 %7027  ;;  %v18584_v58 = vpop.permute.xlu0 %7025 }
 0x638   :  { %22772 = vst [vmem:[#allocation61_spill] sm:$0xff] %v18582_v56  ;;  %22773 = vst [vmem:[#allocation68_spill] sm:$0xff] %v18584_v58  ;;  %v22782_v58 = vld [vmem:[#allocation265_spill] sm:$0xff] }
 0x639   :  { %7241 = vrot.lane.b32.xlu1 %v22774_v60, %s10962_s23  ;;  %7239 = vrot.lane.b32.xlu0 %v22775_v15, %s10962_s23  ;;  %v22820_v15 = vld [vmem:[#allocation202_spill] sm:$0xff] }
 0x63b   :  { %v18590_v17 = vpop.permute.xlu1 %7031  ;;  %v18592_v59 = vpop.permute.xlu0 %7029 }
 0x63c   :  { %22776 = vst [vmem:[#allocation422_spill] sm:$0xff] %v18590_v17  ;;  %22777 = vst [vmem:[#allocation423_spill] sm:$0xff] %v18592_v59 }
 0x63d   :  { %7245 = vrot.lane.b32.xlu1 %v22778_v29, %s10962_s23  ;;  %7243 = vrot.lane.b32.xlu0 %v22779_v52, %s10962_s23 }
 0x63f   :  { %v18598_v33 = vpop.permute.xlu1 %7035  ;;  %v18600_v56 = vpop.permute.xlu0 %7033 }
 0x640   :  { %22780 = vst [vmem:[#allocation424_spill] sm:$0xff] %v18598_v33  ;;  %22781 = vst [vmem:[#allocation48_spill] sm:$0xff] %v18600_v56 }
 0x641   :  { %7249 = vrot.lane.b32.xlu1 %v22782_v58, %s10962_s23  ;;  %7247 = vrot.lane.b32.xlu0 %v22491_v3, %s10962_s23  ;;  %v22816_v3 = vld [vmem:[#allocation196_spill] sm:$0xff] }
 0x643   :  { %v18606_v60 = vpop.permute.xlu1 %7039  ;;  %v18608_v17 = vpop.permute.xlu0 %7037 }
 0x644   :  { %22783 = vst [vmem:[#allocation425_spill] sm:$0xff] %v18606_v60  ;;  %22784 = vst [vmem:[#allocation49_spill] sm:$0xff] %v18608_v17  ;;  %v22788_v60 = vld [vmem:[#allocation237_spill] sm:$0xff] }
 0x645   :  { %7253 = vrot.lane.b32.xlu1 %v17776_v46, %s10962_s23  ;;  %7251 = vrot.lane.b32.xlu0 %v22509_v38, %s10962_s23  ;;  %v7163_v17 = vcombine.low %v22558_v42, %v22788_v60  ;;  %v22812_v38 = vld [vmem:[#allocation191_spill] sm:$0xff] }
 0x647   :  { %v18614_v59 = vpop.permute.xlu1 %7043  ;;  %v18616_v33 = vpop.permute.xlu0 %7041 }
 0x648   :  { %22785 = vst [vmem:[#allocation50_spill] sm:$0xff] %v18614_v59  ;;  %22786 = vst [vmem:[#allocation51_spill] sm:$0xff] %v18616_v33  ;;  %v18635_v33 = vrot.slane %v7163_v17, %v15167_v5 }
 0x649   :  { %7257 = vrot.lane.b32.xlu1 %v17795_v8, %s10962_s23  ;;  %7255 = vrot.lane.b32.xlu0 %v17778_v30, %s10962_s23  ;;  %v22808_v30 = vld [vmem:[#allocation110_spill] sm:$0xff] }
 0x64a   :  { %22791 = vst [vmem:[#allocation54_spill] sm:$0xff] %v18635_v33 }
 0x64b   :  { %v18622_v56 = vpop.permute.xlu1 %7047  ;;  %v18626_v58 = vpop.permute.xlu0 %7045 }
 0x64c   :  { %22787 = vst [vmem:[#allocation65_spill] sm:$0xff] %v18622_v56  ;;  %22789 = vst [vmem:[#allocation52_spill] sm:$0xff] %v18626_v58  ;;  %v22795_v58 = vld [vmem:[#allocation162_spill] sm:$0xff] }
 0x64d   :  { %7261 = vrot.lane.b32.xlu1 %v17803_v11, %s10962_s23  ;;  %7259 = vrot.lane.b32.xlu0 %v22551_v7, %s10962_s23  ;;  %v22800_v11 = vld [vmem:[#allocation172_spill] sm:$0xff] }
 0x64f   :  { %v18632_v59 = vpop.permute.xlu1 %7051  ;;  %v18637_v8 = vpop.permute.xlu0 %7049 }
 0x650   :  { %22790 = vst [vmem:[#allocation53_spill] sm:$0xff] %v18632_v59  ;;  %22792 = vst [vmem:[#allocation222_spill] sm:$0xff] %v18637_v8  ;;  %v22796_v59 = vld [vmem:[#allocation165_spill] sm:$0xff]  ;;  %v22799_v8 = vld [vmem:[#allocation170_spill] sm:$0xff] }
 0x651   :  { %7265 = vrot.lane.b32.xlu1 %v18635_v33, %s10962_s23  ;;  %7263 = vrot.lane.b32.xlu0 %v18036_v43, %s10962_s23 }
 0x653   :  { %v18643_v42 = vpop.permute.xlu1 %7055  ;;  %v18645_v56 = vpop.permute.xlu0 %7053 }
 0x654   :  { %22793 = vst [vmem:[#allocation225_spill] sm:$0xff] %v18643_v42  ;;  %22794 = vst [vmem:[#allocation72_spill] sm:$0xff] %v18645_v56  ;;  %v22803_v56 = vld [vmem:[#allocation175_spill] sm:$0xff] }
 0x655   :  { %7339 = vrot.lane.b32.xlu1 %v22795_v58, %s10965_s25  ;;  %7337 = vrot.lane.b32.xlu0 %v22796_v59, %s10965_s25  ;;  %v22804_v58 = vld [vmem:[#allocation179_spill] sm:$0xff] }
 0x657   :  { %v18651_v17 = vpop.permute.xlu1 %7059  ;;  %v18653_v60 = vpop.permute.xlu0 %7057 }
 0x658   :  { %22797 = vst [vmem:[#allocation426_spill] sm:$0xff] %v18651_v17  ;;  %22798 = vst [vmem:[#allocation427_spill] sm:$0xff] %v18653_v60  ;;  %v22807_v60 = vld [vmem:[#allocation185_spill] sm:$0xff] }
 0x659   :  { %7343 = vrot.lane.b32.xlu1 %v22799_v8, %s10965_s25  ;;  %7341 = vrot.lane.b32.xlu0 %v22800_v11, %s10965_s25 }
 0x65b   :  { %v18659_v7 = vpop.permute.xlu1 %7063  ;;  %v18661_v42 = vpop.permute.xlu0 %7061 }
 0x65c   :  { %22801 = vst [vmem:[#allocation123_spill] sm:$0xff] %v18659_v7  ;;  %22802 = vst [vmem:[#allocation69_spill] sm:$0xff] %v18661_v42  ;;  %v22811_v42 = vld [vmem:[#allocation188_spill] sm:$0xff] }
 0x65d   :  { %7347 = vrot.lane.b32.xlu1 %v22803_v56, %s10965_s25  ;;  %7345 = vrot.lane.b32.xlu0 %v22804_v58, %s10965_s25 }
 0x65f   :  { %v18667_v59 = vpop.permute.xlu1 %7067  ;;  %v18669_v17 = vpop.permute.xlu0 %7065 }
 0x660   :  { %22805 = vst [vmem:[#allocation73_spill] sm:$0xff] %v18667_v59  ;;  %22806 = vst [vmem:[#allocation76_spill] sm:$0xff] %v18669_v17  ;;  %v22815_v17 = vld [vmem:[#allocation193_spill] sm:$0xff] }
 0x661   :  { %7351 = vrot.lane.b32.xlu1 %v22807_v60, %s10965_s25  ;;  %7349 = vrot.lane.b32.xlu0 %v22808_v30, %s10965_s25 }
 0x663   :  { %v18675_v46 = vpop.permute.xlu1 %7071  ;;  %v18677_v7 = vpop.permute.xlu0 %7069 }
 0x664   :  { %22809 = vst [vmem:[#allocation77_spill] sm:$0xff] %v18675_v46  ;;  %22810 = vst [vmem:[#allocation80_spill] sm:$0xff] %v18677_v7  ;;  %v22819_v7 = vld [vmem:[#allocation114_spill] sm:$0xff] }
 0x665   :  { %7355 = vrot.lane.b32.xlu1 %v22811_v42, %s10965_s25  ;;  %7353 = vrot.lane.b32.xlu0 %v22812_v38, %s10965_s25 }
 0x667   :  { %v18683_v29 = vpop.permute.xlu1 %7173  ;;  %v18685_v59 = vpop.permute.xlu0 %7171 }
 0x668   :  { %22813 = vst [vmem:[#allocation81_spill] sm:$0xff] %v18683_v29  ;;  %22814 = vst [vmem:[#allocation332_spill] sm:$0xff] %v18685_v59 }
 0x669   :  { %7359 = vrot.lane.b32.xlu1 %v22815_v17, %s10965_s25  ;;  %7357 = vrot.lane.b32.xlu0 %v22816_v3, %s10965_s25 }
 0x66b   :  { %v18691_v52 = vpop.permute.xlu1 %7177  ;;  %v18693_v46 = vpop.permute.xlu0 %7175 }
 0x66c   :  { %22817 = vst [vmem:[#allocation84_spill] sm:$0xff] %v18691_v52  ;;  %22818 = vst [vmem:[#allocation85_spill] sm:$0xff] %v18693_v46  ;;  %v22827_v46 = vld [vmem:[#allocation213_spill] sm:$0xff] }
 0x66d   :  { %7363 = vrot.lane.b32.xlu1 %v22819_v7, %s10965_s25  ;;  %7361 = vrot.lane.b32.xlu0 %v22820_v15, %s10965_s25 }
 0x66f   :  { %v18699_v63 = vpop.permute.xlu1 %7181  ;;  %v18701_v29 = vpop.permute.xlu0 %7179 }
 0x670   :  { %22821 = vst [vmem:[#allocation88_spill] sm:$0xff] %v18699_v63  ;;  %22822 = vst [vmem:[#allocation58_spill] sm:$0xff] %v18701_v29  ;;  %v22829_v63 = vld [vmem:[#allocation252_spill] sm:$0xff] }
 0x671   :  { %7367 = vrot.lane.b32.xlu1 %v22823_v14, %s10965_s25  ;;  %7365 = vrot.lane.b32.xlu0 %v22824_v22, %s10965_s25  ;;  %v7321_v59 = vrot.slane %v22829_v63, %v15167_v5 }
 0x673   :  { %v18707_v41 = vpop.permute.xlu1 %7185  ;;  %v18709_v52 = vpop.permute.xlu0 %7183 }
 0x674   :  { %22825 = vst [vmem:[#allocation59_spill] sm:$0xff] %v18707_v41  ;;  %22826 = vst [vmem:[#allocation62_spill] sm:$0xff] %v18709_v52  ;;  %v7322_v41 = vcombine.low %v18532_v39, %v7321_v59  ;;  %v22833_v52 = vld [vmem:[#allocation16_spill] sm:$0xff]  ;;  %v22845_v39 = vld [vmem:[#allocation238_spill] sm:$0xff] }
 0x675   :  { %7371 = vrot.lane.b32.xlu1 %v22827_v46, %s10965_s25  ;;  %7369 = vrot.lane.b32.xlu0 %v22828_v47, %s10965_s25 }
 0x676   :  { %v18732_v63 = vrot.slane %v7322_v41, 1 }
 0x677   :  { %v18717_v29 = vpop.permute.xlu1 %7189  ;;  %v18719_v51 = vpop.permute.xlu0 %7187 }
 0x678   :  { %22830 = vst [vmem:[#allocation63_spill] sm:$0xff] %v18717_v29  ;;  %22831 = vst [vmem:[#allocation127_spill] sm:$0xff] %v18719_v51  ;;  %v22838_v29 = vld [vmem:[#allocation27_spill] sm:$0xff] }
 0x679   :  { %7375 = vrot.lane.b32.xlu1 %v22832_v36, %s10965_s25  ;;  %7373 = vrot.lane.b32.xlu0 %v22833_v52, %s10965_s25  ;;  %22837 = vst [vmem:[#allocation67_spill] sm:$0xff] %v18732_v63  ;;  %v7331_v36 = vrot.slane %v18536_v28, 1 }
 0x67b   :  { %v18726_v14 = vpop.permute.xlu1 %7193  ;;  %v18728_v46 = vpop.permute.xlu0 %7191 }
 0x67c   :  { %22834 = vst [vmem:[#allocation66_spill] sm:$0xff] %v18726_v14  ;;  %22835 = vst [vmem:[#allocation335_spill] sm:$0xff] %v18728_v46  ;;  %v18745_v14 = vsel %vm146_vm0, %v7331_v36, %v18732_v63  ;;  %v22848_v36 = vld [vmem:[#allocation247_spill] sm:$0xff] }
 0x67d   :  { %7379 = vrot.lane.b32.xlu1 %v22836_v31, %s10965_s25  ;;  %7377 = vrot.lane.b32.xlu0 %v22838_v29, %s10965_s25  ;;  %22841 = vst [vmem:[#allocation71_spill] sm:$0xff] %v18745_v14 }
 0x67f   :  { %v18736_v51 = vpop.permute.xlu1 %7197  ;;  %v18739_v59 = vpop.permute.xlu0 %7195 }
 0x680   :  { %22839 = vst [vmem:[#allocation70_spill] sm:$0xff] %v18736_v51  ;;  %22840 = vst [vmem:[#allocation128_spill] sm:$0xff] %v18739_v59  ;;  %v22844_v51 = vld [vmem:[#allocation236_spill] sm:$0xff] }
 0x681   :  { %7383 = vrot.lane.b32.xlu1 %v18732_v63, %s10965_s25  ;;  %7381 = vrot.lane.b32.xlu0 %v18745_v14, %s10965_s25  ;;  %v22849_v63 = vld [vmem:[#allocation249_spill] sm:$0xff] }
 0x683   :  { %v18749_v41 = vpop.permute.xlu1 %7201  ;;  %v18751_v46 = vpop.permute.xlu0 %7199 }
 0x684   :  { %22842 = vst [vmem:[#allocation78_spill] sm:$0xff] %v18749_v41  ;;  %22843 = vst [vmem:[#allocation79_spill] sm:$0xff] %v18751_v46  ;;  %v22852_v46 = vld [vmem:[#allocation255_spill] sm:$0xff] }
 0x685   :  { %7387 = vrot.lane.b32.xlu1 %v22844_v51, %s10965_s25  ;;  %7385 = vrot.lane.b32.xlu0 %v22845_v39, %s10965_s25  ;;  %v22853_v51 = vld [vmem:[#allocation258_spill] sm:$0xff] }
 0x687   :  { %v18757_v59 = vpop.permute.xlu1 %7205  ;;  %v18759_v31 = vpop.permute.xlu0 %7203 }
 0x688   :  { %22846 = vst [vmem:[#allocation82_spill] sm:$0xff] %v18757_v59  ;;  %22847 = vst [vmem:[#allocation83_spill] sm:$0xff] %v18759_v31  ;;  %v22856_v31 = vld [vmem:[#allocation256_spill] sm:$0xff] }
 0x689   :  { %7391 = vrot.lane.b32.xlu1 %v22848_v36, %s10965_s25  ;;  %7389 = vrot.lane.b32.xlu0 %v22849_v63, %s10965_s25  ;;  %v22857_v36 = vld [vmem:[#allocation260_spill] sm:$0xff] }
 0x68b   :  { %v18765_v14 = vpop.permute.xlu1 %7209  ;;  %v18767_v41 = vpop.permute.xlu0 %7207 }
 0x68c   :  { %22850 = vst [vmem:[#allocation86_spill] sm:$0xff] %v18765_v14  ;;  %22851 = vst [vmem:[#allocation336_spill] sm:$0xff] %v18767_v41  ;;  %v22860_v41 = vld [vmem:[#allocation145_spill] sm:$0xff] }
 0x68d   :  { %7395 = vrot.lane.b32.xlu1 %v22852_v46, %s10965_s25  ;;  %7393 = vrot.lane.b32.xlu0 %v22853_v51, %s10965_s25  ;;  %v22861_v46 = vld [vmem:[#allocation264_spill] sm:$0xff] }
 0x68f   :  { %v18773_v39 = vpop.permute.xlu1 %7213  ;;  %v18775_v59 = vpop.permute.xlu0 %7211 }
 0x690   :  { %22854 = vst [vmem:[#allocation295_spill] sm:$0xff] %v18773_v39  ;;  %22855 = vst [vmem:[#allocation131_spill] sm:$0xff] %v18775_v59  ;;  %v22864_v59 = vld [vmem:[#allocation269_spill] sm:$0xff] }
 0x691   :  { %7399 = vrot.lane.b32.xlu1 %v22856_v31, %s10965_s25  ;;  %7397 = vrot.lane.b32.xlu0 %v22857_v36, %s10965_s25  ;;  %v22865_v31 = vld [vmem:[#allocation273_spill] sm:$0xff] }
 0x693   :  { %v18781_v63 = vpop.permute.xlu1 %7217  ;;  %v18783_v14 = vpop.permute.xlu0 %7215 }
 0x694   :  { %22858 = vst [vmem:[#allocation296_spill] sm:$0xff] %v18781_v63  ;;  %22859 = vst [vmem:[#allocation339_spill] sm:$0xff] %v18783_v14 }
 0x695   :  { %7403 = vrot.lane.b32.xlu1 %v22860_v41, %s10965_s25  ;;  %7401 = vrot.lane.b32.xlu0 %v22861_v46, %s10965_s25 }
 0x697   :  { %v18789_v51 = vpop.permute.xlu1 %7221  ;;  %v18791_v39 = vpop.permute.xlu0 %7219 }
 0x698   :  { %22862 = vst [vmem:[#allocation90_spill] sm:$0xff] %v18789_v51  ;;  %22863 = vst [vmem:[#allocation91_spill] sm:$0xff] %v18791_v39 }
 0x699   :  { %7407 = vrot.lane.b32.xlu1 %v22864_v59, %s10965_s25  ;;  %7405 = vrot.lane.b32.xlu0 %v22865_v31, %s10965_s25  ;;  %v22946_v59 = vld [vmem:[#allocation85_spill] sm:$0xff] }
 0x69b   :  { %v18797_v36 = vpop.permute.xlu1 %7225  ;;  %v18799_v63 = vpop.permute.xlu0 %7223 }
 0x69c   :  { %22866 = vst [vmem:[#allocation132_spill] sm:$0xff] %v18797_v36  ;;  %22867 = vst [vmem:[#allocation300_spill] sm:$0xff] %v18799_v63 }
 0x69d   :  { %7411 = vrot.lane.b32.xlu1 %v17818_v20, %s10965_s25  ;;  %7409 = vrot.lane.b32.xlu0 %v17872_v23, %s10965_s25  ;;  %v22943_v23 = vld [vmem:[#allocation401_spill] sm:$0xff] }
 0x69f   :  { %v18805_v14 = vpop.permute.xlu1 %7229  ;;  %v18807_v51 = vpop.permute.xlu0 %7227 }
 0x6a0   :  { %22868 = vst [vmem:[#allocation94_spill] sm:$0xff] %v18805_v14  ;;  %22869 = vst [vmem:[#allocation303_spill] sm:$0xff] %v18807_v51  ;;  %v22872_v14 = vld [vmem:[#allocation240_spill] sm:$0xff] }
 0x6a1   :  { %7415 = vrot.lane.b32.xlu1 %v17874_v18, %s10965_s25  ;;  %7413 = vrot.lane.b32.xlu0 %v17923_v57, %s10965_s25  ;;  %v7329_v63 = vrot.slane %v22872_v14, %v15167_v5  ;;  %v22877_v18 = vld [vmem:[#allocation308_spill] sm:$0xff] }
 0x6a3   :  { %v18813_v39 = vpop.permute.xlu1 %7233  ;;  %v18815_v36 = vpop.permute.xlu0 %7231 }
 0x6a4   :  { %22870 = vst [vmem:[#allocation95_spill] sm:$0xff] %v18813_v39  ;;  %22871 = vst [vmem:[#allocation304_spill] sm:$0xff] %v18815_v36  ;;  %v7330_v39 = vcombine.low %v18635_v33, %v7329_v63  ;;  %v5315_v33 = vld [vmem:[%s20384_s3 + $0x20] sm:$0xff] }
 0x6a5   :  { %7419 = vrot.lane.b32.xlu1 %v17933_v12, %s10965_s25  ;;  %7417 = vrot.lane.b32.xlu0 %v17984_v4, %s10965_s25 }
 0x6a6   :  { %v18838_v14 = vrot.slane %v7330_v39, 1 }
 0x6a7   :  { %v18823_v51 = vpop.permute.xlu1 %7237  ;;  %v18825_v20 = vpop.permute.xlu0 %7235 }
 0x6a8   :  { %22873 = vst [vmem:[#allocation307_spill] sm:$0xff] %v18823_v51  ;;  %22874 = vst [vmem:[#allocation340_spill] sm:$0xff] %v18825_v20  ;;  %v22879_v51 = vld [vmem:[#allocation298_spill] sm:$0xff] }
 0x6a9   :  { %7423 = vrot.lane.b32.xlu1 %v17954_v34, %s10965_s25  ;;  %7421 = vrot.lane.b32.xlu0 %v18034_v19, %s10965_s25  ;;  %22878 = vst [vmem:[#allocation102_spill] sm:$0xff] %v18838_v14  ;;  %v7334_v34 = vrot.slane %v18036_v43, 1 }
 0x6ab   :  { %v18832_v36 = vpop.permute.xlu1 %7241  ;;  %v18834_v12 = vpop.permute.xlu0 %7239 }
 0x6ac   :  { %22875 = vst [vmem:[#allocation99_spill] sm:$0xff] %v18832_v36  ;;  %22876 = vst [vmem:[#allocation101_spill] sm:$0xff] %v18834_v12  ;;  %v18851_v36 = vsel %vm146_vm0, %v7334_v34, %v18838_v14  ;;  %vm8568_vm0 = vcmask 523264  }
 0x6ad   :  { %7427 = vrot.lane.b32.xlu1 %v22877_v18, %s10965_s25  ;;  %7425 = vrot.lane.b32.xlu0 %v22879_v51, %s10965_s25  ;;  %22882 = vst [vmem:[#allocation312_spill] sm:$0xff] %v18851_v36 }
 0x6af   :  { %v18842_v20 = vpop.permute.xlu1 %7245  ;;  %v18845_v63 = vpop.permute.xlu0 %7243 }
 0x6b0   :  { %22880 = vst [vmem:[#allocation311_spill] sm:$0xff] %v18842_v20  ;;  %22881 = vst [vmem:[#allocation103_spill] sm:$0xff] %v18845_v63 }
 0x6b1   :  { %7431 = vrot.lane.b32.xlu1 %v18838_v14, %s10965_s25  ;;  %7429 = vrot.lane.b32.xlu0 %v18851_v36, %s10965_s25 }
 0x6b3   :  { %v18855_v39 = vpop.permute.xlu1 %7249  ;;  %v18857_v12 = vpop.permute.xlu0 %7247 }
 0x6b4   :  { %22883 = vst [vmem:[#allocation104_spill] sm:$0xff] %v18855_v39  ;;  %22884 = vst [vmem:[#allocation105_spill] sm:$0xff] %v18857_v12 }
 0x6b5   :  { %7533 = vrot.lane.b32.xlu1 %v18123_v26, %s10969_s2  ;;  %7531 = vrot.lane.b32.xlu0 %v22579_v27, %s10969_s2  ;;  %v5311_v26 = vld [vmem:[%s20384_s3] sm:$0xff]  ;;  %v5312_v27 = vld [vmem:[%s20384_s3 + $0x8] sm:$0xff] }
 0x6b7   :  { %v18863_v20 = vpop.permute.xlu1 %7253  ;;  %v18865_v63 = vpop.permute.xlu0 %7251 }
 0x6b8   :  { %22885 = vst [vmem:[#allocation315_spill] sm:$0xff] %v18863_v20  ;;  %22886 = vst [vmem:[#allocation106_spill] sm:$0xff] %v18865_v63  ;;  %v5314_v63 = vld [vmem:[%s20384_s3 + $0x18] sm:$0xff] }
 0x6b9   :  { %7537 = vrot.lane.b32.xlu1 %v18142_v21, %s10969_s2  ;;  %7535 = vrot.lane.b32.xlu0 %v22584_v49, %s10969_s2 }
 0x6bb   :  { %v18871_v34 = vpop.permute.xlu1 %7257  ;;  %v18873_v39 = vpop.permute.xlu0 %7255 }
 0x6bc   :  { %22887 = vst [vmem:[#allocation316_spill] sm:$0xff] %v18871_v34  ;;  %22888 = vst [vmem:[#allocation108_spill] sm:$0xff] %v18873_v39  ;;  %v5313_v34 = vld [vmem:[%s20384_s3 + $0x10] sm:$0xff]  ;;  %v10861_v39 = vpack.c.bf16 %v5312_v27, %v5311_v26  ;;  %v5316_v26 = vld [vmem:[%s20384_s3 + $0x28] sm:$0xff] }
 0x6bd   :  { %7541 = vrot.lane.b32.xlu1 %v18152_v45, %s10969_s2  ;;  %7539 = vrot.lane.b32.xlu0 %v22588_v40, %s10969_s2  ;;  %v10865_v14 = vpack.c.bf16 %v5314_v63, %v5313_v34  ;;  %v10869_v63 = vpack.c.bf16 %v5316_v26, %v5315_v33 }
 0x6be   :  { %10862 = vmatprep.subr.bf16.mxu1 %v10861_v39 }
 0x6bf   :  { %v18888_v20 = vpop.permute.xlu1 %7261  ;;  %v18893_v12 = vpop.permute.xlu0 %7259  ;;  %10864 = vmatpush3.bf16.msra.mxu1 %v10861_v39 }
 0x6c0   :  { %22889 = vst [vmem:[#allocation320_spill] sm:$0xff] %v18888_v20  ;;  %22890 = vst [vmem:[#allocation135_spill] sm:$0xff] %v18893_v12  ;;  %10866 = vmatprep.subr.bf16.mxu1 %v10865_v14  ;;  %v5317_v20 = vld [vmem:[%s20384_s3 + $0x30] sm:$0xff]  ;;  %v5318_v12 = vld [vmem:[%s20384_s3 + $0x38] sm:$0xff] }
 0x6c1   :  { %7725 = vrot.lane.b32.xlu1 %v22708_v0, %s10970_s28  ;;  %7543 = vrot.lane.b32.xlu0 %v22592_v16, %s10969_s2  ;;  %v10873_v39 = vpack.c.bf16 %v5318_v12, %v5317_v20 }
 0x6c3   :  { %v18905_v27 = vpop.permute.xlu1 %7265  ;;  %v18907_v34 = vpop.permute.xlu0 %7263  ;;  %10868 = vmatpush3.bf16.msra.mxu1 %v10865_v14 }
 0x6c4   :  { %22891 = vst [vmem:[#allocation111_spill] sm:$0xff] %v18905_v27  ;;  %22892 = vst [vmem:[#allocation343_spill] sm:$0xff] %v18907_v34  ;;  %10870 = vmatprep.subr.bf16.mxu1 %v10869_v63 }
 0x6c5   :  { %8085 = vrot.lane.b32.xlu1 %v22584_v49, %s10971_s9  ;;  %7891 = vrot.lane.b32.xlu0 %v22800_v11, %s10972_s14  ;;  %v5319_v11 = vld [vmem:[%s20384_s3 + $0x40] sm:$0xff] }
 0x6c7   :  { %v18919_v33 = vpop.permute.xlu1 %7339  ;;  %v18921_v26 = vpop.permute.xlu0 %7337  ;;  %10872 = vmatpush3.bf16.msra.mxu1 %v10869_v63 }
 0x6c8   :  { %10874 = vmatprep.subr.bf16.mxu1 %v10873_v39 }
 0x6c9   :  { %7729 = vrot.lane.b32.xlu1 %v22712_v44, %s10970_s28  ;;  %7727 = vrot.lane.b32.xlu0 %v22707_v1, %s10970_s28 }
 0x6cb   :  { %v18927_v49 = vpop.permute.xlu1 %7343  ;;  %v18929_v27 = vpop.permute.xlu0 %7341  ;;  %10876 = vmatpush3.bf16.msra.mxu1 %v10873_v39 }
 0x6cc   :  { %10799 = vmatprep.subr.mxu1 %v5319_v11 }
 0x6cd   :  { %7895 = vrot.lane.b32.xlu1 %v22804_v58, %s10972_s14  ;;  %7893 = vrot.lane.b32.xlu0 %v22799_v8, %s10972_s14 }
 0x6cf   :  { %v18938_v20 = vpop.permute.xlu1 %7347  ;;  %v18940_v12 = vpop.permute.xlu0 %7345  ;;  %10800 = vmatpush3.msra.mxu1 %v5319_v11 }
 0x6d1   :  { %8087 = vrot.lane.b32.xlu1 %v18142_v21, %s10971_s9  ;;  %7733 = vrot.lane.b32.xlu0 %v22716_v62, %s10970_s28 }
 0x6d3   :  { %v18946_v14 = vpop.permute.xlu1 %7351  ;;  %v18948_v63 = vpop.permute.xlu0 %7349 }
 0x6d5   :  { %7731 = vrot.lane.b32.xlu1 %v22711_v32, %s10970_s28  ;;  %8089 = vrot.lane.b32.xlu0 %v22588_v40, %s10971_s9 }
 0x6d7   :  { %v18954_v8 = vpop.permute.xlu1 %7355  ;;  %v18956_v58 = vpop.permute.xlu0 %7353 }
 0x6d9   :  { %7897 = vrot.lane.b32.xlu1 %v22803_v56, %s10972_s14  ;;  %7899 = vrot.lane.b32.xlu0 %v22808_v30, %s10972_s14 }
 0x6db   :  { %v18962_v21 = vpop.permute.xlu1 %7359  ;;  %v18964_v39 = vpop.permute.xlu0 %7357 }
 0x6dd   :  { %8091 = vrot.lane.b32.xlu1 %v18152_v45, %s10971_s9  ;;  %8093 = vrot.lane.b32.xlu0 %v22592_v16, %s10971_s9 }
 0x6df   :  { %v18970_v40 = vpop.permute.xlu1 %7363  ;;  %v18972_v11 = vpop.permute.xlu0 %7361 }
 0x6e1   :  { %7545 = vrot.lane.b32.xlu1 %v18162_v61, %s10969_s2  ;;  %7737 = vrot.lane.b32.xlu0 %v22720_v25, %s10970_s28 }
 0x6e3   :  { %v18978_v30 = vpop.permute.xlu1 %7367  ;;  %v18980_v56 = vpop.permute.xlu0 %7365 }
 0x6e5   :  { %7903 = vrot.lane.b32.xlu1 %v22812_v38, %s10972_s14  ;;  %7735 = vrot.lane.b32.xlu0 %v22715_v10, %s10970_s28 }
 0x6e7   :  { %v18986_v16 = vpop.permute.xlu1 %7371  ;;  %v18988_v45 = vpop.permute.xlu0 %7369 }
 0x6e9   :  { %7739 = vrot.lane.b32.xlu1 %v22719_v54, %s10970_s28  ;;  %7547 = vrot.lane.b32.xlu0 %v22598_v6, %s10969_s2 }
 0x6eb   :  { %v18994_v34 = vpop.permute.xlu1 %7375  ;;  %v18996_v36 = vpop.permute.xlu0 %7373 }
 0x6ec   :  { %22893 = vst [vmem:[#allocation112_spill] sm:$0xff] %v18994_v34  ;;  %v22941_v34 = vld [vmem:[#allocation371_spill] sm:$0xff] }
 0x6ed   :  { %8097 = vrot.lane.b32.xlu1 %v22598_v6, %s10971_s9  ;;  %7901 = vrot.lane.b32.xlu0 %v22807_v60, %s10972_s14 }
 0x6ef   :  { %v19002_v38 = vpop.permute.xlu1 %7379  ;;  %v19004_v18 = vpop.permute.xlu0 %7377 }
 0x6f0   :  { %22894 = vst [vmem:[#allocation136_spill] sm:$0xff] %v19002_v38  ;;  %22895 = vst [vmem:[#allocation327_spill] sm:$0xff] %v19004_v18  ;;  %v22934_v38 = vld [vmem:[#allocation332_spill] sm:$0xff] }
 0x6f1   :  { %7905 = vrot.lane.b32.xlu1 %v22811_v42, %s10972_s14  ;;  %7741 = vrot.lane.b32.xlu0 %v22724_v24, %s10970_s28 }
 0x6f3   :  { %v19010_v43 = vpop.permute.xlu1 %7383  ;;  %v19012_v51 = vpop.permute.xlu0 %7381 }
 0x6f4   :  { %22896 = vst [vmem:[#allocation344_spill] sm:$0xff] %v19010_v43  ;;  %22897 = vst [vmem:[#allocation120_spill] sm:$0xff] %v19012_v51  ;;  %v22933_v51 = vld [vmem:[#allocation402_spill] sm:$0xff] }
 0x6f5   :  { %7907 = vrot.lane.b32.xlu1 %v22816_v3, %s10972_s14  ;;  %8095 = vrot.lane.b32.xlu0 %v18162_v61, %s10971_s9 }
 0x6f7   :  { %v19018_v6 = vpop.permute.xlu1 %7387  ;;  %v19020_v60 = vpop.permute.xlu0 %7385 }
 0x6f8   :  { %22898 = vst [vmem:[#allocation139_spill] sm:$0xff] %v19018_v6  ;;  %22899 = vst [vmem:[#allocation331_spill] sm:$0xff] %v19020_v60  ;;  %v22932_v60 = vld [vmem:[#allocation248_spill] sm:$0xff] }
 0x6f9   :  { %7549 = vrot.lane.b32.xlu1 %v18174_v9, %s10969_s2  ;;  %8099 = vrot.lane.b32.xlu0 %v18174_v9, %s10971_s9 }
 0x6fb   :  { %v19026_v42 = vpop.permute.xlu1 %7391  ;;  %v19028_v19 = vpop.permute.xlu0 %7389 }
 0x6fc   :  { %22900 = vst [vmem:[#allocation347_spill] sm:$0xff] %v19026_v42  ;;  %22901 = vst [vmem:[#allocation124_spill] sm:$0xff] %v19028_v19  ;;  %v22906_v19 = vld [vmem:[#allocation204_spill] sm:$0xff] }
 0x6fd   :  { %8101 = vrot.lane.b32.xlu1 %v22605_v55, %s10971_s9  ;;  %7551 = vrot.lane.b32.xlu0 %v22605_v55, %s10969_s2 }
 0x6ff   :  { %v19034_v3 = vpop.permute.xlu1 %7395  ;;  %v19036_v61 = vpop.permute.xlu0 %7393 }
 0x700   :  { %22902 = vst [vmem:[#allocation140_spill] sm:$0xff] %v19034_v3  ;;  %22903 = vst [vmem:[#allocation348_spill] sm:$0xff] %v19036_v61  ;;  %v22909_v61 = vld [vmem:[#allocation154_spill] sm:$0xff] }
 0x701   :  { %7745 = vrot.lane.b32.xlu1 %v22728_v37, %s10970_s28  ;;  %7743 = vrot.lane.b32.xlu0 %v22723_v2, %s10970_s28 }
 0x703   :  { %v19042_v9 = vpop.permute.xlu1 %7399  ;;  %v19044_v42 = vpop.permute.xlu0 %7397 }
 0x704   :  { %22904 = vst [vmem:[#allocation351_spill] sm:$0xff] %v19042_v9  ;;  %22905 = vst [vmem:[#allocation143_spill] sm:$0xff] %v19044_v42  ;;  %v22931_v42 = vld [vmem:[#allocation318_spill] sm:$0xff] }
 0x705   :  { %7909 = vrot.lane.b32.xlu1 %v22815_v17, %s10972_s14  ;;  %7555 = vrot.lane.b32.xlu0 %v22906_v19, %s10969_s2  ;;  %v8229_v43 = vsel %vm1749_vm5, %v22932_v60, %v22931_v42 }
 0x707   :  { %v19050_v55 = vpop.permute.xlu1 %7403  ;;  %v19052_v3 = vpop.permute.xlu0 %7401 }
 0x708   :  { %22907 = vst [vmem:[#allocation144_spill] sm:$0xff] %v19050_v55  ;;  %22908 = vst [vmem:[#allocation352_spill] sm:$0xff] %v19052_v3  ;;  %v22930_v3 = vld [vmem:[#allocation121_spill] sm:$0xff] }
 0x709   :  { %7553 = vrot.lane.b32.xlu1 %v22909_v61, %s10969_s2  ;;  %7911 = vrot.lane.b32.xlu0 %v22820_v15, %s10972_s14 }
 0x70b   :  { %v19058_v6 = vpop.permute.xlu1 %7407  ;;  %v19060_v9 = vpop.permute.xlu0 %7405 }
 0x70c   :  { %22910 = vst [vmem:[#allocation147_spill] sm:$0xff] %v19058_v6  ;;  %22911 = vst [vmem:[#allocation355_spill] sm:$0xff] %v19060_v9  ;;  %v22929_v9 = vld [vmem:[#allocation213_spill] sm:$0xff] }
 0x70d   :  { %8103 = vrot.lane.b32.xlu1 %v22909_v61, %s10971_s9  ;;  %7749 = vrot.lane.b32.xlu0 %v22732_v48, %s10970_s28 }
 0x70f   :  { %v19066_v17 = vpop.permute.xlu1 %7411  ;;  %v19068_v55 = vpop.permute.xlu0 %7409 }
 0x710   :  { %22912 = vst [vmem:[#allocation148_spill] sm:$0xff] %v19066_v17  ;;  %22913 = vst [vmem:[#allocation152_spill] sm:$0xff] %v19068_v55  ;;  %v22918_v55 = vld [vmem:[#allocation209_spill] sm:$0xff] }
 0x711   :  { %7747 = vrot.lane.b32.xlu1 %v22727_v50, %s10970_s28  ;;  %8105 = vrot.lane.b32.xlu0 %v22906_v19, %s10971_s9 }
 0x713   :  { %v19074_v15 = vpop.permute.xlu1 %7415  ;;  %v19076_v6 = vpop.permute.xlu0 %7413 }
 0x714   :  { %22914 = vst [vmem:[#allocation151_spill] sm:$0xff] %v19074_v15  ;;  %22915 = vst [vmem:[#allocation155_spill] sm:$0xff] %v19076_v6  ;;  %v22921_v6 = vld [vmem:[#allocation323_spill] sm:$0xff] }
 0x715   :  { %7913 = vrot.lane.b32.xlu1 %v22819_v7, %s10972_s14  ;;  %7915 = vrot.lane.b32.xlu0 %v22824_v22, %s10972_s14 }
 0x717   :  { %v19082_v61 = vpop.permute.xlu1 %7419  ;;  %v19084_v17 = vpop.permute.xlu0 %7417 }
 0x718   :  { %22916 = vst [vmem:[#allocation359_spill] sm:$0xff] %v19082_v61  ;;  %22917 = vst [vmem:[#allocation356_spill] sm:$0xff] %v19084_v17  ;;  %v22924_v61 = vld [vmem:[#allocation326_spill] sm:$0xff] }
 0x719   :  { %7559 = vrot.lane.b32.xlu1 %v22918_v55, %s10969_s2  ;;  %8109 = vrot.lane.b32.xlu0 %v22918_v55, %s10971_s9 }
 0x71b   :  { %v19090_v19 = vpop.permute.xlu1 %7423  ;;  %v19092_v15 = vpop.permute.xlu0 %7421 }
 0x71c   :  { %22919 = vst [vmem:[#allocation156_spill] sm:$0xff] %v19090_v19  ;;  %22920 = vst [vmem:[#allocation360_spill] sm:$0xff] %v19092_v15 }
 0x71d   :  { %7557 = vrot.lane.b32.xlu1 %v22921_v6, %s10969_s2  ;;  %8107 = vrot.lane.b32.xlu0 %v22921_v6, %s10971_s9 }
 0x71f   :  { %v19098_v7 = vpop.permute.xlu1 %7427  ;;  %v19100_v22 = vpop.permute.xlu0 %7425 }
 0x720   :  { %22922 = vst [vmem:[#allocation363_spill] sm:$0xff] %v19098_v7  ;;  %22923 = vst [vmem:[#allocation130_spill] sm:$0xff] %v19100_v22  ;;  %v22927_v22 = vld [vmem:[#allocation96_spill] sm:$0xff] }
 0x721   :  { %7561 = vrot.lane.b32.xlu1 %v22924_v61, %s10969_s2  ;;  %7753 = vrot.lane.b32.xlu0 %v22736_v13, %s10970_s28 }
 0x723   :  { %v19106_v55 = vpop.permute.xlu1 %7431  ;;  %v19108_v19 = vpop.permute.xlu0 %7429 }
 0x724   :  { %22925 = vst [vmem:[#allocation45_spill] sm:$0xff] %v19106_v55  ;;  %22926 = vst [vmem:[#allocation46_spill] sm:$0xff] %v19108_v19  ;;  %v22928_v55 = vld [vmem:[#allocation208_spill] sm:$0xff] }
 0x725   :  { %7919 = vrot.lane.b32.xlu1 %v22828_v47, %s10972_s14  ;;  %7751 = vrot.lane.b32.xlu0 %v22731_v35, %s10970_s28 }
 0x727   :  { %v7534_v6 = vpop.permute.xlu1 %7533  ;;  %v7532_v7 = vpop.permute.xlu0 %7531 }
 0x729   :  { %7755 = vrot.lane.b32.xlu1 %v22735_v53, %s10970_s28  ;;  %7563 = vrot.lane.b32.xlu0 %v22927_v22, %s10969_s2  ;;  %v22944_v53 = vld [vmem:[#allocation404_spill] sm:$0xff] }
 0x72b   :  { %v19118_v15 = vpop.permute.xlu1 %7537  ;;  %v7536_v17 = vpop.permute.xlu0 %7535 }
 0x72d   :  { %8113 = vrot.lane.b32.xlu1 %v22927_v22, %s10971_s9  ;;  %7917 = vrot.lane.b32.xlu0 %v22928_v55, %s10972_s14  ;;  %v8277_v22 = vsel %vm1863_vm7, %v8229_v43, %v22933_v51 }
 0x72e   :  { %v8325_v57 = vsel %vm1977_vm9, %v8277_v22, %v22934_v38  ;;  %v22935_v22 = vld [vmem:[#allocation333_spill] sm:$0xff] }
 0x72f   :  { %v19124_v47 = vpop.permute.xlu1 %7541  ;;  %v19126_v19 = vpop.permute.xlu0 %7539 }
 0x731   :  { %7921 = vrot.lane.b32.xlu1 %v22929_v9, %s10972_s14  ;;  %7757 = vrot.lane.b32.xlu0 %v22930_v3, %s10970_s28  ;;  %v8373_v9 = vsel %vm2091_vm11, %v8325_v57, %v18921_v26  ;;  %v22945_v3 = vld [vmem:[#allocation81_spill] sm:$0xff] }
 0x732   :  { %v8422_v60 = vsel %vm8421_vm13, %v8373_v9, %v7532_v7  ;;  %v22936_v9 = vld [vmem:[#allocation274_spill] sm:$0xff] }
 0x733   :  { %v7726_v4 = vpop.permute.xlu1 %7725  ;;  %v19137_v55 = vpop.permute.xlu0 %7543 }
 0x734   :  { %v8471_v51 = vsel %vm8470_vm14, %v8422_v60, %v7726_v4 }
 0x735   :  { %7923 = vrot.lane.b32.xlu1 %v22833_v52, %s10972_s14  ;;  %8111 = vrot.lane.b32.xlu0 %v22924_v61, %s10971_s9 }
 0x737   :  { %v8086_v43 = vpop.permute.xlu1 %8085  ;;  %v7892_v42 = vpop.permute.xlu0 %7891 }
 0x738   :  { %v8520_v38 = vsel %vm8519_vm15, %v8471_v51, %v7892_v42  ;;  %v22938_v51 = vld [vmem:[#allocation317_spill] sm:$0xff]  ;;  %v22939_v42 = vld [vmem:[#allocation251_spill] sm:$0xff] }
 0x739   :  { %7565 = vrot.lane.b32.xlu1 %v22935_v22, %s10969_s2  ;;  %v8569_v52 = vsel %vm8568_vm0, %v8520_v38, %v8086_v43  ;;  %8115 = vrot.lane.b32.xlu0 %v22935_v22, %s10971_s9  ;;  %v22937_v43 = vld [vmem:[#allocation6_spill] sm:$0xff]  ;;  %v8230_v38 = vsel %vm1749_vm5, %v22939_v42, %v22938_v51  ;;  %v22940_v22 = vld [vmem:[#allocation157_spill] sm:$0xff] }
 0x73a   :  { %v8665_v57 = vcombine.high %v8569_v52, %v8569_v52 }
 0x73b   :  { %v7730_v26 = vpop.permute.xlu1 %7729  ;;  %v7728_v61 = vpop.permute.xlu0 %7727 }
 0x73c   :  { %v8695_v7 = vcombine.low %v8569_v52, %v8665_v57  ;;  %v8231_v52 = vsel %vm1749_vm5, %v22941_v34, %v22940_v22  ;;  %v22942_v57 = vld [vmem:[#allocation5_spill] sm:$0xff] }
 0x73d   :  { %8117 = vrot.lane.b32.xlu1 %v22936_v9, %s10971_s9  ;;  %7567 = vrot.lane.b32.xlu0 %v22936_v9, %s10969_s2  ;;  %v8278_v9 = vsel %vm1863_vm7, %v8230_v38, %v22943_v23  ;;  %v22948_v38 = vld [vmem:[#allocation275_spill] sm:$0xff] }
 0x73e   :  { %10801 = vmatprep.mubr.msk.f32.mxu1 %vm8731_vm1, %v8695_v7  ;;  %v8279_v7 = vsel %vm1863_vm7, %v8231_v52, %v22944_v53 }
 0x73f   :  { %v7896_v4 = vpop.permute.xlu1 %7895  ;;  %v7894_v60 = vpop.permute.xlu0 %7893  ;;  %v8327_v51 = vsel %vm1977_vm9, %v8279_v7, %v22946_v59  ;;  %v22950_v7 = vld [vmem:[#allocation161_spill] sm:$0xff] }
 0x740   :  { %v8375_v22 = vsel %vm2091_vm11, %v8327_v51, %v18929_v27  ;;  %v22951_v51 = vld [vmem:[#allocation338_spill] sm:$0xff] }
 0x741   :  { %7761 = vrot.lane.b32.xlu1 %v22937_v43, %s10970_s28  ;;  %7759 = vrot.lane.b32.xlu0 %v22942_v57, %s10970_s28  ;;  %v8326_v43 = vsel %vm1977_vm9, %v8278_v9, %v22945_v3  ;;  %v22947_v57 = vld [vmem:[#allocation14_spill] sm:$0xff]  ;;  %v8424_v53 = vsel %vm8421_vm13, %v8375_v22, %v7536_v17  ;;  %v22949_v9 = vld [vmem:[#allocation321_spill] sm:$0xff] }
 0x742   :  { %v8374_v34 = vsel %vm2091_vm11, %v8326_v43, %v18919_v33  ;;  %v8473_v3 = vsel %vm8470_vm14, %v8424_v53, %v7730_v26  ;;  %v22952_v26 = vld [vmem:[#allocation324_spill] sm:$0xff]  ;;  %v22954_v22 = vld [vmem:[#allocation405_spill] sm:$0xff] }
 0x743   :  { %v8088_v18 = vpop.permute.xlu1 %8087  ;;  %v7734_v42 = vpop.permute.xlu0 %7733  ;;  %v8423_v23 = vsel %vm8421_vm13, %v8374_v34, %v7534_v6  ;;  %v8522_v33 = vsel %vm8519_vm15, %v8473_v3, %v7896_v4  ;;  %v22953_v34 = vld [vmem:[#allocation403_spill] sm:$0xff] }
 0x744   :  { %v8472_v59 = vsel %vm8470_vm14, %v8423_v23, %v7728_v61  ;;  %v8233_v61 = vsel %vm1749_vm5, %v22708_v0, %v22952_v26 }
 0x745   :  { %7925 = vrot.lane.b32.xlu1 %v22947_v57, %s10972_s14  ;;  %7571 = vrot.lane.b32.xlu0 %v22948_v38, %s10969_s2  ;;  %v8521_v43 = vsel %vm8519_vm15, %v8472_v59, %v7894_v60  ;;  %v8232_v57 = vsel %vm1749_vm5, %v22950_v7, %v22949_v9  ;;  %v8281_v23 = vsel %vm1863_vm7, %v8233_v61, %v22954_v22  ;;  %v22956_v59 = vld [vmem:[#allocation58_spill] sm:$0xff] }
 0x746   :  { %v8570_v6 = vsel %vm8568_vm0, %v8521_v43, %v8088_v18  ;;  %v8280_v4 = vsel %vm1863_vm7, %v8232_v57, %v22953_v34  ;;  %v22955_v18 = vld [vmem:[#allocation84_spill] sm:$0xff] }
 0x747   :  { %v7732_v52 = vpop.permute.xlu1 %7731  ;;  %v8090_v27 = vpop.permute.xlu0 %8089  ;;  %v8328_v53 = vsel %vm1977_vm9, %v8280_v4, %v22955_v18  ;;  %v22958_v4 = vld [vmem:[#allocation21_spill] sm:$0xff] }
 0x748   :  { %v8571_v17 = vsel %vm8568_vm0, %v8522_v33, %v8090_v27  ;;  %v8329_v33 = vsel %vm1977_vm9, %v8281_v23, %v22956_v59  ;;  %v8376_v0 = vsel %vm2091_vm11, %v8328_v53, %v18927_v49  ;;  %v22960_v18 = vld [vmem:[#allocation153_spill] sm:$0xff]  ;;  %v22961_v53 = vld [vmem:[#allocation252_spill] sm:$0xff] }
 0x749   :  { %7569 = vrot.lane.b32.xlu1 %v22951_v51, %s10969_s2  ;;  %v8696_v60 = vcombine.low %v8570_v6, %v8571_v17  ;;  %7927 = vrot.lane.b32.xlu0 %v22838_v29, %s10972_s14  ;;  %v8377_v27 = vsel %vm2091_vm11, %v8329_v33, %v18940_v12  ;;  %v8425_v29 = vsel %vm8421_vm13, %v8376_v0, %v19118_v15  ;;  %v22963_v0 = vld [vmem:[#allocation277_spill] sm:$0xff] }
 0x74a   :  { %v8426_v9 = vsel %vm8421_vm13, %v8377_v27, %v19126_v19  ;;  %v8474_v7 = vsel %vm8470_vm14, %v8425_v29, %v7732_v52  ;;  %v8666_v57 = vcombine.high %v8571_v17, %v8571_v17  ;;  %v22957_v19 = vld [vmem:[#allocation122_spill] sm:$0xff] }
 0x74b   :  { %v7898_v3 = vpop.permute.xlu1 %7897  ;;  %10802 = vmatmul.mubr.msk.f32.vlgmr.msra.gmra.mrb[30].mxu1 %vm8731_vm1, %v8696_v60  ;;  %v7900_v43 = vpop.permute.xlu0 %7899  ;;  %v8475_v49 = vsel %vm8470_vm14, %v8426_v9, %v7734_v42  ;;  %v22959_v60 = vld [vmem:[#allocation71_spill] sm:$0xff]  ;;  %v22964_v9 = vld [vmem:[#allocation322_spill] sm:$0xff] }
 0x74c   :  { %v8523_v6 = vsel %vm8519_vm15, %v8474_v7, %v7898_v3  ;;  %v8524_v26 = vsel %vm8519_vm15, %v8475_v49, %v7900_v43  ;;  %v22962_v3 = vld [vmem:[#allocation407_spill] sm:$0xff]  ;;  %v8234_v7 = vsel %vm1749_vm5, %v22707_v1, %v22964_v9  ;;  %v22965_v49 = vld [vmem:[#allocation329_spill] sm:$0xff] }
 0x74d   :  { %8119 = vrot.lane.b32.xlu1 %v22951_v51, %s10971_s9  ;;  %7765 = vrot.lane.b32.xlu0 %v18536_v28, %s10970_s28  ;;  %v7498_v59 = vcombine.low %v22962_v3, %v22961_v53  ;;  %v22973_v53 = vld [vmem:[#allocation259_spill] sm:$0xff]  ;;  %v22974_v3 = vld [vmem:[#allocation253_spill] sm:$0xff] }
 0x74f   :  { %v8092_v12 = vpop.permute.xlu1 %8091  ;;  %v8094_v61 = vpop.permute.xlu0 %8093  ;;  %v19252_v27 = vrot.slane %v7498_v59, %v15167_v5  ;;  %v8035_v59 = vcombine.low %v22974_v3, %v22973_v53  ;;  %v22982_v3 = vld [vmem:[#allocation409_spill] sm:$0xff] }
 0x750   :  { %v8572_v15 = vsel %vm8568_vm0, %v8523_v6, %v8092_v12  ;;  %v8573_v34 = vsel %vm8568_vm0, %v8524_v26, %v8094_v61  ;;  %v22966_v6 = vld [vmem:[#allocation294_spill] sm:$0xff]  ;;  %v22967_v12 = vld [vmem:[#allocation17_spill] sm:$0xff] }
 0x751   :  { %v8697_v51 = vcombine.low %v8666_v57, %v8572_v15  ;;  %7763 = vrot.lane.b32.xlu1 %v22957_v19, %s10970_s28  ;;  %v8667_v52 = vcombine.high %v8573_v34, %v8573_v34  ;;  %8121 = vrot.lane.b32.xlu0 %v22948_v38, %s10971_s9  ;;  %v8235_v57 = vsel %vm1749_vm5, %v22712_v44, %v22965_v49  ;;  %v22968_v26 = vld [vmem:[#allocation125_spill] sm:$0xff] }
 0x752   :  { %v8036_v15 = vcombine.low %v22968_v26, %v22967_v12  ;;  %v22969_v61 = vld [vmem:[#allocation57_spill] sm:$0xff] }
 0x753   :  { %v7546_v28 = vpop.permute.xlu1 %7545  ;;  %10804 = vmatprep.mubr.msk.f32.mxu1 %vm8731_vm1, %v8697_v51  ;;  %v8698_v42 = vcombine.low %v8573_v34, %v8667_v52  ;;  %v7738_v17 = vpop.permute.xlu0 %7737  ;;  %v8282_v51 = vsel %vm1863_vm7, %v8234_v7, %v22969_v61  ;;  %v22970_v34 = vld [vmem:[#allocation406_spill] sm:$0xff]  ;;  %v22975_v7 = vld [vmem:[#allocation301_spill] sm:$0xff] }
 0x754   :  { %v8283_v52 = vsel %vm1863_vm7, %v8235_v57, %v22970_v34  ;;  %v22976_v49 = vld [vmem:[#allocation325_spill] sm:$0xff] }
 0x755   :  { %7929 = vrot.lane.b32.xlu1 %v22958_v4, %s10972_s14  ;;  %7931 = vrot.lane.b32.xlu0 %v22959_v60, %s10972_s14  ;;  %v22971_v4 = vld [vmem:[#allocation88_spill] sm:$0xff]  ;;  %v22972_v60 = vld [vmem:[#allocation62_spill] sm:$0xff]  ;;  %v8236_v57 = vsel %vm1749_vm5, %v22711_v32, %v22976_v49  ;;  %v22977_v26 = vld [vmem:[#allocation413_spill] sm:$0xff] }
 0x756   :  { %10805 = vmatmul.mubr.msk.f32.gmra.mrb[32].mxu1 %vm8731_vm1, %v8698_v42  ;;  %v8330_v1 = vsel %vm1977_vm9, %v8282_v51, %v22971_v4  ;;  %v22979_v32 = vld [vmem:[#allocation334_spill] sm:$0xff]  ;;  %v22980_v4 = vld [vmem:[#allocation59_spill] sm:$0xff] }
 0x757   :  { %v7904_v22 = vpop.permute.xlu1 %7903  ;;  %v7736_v23 = vpop.permute.xlu0 %7735 }
 0x759   :  { %7575 = vrot.lane.b32.xlu1 %v22960_v18, %s10969_s2  ;;  %8125 = vrot.lane.b32.xlu0 %v22960_v18, %s10971_s9  ;;  %v8331_v18 = vsel %vm1977_vm9, %v8283_v52, %v22972_v60  ;;  %v8050_v52 = vrot.slane %v8036_v15, %v15167_v5  ;;  %v22981_v15 = vld [vmem:[#allocation288_spill] sm:$0xff] }
 0x75a   :  { %v8379_v9 = vsel %vm2091_vm11, %v8331_v18, %v18948_v63 }
 0x75b   :  { %v7740_v38 = vpop.permute.xlu1 %7739  ;;  %v7548_v33 = vpop.permute.xlu0 %7547  ;;  %v8428_v12 = vsel %vm8421_vm13, %v8379_v9, %v19137_v55 }
 0x75c   :  { %v8477_v63 = vsel %vm8470_vm14, %v8428_v12, %v7738_v17 }
 0x75d   :  { %7573 = vrot.lane.b32.xlu1 %v22963_v0, %s10969_s2  ;;  %8123 = vrot.lane.b32.xlu0 %v22963_v0, %s10971_s9  ;;  %v8378_v0 = vsel %vm2091_vm11, %v8330_v1, %v18938_v20  ;;  %v22978_v20 = vld [vmem:[#allocation64_spill] sm:$0xff]  ;;  %v8526_v1 = vsel %vm8519_vm15, %v8477_v63, %v7904_v22  ;;  %v22985_v63 = vld [vmem:[#allocation67_spill] sm:$0xff] }
 0x75e   :  { %v8284_v61 = vsel %vm1863_vm7, %v8236_v57, %v22978_v20 }
 0x75f   :  { %v8098_v43 = vpop.permute.xlu1 %8097  ;;  %v7902_v29 = vpop.permute.xlu0 %7901  ;;  %v8332_v55 = vsel %vm1977_vm9, %v8284_v61, %v22980_v4  ;;  %v22988_v4 = vld [vmem:[#allocation235_spill] sm:$0xff] }
 0x760   :  { %v8380_v17 = vsel %vm2091_vm11, %v8332_v55, %v18946_v14 }
 0x761   :  { %7577 = vrot.lane.b32.xlu1 %v19252_v27, %s10969_s2  ;;  %7769 = vrot.lane.b32.xlu0 %v22966_v6, %s10970_s28  ;;  %v8427_v6 = vsel %vm8421_vm13, %v8378_v0, %v19124_v47  ;;  %v8237_v47 = vsel %vm1749_vm5, %v22716_v62, %v22979_v32  ;;  %v8043_v62 = vrot.slane %v8035_v59, %v15167_v5 }
 0x762   :  { %v8476_v51 = vsel %vm8470_vm14, %v8427_v6, %v7736_v23  ;;  %v8575_v23 = vsel %vm8568_vm0, %v8526_v1, %v8098_v43  ;;  %v8285_v0 = vsel %vm1863_vm7, %v8237_v47, %v22982_v3  ;;  %v8429_v22 = vsel %vm8421_vm13, %v8380_v17, %v7546_v28  ;;  %v22989_v1 = vld [vmem:[#allocation263_spill] sm:$0xff]  ;;  %v22991_v17 = vld [vmem:[#allocation249_spill] sm:$0xff] }
 0x763   :  { %v7906_v42 = vpop.permute.xlu1 %7905  ;;  %v7742_v44 = vpop.permute.xlu0 %7741  ;;  %v8525_v60 = vsel %vm8519_vm15, %v8476_v51, %v7902_v29  ;;  %v22983_v29 = vld [vmem:[#allocation146_spill] sm:$0xff]  ;;  %v8478_v43 = vsel %vm8470_vm14, %v8429_v22, %v7740_v38  ;;  %v8051_v57 = vcombine.low %v8043_v62, %v8050_v52  ;;  %v8668_v59 = vcombine.high %v8575_v23, %v8575_v23  ;;  %v22993_v22 = vld [vmem:[#allocation149_spill] sm:$0xff] }
 0x764   :  { %v8527_v12 = vsel %vm8519_vm15, %v8478_v43, %v7906_v42  ;;  %v22992_v62 = vld [vmem:[#allocation350_spill] sm:$0xff] }
 0x765   :  { %7935 = vrot.lane.b32.xlu1 %v22975_v7, %s10972_s14  ;;  %7767 = vrot.lane.b32.xlu0 %v22977_v26, %s10970_s28  ;;  %v22984_v7 = vld [vmem:[#allocation127_spill] sm:$0xff] }
 0x766   :  { %v8333_v14 = vsel %vm1977_vm9, %v8285_v0, %v22984_v7  ;;  %v22995_v7 = vld [vmem:[#allocation341_spill] sm:$0xff] }
 0x767   :  { %v7908_v34 = vpop.permute.xlu1 %7907  ;;  %v8096_v18 = vpop.permute.xlu0 %8095  ;;  %v8381_v6 = vsel %vm2091_vm11, %v8333_v14, %v18956_v58  ;;  %v22996_v14 = vld [vmem:[#allocation408_spill] sm:$0xff] }
 0x768   :  { %v8574_v53 = vsel %vm8568_vm0, %v8525_v60, %v8096_v18  ;;  %v8430_v26 = vsel %vm8421_vm13, %v8381_v6, %v7548_v33  ;;  %v22986_v33 = vld [vmem:[#allocation293_spill] sm:$0xff]  ;;  %v22990_v60 = vld [vmem:[#allocation19_spill] sm:$0xff] }
 0x769   :  { %7771 = vrot.lane.b32.xlu1 %v22981_v15, %s10970_s28  ;;  %v8699_v9 = vcombine.low %v8574_v53, %v8575_v23  ;;  %7579 = vrot.lane.b32.xlu0 %v22983_v29, %s10969_s2  ;;  %v8479_v61 = vsel %vm8470_vm14, %v8430_v26, %v7742_v44  ;;  %v22987_v47 = vrot.slane %v22986_v33, 1  ;;  %v8052_v18 = vcombine.low %v22990_v60, %v22989_v1  ;;  %v22999_v26 = vld [vmem:[#allocation335_spill] sm:$0xff] }
 0x76a   :  { %v8528_v58 = vsel %vm8519_vm15, %v8479_v61, %v7908_v34 }
 0x76b   :  { %v7550_v49 = vpop.permute.xlu1 %7549  ;;  %10807 = vmatprep.mubr.msk.f32.mxu1 %vm8731_vm1, %v8699_v9  ;;  %v8100_v28 = vpop.permute.xlu0 %8099  ;;  %v8059_v15 = vrot.slane %v8052_v18, %v15167_v5  ;;  %v22994_v9 = vld [vmem:[#allocation330_spill] sm:$0xff]  ;;  %v23004_v18 = vld [vmem:[#allocation276_spill] sm:$0xff] }
 0x76c   :  { %v8576_v20 = vsel %vm8568_vm0, %v8527_v12, %v8100_v28  ;;  %v8238_v29 = vsel %vm1749_vm5, %v22715_v10, %v22994_v9  ;;  %v22998_v12 = vld [vmem:[#allocation63_spill] sm:$0xff]  ;;  %v23007_v9 = vld [vmem:[#allocation357_spill] sm:$0xff] }
 0x76d   :  { %8129 = vrot.lane.b32.xlu1 %v8051_v57, %s10971_s9  ;;  %v8700_v38 = vcombine.low %v8668_v59, %v8576_v20  ;;  %7933 = vrot.lane.b32.xlu0 %v22985_v63, %s10972_s14  ;;  %v8286_v43 = vsel %vm1863_vm7, %v8238_v29, %v22996_v14  ;;  %v22997_v57 = vld [vmem:[#allocation411_spill] sm:$0xff]  ;;  %v23010_v14 = vld [vmem:[#allocation410_spill] sm:$0xff] }
 0x76e   :  { %v8334_v28 = vsel %vm1977_vm9, %v8286_v43, %v22998_v12 }
 0x76f   :  { %v8102_v51 = vpop.permute.xlu1 %8101  ;;  %10808 = vmatmul.mubr.msk.f32.gmra.mrb[34].mxu1 %vm8731_vm1, %v8700_v38  ;;  %v7552_v52 = vpop.permute.xlu0 %7551  ;;  %v23000_v38 = vld [vmem:[#allocation232_spill] sm:$0xff] }
 0x770   :  { %v8577_v42 = vsel %vm8568_vm0, %v8528_v58, %v8102_v51  ;;  %v23001_v51 = vld [vmem:[#allocation239_spill] sm:$0xff] }
 0x771   :  { %v8669_v32 = vcombine.high %v8577_v42, %v8577_v42  ;;  %7937 = vrot.lane.b32.xlu1 %v22987_v47, %s10972_s14  ;;  %7773 = vrot.lane.b32.xlu0 %v22988_v4, %s10970_s28 }
 0x773   :  { %v8701_v44 = vcombine.low %v8577_v42, %v8669_v32  ;;  %v7746_v55 = vpop.permute.xlu1 %7745  ;;  %v7744_v34 = vpop.permute.xlu0 %7743 }
 0x775   :  { %7939 = vrot.lane.b32.xlu1 %v22991_v17, %s10972_s14  ;;  %10810 = vmatprep.mubr.msk.f32.mxu1 %vm8731_vm1, %v8701_v44 }
 0x776   :  { %8127 = vrot.lane.b32.xlu0 %v19252_v27, %s10971_s9  ;;  %v8239_v27 = vsel %vm1749_vm5, %v22720_v25, %v22995_v7  ;;  %v8382_v25 = vsel %vm2091_vm11, %v8334_v28, %v18954_v8 }
 0x777   :  { %v7910_v23 = vpop.permute.xlu1 %7909  ;;  %v7556_v53 = vpop.permute.xlu0 %7555  ;;  %v8287_v6 = vsel %vm1863_vm7, %v8239_v27, %v22997_v57  ;;  %v8431_v63 = vsel %vm8421_vm13, %v8382_v25, %v7550_v49  ;;  %v23002_v49 = vld [vmem:[#allocation247_spill] sm:$0xff]  ;;  %v23009_v27 = vld [vmem:[#allocation258_spill] sm:$0xff] }
 0x778   :  { %v8335_v10 = vsel %vm1977_vm9, %v8287_v6, %v22999_v26  ;;  %v8480_v32 = vsel %vm8470_vm14, %v8431_v63, %v7744_v34  ;;  %v23005_v34 = vld [vmem:[#allocation414_spill] sm:$0xff] }
 0x779   :  { %7581 = vrot.lane.b32.xlu1 %v22992_v62, %s10969_s2  ;;  %v8383_v61 = vsel %vm2091_vm11, %v8335_v10, %v18964_v39  ;;  %v8529_v8 = vsel %vm8519_vm15, %v8480_v32, %v7910_v23  ;;  %v23012_v10 = vld [vmem:[#allocation92_spill] sm:$0xff]  ;;  %v23013_v32 = vld [vmem:[#allocation141_spill] sm:$0xff] }
 0x77a   :  { %8131 = vrot.lane.b32.xlu0 %v8059_v15, %s10971_s9  ;;  %v8432_v58 = vsel %vm8421_vm13, %v8383_v61, %v7552_v52  ;;  %v23003_v52 = vld [vmem:[#allocation280_spill] sm:$0xff] }
 0x77b   :  { %v7554_v3 = vpop.permute.xlu1 %7553  ;;  %v7912_v0 = vpop.permute.xlu0 %7911  ;;  %v8481_v42 = vsel %vm8470_vm14, %v8432_v58, %v7746_v55  ;;  %v8241_v60 = vsel %vm1749_vm5, %v22724_v24, %v23003_v52  ;;  %v23006_v15 = vld [vmem:[#allocation128_spill] sm:$0xff]  ;;  %v23008_v24 = vld [vmem:[#allocation337_spill] sm:$0xff]  ;;  %v23016_v52 = vld [vmem:[#allocation279_spill] sm:$0xff] }
 0x77c   :  { %v8530_v47 = vsel %vm8519_vm15, %v8481_v42, %v7912_v0  ;;  %v8289_v17 = vsel %vm1863_vm7, %v8241_v60, %v23005_v34  ;;  %v8240_v29 = vsel %vm1749_vm5, %v22719_v54, %v23008_v24  ;;  %v23022_v24 = vld [vmem:[#allocation412_spill] sm:$0xff] }
 0x77d   :  { %8133 = vrot.lane.b32.xlu1 %v22993_v22, %s10971_s9  ;;  %v8337_v62 = vsel %vm1977_vm9, %v8289_v17, %v23006_v15  ;;  %v8288_v43 = vsel %vm1863_vm7, %v8240_v29, %v23010_v14  ;;  %v23019_v15 = vld [vmem:[#allocation342_spill] sm:$0xff] }
 0x77e   :  { %7583 = vrot.lane.b32.xlu0 %v22993_v22, %s10969_s2  ;;  %v8385_v22 = vsel %vm2091_vm11, %v8337_v62, %v18972_v11  ;;  %v8242_v62 = vsel %vm1749_vm5, %v22723_v2, %v23019_v15 }
 0x77f   :  { %v8104_v59 = vpop.permute.xlu1 %8103  ;;  %v7750_v20 = vpop.permute.xlu0 %7749  ;;  %v8434_v7 = vsel %vm8421_vm13, %v8385_v22, %v7556_v53  ;;  %v8290_v29 = vsel %vm1863_vm7, %v8242_v62, %v23022_v24 }
 0x780   :  { %v8578_v44 = vsel %vm8568_vm0, %v8529_v8, %v8104_v59  ;;  %v8483_v57 = vsel %vm8470_vm14, %v8434_v7, %v7750_v20  ;;  %v23011_v59 = vld [vmem:[#allocation66_spill] sm:$0xff]  ;;  %v23023_v7 = vld [vmem:[#allocation415_spill] sm:$0xff] }
 0x781   :  { %7777 = vrot.lane.b32.xlu1 %v23000_v38, %s10970_s28  ;;  %v8336_v11 = vsel %vm1977_vm9, %v8288_v43, %v23011_v59  ;;  %v23024_v43 = vld [vmem:[#allocation70_spill] sm:$0xff]  ;;  %v23025_v59 = vld [vmem:[#allocation79_spill] sm:$0xff] }
 0x782   :  { %7775 = vrot.lane.b32.xlu0 %v23001_v51, %s10970_s28  ;;  %v8384_v54 = vsel %vm2091_vm11, %v8336_v11, %v18962_v21 }
 0x783   :  { %v7748_v33 = vpop.permute.xlu1 %7747  ;;  %v8106_v39 = vpop.permute.xlu0 %8105  ;;  %v8433_v26 = vsel %vm8421_vm13, %v8384_v54, %v7554_v3 }
 0x784   :  { %v8579_v1 = vsel %vm8568_vm0, %v8530_v47, %v8106_v39  ;;  %v8482_v20 = vsel %vm8470_vm14, %v8433_v26, %v7748_v33  ;;  %v23014_v39 = vld [vmem:[#allocation255_spill] sm:$0xff] }
 0x785   :  { %7941 = vrot.lane.b32.xlu1 %v23002_v49, %s10972_s14  ;;  %v8702_v55 = vcombine.low %v8578_v44, %v8579_v1  ;;  %v8670_v63 = vcombine.high %v8579_v1, %v8579_v1  ;;  %v23015_v44 = vld [vmem:[#allocation260_spill] sm:$0xff] }
 0x786   :  { %7587 = vrot.lane.b32.xlu0 %v23004_v18, %s10969_s2 }
 0x787   :  { %v7914_v23 = vpop.permute.xlu1 %7913  ;;  %10811 = vmatmul.mubr.msk.f32.gmra.mrb[36].mxu1 %vm8731_vm1, %v8702_v55  ;;  %v7916_v0 = vpop.permute.xlu0 %7915 }
 0x788   :  { %v8532_v12 = vsel %vm8519_vm15, %v8483_v57, %v7916_v0  ;;  %v8531_v58 = vsel %vm8519_vm15, %v8482_v20, %v7914_v23  ;;  %v23018_v23 = vld [vmem:[#allocation366_spill] sm:$0xff]  ;;  %v8338_v57 = vsel %vm1977_vm9, %v8290_v29, %v23024_v43 }
 0x789   :  { %7585 = vrot.lane.b32.xlu1 %v23007_v9, %s10969_s2  ;;  %v23020_v0 = vld [vmem:[#allocation346_spill] sm:$0xff] }
 0x78a   :  { %7943 = vrot.lane.b32.xlu0 %v23009_v27, %s10972_s14  ;;  %v8243_v22 = vsel %vm1749_vm5, %v22728_v37, %v23020_v0  ;;  %v8386_v37 = vsel %vm2091_vm11, %v8338_v57, %v18970_v40  ;;  %v23027_v20 = vld [vmem:[#allocation246_spill] sm:$0xff] }
 0x78b   :  { %v7560_v6 = vpop.permute.xlu1 %7559  ;;  %v8110_v28 = vpop.permute.xlu0 %8109  ;;  %v8291_v27 = vsel %vm1863_vm7, %v8243_v22, %v23023_v7 }
 0x78c   :  { %v8581_v53 = vsel %vm8568_vm0, %v8532_v12, %v8110_v28  ;;  %v8339_v2 = vsel %vm1977_vm9, %v8291_v27, %v23025_v59  ;;  %v23026_v28 = vld [vmem:[#allocation345_spill] sm:$0xff]  ;;  %v23035_v27 = vld [vmem:[#allocation256_spill] sm:$0xff]  ;;  %v23036_v59 = vld [vmem:[#allocation250_spill] sm:$0xff] }
 0x78d   :  { %8135 = vrot.lane.b32.xlu1 %v23007_v9, %s10971_s9  ;;  %v8671_v25 = vcombine.high %v8581_v53, %v8581_v53  ;;  %v23021_v9 = vld [vmem:[#allocation254_spill] sm:$0xff]  ;;  %v8387_v12 = vsel %vm2091_vm11, %v8339_v2, %v18980_v56  ;;  %v8244_v54 = vsel %vm1749_vm5, %v22727_v50, %v23026_v28 }
 0x78e   :  { %7781 = vrot.lane.b32.xlu0 %v23012_v10, %s10970_s28 }
 0x78f   :  { %v7558_v61 = vpop.permute.xlu1 %7557  ;;  %v8108_v42 = vpop.permute.xlu0 %8107  ;;  %v8704_v3 = vcombine.low %v8581_v53, %v8671_v25  ;;  %v8436_v53 = vsel %vm8421_vm13, %v8387_v12, %v7560_v6  ;;  %v23028_v25 = vld [vmem:[#allocation115_spill] sm:$0xff] }
 0x790   :  { %v8580_v21 = vsel %vm8568_vm0, %v8531_v58, %v8108_v42  ;;  %v8435_v26 = vsel %vm8421_vm13, %v8386_v37, %v7558_v61  ;;  %v8292_v40 = vsel %vm1863_vm7, %v8244_v54, %v23028_v25  ;;  %v23030_v61 = vld [vmem:[#allocation353_spill] sm:$0xff] }
 0x791   :  { %7779 = vrot.lane.b32.xlu1 %v23013_v32, %s10970_s28  ;;  %v8703_v8 = vcombine.low %v8670_v63, %v8580_v21  ;;  %v23037_v54 = vld [vmem:[#allocation373_spill] sm:$0xff] }
 0x792   :  { %8137 = vrot.lane.b32.xlu0 %v23004_v18, %s10971_s9  ;;  %v23017_v18 = vld [vmem:[#allocation97_spill] sm:$0xff] }
 0x793   :  { %v7562_v47 = vpop.permute.xlu1 %7561  ;;  %10813 = vmatprep.mubr.msk.f32.mxu1 %vm8731_vm1, %v8703_v8  ;;  %v7754_v33 = vpop.permute.xlu0 %7753  ;;  %v8245_v8 = vsel %vm1749_vm5, %v22732_v48, %v23030_v61  ;;  %v23034_v48 = vld [vmem:[#allocation83_spill] sm:$0xff]  ;;  %v23039_v25 = vld [vmem:[#allocation349_spill] sm:$0xff] }
 0x794   :  { %10814 = vmatmul.mubr.msk.f32.gmra.mrb[38].mxu1 %vm8731_vm1, %v8704_v3  ;;  %v8485_v63 = vsel %vm8470_vm14, %v8436_v53, %v7754_v33 }
 0x795   :  { %7945 = vrot.lane.b32.xlu1 %v23014_v39, %s10972_s14 }
 0x796   :  { %7947 = vrot.lane.b32.xlu0 %v23015_v44, %s10972_s14  ;;  %v23031_v44 = vld [vmem:[#allocation47_spill] sm:$0xff] }
 0x797   :  { %v7920_v1 = vpop.permute.xlu1 %7919  ;;  %v7752_v49 = vpop.permute.xlu0 %7751 }
 0x798   :  { %v8484_v56 = vsel %vm8470_vm14, %v8435_v26, %v7752_v49  ;;  %v8534_v50 = vsel %vm8519_vm15, %v8485_v63, %v7920_v1  ;;  %v23032_v49 = vld [vmem:[#allocation116_spill] sm:$0xff]  ;;  %v23038_v26 = vld [vmem:[#allocation283_spill] sm:$0xff] }
 0x799   :  { %7591 = vrot.lane.b32.xlu1 %v23016_v52, %s10969_s2  ;;  %v8293_v1 = vsel %vm1863_vm7, %v8245_v8, %v23032_v49  ;;  %v23041_v63 = vld [vmem:[#allocation416_spill] sm:$0xff]  ;;  %v23046_v49 = vld [vmem:[#allocation109_spill] sm:$0xff] }
 0x79a   :  { %8141 = vrot.lane.b32.xlu0 %v23016_v52, %s10971_s9  ;;  %v8341_v15 = vsel %vm1977_vm9, %v8293_v1, %v23034_v48 }
 0x79b   :  { %v7756_v60 = vpop.permute.xlu1 %7755  ;;  %v7564_v55 = vpop.permute.xlu0 %7563  ;;  %v8389_v62 = vsel %vm2091_vm11, %v8341_v15, %v18988_v45 }
 0x79d   :  { %7589 = vrot.lane.b32.xlu1 %v23017_v18, %s10969_s2 }
 0x79e   :  { %8139 = vrot.lane.b32.xlu0 %v23017_v18, %s10971_s9 }
 0x79f   :  { %v8114_v34 = vpop.permute.xlu1 %8113  ;;  %v7918_v17 = vpop.permute.xlu0 %7917 }
 0x7a0   :  { %v8533_v6 = vsel %vm8519_vm15, %v8484_v56, %v7918_v17  ;;  %v8583_v33 = vsel %vm8568_vm0, %v8534_v50, %v8114_v34  ;;  %v23033_v17 = vld [vmem:[#allocation282_spill] sm:$0xff] }
 0x7a1   :  { %7593 = vrot.lane.b32.xlu1 %v23018_v23, %s10969_s2  ;;  %v8672_v0 = vcombine.high %v8583_v33, %v8583_v33  ;;  %v23043_v50 = vld [vmem:[#allocation82_spill] sm:$0xff] }
 0x7a2   :  { %7785 = vrot.lane.b32.xlu0 %v23021_v9, %s10970_s28 }
 0x7a3   :  { %v7922_v14 = vpop.permute.xlu1 %7921  ;;  %v7758_v11 = vpop.permute.xlu0 %7757 }
 0x7a5   :  { %7951 = vrot.lane.b32.xlu1 %v22861_v46, %s10972_s14  ;;  %v23029_v46 = vld [vmem:[#allocation78_spill] sm:$0xff] }
 0x7a6   :  { %7783 = vrot.lane.b32.xlu0 %v23027_v20, %s10970_s28  ;;  %v8340_v42 = vsel %vm1977_vm9, %v8292_v40, %v23029_v46  ;;  %v23040_v40 = vld [vmem:[#allocation358_spill] sm:$0xff] }
 0x7a7   :  { %v7924_v58 = vpop.permute.xlu1 %7923  ;;  %v8112_v21 = vpop.permute.xlu0 %8111  ;;  %v8388_v3 = vsel %vm2091_vm11, %v8340_v42, %v18978_v30 }
 0x7a8   :  { %v8582_v39 = vsel %vm8568_vm0, %v8533_v6, %v8112_v21  ;;  %v8437_v52 = vsel %vm8421_vm13, %v8388_v3, %v7562_v47  ;;  %v8438_v47 = vsel %vm8421_vm13, %v8389_v62, %v7564_v55  ;;  %v23044_v21 = vld [vmem:[#allocation336_spill] sm:$0xff]  ;;  %v23045_v3 = vld [vmem:[#allocation262_spill] sm:$0xff]  ;;  %v23049_v62 = vld [vmem:[#allocation121_spill] sm:$0xff] }
 0x7a9   :  { %7787 = vrot.lane.b32.xlu1 %v23031_v44, %s10970_s28  ;;  %v8705_v18 = vcombine.low %v8582_v39, %v8583_v33  ;;  %v8486_v30 = vsel %vm8470_vm14, %v8437_v52, %v7756_v60  ;;  %v8487_v7 = vsel %vm8470_vm14, %v8438_v47, %v7758_v11  ;;  %v23051_v47 = vld [vmem:[#allocation420_spill] sm:$0xff] }
 0x7aa   :  { %7595 = vrot.lane.b32.xlu0 %v23033_v17, %s10969_s2  ;;  %v8535_v22 = vsel %vm8519_vm15, %v8486_v30, %v7922_v14  ;;  %v8536_v45 = vsel %vm8519_vm15, %v8487_v7, %v7924_v58  ;;  %v23042_v58 = vld [vmem:[#allocation418_spill] sm:$0xff]  ;;  %v23047_v30 = vld [vmem:[#allocation269_spill] sm:$0xff] }
 0x7ab   :  { %v7566_v34 = vpop.permute.xlu1 %7565  ;;  %10816 = vmatprep.mubr.msk.f32.mxu1 %vm8731_vm1, %v8705_v18  ;;  %v8116_v24 = vpop.permute.xlu0 %8115 }
 0x7ac   :  { %v8584_v29 = vsel %vm8568_vm0, %v8535_v22, %v8116_v24  ;;  %v23050_v24 = vld [vmem:[#allocation285_spill] sm:$0xff] }
 0x7ad   :  { %8145 = vrot.lane.b32.xlu1 %v23033_v17, %s10971_s9  ;;  %v8706_v60 = vcombine.low %v8672_v0, %v8584_v29 }
 0x7ae   :  { %7949 = vrot.lane.b32.xlu0 %v23035_v27, %s10972_s14 }
 0x7af   :  { %v8118_v43 = vpop.permute.xlu1 %8117  ;;  %10817 = vmatmul.mubr.msk.f32.gmra.mrb[40].mxu1 %vm8731_vm1, %v8706_v60  ;;  %v7568_v57 = vpop.permute.xlu0 %7567  ;;  %v23052_v60 = vld [vmem:[#allocation131_spill] sm:$0xff] }
 0x7b0   :  { %v8585_v14 = vsel %vm8568_vm0, %v8536_v45, %v8118_v43  ;;  %v23053_v43 = vld [vmem:[#allocation327_spill] sm:$0xff] }
 0x7b1   :  { %v8673_v55 = vcombine.high %v8585_v14, %v8585_v14  ;;  %7953 = vrot.lane.b32.xlu1 %v22860_v41, %s10972_s14 }
 0x7b2   :  { %7789 = vrot.lane.b32.xlu0 %v23036_v59, %s10970_s28 }
 0x7b3   :  { %v8707_v2 = vcombine.low %v8585_v14, %v8673_v55  ;;  %v7762_v11 = vpop.permute.xlu1 %7761  ;;  %v7760_v37 = vpop.permute.xlu0 %7759  ;;  %v23055_v55 = vld [vmem:[#allocation354_spill] sm:$0xff] }
 0x7b5   :  { %7955 = vrot.lane.b32.xlu1 %v22865_v31, %s10972_s14  ;;  %10819 = vmatprep.mubr.msk.f32.mxu1 %vm8731_vm1, %v8707_v2  ;;  %v8246_v31 = vsel %vm1749_vm5, %v22731_v35, %v23039_v25  ;;  %v23056_v2 = vld [vmem:[#allocation74_spill] sm:$0xff] }
 0x7b6   :  { %8143 = vrot.lane.b32.xlu0 %v23018_v23, %s10971_s9  ;;  %v8247_v23 = vsel %vm1749_vm5, %v22736_v13, %v23040_v40  ;;  %v8294_v56 = vsel %vm1863_vm7, %v8246_v31, %v23041_v63  ;;  %v23059_v31 = vld [vmem:[#allocation86_spill] sm:$0xff] }
 0x7b7   :  { %v7926_v12 = vpop.permute.xlu1 %7925  ;;  %v7572_v28 = vpop.permute.xlu0 %7571  ;;  %v8295_v46 = vsel %vm1863_vm7, %v8247_v23, %v23042_v58  ;;  %v8342_v6 = vsel %vm1977_vm9, %v8294_v56, %v23043_v50  ;;  %v23060_v56 = vld [vmem:[#allocation112_spill] sm:$0xff] }
 0x7b8   :  { %v8343_v35 = vsel %vm1977_vm9, %v8295_v46, %v23044_v21  ;;  %v8390_v13 = vsel %vm2091_vm11, %v8342_v6, %v18986_v16 }
 0x7b9   :  { %7597 = vrot.lane.b32.xlu1 %v23037_v54, %s10969_s2  ;;  %v8391_v8 = vsel %vm2091_vm11, %v8343_v35, %v18996_v36  ;;  %v8439_v33 = vsel %vm8421_vm13, %v8390_v13, %v7566_v34  ;;  %v23048_v34 = vld [vmem:[#allocation362_spill] sm:$0xff] }
 0x7ba   :  { %8147 = vrot.lane.b32.xlu0 %v23037_v54, %s10971_s9  ;;  %v8440_v39 = vsel %vm8421_vm13, %v8391_v8, %v7568_v57  ;;  %v8488_v52 = vsel %vm8470_vm14, %v8439_v33, %v7760_v37  ;;  %v8249_v0 = vsel %vm1749_vm5, %v23049_v62, %v23048_v34  ;;  %v23054_v57 = vld [vmem:[#allocation100_spill] sm:$0xff]  ;;  %v23058_v54 = vld [vmem:[#allocation417_spill] sm:$0xff]  ;;  %v23062_v33 = vld [vmem:[#allocation142_spill] sm:$0xff] }
 0x7bb   :  { %v7570_v41 = vpop.permute.xlu1 %7569  ;;  %v7928_v53 = vpop.permute.xlu0 %7927  ;;  %v8489_v1 = vsel %vm8470_vm14, %v8440_v39, %v7762_v11  ;;  %v8537_v16 = vsel %vm8519_vm15, %v8488_v52, %v7926_v12  ;;  %v8297_v29 = vsel %vm1863_vm7, %v8249_v0, %v23051_v47  ;;  %v8248_v11 = vsel %vm1749_vm5, %v23056_v2, %v23055_v55  ;;  %v23057_v12 = vld [vmem:[#allocation98_spill] sm:$0xff]  ;;  %v23066_v34 = vld [vmem:[#allocation380_spill] sm:$0xff]  ;;  %v23069_v47 = vld [vmem:[#allocation5_spill] sm:$0xff] }
 0x7bc   :  { %v8538_v17 = vsel %vm8519_vm15, %v8489_v1, %v7928_v53  ;;  %v8345_v27 = vsel %vm1977_vm9, %v8297_v29, %v23052_v60  ;;  %v8296_v53 = vsel %vm1863_vm7, %v8248_v11, %v23058_v54  ;;  %v23071_v60 = vld [vmem:[#allocation6_spill] sm:$0xff]  ;;  %v23075_v11 = vld [vmem:[#allocation295_spill] sm:$0xff] }
 0x7bd   :  { %8149 = vrot.lane.b32.xlu1 %v23038_v26, %s10971_s9  ;;  %v8393_v14 = vsel %vm2091_vm11, %v8345_v27, %v23053_v43  ;;  %v8344_v40 = vsel %vm1977_vm9, %v8296_v53, %v23059_v31  ;;  %v23073_v43 = vld [vmem:[#allocation419_spill] sm:$0xff] }
 0x7be   :  { %7599 = vrot.lane.b32.xlu0 %v23038_v26, %s10969_s2  ;;  %v8442_v37 = vsel %vm8421_vm13, %v8393_v14, %v7572_v28  ;;  %v8392_v58 = vsel %vm2091_vm11, %v8344_v40, %v23060_v56  ;;  %v23078_v40 = vld [vmem:[#allocation120_spill] sm:$0xff]  ;;  %v23080_v56 = vld [vmem:[#allocation365_spill] sm:$0xff] }
 0x7bf   :  { %v8120_v42 = vpop.permute.xlu1 %8119  ;;  %v7766_v61 = vpop.permute.xlu0 %7765  ;;  %v8441_v46 = vsel %vm8421_vm13, %v8392_v58, %v7570_v41  ;;  %v8252_v58 = vsel %vm1749_vm5, %v22957_v19, %v23080_v56  ;;  %v23093_v56 = vld [vmem:[#allocation281_spill] sm:$0xff] }
 0x7c0   :  { %v8586_v48 = vsel %vm8568_vm0, %v8537_v16, %v8120_v42  ;;  %v8491_v26 = vsel %vm8470_vm14, %v8442_v37, %v7766_v61  ;;  %v23061_v42 = vld [vmem:[#allocation217_spill] sm:$0xff]  ;;  %v23064_v16 = vld [vmem:[#allocation278_spill] sm:$0xff] }
 0x7c1   :  { %7793 = vrot.lane.b32.xlu1 %v23045_v3, %s10970_s28 }
 0x7c2   :  { %7791 = vrot.lane.b32.xlu0 %v23046_v49, %s10970_s28 }
 0x7c3   :  { %v7764_v18 = vpop.permute.xlu1 %7763  ;;  %v8122_v36 = vpop.permute.xlu0 %8121 }
 0x7c4   :  { %v8587_v15 = vsel %vm8568_vm0, %v8538_v17, %v8122_v36  ;;  %v8490_v50 = vsel %vm8470_vm14, %v8441_v46, %v7764_v18  ;;  %v23063_v18 = vld [vmem:[#allocation272_spill] sm:$0xff] }
 0x7c5   :  { %7957 = vrot.lane.b32.xlu1 %v23047_v30, %s10972_s14  ;;  %v8708_v22 = vcombine.low %v8586_v48, %v8587_v15  ;;  %v8674_v35 = vcombine.high %v8587_v15, %v8587_v15  ;;  %v23065_v48 = vld [vmem:[#allocation287_spill] sm:$0xff] }
 0x7c6   :  { %7603 = vrot.lane.b32.xlu0 %v23050_v24, %s10969_s2 }
 0x7c7   :  { %v7930_v7 = vpop.permute.xlu1 %7929  ;;  %10820 = vmatmul.mubr.msk.f32.gmra.mrb[42].mxu1 %vm8731_vm1, %v8708_v22  ;;  %v7932_v45 = vpop.permute.xlu0 %7931  ;;  %v23067_v22 = vld [vmem:[#allocation383_spill] sm:$0xff] }
 0x7c8   :  { %v8540_v23 = vsel %vm8519_vm15, %v8491_v26, %v7932_v45  ;;  %v8539_v61 = vsel %vm8519_vm15, %v8490_v50, %v7930_v7  ;;  %v23070_v7 = vld [vmem:[#allocation369_spill] sm:$0xff]  ;;  %v23077_v26 = vld [vmem:[#allocation136_spill] sm:$0xff] }
 0x7c9   :  { %7601 = vrot.lane.b32.xlu1 %v23054_v57, %s10969_s2  ;;  %v8251_v27 = vsel %vm1749_vm5, %v23071_v60, %v23070_v7  ;;  %v23072_v45 = vld [vmem:[#allocation41_spill] sm:$0xff] }
 0x7ca   :  { %7959 = vrot.lane.b32.xlu0 %v23057_v12, %s10972_s14  ;;  %v23076_v12 = vld [vmem:[#allocation339_spill] sm:$0xff]  ;;  %v23081_v50 = vld [vmem:[#allocation265_spill] sm:$0xff] }
 0x7cb   :  { %v7576_v25 = vpop.permute.xlu1 %7575  ;;  %v8126_v63 = vpop.permute.xlu0 %8125  ;;  %v23089_v60 = vld [vmem:[#allocation289_spill] sm:$0xff] }
 0x7cc   :  { %v8589_v28 = vsel %vm8568_vm0, %v8540_v23, %v8126_v63  ;;  %v23079_v63 = vld [vmem:[#allocation286_spill] sm:$0xff] }
 0x7cd   :  { %8151 = vrot.lane.b32.xlu1 %v23054_v57, %s10971_s9  ;;  %v8675_v6 = vcombine.high %v8589_v28, %v8589_v28  ;;  %v23074_v57 = vld [vmem:[#allocation119_spill] sm:$0xff] }
 0x7ce   :  { %7797 = vrot.lane.b32.xlu0 %v23061_v42, %s10970_s28  ;;  %v8299_v55 = vsel %vm1863_vm7, %v8251_v27, %v23074_v57  ;;  %v23090_v27 = vld [vmem:[#allocation91_spill] sm:$0xff] }
 0x7cf   :  { %v7574_v21 = vpop.permute.xlu1 %7573  ;;  %v8124_v13 = vpop.permute.xlu0 %8123  ;;  %v8710_v41 = vcombine.low %v8589_v28, %v8675_v6  ;;  %v8347_v54 = vsel %vm1977_vm9, %v8299_v55, %v23076_v12  ;;  %v23082_v6 = vld [vmem:[#allocation421_spill] sm:$0xff]  ;;  %v23091_v57 = vld [vmem:[#allocation331_spill] sm:$0xff] }
 0x7d0   :  { %v8588_v8 = vsel %vm8568_vm0, %v8539_v61, %v8124_v13  ;;  %v8395_v23 = vsel %vm2091_vm11, %v8347_v54, %v23078_v40 }
 0x7d1   :  { %7795 = vrot.lane.b32.xlu1 %v23062_v33, %s10970_s28  ;;  %v8709_v39 = vcombine.low %v8674_v35, %v8588_v8  ;;  %v8444_v28 = vsel %vm8421_vm13, %v8395_v23, %v7576_v25  ;;  %v8300_v35 = vsel %vm1863_vm7, %v8252_v58, %v23082_v6  ;;  %v23094_v58 = vld [vmem:[#allocation268_spill] sm:$0xff] }
 0x7d2   :  { %8153 = vrot.lane.b32.xlu0 %v23050_v24, %s10971_s9  ;;  %v23068_v24 = vld [vmem:[#allocation361_spill] sm:$0xff]  ;;  %v23095_v6 = vld [vmem:[#allocation376_spill] sm:$0xff] }
 0x7d3   :  { %v7578_v1 = vpop.permute.xlu1 %7577  ;;  %10822 = vmatprep.mubr.msk.f32.mxu1 %vm8731_vm1, %v8709_v39  ;;  %v7770_v52 = vpop.permute.xlu0 %7769  ;;  %v8250_v29 = vsel %vm1749_vm5, %v23069_v47, %v23068_v24  ;;  %v23083_v39 = vld [vmem:[#allocation296_spill] sm:$0xff]  ;;  %v23087_v47 = vld [vmem:[#allocation267_spill] sm:$0xff] }
 0x7d4   :  { %10823 = vmatmul.mubr.msk.f32.gmra.mrb[44].mxu1 %vm8731_vm1, %v8710_v41  ;;  %v8298_v14 = vsel %vm1863_vm7, %v8250_v29, %v23073_v43  ;;  %v8493_v61 = vsel %vm8470_vm14, %v8444_v28, %v7770_v52  ;;  %v8348_v41 = vsel %vm1977_vm9, %v8300_v35, %v23083_v39  ;;  %v23088_v29 = vld [vmem:[#allocation68_spill] sm:$0xff] }
 0x7d5   :  { %7961 = vrot.lane.b32.xlu1 %v23063_v18, %s10972_s14  ;;  %v8346_v37 = vsel %vm1977_vm9, %v8298_v14, %v23075_v11 }
 0x7d6   :  { %7963 = vrot.lane.b32.xlu0 %v23064_v16, %s10972_s14  ;;  %v8394_v31 = vsel %vm2091_vm11, %v8346_v37, %v23077_v26  ;;  %v23085_v16 = vld [vmem:[#allocation223_spill] sm:$0xff] }
 0x7d7   :  { %v7936_v17 = vpop.permute.xlu1 %7935  ;;  %v7768_v36 = vpop.permute.xlu0 %7767  ;;  %v8443_v46 = vsel %vm8421_vm13, %v8394_v31, %v7574_v21  ;;  %v23084_v21 = vld [vmem:[#allocation374_spill] sm:$0xff]  ;;  %v23092_v31 = vld [vmem:[#allocation375_spill] sm:$0xff] }
 0x7d8   :  { %v8492_v13 = vsel %vm8470_vm14, %v8443_v46, %v7768_v36  ;;  %v8542_v19 = vsel %vm8519_vm15, %v8493_v61, %v7936_v17 }
 0x7d9   :  { %7607 = vrot.lane.b32.xlu1 %v23065_v48, %s10969_s2 }
 0x7da   :  { %8157 = vrot.lane.b32.xlu0 %v23065_v48, %s10971_s9  ;;  %v8253_v48 = vsel %vm1749_vm5, %v23085_v16, %v23084_v21  ;;  %v23100_v21 = vld [vmem:[#allocation378_spill] sm:$0xff]  ;;  %v23101_v16 = vld [vmem:[#allocation43_spill] sm:$0xff] }
 0x7db   :  { %v7772_v15 = vpop.permute.xlu1 %7771  ;;  %v7580_v30 = vpop.permute.xlu0 %7579  ;;  %v8301_v17 = vsel %vm1863_vm7, %v8253_v48, %v23088_v29  ;;  %v23102_v48 = vld [vmem:[#allocation61_spill] sm:$0xff]  ;;  %v23104_v29 = vld [vmem:[#allocation90_spill] sm:$0xff] }
 0x7dc   :  { %v8349_v43 = vsel %vm1977_vm9, %v8301_v17, %v23090_v27  ;;  %v23106_v27 = vld [vmem:[#allocation139_spill] sm:$0xff] }
 0x7dd   :  { %7605 = vrot.lane.b32.xlu1 %v23066_v34, %s10969_s2  ;;  %v8397_v55 = vsel %vm2091_vm11, %v8349_v43, %v23091_v57 }
 0x7de   :  { %8155 = vrot.lane.b32.xlu0 %v23066_v34, %s10971_s9  ;;  %v23086_v34 = vld [vmem:[#allocation344_spill] sm:$0xff] }
 0x7df   :  { %v8130_v62 = vpop.permute.xlu1 %8129  ;;  %v7934_v0 = vpop.permute.xlu0 %7933  ;;  %v8396_v24 = vsel %vm2091_vm11, %v8348_v41, %v23086_v34  ;;  %v23097_v41 = vld [vmem:[#allocation290_spill] sm:$0xff] }
 0x7e0   :  { %v8541_v25 = vsel %vm8519_vm15, %v8492_v13, %v7934_v0  ;;  %v8591_v52 = vsel %vm8568_vm0, %v8542_v19, %v8130_v62  ;;  %v8445_v0 = vsel %vm8421_vm13, %v8396_v24, %v7578_v1  ;;  %v8446_v1 = vsel %vm8421_vm13, %v8397_v55, %v7580_v30  ;;  %v23096_v13 = vld [vmem:[#allocation385_spill] sm:$0xff]  ;;  %v23098_v19 = vld [vmem:[#allocation370_spill] sm:$0xff]  ;;  %v23103_v24 = vld [vmem:[#allocation423_spill] sm:$0xff] }
 0x7e1   :  { %7609 = vrot.lane.b32.xlu1 %v23067_v22, %s10969_s2  ;;  %v8494_v14 = vsel %vm8470_vm14, %v8445_v0, %v7772_v15  ;;  %v8676_v11 = vcombine.high %v8591_v52, %v8591_v52  ;;  %v23105_v0 = vld [vmem:[#allocation300_spill] sm:$0xff] }
 0x7e2   :  { %7801 = vrot.lane.b32.xlu0 %v23072_v45, %s10970_s28  ;;  %v23108_v55 = vld [vmem:[#allocation228_spill] sm:$0xff] }
 0x7e3   :  { %v7938_v2 = vpop.permute.xlu1 %7937  ;;  %v7774_v53 = vpop.permute.xlu0 %7773 }
 0x7e4   :  { %v8543_v37 = vsel %vm8519_vm15, %v8494_v14, %v7938_v2  ;;  %v8495_v26 = vsel %vm8470_vm14, %v8446_v1, %v7774_v53  ;;  %v23107_v14 = vld [vmem:[#allocation124_spill] sm:$0xff] }
 0x7e5   :  { %7967 = vrot.lane.b32.xlu1 %v23079_v63, %s10972_s14 }
 0x7e6   :  { %7799 = vrot.lane.b32.xlu0 %v23081_v50, %s10970_s28 }
 0x7e7   :  { %v7940_v8 = vpop.permute.xlu1 %7939 }
 0x7e8   :  { %v8128_v18 = vpop.permute.xlu0 %8127  ;;  %v8544_v40 = vsel %vm8519_vm15, %v8495_v26, %v7940_v8 }
 0x7e9   :  { %v8590_v36 = vsel %vm8568_vm0, %v8541_v25, %v8128_v18  ;;  %7803 = vrot.lane.b32.xlu1 %v23087_v47, %s10970_s28  ;;  %v23099_v25 = vld [vmem:[#allocation221_spill] sm:$0xff] }
 0x7ea   :  { %v8711_v7 = vcombine.low %v8590_v36, %v8591_v52  ;;  %7611 = vrot.lane.b32.xlu0 %v23089_v60, %s10969_s2  ;;  %v8254_v18 = vsel %vm1749_vm5, %v23099_v25, %v23098_v19  ;;  %v23116_v25 = vld [vmem:[#allocation388_spill] sm:$0xff] }
 0x7eb   :  { %v7582_v62 = vpop.permute.xlu1 %7581  ;;  %v8302_v34 = vsel %vm1863_vm7, %v8254_v18, %v23102_v48  ;;  %v23118_v18 = vld [vmem:[#allocation87_spill] sm:$0xff]  ;;  %v23120_v48 = vld [vmem:[#allocation422_spill] sm:$0xff] }
 0x7ec   :  { %10825 = vmatprep.mubr.msk.f32.mxu1 %vm8731_vm1, %v8711_v7  ;;  %v8132_v12 = vpop.permute.xlu0 %8131  ;;  %v8350_v17 = vsel %vm1977_vm9, %v8302_v34, %v23104_v29 }
 0x7ed   :  { %v8592_v54 = vsel %vm8568_vm0, %v8543_v37, %v8132_v12  ;;  %8161 = vrot.lane.b32.xlu1 %v23089_v60, %s10971_s9  ;;  %v8398_v43 = vsel %vm2091_vm11, %v8350_v17, %v23106_v27  ;;  %v23109_v12 = vld [vmem:[#allocation270_spill] sm:$0xff] }
 0x7ee   :  { %v8712_v15 = vcombine.low %v8676_v11, %v8592_v54  ;;  %7965 = vrot.lane.b32.xlu0 %v23092_v31, %s10972_s14  ;;  %v8447_v11 = vsel %vm8421_vm13, %v8398_v43, %v7582_v62  ;;  %v23110_v62 = vld [vmem:[#allocation284_spill] sm:$0xff] }
 0x7ef   :  { %v8134_v23 = vpop.permute.xlu1 %8133 }
 0x7f0   :  { %v8593_v2 = vsel %vm8568_vm0, %v8544_v40, %v8134_v23  ;;  %10826 = vmatmul.mubr.msk.f32.gmra.mrb[46].mxu1 %vm8731_vm1, %v8712_v15  ;;  %v7584_v63 = vpop.permute.xlu0 %7583 }
 0x7f1   :  { %v8677_v30 = vcombine.high %v8593_v2, %v8593_v2  ;;  %7969 = vrot.lane.b32.xlu1 %v23093_v56, %s10972_s14 }
 0x7f2   :  { %7805 = vrot.lane.b32.xlu0 %v23094_v58, %s10970_s28 }
 0x7f3   :  { %v8713_v53 = vcombine.low %v8593_v2, %v8677_v30  ;;  %v7778_v28 = vpop.permute.xlu1 %7777 }
 0x7f4   :  { %v7776_v46 = vpop.permute.xlu0 %7775 }
 0x7f5   :  { %7971 = vrot.lane.b32.xlu1 %v23095_v6, %s10972_s14  ;;  %10828 = vmatprep.mubr.msk.f32.mxu1 %vm8731_vm1, %v8713_v53  ;;  %v8496_v54 = vsel %vm8470_vm14, %v8447_v11, %v7776_v46  ;;  %v23112_v53 = vld [vmem:[#allocation291_spill] sm:$0xff] }
 0x7f6   :  { %8159 = vrot.lane.b32.xlu0 %v23067_v22, %s10971_s9  ;;  %v8255_v22 = vsel %vm1749_vm5, %v23101_v16, %v23100_v21 }
 0x7f7   :  { %v7942_v35 = vpop.permute.xlu1 %7941  ;;  %v8303_v52 = vsel %vm1863_vm7, %v8255_v22, %v23103_v24  ;;  %v23119_v22 = vld [vmem:[#allocation298_spill] sm:$0xff] }
 0x7f8   :  { %v7588_v61 = vpop.permute.xlu0 %7587  ;;  %v8351_v7 = vsel %vm1977_vm9, %v8303_v52, %v23105_v0  ;;  %v8545_v15 = vsel %vm8519_vm15, %v8496_v54, %v7942_v35  ;;  %v23114_v35 = vld [vmem:[#allocation303_spill] sm:$0xff] }
 0x7f9   :  { %7613 = vrot.lane.b32.xlu1 %v23096_v13, %s10969_s2  ;;  %v8399_v57 = vsel %vm2091_vm11, %v8351_v7, %v23107_v14  ;;  %v23122_v7 = vld [vmem:[#allocation347_spill] sm:$0xff]  ;;  %v23123_v14 = vld [vmem:[#allocation150_spill] sm:$0xff] }
 0x7fa   :  { %8163 = vrot.lane.b32.xlu0 %v23096_v13, %s10971_s9  ;;  %v8448_v37 = vsel %vm8421_vm13, %v8399_v57, %v7584_v63  ;;  %v23111_v63 = vld [vmem:[#allocation381_spill] sm:$0xff] }
 0x7fb   :  { %v7586_v8 = vpop.permute.xlu1 %7585  ;;  %v8497_v1 = vsel %vm8470_vm14, %v8448_v37, %v7778_v28  ;;  %v8257_v30 = vsel %vm1749_vm5, %v22988_v4, %v23111_v63  ;;  %v23113_v28 = vld [vmem:[#allocation48_spill] sm:$0xff]  ;;  %v23117_v4 = vld [vmem:[#allocation377_spill] sm:$0xff] }
 0x7fc   :  { %v7944_v39 = vpop.permute.xlu0 %7943  ;;  %v8305_v46 = vsel %vm1863_vm7, %v8257_v30, %v23113_v28  ;;  %v8256_v21 = vsel %vm1749_vm5, %v23118_v18, %v23117_v4 }
 0x7fd   :  { %8165 = vrot.lane.b32.xlu1 %v23097_v41, %s10971_s9  ;;  %v8546_v31 = vsel %vm8519_vm15, %v8497_v1, %v7944_v39  ;;  %v8353_v13 = vsel %vm1977_vm9, %v8305_v46, %v23114_v35  ;;  %v8304_v34 = vsel %vm1863_vm7, %v8256_v21, %v23120_v48  ;;  %v23128_v46 = vld [vmem:[#allocation391_spill] sm:$0xff] }
 0x7fe   :  { %7615 = vrot.lane.b32.xlu0 %v23097_v41, %s10969_s2  ;;  %v23115_v41 = vld [vmem:[#allocation348_spill] sm:$0xff] }
 0x7ff   :  { %v8136_v36 = vpop.permute.xlu1 %8135  ;;  %v8401_v19 = vsel %vm2091_vm11, %v8353_v13, %v23115_v41  ;;  %v23130_v41 = vld [vmem:[#allocation240_spill] sm:$0xff] }
 0x800   :  { %v7782_v60 = vpop.permute.xlu0 %7781  ;;  %v8594_v23 = vsel %vm8568_vm0, %v8545_v15, %v8136_v36  ;;  %v8450_v16 = vsel %vm8421_vm13, %v8401_v19, %v7588_v61  ;;  %v23121_v36 = vld [vmem:[#allocation132_spill] sm:$0xff] }
 0x801   :  { %7809 = vrot.lane.b32.xlu1 %v23108_v55, %s10970_s28  ;;  %v8499_v24 = vsel %vm8470_vm14, %v8450_v16, %v7782_v60  ;;  %v8352_v29 = vsel %vm1977_vm9, %v8304_v34, %v23121_v36  ;;  %v23133_v34 = vld [vmem:[#allocation384_spill] sm:$0xff] }
 0x802   :  { %7807 = vrot.lane.b32.xlu0 %v23109_v12, %s10970_s28  ;;  %v8400_v27 = vsel %vm2091_vm11, %v8352_v29, %v23122_v7  ;;  %v23134_v29 = vld [vmem:[#allocation306_spill] sm:$0xff]  ;;  %v23136_v7 = vld [vmem:[#allocation49_spill] sm:$0xff] }
 0x803   :  { %v7780_v26 = vpop.permute.xlu1 %7779  ;;  %v8449_v43 = vsel %vm8421_vm13, %v8400_v27, %v7586_v8 }
 0x804   :  { %v8138_v40 = vpop.permute.xlu0 %8137  ;;  %v8498_v60 = vsel %vm8470_vm14, %v8449_v43, %v7780_v26 }
 0x805   :  { %v8595_v2 = vsel %vm8568_vm0, %v8546_v31, %v8138_v40  ;;  %7973 = vrot.lane.b32.xlu1 %v23110_v62, %s10972_s14  ;;  %v23124_v31 = vld [vmem:[#allocation271_spill] sm:$0xff]  ;;  %v23125_v62 = vld [vmem:[#allocation308_spill] sm:$0xff] }
 0x806   :  { %v8714_v56 = vcombine.low %v8594_v23, %v8595_v2  ;;  %7619 = vrot.lane.b32.xlu0 %v23112_v53, %s10969_s2  ;;  %v8678_v37 = vcombine.high %v8595_v2, %v8595_v2  ;;  %v23126_v2 = vld [vmem:[#allocation312_spill] sm:$0xff] }
 0x807   :  { %v7946_v6 = vpop.permute.xlu1 %7945 }
 0x808   :  { %10829 = vmatmul.mubr.msk.f32.gmra.mrb[48].mxu1 %vm8731_vm1, %v8714_v56  ;;  %v7948_v39 = vpop.permute.xlu0 %7947  ;;  %v8547_v1 = vsel %vm8519_vm15, %v8498_v60, %v7946_v6  ;;  %v23127_v56 = vld [vmem:[#allocation302_spill] sm:$0xff]  ;;  %v23138_v60 = vld [vmem:[#allocation304_spill] sm:$0xff] }
 0x809   :  { %7617 = vrot.lane.b32.xlu1 %v23116_v25, %s10969_s2  ;;  %v8548_v17 = vsel %vm8519_vm15, %v8499_v24, %v7948_v39  ;;  %v19789_v6 = vld [vmem:[%s20385_s4] ss:$0 sm:$0xff]  ;;  %v23129_v39 = vld [vmem:[#allocation237_spill] sm:$0xff]  ;;  %v8259_v24 = vsel %vm1749_vm5, %v23000_v38, %v23133_v34 }
 0x80a   :  { %7975 = vrot.lane.b32.xlu0 %v23119_v22, %s10972_s14  ;;  %v23131_v19 = vcombine.low %v23129_v39, %v23130_v41  ;;  %v23132_v22 = vld [vmem:[#allocation379_spill] sm:$0xff]  ;;  %v8307_v27 = vsel %vm1863_vm7, %v8259_v24, %v23136_v7  ;;  %v23143_v39 = vld [vmem:[#allocation54_spill] sm:$0xff]  ;;  %v23144_v41 = vld [vmem:[#allocation425_spill] sm:$0xff] }
 0x80b   :  { %v7592_v52 = vpop.permute.xlu1 %7591  ;;  %v8258_v48 = vsel %vm1749_vm5, %v23001_v51, %v23132_v22  ;;  %v23145_v22 = vld [vmem:[#allocation95_spill] sm:$0xff]  ;;  %v23146_v24 = vld [vmem:[#allocation386_spill] sm:$0xff] }
 0x80c   :  { %v8142_v0 = vpop.permute.xlu0 %8141  ;;  %v23148_v7 = vld [vmem:[#allocation102_spill] sm:$0xff] }
 0x80d   :  { %v8597_v61 = vsel %vm8568_vm0, %v8548_v17, %v8142_v0  ;;  %8167 = vrot.lane.b32.xlu1 %v23116_v25, %s10971_s9  ;;  %v19797_v25 = vrot.slane %v23131_v19, %v15167_v5  ;;  %v23135_v17 = vld [vmem:[#allocation424_spill] sm:$0xff] }
 0x80e   :  { %7813 = vrot.lane.b32.xlu0 %v23123_v14, %s10970_s28  ;;  %v8679_v57 = vcombine.high %v8597_v61, %v8597_v61  ;;  %v8306_v0 = vsel %vm1863_vm7, %v8258_v48, %v23135_v17  ;;  %v23137_v14 = vld [vmem:[#allocation94_spill] sm:$0xff]  ;;  %v23147_v17 = vld [vmem:[#allocation351_spill] sm:$0xff] }
 0x80f   :  { %v7590_v11 = vpop.permute.xlu1 %7589  ;;  %v8354_v51 = vsel %vm1977_vm9, %v8306_v0, %v23137_v14 }
 0x810   :  { %v8140_v54 = vpop.permute.xlu0 %8139  ;;  %v8716_v8 = vcombine.low %v8597_v61, %v8679_v57  ;;  %v8355_v57 = vsel %vm1977_vm9, %v8307_v27, %v23138_v60  ;;  %v23149_v27 = vld [vmem:[#allocation51_spill] sm:$0xff] }
 0x811   :  { %v8596_v15 = vsel %vm8568_vm0, %v8547_v1, %v8140_v54  ;;  %7811 = vrot.lane.b32.xlu1 %v23124_v31, %s10970_s28  ;;  %v23139_v1 = vld [vmem:[#allocation140_spill] sm:$0xff] }
 0x812   :  { %v8715_v40 = vcombine.low %v8678_v37, %v8596_v15  ;;  %8169 = vrot.lane.b32.xlu0 %v23112_v53, %s10971_s9  ;;  %v8402_v54 = vsel %vm2091_vm11, %v8354_v51, %v23139_v1  ;;  %v23140_v15 = vld [vmem:[#allocation143_spill] sm:$0xff] }
 0x813   :  { %v7594_v23 = vpop.permute.xlu1 %7593 }
 0x814   :  { %10831 = vmatprep.mubr.msk.f32.mxu1 %vm8731_vm1, %v8715_v40  ;;  %v7786_v26 = vpop.permute.xlu0 %7785  ;;  %v8403_v40 = vsel %vm2091_vm11, %v8355_v57, %v23140_v15  ;;  %v23150_v57 = vld [vmem:[#allocation305_spill] sm:$0xff] }
 0x815   :  { %7977 = vrot.lane.b32.xlu1 %v23125_v62, %s10972_s14  ;;  %10832 = vmatmul.mubr.msk.f32.gmra.mrb[50].mxu1 %vm8731_vm1, %v8716_v8  ;;  %v23141_v8 = vld [vmem:[#allocation314_spill] sm:$0xff] }
 0x816   :  { %7979 = vrot.lane.b32.xlu0 %v23126_v2, %s10972_s14  ;;  %v23142_v62 = vld [vmem:[#allocation382_spill] sm:$0xff] }
 0x817   :  { %v7952_v63 = vpop.permute.xlu1 %7951  ;;  %v8260_v2 = vsel %vm1749_vm5, %v23013_v32, %v23142_v62 }
 0x818   :  { %v7784_v30 = vpop.permute.xlu0 %7783  ;;  %v8308_v19 = vsel %vm1863_vm7, %v8260_v2, %v23144_v41  ;;  %v23154_v2 = vld [vmem:[#allocation352_spill] sm:$0xff] }
 0x819   :  { %7623 = vrot.lane.b32.xlu1 %v23127_v56, %s10969_s2  ;;  %v8356_v48 = vsel %vm1977_vm9, %v8308_v19, %v23145_v22 }
 0x81a   :  { %8173 = vrot.lane.b32.xlu0 %v23127_v56, %s10971_s9  ;;  %v8452_v56 = vsel %vm8421_vm13, %v8403_v40, %v7592_v52  ;;  %v23152_v40 = vld [vmem:[#allocation297_spill] sm:$0xff] }
 0x81b   :  { %v7788_v53 = vpop.permute.xlu1 %7787 }
 0x81c   :  { %v19782_v28 = vpop.permute.xlu0 %7595 }
 0x81d   :  { %7621 = vrot.lane.b32.xlu1 %v23128_v46, %s10969_s2 }
 0x81e   :  { %8171 = vrot.lane.b32.xlu0 %v23128_v46, %s10971_s9  ;;  %v10803_v13 = vpop.f32.mrb[30].mxu1  ;;  %v8451_v46 = vsel %vm8421_vm13, %v8402_v54, %v7590_v11 }
 0x81f   :  { %v8146_v35 = vpop.permute.xlu1 %8145  ;;  %v8876_v4 = vadd.f32 %v10803_v13, %v19789_v6  ;;  %v8870_v18 = vpop.f32.mrb[31].mxu1 }
 0x820   :  { %v7950_v21 = vpop.permute.xlu0 %7949  ;;  %v8871_v16 = vadd.f32 %v19789_v6, %v8870_v18  ;;  %v8500_v18 = vsel %vm8470_vm14, %v8451_v46, %v7784_v30 }
 0x821   :  { %7625 = vrot.lane.b32.xlu1 %v19797_v25, %s10969_s2  ;;  %v19809_v36 = vmax.f32 %v8876_v4, 0.0  ;;  %v8501_v4 = vsel %vm8470_vm14, %v8452_v56, %v7786_v26  ;;  %v8549_v11 = vsel %vm8519_vm15, %v8500_v18, %v7950_v21  ;;  %v8404_v26 = vsel %vm2091_vm11, %v8356_v48, %v23147_v17  ;;  %v23155_v18 = vld [vmem:[#allocation313_spill] sm:$0xff] }
 0x822   :  { %7817 = vrot.lane.b32.xlu0 %v23134_v29, %s10970_s28  ;;  %v9049_v61 = vmax.f32 %v8871_v16, 0.0  ;;  %v8550_v32 = vsel %vm8519_vm15, %v8501_v4, %v7952_v63  ;;  %v8261_v29 = vsel %vm1749_vm5, %v23012_v10, %v23146_v24  ;;  %v8453_v14 = vsel %vm8421_vm13, %v8404_v26, %v7594_v23 }
 0x823   :  { %v7954_v43 = vpop.permute.xlu1 %7953  ;;  %v9122_v38 = vcombine.high %v19809_v36, %v19809_v36  ;;  %v8599_v30 = vsel %vm8568_vm0, %v8550_v32, %v8146_v35  ;;  %v8309_v21 = vsel %vm1863_vm7, %v8261_v29, %v23149_v27  ;;  %v8502_v1 = vsel %vm8470_vm14, %v8453_v14, %v7788_v53 }
 0x824   :  { %v7790_v37 = vpop.permute.xlu0 %7789  ;;  %v8680_v56 = vcombine.high %v8599_v30, %v8599_v30  ;;  %v9121_v41 = vcombine.high %v9049_v61, %v9049_v61  ;;  %v23156_v22 = vrot.slane %v23155_v18, 1 }
 0x825   :  { %7983 = vrot.lane.b32.xlu1 %v23141_v8, %s10972_s14  ;;  %v9193_v13 = vmax.f32 %v9049_v61, %v9122_v38  ;;  %v23151_v38 = vld [vmem:[#allocation340_spill] sm:$0xff] }
 0x826   :  { %7815 = vrot.lane.b32.xlu0 %v23143_v39, %s10970_s28  ;;  %v8357_v35 = vsel %vm1977_vm9, %v8309_v21, %v23151_v38  ;;  %v23153_v8 = vld [vmem:[#allocation292_spill] sm:$0xff] }
 0x827   :  { %v7956_v16 = vpop.permute.xlu1 %7955  ;;  %v9271_v52 = vrot.slane %v9193_v13, %v15167_v5  ;;  %v8077_v62 = vcombine.low %v23153_v8, %v23152_v40  ;;  %v8405_v23 = vsel %vm2091_vm11, %v8357_v35, %v23154_v2  ;;  %v8551_v13 = vsel %vm8519_vm15, %v8502_v1, %v7954_v43  ;;  %v23157_v43 = vld [vmem:[#allocation309_spill] sm:$0xff] }
 0x828   :  { %v8144_v34 = vpop.permute.xlu0 %8143  ;;  %v8454_v53 = vsel %vm8421_vm13, %v8405_v23, %v19782_v28 }
 0x829   :  { %v8598_v0 = vsel %vm8568_vm0, %v8549_v11, %v8144_v34  ;;  %7981 = vrot.lane.b32.xlu1 %v23148_v7, %s10972_s14  ;;  %v19854_v63 = vpop.f32.mrb[32].mxu1  ;;  %v9272_v51 = vcombine.high %v9271_v52, %v9271_v52  ;;  %v10455_v48 = vrot.slane %v9271_v52, 9  ;;  %v8503_v32 = vsel %vm8470_vm14, %v8454_v53, %v7790_v37  ;;  %v23158_v34 = vld [vmem:[#allocation310_spill] sm:$0xff] }
 0x82a   :  { %v8717_v60 = vcombine.low %v8598_v0, %v8599_v30  ;;  %v8880_v10 = vpop.f32.mrb[33].mxu1  ;;  %7819 = vrot.lane.b32.xlu0 %v23150_v57, %s10970_s28  ;;  %v23159_v24 = vcombine.low %v23157_v43, %v23158_v34  ;;  %v8552_v29 = vsel %vm8519_vm15, %v8503_v32, %v7956_v16  ;;  %v8084_v26 = vrot.slane %v8077_v62, %v15167_v5  ;;  %v23160_v16 = vld [vmem:[#allocation328_spill] sm:$0xff]  ;;  %v23161_v34 = vld [vmem:[#allocation107_spill] sm:$0xff] }
 0x82b   :  { %v8881_v54 = vadd.f32 %v19789_v6, %v8880_v10  ;;  %v19865_v15 = vpop.permute.xlu1 %7597  ;;  %v10456_v46 = vrot.slane %v9272_v51, 9  ;;  %v9841_v14 = vmax.f32 %v9271_v52, %v10455_v48 }
 0x82c   :  { %10834 = vmatprep.mubr.msk.f32.mxu1 %vm8731_vm1, %v8717_v60  ;;  %v8148_v39 = vpop.permute.xlu0 %8147  ;;  %v19892_v60 = vsub.s32 0, %v23160_v16 }
 0x82d   :  { %v9051_v19 = vmax.f32 %v8881_v54, 0.0  ;;  %v8600_v4 = vsel %vm8568_vm0, %v8551_v13, %v8148_v39  ;;  %7985 = vrot.lane.b32.xlu1 %v23156_v22, %s10972_s14  ;;  %v9842_v30 = vmax.f32 %v9272_v51, %v10456_v46 }
 0x82e   :  { %v8718_v11 = vcombine.low %v8680_v56, %v8600_v4  ;;  %8177 = vrot.lane.b32.xlu0 %v23159_v24, %s10971_s9  ;;  %v9988_v62 = vrot.slane %v9841_v14, %v19892_v60  ;;  %v8262_v24 = vsel %vm1749_vm5, %v23027_v20, %v23161_v34  ;;  %v23165_v20 = vld [vmem:[#allocation307_spill] sm:$0xff] }
 0x82f   :  { %v9123_v28 = vcombine.high %v9051_v19, %v9051_v19  ;;  %v9194_v61 = vmax.f32 %v9121_v41, %v9051_v19  ;;  %v8150_v17 = vpop.permute.xlu1 %8149 }
 0x830   :  { %v8601_v0 = vsel %vm8568_vm0, %v8552_v29, %v8150_v17  ;;  %10835 = vmatmul.mubr.msk.f32.gmra.mrb[52].mxu1 %vm8731_vm1, %v8718_v11  ;;  %v7600_v7 = vpop.permute.xlu0 %7599  ;;  %v23162_v29 = vld [vmem:[#allocation389_spill] sm:$0xff]  ;;  %v23163_v17 = vld [vmem:[#allocation50_spill] sm:$0xff] }
 0x831   :  { %v9195_v37 = vmax.f32 %v19809_v36, %v9123_v28  ;;  %v9279_v27 = vrot.slane %v9194_v61, %v15167_v5  ;;  %v8681_v21 = vcombine.high %v8601_v0, %v8601_v0  ;;  %8179 = vrot.lane.b32.xlu1 %v8084_v26, %s10971_s9  ;;  %v9992_v36 = vrot.slane %v9842_v30, %v19892_v60  ;;  %v23164_v30 = vld [vmem:[#allocation52_spill] sm:$0xff] }
 0x832   :  { %8175 = vrot.lane.b32.xlu0 %v19797_v25, %s10971_s9  ;;  %v8263_v28 = vsel %vm1749_vm5, %v23021_v9, %v23162_v29  ;;  %v8886_v61 = vadd.f32 %v19854_v63, %v19789_v6  ;;  %v8310_v26 = vsel %vm1863_vm7, %v8262_v24, %v23163_v17  ;;  %v23167_v63 = vld [vmem:[#allocation144_spill] sm:$0xff] }
 0x833   :  { %v9280_v51 = vcombine.high %v9279_v27, %v9279_v27  ;;  %v9287_v10 = vrot.slane %v9195_v37, %v15167_v5  ;;  %v10457_v57 = vrot.slane %v9279_v27, 9  ;;  %v8719_v38 = vcombine.low %v8601_v0, %v8681_v21  ;;  %v7794_v35 = vpop.permute.xlu1 %7793  ;;  %v23166_v21 = vld [vmem:[#allocation101_spill] sm:$0xff]  ;;  %v23172_v29 = vld [vmem:[#allocation152_spill] sm:$0xff] }
 0x834   :  { %v7792_v1 = vpop.permute.xlu0 %7791  ;;  %v10274_v13 = vsel %vm10273_vm2, %v9992_v36, %v9988_v62  ;;  %v8311_v0 = vsel %vm1863_vm7, %v8263_v28, %v23164_v30  ;;  %v23173_v30 = vld [vmem:[#allocation387_spill] sm:$0xff] }
 0x835   :  { %v9288_v54 = vcombine.high %v9287_v10, %v9287_v10  ;;  %v10458_v40 = vrot.slane %v9280_v51, 9  ;;  %v10459_v8 = vrot.slane %v9287_v10, 9  ;;  %v9843_v52 = vmax.f32 %v9279_v27, %v10457_v57  ;;  %10837 = vmatprep.mubr.msk.f32.mxu1 %vm8731_vm1, %v8719_v38 }
 0x836   :  { %v8358_v27 = vsel %vm1977_vm9, %v8310_v26, %v23165_v20  ;;  %v8359_v9 = vsel %vm1977_vm9, %v8311_v0, %v23166_v21  ;;  %v9052_v57 = vmax.f32 %v8886_v61, 0.0  ;;  %v8264_v0 = vsel %vm1749_vm5, %v23031_v44, %v23173_v30  ;;  %v23174_v21 = vld [vmem:[#allocation65_spill] sm:$0xff] }
 0x837   :  { %v10460_v25 = vrot.slane %v9288_v54, 9  ;;  %v9844_v2 = vmax.f32 %v9280_v51, %v10458_v40  ;;  %v9845_v23 = vmax.f32 %v9287_v10, %v10459_v8  ;;  %v9996_v56 = vrot.slane %v9843_v52, %v19892_v60  ;;  %v7958_v46 = vpop.permute.xlu1 %7957  ;;  %v23168_v51 = vld [vmem:[#allocation355_spill] sm:$0xff] }
 0x838   :  { %v7604_v39 = vpop.permute.xlu0 %7603  ;;  %v8406_v16 = vsel %vm2091_vm11, %v8358_v27, %v23167_v63  ;;  %v8407_v10 = vsel %vm2091_vm11, %v8359_v9, %v23168_v51  ;;  %v8312_v9 = vsel %vm1863_vm7, %v8264_v0, %v23174_v21 }
 0x839   :  { %v9846_v53 = vmax.f32 %v9288_v54, %v10460_v25  ;;  %v10000_v41 = vrot.slane %v9844_v2, %v19892_v60  ;;  %v10004_v19 = vrot.slane %v9845_v23, %v19892_v60  ;;  %v10276_v4 = vsel %vm10275_vm3, %v9996_v56, %v10274_v13 }
 0x83a   :  { %v8455_v38 = vsel %vm8421_vm13, %v8406_v16, %v19865_v15  ;;  %v8456_v36 = vsel %vm8421_vm13, %v8407_v10, %v7600_v7  ;;  %v23175_v10 = vld [vmem:[#allocation99_spill] sm:$0xff] }
 0x83b   :  { %v10008_v18 = vrot.slane %v9846_v53, %v19892_v60  ;;  %v10278_v22 = vsel %vm10277_vm4, %v10000_v41, %v10276_v4  ;;  %v19907_v48 = vpop.permute.xlu1 %7601  ;;  %v8505_v54 = vsel %vm8470_vm14, %v8456_v36, %v7794_v35  ;;  %v8504_v40 = vsel %vm8470_vm14, %v8455_v38, %v7792_v1  ;;  %v23169_v53 = vld [vmem:[#allocation392_spill] sm:$0xff] }
 0x83c   :  { %v10280_v32 = vsel %vm10279_vm6, %v10004_v19, %v10278_v22  ;;  %v7960_v11 = vpop.permute.xlu0 %7959  ;;  %v8553_v62 = vsel %vm8519_vm15, %v8504_v40, %v7958_v46  ;;  %v8265_v35 = vsel %vm1749_vm5, %v23036_v59, %v23169_v53  ;;  %v9124_v1 = vcombine.high %v9052_v57, %v9052_v57  ;;  %v23170_v46 = vld [vmem:[#allocation222_spill] sm:$0xff] }
 0x83d   :  { %v10282_v43 = vsel %vm10281_vm8, %v10008_v18, %v10280_v32  ;;  %v8554_v25 = vsel %vm8519_vm15, %v8505_v54, %v7960_v11  ;;  %v8313_v4 = vsel %vm1863_vm7, %v8265_v35, %v23170_v46  ;;  %v23171_v32 = vld [vmem:[#allocation103_spill] sm:$0xff]  ;;  %v8360_v38 = vsel %vm1977_vm9, %v8312_v9, %v23175_v10 }
 0x83e   :  { %10351 = vst.msk [vmem:[%s20386_s5] sm:$0x3f] %vm10350_vm10, %v10282_v43  ;;  %v8361_v11 = vsel %vm1977_vm9, %v8313_v4, %v23171_v32 }
 0x83f   :  { %v8152_v37 = vpop.permute.xlu1 %8151  ;;  %v8409_v28 = vsel %vm2091_vm11, %v8361_v11, %v23172_v29 }
 0x840   :  { %v7798_v14 = vpop.permute.xlu0 %7797  ;;  %v8602_v13 = vsel %vm8568_vm0, %v8553_v62, %v8152_v37  ;;  %v8458_v61 = vsel %vm8421_vm13, %v8409_v28, %v7604_v39 }
 0x841   :  { %v8507_v37 = vsel %vm8470_vm14, %v8458_v61, %v7798_v14  ;;  %v23176_v14 = vld [vmem:[#allocation147_spill] sm:$0xff] }
 0x842   :  { %v10809_v52 = vpop.f32.mrb[34].mxu1 }
 0x843   :  { %v7796_v8 = vpop.permute.xlu1 %7795  ;;  %v8896_v2 = vadd.f32 %v10809_v52, %v19789_v6  ;;  %v8890_v23 = vpop.f32.mrb[35].mxu1 }
 0x844   :  { %v8154_v56 = vpop.permute.xlu0 %8153  ;;  %v8891_v15 = vadd.f32 %v19789_v6, %v8890_v23 }
 0x845   :  { %v8603_v7 = vsel %vm8568_vm0, %v8554_v25, %v8154_v56  ;;  %v9054_v41 = vmax.f32 %v8896_v2, 0.0 }
 0x846   :  { %v8720_v19 = vcombine.low %v8602_v13, %v8603_v7  ;;  %v9053_v18 = vmax.f32 %v8891_v15, 0.0  ;;  %v8682_v15 = vcombine.high %v8603_v7, %v8603_v7 }
 0x847   :  { %v7962_v22 = vpop.permute.xlu1 %7961  ;;  %v9126_v43 = vcombine.high %v9054_v41, %v9054_v41  ;;  %v9197_v34 = vmax.f32 %v9124_v1, %v9054_v41 }
 0x848   :  { %10838 = vmatmul.mubr.msk.f32.gmra.mrb[54].mxu1 %vm8731_vm1, %v8720_v19  ;;  %v7964_v24 = vpop.permute.xlu0 %7963  ;;  %v9125_v59 = vcombine.high %v9053_v18, %v9053_v18 }
 0x849   :  { %v9303_v17 = vrot.slane %v9197_v34, %v15167_v5  ;;  %v9198_v26 = vmax.f32 %v9053_v18, %v9126_v43  ;;  %v8556_v39 = vsel %vm8519_vm15, %v8507_v37, %v7964_v24 }
 0x84a   :  { %v9196_v20 = vmax.f32 %v9052_v57, %v9125_v59  ;;  %v8408_v57 = vsel %vm2091_vm11, %v8360_v38, %v23176_v14 }
 0x84b   :  { %v19962_v27 = vpop.permute.xlu1 %7607  ;;  %v9304_v63 = vcombine.high %v9303_v17, %v9303_v17  ;;  %v9311_v16 = vrot.slane %v9198_v26, %v15167_v5  ;;  %v10463_v54 = vrot.slane %v9303_v17, 9  ;;  %v8457_v52 = vsel %vm8421_vm13, %v8408_v57, %v19907_v48 }
 0x84c   :  { %v8158_v51 = vpop.permute.xlu0 %8157  ;;  %v9295_v36 = vrot.slane %v9196_v20, %v15167_v5  ;;  %v8506_v56 = vsel %vm8470_vm14, %v8457_v52, %v7796_v8 }
 0x84d   :  { %v8605_v44 = vsel %vm8568_vm0, %v8556_v39, %v8158_v51  ;;  %v9312_v40 = vcombine.high %v9311_v16, %v9311_v16  ;;  %v10464_v62 = vrot.slane %v9304_v63, 9  ;;  %v10465_v13 = vrot.slane %v9311_v16, 9 }
 0x84e   :  { %v9296_v25 = vcombine.high %v9295_v36, %v9295_v36  ;;  %v10461_v2 = vrot.slane %v9295_v36, 9  ;;  %v8683_v53 = vcombine.high %v8605_v44, %v8605_v44  ;;  %v8555_v46 = vsel %vm8519_vm15, %v8506_v56, %v7962_v22  ;;  %v23179_v56 = vld [vmem:[#allocation53_spill] sm:$0xff] }
 0x84f   :  { %v7606_v23 = vpop.permute.xlu1 %7605  ;;  %v10466_v41 = vrot.slane %v9312_v40, 9  ;;  %v9849_v4 = vmax.f32 %v9303_v17, %v10463_v54  ;;  %v9850_v32 = vmax.f32 %v9304_v63, %v10464_v62  ;;  %v9851_v34 = vmax.f32 %v9311_v16, %v10465_v13  ;;  %v23178_v62 = vld [vmem:[#allocation393_spill] sm:$0xff] }
 0x850   :  { %v8156_v35 = vpop.permute.xlu0 %8155  ;;  %v10462_v1 = vrot.slane %v9296_v25, 9  ;;  %v9847_v19 = vmax.f32 %v9295_v36, %v10461_v2  ;;  %v8722_v24 = vcombine.low %v8605_v44, %v8683_v53 }
 0x851   :  { %v8604_v18 = vsel %vm8568_vm0, %v8555_v46, %v8156_v35  ;;  %v9852_v29 = vmax.f32 %v9312_v40, %v10466_v41  ;;  %v10020_v22 = vrot.slane %v9849_v4, %v19892_v60  ;;  %v10024_v59 = vrot.slane %v9850_v32, %v19892_v60  ;;  %v23177_v40 = vld [vmem:[#allocation390_spill] sm:$0xff]  ;;  %v23184_v32 = vld [vmem:[#allocation155_spill] sm:$0xff] }
 0x852   :  { %v9848_v48 = vmax.f32 %v9296_v25, %v10462_v1  ;;  %v8721_v11 = vcombine.low %v8682_v15, %v8604_v18  ;;  %v10012_v7 = vrot.slane %v9847_v19, %v19892_v60  ;;  %v10028_v26 = vrot.slane %v9851_v34, %v19892_v60  ;;  %v23180_v15 = vld [vmem:[#allocation72_spill] sm:$0xff]  ;;  %v23181_v1 = vld [vmem:[#allocation311_spill] sm:$0xff]  ;;  %v23182_v19 = vld [vmem:[#allocation105_spill] sm:$0xff] }
 0x853   :  { %v19979_v43 = vpop.permute.xlu1 %7609  ;;  %v10032_v37 = vrot.slane %v9852_v29, %v19892_v60  ;;  %v8266_v52 = vsel %vm1749_vm5, %v23046_v49, %v23177_v40  ;;  %v8267_v25 = vsel %vm1749_vm5, %v23045_v3, %v23178_v62  ;;  %v23183_v18 = vld [vmem:[#allocation148_spill] sm:$0xff] }
 0x854   :  { %v7802_v8 = vpop.permute.xlu0 %7801  ;;  %v10016_v28 = vrot.slane %v9848_v48, %v19892_v60  ;;  %10840 = vmatprep.mubr.msk.f32.mxu1 %vm8731_vm1, %v8721_v11  ;;  %v8314_v13 = vsel %vm1863_vm7, %v8266_v52, %v23179_v56  ;;  %v8315_v53 = vsel %vm1863_vm7, %v8267_v25, %v23180_v15  ;;  %v23185_v11 = vld [vmem:[#allocation319_spill] sm:$0xff]  ;;  %v23192_v62 = vld [vmem:[#allocation356_spill] sm:$0xff] }
 0x855   :  { %10841 = vmatmul.mubr.msk.f32.gmra.mrb[56].mxu1 %vm8731_vm1, %v8722_v24  ;;  %v8362_v41 = vsel %vm1977_vm9, %v8314_v13, %v23181_v1  ;;  %v8363_v46 = vsel %vm1977_vm9, %v8315_v53, %v23182_v19  ;;  %v8268_v34 = vsel %vm1749_vm5, %v23062_v33, %v23185_v11 }
 0x856   :  { %v10283_v61 = vsel %vm10273_vm2, %v10016_v28, %v10012_v7  ;;  %v8410_v3 = vsel %vm2091_vm11, %v8362_v41, %v23183_v18  ;;  %v8411_v48 = vsel %vm2091_vm11, %v8363_v46, %v23184_v32  ;;  %v23186_v7 = vld [vmem:[#allocation225_spill] sm:$0xff] }
 0x857   :  { %v7968_v17 = vpop.permute.xlu1 %7967  ;;  %v10284_v30 = vsel %vm10275_vm3, %v10020_v22, %v10283_v61  ;;  %v8460_v24 = vsel %vm8421_vm13, %v8411_v48, %v19962_v27  ;;  %v8459_v29 = vsel %vm8421_vm13, %v8410_v3, %v7606_v23  ;;  %v8316_v28 = vsel %vm1863_vm7, %v8268_v34, %v23186_v7 }
 0x858   :  { %v7800_v0 = vpop.permute.xlu0 %7799  ;;  %v10285_v20 = vsel %vm10277_vm4, %v10024_v59, %v10284_v30  ;;  %v8509_v22 = vsel %vm8470_vm14, %v8460_v24, %v7802_v8  ;;  %v23187_v30 = vld [vmem:[#allocation394_spill] sm:$0xff] }
 0x859   :  { %v10286_v21 = vsel %vm10279_vm6, %v10028_v26, %v10285_v20  ;;  %v8508_v59 = vsel %vm8470_vm14, %v8459_v29, %v7800_v0  ;;  %v23188_v20 = vld [vmem:[#allocation104_spill] sm:$0xff]  ;;  %v8558_v27 = vsel %vm8519_vm15, %v8509_v22, %v7968_v17  ;;  %v23190_v0 = vld [vmem:[#allocation151_spill] sm:$0xff] }
 0x85a   :  { %v10287_v9 = vsel %vm10281_vm8, %v10032_v37, %v10286_v21  ;;  %v10812_v16 = vpop.f32.mrb[36].mxu1  ;;  %v8269_v37 = vsel %vm1749_vm5, %v23061_v42, %v23187_v30  ;;  %v8364_v33 = vsel %vm1977_vm9, %v8316_v28, %v23188_v20 }
 0x85b   :  { %v7804_v63 = vpop.permute.xlu1 %7803  ;;  %10352 = vst.msk [vmem:[%s20386_s5 + $0x8] sm:$0x3f] %vm10350_vm10, %v10287_v9  ;;  %v8906_v39 = vadd.f32 %v10812_v16, %v19789_v6  ;;  %v8900_v51 = vpop.f32.mrb[37].mxu1  ;;  %v23189_v16 = vld [vmem:[#allocation427_spill] sm:$0xff] }
 0x85c   :  { %v7612_v10 = vpop.permute.xlu0 %7611  ;;  %v8901_v38 = vadd.f32 %v19789_v6, %v8900_v51  ;;  %v8317_v8 = vsel %vm1863_vm7, %v8269_v37, %v23189_v16 }
 0x85d   :  { %v9056_v36 = vmax.f32 %v8906_v39, 0.0  ;;  %v8412_v39 = vsel %vm2091_vm11, %v8364_v33, %v23190_v0 }
 0x85e   :  { %v9055_v44 = vmax.f32 %v8901_v38, 0.0  ;;  %v8461_v17 = vsel %vm8421_vm13, %v8412_v39, %v19979_v43 }
 0x85f   :  { %v8162_v14 = vpop.permute.xlu1 %8161  ;;  %v9128_v57 = vcombine.high %v9056_v36, %v9056_v36 }
 0x860   :  { %v7966_v54 = vpop.permute.xlu0 %7965  ;;  %v8607_v51 = vsel %vm8568_vm0, %v8558_v27, %v8162_v14  ;;  %v9127_v14 = vcombine.high %v9055_v44, %v9055_v44 }
 0x861   :  { %v9199_v2 = vmax.f32 %v9055_v44, %v9128_v57  ;;  %v8557_v23 = vsel %vm8519_vm15, %v8508_v59, %v7966_v54  ;;  %v23191_v57 = vld [vmem:[#allocation106_spill] sm:$0xff]  ;;  %v8684_v15 = vcombine.high %v8607_v51, %v8607_v51 }
 0x862   :  { %v8365_v40 = vsel %vm1977_vm9, %v8317_v8, %v23191_v57 }
 0x863   :  { %v7970_v35 = vpop.permute.xlu1 %7969  ;;  %v9319_v49 = vrot.slane %v9199_v2, %v15167_v5  ;;  %v8413_v25 = vsel %vm2091_vm11, %v8365_v40, %v23192_v62  ;;  %v8510_v2 = vsel %vm8470_vm14, %v8461_v17, %v7804_v63 }
 0x864   :  { %v7806_v4 = vpop.permute.xlu0 %7805  ;;  %v8559_v53 = vsel %vm8519_vm15, %v8510_v2, %v7970_v35  ;;  %v8462_v19 = vsel %vm8421_vm13, %v8413_v25, %v7612_v10  ;;  %v23193_v2 = vld [vmem:[#allocation60_spill] sm:$0xff] }
 0x865   :  { %v9320_v61 = vcombine.high %v9319_v49, %v9319_v49  ;;  %v10467_v43 = vrot.slane %v9319_v49, 9  ;;  %v8511_v18 = vsel %vm8470_vm14, %v8462_v19, %v7806_v4 }
 0x867   :  { %v7972_v26 = vpop.permute.xlu1 %7971  ;;  %v20036_v21 = vpop.f32.mrb[38].mxu1  ;;  %v10468_v56 = vrot.slane %v9320_v61, 9  ;;  %v9853_v10 = vmax.f32 %v9319_v49, %v10467_v43  ;;  %v23196_v43 = vld [vmem:[#allocation69_spill] sm:$0xff] }
 0x868   :  { %v8160_v9 = vpop.permute.xlu0 %8159  ;;  %v8910_v38 = vpop.f32.mrb[39].mxu1  ;;  %v8560_v44 = vsel %vm8519_vm15, %v8511_v18, %v7972_v26  ;;  %v23197_v18 = vld [vmem:[#allocation315_spill] sm:$0xff] }
 0x869   :  { %v8606_v42 = vsel %vm8568_vm0, %v8557_v23, %v8160_v9  ;;  %v8911_v52 = vadd.f32 %v19789_v6, %v8910_v38  ;;  %v9854_v48 = vmax.f32 %v9320_v61, %v10468_v56  ;;  %v10036_v27 = vrot.slane %v9853_v10, %v19892_v60 }
 0x86a   :  { %v8723_v54 = vcombine.low %v8606_v42, %v8607_v51  ;;  %v8270_v56 = vsel %vm1749_vm5, %v23081_v50, %v23193_v2 }
 0x86b   :  { %v20052_v13 = vpop.permute.xlu1 %7613  ;;  %v9057_v1 = vmax.f32 %v8911_v52, 0.0  ;;  %v10040_v59 = vrot.slane %v9854_v48, %v19892_v60  ;;  %v23199_v48 = vld [vmem:[#allocation359_spill] sm:$0xff] }
 0x86c   :  { %10843 = vmatprep.mubr.msk.f32.mxu1 %vm8731_vm1, %v8723_v54  ;;  %v8164_v41 = vpop.permute.xlu0 %8163 }
 0x86d   :  { %v8608_v46 = vsel %vm8568_vm0, %v8559_v53, %v8164_v41  ;;  %v9129_v3 = vcombine.high %v9057_v1, %v9057_v1  ;;  %v9200_v63 = vmax.f32 %v9127_v14, %v9057_v1  ;;  %v10288_v8 = vsel %vm10273_vm2, %v10040_v59, %v10036_v27  ;;  %v23194_v14 = vld [vmem:[#allocation396_spill] sm:$0xff]  ;;  %v23195_v1 = vld [vmem:[#allocation426_spill] sm:$0xff] }
 0x86e   :  { %v8724_v32 = vcombine.low %v8684_v15, %v8608_v46  ;;  %v8271_v15 = vsel %vm1749_vm5, %v23072_v45, %v23194_v14  ;;  %v8916_v53 = vadd.f32 %v20036_v21, %v19789_v6  ;;  %v8318_v41 = vsel %vm1863_vm7, %v8270_v56, %v23195_v1 }
 0x86f   :  { %v8166_v11 = vpop.permute.xlu1 %8165  ;;  %v9201_v34 = vmax.f32 %v9056_v36, %v9129_v3  ;;  %v9327_v35 = vrot.slane %v9200_v63, %v15167_v5  ;;  %v8319_v19 = vsel %vm1863_vm7, %v8271_v15, %v23196_v43  ;;  %v8366_v3 = vsel %vm1977_vm9, %v8318_v41, %v23197_v18  ;;  %v23198_v63 = vld [vmem:[#allocation108_spill] sm:$0xff] }
 0x870   :  { %v8609_v24 = vsel %vm8568_vm0, %v8560_v44, %v8166_v11  ;;  %10844 = vmatmul.mubr.msk.f32.gmra.mrb[58].mxu1 %vm8731_vm1, %v8724_v32  ;;  %v7616_v29 = vpop.permute.xlu0 %7615  ;;  %v8367_v50 = vsel %vm1977_vm9, %v8319_v19, %v23198_v63  ;;  %v8414_v45 = vsel %vm2091_vm11, %v8366_v3, %v23199_v48  ;;  %v23200_v44 = vld [vmem:[#allocation360_spill] sm:$0xff]  ;;  %v9058_v11 = vmax.f32 %v8916_v53, 0.0  ;;  %v23206_v53 = vld [vmem:[#allocation123_spill] sm:$0xff] }
 0x871   :  { %v8685_v7 = vcombine.high %v8609_v24, %v8609_v24  ;;  %v9328_v28 = vcombine.high %v9327_v35, %v9327_v35  ;;  %v9335_v4 = vrot.slane %v9201_v34, %v15167_v5  ;;  %v10469_v22 = vrot.slane %v9327_v35, 9  ;;  %v23208_v63 = vld [vmem:[#allocation156_spill] sm:$0xff] }
 0x872   :  { %v8415_v21 = vsel %vm2091_vm11, %v8367_v50, %v23200_v44  ;;  %v8463_v34 = vsel %vm8421_vm13, %v8414_v45, %v20052_v13 }
 0x873   :  { %v8725_v61 = vcombine.low %v8609_v24, %v8685_v7  ;;  %v7810_v30 = vpop.permute.xlu1 %7809  ;;  %v9336_v26 = vcombine.high %v9335_v4, %v9335_v4  ;;  %v10470_v37 = vrot.slane %v9328_v28, 9  ;;  %v10471_v36 = vrot.slane %v9335_v4, 9 }
 0x874   :  { %v9855_v20 = vmax.f32 %v9327_v35, %v10469_v22  ;;  %v7808_v33 = vpop.permute.xlu0 %7807  ;;  %v8464_v35 = vsel %vm8421_vm13, %v8415_v21, %v7616_v29 }
 0x875   :  { %10846 = vmatprep.mubr.msk.f32.mxu1 %vm8731_vm1, %v8725_v61  ;;  %v10472_v23 = vrot.slane %v9336_v26, 9  ;;  %v9856_v49 = vmax.f32 %v9328_v28, %v10470_v37  ;;  %v9857_v9 = vmax.f32 %v9335_v4, %v10471_v36  ;;  %v8513_v24 = vsel %vm8470_vm14, %v8464_v35, %v7810_v30  ;;  %v23201_v36 = vld [vmem:[#allocation398_spill] sm:$0xff] }
 0x876   :  { %v10044_v16 = vrot.slane %v9855_v20, %v19892_v60  ;;  %v8512_v10 = vsel %vm8470_vm14, %v8463_v34, %v7808_v33  ;;  %v8273_v30 = vsel %vm1749_vm5, %v23094_v58, %v23201_v36  ;;  %v9130_v20 = vcombine.high %v9058_v11, %v9058_v11 }
 0x877   :  { %v7974_v0 = vpop.permute.xlu1 %7973  ;;  %v9858_v39 = vmax.f32 %v9336_v26, %v10472_v23  ;;  %v10048_v51 = vrot.slane %v9856_v49, %v19892_v60  ;;  %v10052_v42 = vrot.slane %v9857_v9, %v19892_v60  ;;  %v23202_v23 = vld [vmem:[#allocation76_spill] sm:$0xff] }
 0x878   :  { %v10289_v38 = vsel %vm10275_vm3, %v10044_v16, %v10288_v8  ;;  %v7620_v57 = vpop.permute.xlu0 %7619  ;;  %v8561_v4 = vsel %vm8519_vm15, %v8512_v10, %v7974_v0  ;;  %v8321_v49 = vsel %vm1863_vm7, %v8273_v30, %v23202_v23  ;;  %v23203_v8 = vld [vmem:[#allocation135_spill] sm:$0xff] }
 0x879   :  { %v10056_v40 = vrot.slane %v9858_v39, %v19892_v60  ;;  %v10290_v17 = vsel %vm10277_vm4, %v10048_v51, %v10289_v38  ;;  %v8369_v0 = vsel %vm1977_vm9, %v8321_v49, %v23203_v8  ;;  %v23204_v38 = vld [vmem:[#allocation130_spill] sm:$0xff] }
 0x87a   :  { %v10291_v54 = vsel %vm10279_vm6, %v10052_v42, %v10290_v17 }
 0x87b   :  { %v20075_v52 = vpop.permute.xlu1 %7617  ;;  %v10292_v62 = vsel %vm10281_vm8, %v10056_v40, %v10291_v54  ;;  %v8417_v40 = vsel %vm2091_vm11, %v8369_v0, %v23204_v38 }
 0x87c   :  { %v7976_v25 = vpop.permute.xlu0 %7975  ;;  %10353 = vst.msk [vmem:[%s20386_s5 + $0x10] sm:$0x3f] %vm10350_vm10, %v10292_v62  ;;  %v8466_v17 = vsel %vm8421_vm13, %v8417_v40, %v7620_v57 }
 0x87d   :  { %v8562_v22 = vsel %vm8519_vm15, %v8513_v24, %v7976_v25  ;;  %v23205_v25 = vld [vmem:[#allocation395_spill] sm:$0xff] }
 0x87e   :  { %v8272_v2 = vsel %vm1749_vm5, %v23087_v47, %v23205_v25 }
 0x87f   :  { %v8168_v46 = vpop.permute.xlu1 %8167  ;;  %v8320_v1 = vsel %vm1863_vm7, %v8272_v2, %v23206_v53  ;;  %v23211_v53 = vld [vmem:[#allocation343_spill] sm:$0xff] }
 0x880   :  { %v7814_v32 = vpop.permute.xlu0 %7813  ;;  %v8610_v37 = vsel %vm8568_vm0, %v8561_v4, %v8168_v46  ;;  %v23207_v46 = vld [vmem:[#allocation316_spill] sm:$0xff] }
 0x881   :  { %v8515_v56 = vsel %vm8470_vm14, %v8466_v17, %v7814_v32  ;;  %v8368_v18 = vsel %vm1977_vm9, %v8320_v1, %v23207_v46  ;;  %v23213_v46 = vld [vmem:[#allocation46_spill] sm:$0xff] }
 0x882   :  { %v10818_v28 = vpop.f32.mrb[40].mxu1  ;;  %v8416_v50 = vsel %vm2091_vm11, %v8368_v18, %v23208_v63 }
 0x883   :  { %v7812_v7 = vpop.permute.xlu1 %7811  ;;  %v8926_v59 = vadd.f32 %v10818_v28, %v19789_v6  ;;  %v8920_v61 = vpop.f32.mrb[41].mxu1  ;;  %v8465_v45 = vsel %vm8421_vm13, %v8416_v50, %v20075_v52  ;;  %v23215_v50 = vld [vmem:[#allocation77_spill] sm:$0xff] }
 0x884   :  { %v8170_v26 = vpop.permute.xlu0 %8169  ;;  %v8921_v13 = vadd.f32 %v19789_v6, %v8920_v61  ;;  %v8514_v35 = vsel %vm8470_vm14, %v8465_v45, %v7812_v7 }
 0x885   :  { %v8611_v29 = vsel %vm8568_vm0, %v8562_v22, %v8170_v26  ;;  %v9060_v33 = vmax.f32 %v8926_v59, 0.0 }
 0x886   :  { %v8726_v27 = vcombine.low %v8610_v37, %v8611_v29  ;;  %v9059_v9 = vmax.f32 %v8921_v13, 0.0  ;;  %v8686_v10 = vcombine.high %v8611_v29, %v8611_v29 }
 0x887   :  { %v7978_v16 = vpop.permute.xlu1 %7977  ;;  %v9132_v39 = vcombine.high %v9060_v33, %v9060_v33  ;;  %v9203_v51 = vmax.f32 %v9130_v20, %v9060_v33 }
 0x888   :  { %10847 = vmatmul.mubr.msk.f32.gmra.mrb[60].mxu1 %vm8731_vm1, %v8726_v27  ;;  %v7980_v42 = vpop.permute.xlu0 %7979  ;;  %v9131_v58 = vcombine.high %v9059_v9, %v9059_v9  ;;  %v8563_v26 = vsel %vm8519_vm15, %v8514_v35, %v7978_v16 }
 0x889   :  { %v9351_v54 = vrot.slane %v9203_v51, %v15167_v5  ;;  %v9204_v62 = vmax.f32 %v9059_v9, %v9132_v39  ;;  %v8564_v57 = vsel %vm8519_vm15, %v8515_v56, %v7980_v42 }
 0x88a   :  { %v9202_v14 = vmax.f32 %v9058_v11, %v9131_v58  ;;  %v23209_v58 = vld [vmem:[#allocation400_spill] sm:$0xff] }
 0x88b   :  { %v20129_v15 = vpop.permute.xlu1 %7623  ;;  %v9352_v41 = vcombine.high %v9351_v54, %v9351_v54  ;;  %v9359_v43 = vrot.slane %v9204_v62, %v15167_v5  ;;  %v10475_v32 = vrot.slane %v9351_v54, 9  ;;  %v8275_v17 = vsel %vm1749_vm5, %v23108_v55, %v23209_v58  ;;  %v23210_v62 = vld [vmem:[#allocation80_spill] sm:$0xff] }
 0x88c   :  { %v8174_v19 = vpop.permute.xlu0 %8173  ;;  %v9343_v3 = vrot.slane %v9202_v14, %v15167_v5  ;;  %v8323_v25 = vsel %vm1863_vm7, %v8275_v17, %v23210_v62 }
 0x88d   :  { %v8613_v47 = vsel %vm8568_vm0, %v8564_v57, %v8174_v19  ;;  %v9360_v48 = vcombine.high %v9359_v43, %v9359_v43  ;;  %v10476_v44 = vrot.slane %v9352_v41, 9  ;;  %v10477_v24 = vrot.slane %v9359_v43, 9  ;;  %v23212_v57 = vld [vmem:[#allocation399_spill] sm:$0xff] }
 0x88e   :  { %v9344_v21 = vcombine.high %v9343_v3, %v9343_v3  ;;  %v10473_v11 = vrot.slane %v9343_v3, 9  ;;  %v8687_v28 = vcombine.high %v8613_v47, %v8613_v47  ;;  %v9861_v37 = vmax.f32 %v9351_v54, %v10475_v32 }
 0x88f   :  { %v20143_v34 = vpop.permute.xlu1 %7621  ;;  %v10478_v59 = vrot.slane %v9360_v48, 9  ;;  %v9862_v52 = vmax.f32 %v9352_v41, %v10476_v44  ;;  %v9863_v33 = vmax.f32 %v9359_v43, %v10477_v24  ;;  %v8371_v1 = vsel %vm1977_vm9, %v8323_v25, %v23211_v53  ;;  %v23216_v44 = vld [vmem:[#allocation73_spill] sm:$0xff] }
 0x890   :  { %v8172_v4 = vpop.permute.xlu0 %8171  ;;  %v10474_v22 = vrot.slane %v9344_v21, 9  ;;  %v9859_v61 = vmax.f32 %v9343_v3, %v10473_v11  ;;  %v8728_v27 = vcombine.low %v8613_v47, %v8687_v28  ;;  %v10068_v9 = vrot.slane %v9861_v37, %v19892_v60  ;;  %v23214_v47 = vld [vmem:[#allocation397_spill] sm:$0xff]  ;;  %v23218_v28 = vld [vmem:[#allocation320_spill] sm:$0xff] }
 0x891   :  { %v8612_v13 = vsel %vm8568_vm0, %v8563_v26, %v8172_v4  ;;  %v9864_v7 = vmax.f32 %v9360_v48, %v10478_v59  ;;  %v10072_v16 = vrot.slane %v9862_v52, %v19892_v60  ;;  %v10076_v39 = vrot.slane %v9863_v33, %v19892_v60  ;;  %v23219_v4 = vld [vmem:[#allocation45_spill] sm:$0xff]  ;;  %v23220_v26 = vld [vmem:[#allocation363_spill] sm:$0xff] }
 0x892   :  { %v9860_v36 = vmax.f32 %v9344_v21, %v10474_v22  ;;  %v8727_v30 = vcombine.low %v8686_v10, %v8612_v13  ;;  %v10060_v29 = vrot.slane %v9859_v61, %v19892_v60  ;;  %v8276_v19 = vsel %vm1749_vm5, %v23124_v31, %v23212_v57  ;;  %v23217_v31 = vld [vmem:[#allocation111_spill] sm:$0xff] }
 0x893   :  { %v7626_v20 = vpop.permute.xlu1 %7625  ;;  %v10080_v38 = vrot.slane %v9864_v7, %v19892_v60  ;;  %v8419_v18 = vsel %vm2091_vm11, %v8371_v1, %v23213_v46  ;;  %v8274_v63 = vsel %vm1749_vm5, %v23109_v12, %v23214_v47  ;;  %v8324_v32 = vsel %vm1863_vm7, %v8276_v19, %v23215_v50 }
 0x894   :  { %v7818_v23 = vpop.permute.xlu0 %7817  ;;  %v10064_v49 = vrot.slane %v9860_v36, %v19892_v60  ;;  %10849 = vmatprep.mubr.msk.f32.mxu1 %vm8731_vm1, %v8727_v30  ;;  %v8468_v48 = vsel %vm8421_vm13, %v8419_v18, %v20129_v15  ;;  %v8322_v21 = vsel %vm1863_vm7, %v8274_v63, %v23216_v44  ;;  %v8372_v11 = vsel %vm1977_vm9, %v8324_v32, %v23217_v31 }
 0x895   :  { %10850 = vmatmul.mubr.msk.f32.gmra.mrb[62].mxu1 %vm8731_vm1, %v8728_v27  ;;  %v8517_v35 = vsel %vm8470_vm14, %v8468_v48, %v7818_v23  ;;  %v8370_v12 = vsel %vm1977_vm9, %v8322_v21, %v23218_v28  ;;  %v8420_v22 = vsel %vm2091_vm11, %v8372_v11, %v23219_v4 }
 0x896   :  { %v10293_v8 = vsel %vm10273_vm2, %v10064_v49, %v10060_v29  ;;  %v8418_v37 = vsel %vm2091_vm11, %v8370_v12, %v23220_v26  ;;  %v8469_v13 = vsel %vm8421_vm13, %v8420_v22, %v7626_v20 }
 0x897   :  { %v7984_v0 = vpop.permute.xlu1 %7983  ;;  %v10294_v51 = vsel %vm10275_vm3, %v10068_v9, %v10293_v8  ;;  %v8467_v36 = vsel %vm8421_vm13, %v8418_v37, %v20143_v34 }
 0x898   :  { %v7816_v42 = vpop.permute.xlu0 %7815  ;;  %v10295_v40 = vsel %vm10277_vm4, %v10072_v16, %v10294_v51  ;;  %v8566_v59 = vsel %vm8519_vm15, %v8517_v35, %v7984_v0 }
 0x899   :  { %v10296_v54 = vsel %vm10279_vm6, %v10076_v39, %v10295_v40  ;;  %v8516_v27 = vsel %vm8470_vm14, %v8467_v36, %v7816_v42 }
 0x89a   :  { %v10297_v2 = vsel %vm10281_vm8, %v10080_v38, %v10296_v54  ;;  %v10821_v14 = vpop.f32.mrb[42].mxu1 }
 0x89b   :  { %v7982_v56 = vpop.permute.xlu1 %7981  ;;  %10354 = vst.msk [vmem:[%s20386_s5 + $0x18] sm:$0x3f] %vm10350_vm10, %v10297_v2  ;;  %v8936_v41 = vadd.f32 %v10821_v14, %v19789_v6  ;;  %v8930_v55 = vpop.f32.mrb[43].mxu1 }
 0x89c   :  { %v7820_v43 = vpop.permute.xlu0 %7819  ;;  %v8931_v3 = vadd.f32 %v19789_v6, %v8930_v55  ;;  %v8565_v49 = vsel %vm8519_vm15, %v8516_v27, %v7982_v56 }
 0x89d   :  { %v9062_v45 = vmax.f32 %v8936_v41, 0.0  ;;  %v8518_v33 = vsel %vm8470_vm14, %v8469_v13, %v7820_v43 }
 0x89e   :  { %v9061_v24 = vmax.f32 %v8931_v3, 0.0 }
 0x89f   :  { %v7986_v10 = vpop.permute.xlu1 %7985  ;;  %v9134_v15 = vcombine.high %v9062_v45, %v9062_v45 }
 0x8a0   :  { %v8178_v61 = vpop.permute.xlu0 %8177  ;;  %v8567_v23 = vsel %vm8519_vm15, %v8518_v33, %v7986_v10  ;;  %v9133_v58 = vcombine.high %v9061_v24, %v9061_v24 }
 0x8a1   :  { %v8615_v52 = vsel %vm8568_vm0, %v8566_v59, %v8178_v61  ;;  %v9205_v30 = vmax.f32 %v9061_v24, %v9134_v15 }
 0x8a2   :  { %v8688_v7 = vcombine.high %v8615_v52, %v8615_v52 }
 0x8a3   :  { %v8180_v29 = vpop.permute.xlu1 %8179  ;;  %v9367_v9 = vrot.slane %v9205_v30, %v15167_v5 }
 0x8a4   :  { %v8616_v20 = vsel %vm8568_vm0, %v8567_v23, %v8180_v29  ;;  %v8176_v16 = vpop.permute.xlu0 %8175 }
 0x8a5   :  { %v8614_v8 = vsel %vm8568_vm0, %v8565_v49, %v8176_v16  ;;  %v9368_v34 = vcombine.high %v9367_v9, %v9367_v9  ;;  %v8730_v39 = vcombine.low %v8688_v7, %v8616_v20  ;;  %v10479_v54 = vrot.slane %v9367_v9, 9 }
 0x8a6   :  { %v8729_v0 = vcombine.low %v8614_v8, %v8615_v52 }
 0x8a7   :  { %v10824_v51 = vpop.f32.mrb[44].mxu1  ;;  %v10480_v40 = vrot.slane %v9368_v34, 9  ;;  %v9865_v53 = vmax.f32 %v9367_v9, %v10479_v54 }
 0x8a8   :  { %10852 = vmatprep.mubr.msk.f32.mxu1 %vm8731_vm1, %v8729_v0  ;;  %v8940_v42 = vpop.f32.mrb[45].mxu1  ;;  %v8946_v28 = vadd.f32 %v10824_v51, %v19789_v6 }
 0x8a9   :  { %10853 = vmatmul.mubr.msk.f32.gmra.mrb[64].mxu1 %vm8731_vm1, %v8730_v39  ;;  %v8941_v38 = vadd.f32 %v19789_v6, %v8940_v42  ;;  %v9866_v2 = vmax.f32 %v9368_v34, %v10480_v40  ;;  %v10084_v3 = vrot.slane %v9865_v53, %v19892_v60 }
 0x8aa   :  { %v9064_v12 = vmax.f32 %v8946_v28, 0.0 }
 0x8ab   :  { %v9063_v17 = vmax.f32 %v8941_v38, 0.0  ;;  %v10088_v43 = vrot.slane %v9866_v2, %v19892_v60 }
 0x8ac   :  { %v9136_v61 = vcombine.high %v9064_v12, %v9064_v12 }
 0x8ad   :  { %v9135_v62 = vcombine.high %v9063_v17, %v9063_v17  ;;  %v9206_v25 = vmax.f32 %v9133_v58, %v9063_v17  ;;  %v10298_v48 = vsel %vm10273_vm2, %v10088_v43, %v10084_v3 }
 0x8af   :  { %v9207_v56 = vmax.f32 %v9062_v45, %v9135_v62  ;;  %v9375_v14 = vrot.slane %v9206_v25, %v15167_v5 }
 0x8b1   :  { %v9376_v1 = vcombine.high %v9375_v14, %v9375_v14  ;;  %v9383_v41 = vrot.slane %v9207_v56, %v15167_v5  ;;  %v10481_v55 = vrot.slane %v9375_v14, 9 }
 0x8b3   :  { %v9384_v57 = vcombine.high %v9383_v41, %v9383_v41  ;;  %v10482_v19 = vrot.slane %v9376_v1, 9  ;;  %v10483_v46 = vrot.slane %v9383_v41, 9  ;;  %v9867_v18 = vmax.f32 %v9375_v14, %v10481_v55 }
 0x8b5   :  { %v10484_v47 = vrot.slane %v9384_v57, 9  ;;  %v9868_v63 = vmax.f32 %v9376_v1, %v10482_v19  ;;  %v9869_v50 = vmax.f32 %v9383_v41, %v10483_v46  ;;  %v10092_v32 = vrot.slane %v9867_v18, %v19892_v60 }
 0x8b7   :  { %v9870_v45 = vmax.f32 %v9384_v57, %v10484_v47  ;;  %v10096_v44 = vrot.slane %v9868_v63, %v19892_v60  ;;  %v10100_v21 = vrot.slane %v9869_v50, %v19892_v60  ;;  %v10299_v31 = vsel %vm10275_vm3, %v10092_v32, %v10298_v48  ;;  %v20253_v57 = vld [vmem:[%s20385_s4] ss:$0 sm:$0xff] }
 0x8b9   :  { %v10104_v11 = vrot.slane %v9870_v45, %v19892_v60  ;;  %v10300_v35 = vsel %vm10277_vm4, %v10096_v44, %v10299_v31 }
 0x8ba   :  { %v10301_v24 = vsel %vm10279_vm6, %v10100_v21, %v10300_v35 }
 0x8bb   :  { %v10302_v10 = vsel %vm10281_vm8, %v10104_v11, %v10301_v24 }
 0x8bc   :  { %10355 = vst.msk [vmem:[%s20386_s5 + $0x20] sm:$0x3f] %vm10350_vm10, %v10302_v10 }
 0x8c3   :  { %v10827_v4 = vpop.f32.mrb[46].mxu1 }
 0x8c4   :  { %v8956_v22 = vadd.f32 %v10827_v4, %v19789_v6  ;;  %v8950_v59 = vpop.f32.mrb[47].mxu1 }
 0x8c5   :  { %v8951_v15 = vadd.f32 %v19789_v6, %v8950_v59 }
 0x8c6   :  { %v9066_v26 = vmax.f32 %v8956_v22, 0.0 }
 0x8c7   :  { %v9065_v37 = vmax.f32 %v8951_v15, 0.0 }
 0x8c8   :  { %v9138_v13 = vcombine.high %v9066_v26, %v9066_v26  ;;  %v9209_v52 = vmax.f32 %v9136_v61, %v9066_v26 }
 0x8c9   :  { %v9137_v36 = vcombine.high %v9065_v37, %v9065_v37 }
 0x8ca   :  { %v9399_v30 = vrot.slane %v9209_v52, %v15167_v5  ;;  %v9210_v33 = vmax.f32 %v9065_v37, %v9138_v13 }
 0x8cb   :  { %v9208_v27 = vmax.f32 %v9064_v12, %v9137_v36 }
 0x8cc   :  { %v9400_v23 = vcombine.high %v9399_v30, %v9399_v30  ;;  %v9407_v7 = vrot.slane %v9210_v33, %v15167_v5  ;;  %v10487_v49 = vrot.slane %v9399_v30, 9 }
 0x8cd   :  { %v9391_v29 = vrot.slane %v9208_v27, %v15167_v5 }
 0x8ce   :  { %v9408_v9 = vcombine.high %v9407_v7, %v9407_v7  ;;  %v10488_v20 = vrot.slane %v9400_v23, 9  ;;  %v10489_v8 = vrot.slane %v9407_v7, 9  ;;  %v9873_v51 = vmax.f32 %v9399_v30, %v10487_v49 }
 0x8cf   :  { %v9392_v16 = vcombine.high %v9391_v29, %v9391_v29  ;;  %v10485_v6 = vrot.slane %v9391_v29, 9 }
 0x8d0   :  { %v10490_v34 = vrot.slane %v9408_v9, 9  ;;  %v9874_v42 = vmax.f32 %v9400_v23, %v10488_v20  ;;  %v9875_v40 = vmax.f32 %v9407_v7, %v10489_v8  ;;  %v10116_v62 = vrot.slane %v9873_v51, %v19892_v60 }
 0x8d1   :  { %v10486_v0 = vrot.slane %v9392_v16, 9  ;;  %v9871_v39 = vmax.f32 %v9391_v29, %v10485_v6 }
 0x8d2   :  { %v9876_v58 = vmax.f32 %v9408_v9, %v10490_v34  ;;  %v10120_v25 = vrot.slane %v9874_v42, %v19892_v60  ;;  %v10124_v56 = vrot.slane %v9875_v40, %v19892_v60 }
 0x8d3   :  { %v9872_v38 = vmax.f32 %v9392_v16, %v10486_v0  ;;  %v10108_v17 = vrot.slane %v9871_v39, %v19892_v60 }
 0x8d4   :  { %v10128_v53 = vrot.slane %v9876_v58, %v19892_v60 }
 0x8d5   :  { %v10112_v54 = vrot.slane %v9872_v38, %v19892_v60 }
 0x8d7   :  { %v10303_v2 = vsel %vm10273_vm2, %v10112_v54, %v10108_v17 }
 0x8d8   :  { %v10304_v14 = vsel %vm10275_vm3, %v10116_v62, %v10303_v2 }
 0x8d9   :  { %v10305_v1 = vsel %vm10277_vm4, %v10120_v25, %v10304_v14 }
 0x8da   :  { %v10306_v41 = vsel %vm10279_vm6, %v10124_v56, %v10305_v1 }
 0x8db   :  { %v10307_v55 = vsel %vm10281_vm8, %v10128_v53, %v10306_v41  ;;  %v10830_v43 = vpop.f32.mrb[48].mxu1 }
 0x8dc   :  { %10356 = vst.msk [vmem:[%s20386_s5 + $0x28] sm:$0x3f] %vm10350_vm10, %v10307_v55  ;;  %v8966_v19 = vadd.f32 %v20253_v57, %v10830_v43  ;;  %v8960_v46 = vpop.f32.mrb[49].mxu1 }
 0x8dd   :  { %v8961_v18 = vadd.f32 %v20253_v57, %v8960_v46 }
 0x8de   :  { %v9068_v3 = vmax.f32 %v8966_v19, 0.0 }
 0x8df   :  { %v9067_v47 = vmax.f32 %v8961_v18, 0.0 }
 0x8e0   :  { %v9140_v63 = vcombine.high %v9068_v3, %v9068_v3 }
 0x8e1   :  { %v9139_v11 = vcombine.high %v9067_v47, %v9067_v47 }
 0x8e2   :  { %v9211_v50 = vmax.f32 %v9067_v47, %v9140_v63 }
 0x8e4   :  { %v9415_v32 = vrot.slane %v9211_v50, %v15167_v5 }
 0x8e6   :  { %v9416_v48 = vcombine.high %v9415_v32, %v9415_v32  ;;  %v10491_v24 = vrot.slane %v9415_v32, 9 }
 0x8e8   :  { %v10833_v45 = vpop.f32.mrb[50].mxu1  ;;  %v10492_v31 = vrot.slane %v9416_v48, 9  ;;  %v9877_v59 = vmax.f32 %v9415_v32, %v10491_v24 }
 0x8e9   :  { %v8970_v44 = vpop.f32.mrb[51].mxu1  ;;  %v8976_v51 = vadd.f32 %v20253_v57, %v10833_v45 }
 0x8ea   :  { %v8971_v21 = vadd.f32 %v20253_v57, %v8970_v44  ;;  %v9878_v12 = vmax.f32 %v9416_v48, %v10492_v31  ;;  %v10132_v33 = vrot.slane %v9877_v59, %v19892_v60 }
 0x8eb   :  { %v9070_v42 = vmax.f32 %v8976_v51, 0.0 }
 0x8ec   :  { %v9069_v35 = vmax.f32 %v8971_v21, 0.0  ;;  %v10136_v37 = vrot.slane %v9878_v12, %v19892_v60 }
 0x8ed   :  { %v9142_v54 = vcombine.high %v9070_v42, %v9070_v42 }
 0x8ee   :  { %v9141_v10 = vcombine.high %v9069_v35, %v9069_v35  ;;  %v9212_v28 = vmax.f32 %v9139_v11, %v9069_v35  ;;  %v10308_v49 = vsel %vm10273_vm2, %v10136_v37, %v10132_v33 }
 0x8f0   :  { %v9213_v4 = vmax.f32 %v9068_v3, %v9141_v10  ;;  %v9423_v22 = vrot.slane %v9212_v28, %v15167_v5 }
 0x8f2   :  { %v9424_v15 = vcombine.high %v9423_v22, %v9423_v22  ;;  %v9431_v61 = vrot.slane %v9213_v4, %v15167_v5  ;;  %v10493_v26 = vrot.slane %v9423_v22, 9 }
 0x8f4   :  { %v9432_v13 = vcombine.high %v9431_v61, %v9431_v61  ;;  %v10494_v52 = vrot.slane %v9424_v15, 9  ;;  %v10495_v36 = vrot.slane %v9431_v61, 9  ;;  %v9879_v30 = vmax.f32 %v9423_v22, %v10493_v26 }
 0x8f6   :  { %v10496_v27 = vrot.slane %v9432_v13, 9  ;;  %v9880_v23 = vmax.f32 %v9424_v15, %v10494_v52  ;;  %v9881_v7 = vmax.f32 %v9431_v61, %v10495_v36  ;;  %v10140_v29 = vrot.slane %v9879_v30, %v19892_v60 }
 0x8f8   :  { %v9882_v9 = vmax.f32 %v9432_v13, %v10496_v27  ;;  %v10144_v20 = vrot.slane %v9880_v23, %v19892_v60  ;;  %v10148_v16 = vrot.slane %v9881_v7, %v19892_v60  ;;  %v10309_v6 = vsel %vm10275_vm3, %v10140_v29, %v10308_v49 }
 0x8fa   :  { %v10152_v8 = vrot.slane %v9882_v9, %v19892_v60  ;;  %v10310_v0 = vsel %vm10277_vm4, %v10144_v20, %v10309_v6 }
 0x8fb   :  { %v10311_v34 = vsel %vm10279_vm6, %v10148_v16, %v10310_v0 }
 0x8fc   :  { %v10312_v39 = vsel %vm10281_vm8, %v10152_v8, %v10311_v34 }
 0x8fd   :  { %10357 = vst.msk [vmem:[%s20386_s5 + $0x30] sm:$0x3f] %vm10350_vm10, %v10312_v39 }
 0x903   :  { %v10836_v38 = vpop.f32.mrb[52].mxu1 }
 0x904   :  { %v8986_v40 = vadd.f32 %v20253_v57, %v10836_v38  ;;  %v8980_v58 = vpop.f32.mrb[53].mxu1 }
 0x905   :  { %v8981_v17 = vadd.f32 %v20253_v57, %v8980_v58 }
 0x906   :  { %v9072_v62 = vmax.f32 %v8986_v40, 0.0 }
 0x907   :  { %v9071_v25 = vmax.f32 %v8981_v17, 0.0 }
 0x908   :  { %v9144_v2 = vcombine.high %v9072_v62, %v9072_v62  ;;  %v9215_v56 = vmax.f32 %v9142_v54, %v9072_v62 }
 0x909   :  { %v9143_v14 = vcombine.high %v9071_v25, %v9071_v25 }
 0x90a   :  { %v9447_v53 = vrot.slane %v9215_v56, %v15167_v5  ;;  %v9216_v1 = vmax.f32 %v9071_v25, %v9144_v2 }
 0x90b   :  { %v9214_v41 = vmax.f32 %v9070_v42, %v9143_v14 }
 0x90c   :  { %v9448_v55 = vcombine.high %v9447_v53, %v9447_v53  ;;  %v9455_v43 = vrot.slane %v9216_v1, %v15167_v5  ;;  %v10499_v46 = vrot.slane %v9447_v53, 9 }
 0x90d   :  { %v9439_v19 = vrot.slane %v9214_v41, %v15167_v5 }
 0x90e   :  { %v9456_v18 = vcombine.high %v9455_v43, %v9455_v43  ;;  %v10500_v3 = vrot.slane %v9448_v55, 9  ;;  %v10501_v50 = vrot.slane %v9455_v43, 9  ;;  %v9885_v44 = vmax.f32 %v9447_v53, %v10499_v46 }
 0x90f   :  { %v9440_v47 = vcombine.high %v9439_v19, %v9439_v19  ;;  %v10497_v63 = vrot.slane %v9439_v19, 9 }
 0x910   :  { %v10502_v48 = vrot.slane %v9456_v18, 9  ;;  %v9886_v21 = vmax.f32 %v9448_v55, %v10500_v3  ;;  %v9887_v11 = vmax.f32 %v9455_v43, %v10501_v50  ;;  %v10164_v28 = vrot.slane %v9885_v44, %v19892_v60 }
 0x911   :  { %v10498_v32 = vrot.slane %v9440_v47, 9  ;;  %v9883_v45 = vmax.f32 %v9439_v19, %v10497_v63 }
 0x912   :  { %v9888_v35 = vmax.f32 %v9456_v18, %v10502_v48  ;;  %v10168_v12 = vrot.slane %v9886_v21, %v19892_v60  ;;  %v10172_v22 = vrot.slane %v9887_v11, %v19892_v60 }
 0x913   :  { %v9884_v31 = vmax.f32 %v9440_v47, %v10498_v32  ;;  %v10156_v24 = vrot.slane %v9883_v45, %v19892_v60 }
 0x914   :  { %v10176_v15 = vrot.slane %v9888_v35, %v19892_v60 }
 0x915   :  { %v10160_v10 = vrot.slane %v9884_v31, %v19892_v60 }
 0x917   :  { %v10313_v4 = vsel %vm10273_vm2, %v10160_v10, %v10156_v24 }
 0x918   :  { %v10314_v59 = vsel %vm10275_vm3, %v10164_v28, %v10313_v4 }
 0x919   :  { %v10315_v61 = vsel %vm10277_vm4, %v10168_v12, %v10314_v59 }
 0x91a   :  { %v10316_v26 = vsel %vm10279_vm6, %v10172_v22, %v10315_v61 }
 0x91b   :  { %v10317_v37 = vsel %vm10281_vm8, %v10176_v15, %v10316_v26  ;;  %v10839_v13 = vpop.f32.mrb[54].mxu1 }
 0x91c   :  { %10358 = vst.msk [vmem:[%s20386_s5 + $0x38] sm:$0x3f] %vm10350_vm10, %v10317_v37  ;;  %v8996_v52 = vadd.f32 %v20253_v57, %v10839_v13  ;;  %v8990_v36 = vpop.f32.mrb[55].mxu1 }
 0x91d   :  { %v8991_v30 = vadd.f32 %v20253_v57, %v8990_v36 }
 0x91e   :  { %v9074_v33 = vmax.f32 %v8996_v52, 0.0 }
 0x91f   :  { %v9073_v27 = vmax.f32 %v8991_v30, 0.0 }
 0x920   :  { %v9146_v23 = vcombine.high %v9074_v33, %v9074_v33 }
 0x921   :  { %v9145_v8 = vcombine.high %v9073_v27, %v9073_v27 }
 0x922   :  { %v9217_v7 = vmax.f32 %v9073_v27, %v9146_v23 }
 0x924   :  { %v9463_v29 = vrot.slane %v9217_v7, %v15167_v5 }
 0x926   :  { %v9464_v49 = vcombine.high %v9463_v29, %v9463_v29  ;;  %v10503_v34 = vrot.slane %v9463_v29, 9 }
 0x928   :  { %v10842_v9 = vpop.f32.mrb[56].mxu1  ;;  %v10504_v6 = vrot.slane %v9464_v49, 9  ;;  %v9889_v58 = vmax.f32 %v9463_v29, %v10503_v34 }
 0x929   :  { %v9000_v20 = vpop.f32.mrb[57].mxu1  ;;  %v9006_v44 = vadd.f32 %v20253_v57, %v10842_v9 }
 0x92a   :  { %v9001_v16 = vadd.f32 %v20253_v57, %v9000_v20  ;;  %v9890_v42 = vmax.f32 %v9464_v49, %v10504_v6  ;;  %v10180_v1 = vrot.slane %v9889_v58, %v19892_v60 }
 0x92b   :  { %v9076_v21 = vmax.f32 %v9006_v44, 0.0 }
 0x92c   :  { %v9075_v0 = vmax.f32 %v9001_v16, 0.0  ;;  %v10184_v25 = vrot.slane %v9890_v42, %v19892_v60 }
 0x92d   :  { %v9148_v10 = vcombine.high %v9076_v21, %v9076_v21 }
 0x92e   :  { %v9147_v39 = vcombine.high %v9075_v0, %v9075_v0  ;;  %v9218_v51 = vmax.f32 %v9145_v8, %v9075_v0  ;;  %v10318_v46 = vsel %vm10273_vm2, %v10184_v25, %v10180_v1 }
 0x930   :  { %v9219_v38 = vmax.f32 %v9074_v33, %v9147_v39  ;;  %v9471_v40 = vrot.slane %v9218_v51, %v15167_v5 }
 0x932   :  { %v9472_v17 = vcombine.high %v9471_v40, %v9471_v40  ;;  %v9479_v54 = vrot.slane %v9219_v38, %v15167_v5  ;;  %v10505_v62 = vrot.slane %v9471_v40, 9 }
 0x934   :  { %v9480_v2 = vcombine.high %v9479_v54, %v9479_v54  ;;  %v10506_v56 = vrot.slane %v9472_v17, 9  ;;  %v10507_v14 = vrot.slane %v9479_v54, 9  ;;  %v9891_v53 = vmax.f32 %v9471_v40, %v10505_v62 }
 0x936   :  { %v10508_v41 = vrot.slane %v9480_v2, 9  ;;  %v9892_v55 = vmax.f32 %v9472_v17, %v10506_v56  ;;  %v9893_v43 = vmax.f32 %v9479_v54, %v10507_v14  ;;  %v10188_v19 = vrot.slane %v9891_v53, %v19892_v60 }
 0x938   :  { %v9894_v18 = vmax.f32 %v9480_v2, %v10508_v41  ;;  %v10192_v3 = vrot.slane %v9892_v55, %v19892_v60  ;;  %v10196_v47 = vrot.slane %v9893_v43, %v19892_v60  ;;  %v10319_v63 = vsel %vm10275_vm3, %v10188_v19, %v10318_v46 }
 0x93a   :  { %v10200_v50 = vrot.slane %v9894_v18, %v19892_v60  ;;  %v10320_v32 = vsel %vm10277_vm4, %v10192_v3, %v10319_v63 }
 0x93b   :  { %v10321_v48 = vsel %vm10279_vm6, %v10196_v47, %v10320_v32 }
 0x93c   :  { %v10322_v45 = vsel %vm10281_vm8, %v10200_v50, %v10321_v48 }
 0x93d   :  { %10359 = vst.msk [vmem:[%s20386_s5 + $0x40] sm:$0x3f] %vm10350_vm10, %v10322_v45 }
 0x943   :  { %v10845_v31 = vpop.f32.mrb[58].mxu1 }
 0x944   :  { %v9016_v11 = vadd.f32 %v20253_v57, %v10845_v31  ;;  %v9010_v35 = vpop.f32.mrb[59].mxu1 }
 0x945   :  { %v9011_v24 = vadd.f32 %v20253_v57, %v9010_v35 }
 0x946   :  { %v9078_v28 = vmax.f32 %v9016_v11, 0.0 }
 0x947   :  { %v9077_v12 = vmax.f32 %v9011_v24, 0.0 }
 0x948   :  { %v9150_v4 = vcombine.high %v9078_v28, %v9078_v28  ;;  %v9221_v22 = vmax.f32 %v9148_v10, %v9078_v28 }
 0x949   :  { %v9149_v59 = vcombine.high %v9077_v12, %v9077_v12 }
 0x94a   :  { %v9495_v15 = vrot.slane %v9221_v22, %v15167_v5  ;;  %v9222_v61 = vmax.f32 %v9077_v12, %v9150_v4 }
 0x94b   :  { %v9220_v26 = vmax.f32 %v9076_v21, %v9149_v59 }
 0x94c   :  { %v9496_v37 = vcombine.high %v9495_v15, %v9495_v15  ;;  %v9503_v13 = vrot.slane %v9222_v61, %v15167_v5  ;;  %v10511_v36 = vrot.slane %v9495_v15, 9 }
 0x94d   :  { %v9487_v52 = vrot.slane %v9220_v26, %v15167_v5 }
 0x94e   :  { %v9504_v30 = vcombine.high %v9503_v13, %v9503_v13  ;;  %v10512_v33 = vrot.slane %v9496_v37, 9  ;;  %v10513_v7 = vrot.slane %v9503_v13, 9  ;;  %v9897_v20 = vmax.f32 %v9495_v15, %v10511_v36 }
 0x94f   :  { %v9488_v27 = vcombine.high %v9487_v52, %v9487_v52  ;;  %v10509_v23 = vrot.slane %v9487_v52, 9 }
 0x950   :  { %v10514_v49 = vrot.slane %v9504_v30, 9  ;;  %v9898_v16 = vmax.f32 %v9496_v37, %v10512_v33  ;;  %v9899_v8 = vmax.f32 %v9503_v13, %v10513_v7  ;;  %v10212_v51 = vrot.slane %v9897_v20, %v19892_v60 }
 0x951   :  { %v10510_v29 = vrot.slane %v9488_v27, 9  ;;  %v9895_v9 = vmax.f32 %v9487_v52, %v10509_v23 }
 0x952   :  { %v9900_v0 = vmax.f32 %v9504_v30, %v10514_v49  ;;  %v10216_v42 = vrot.slane %v9898_v16, %v19892_v60  ;;  %v10220_v40 = vrot.slane %v9899_v8, %v19892_v60 }
 0x953   :  { %v9896_v6 = vmax.f32 %v9488_v27, %v10510_v29  ;;  %v10204_v34 = vrot.slane %v9895_v9, %v19892_v60 }
 0x954   :  { %v10224_v17 = vrot.slane %v9900_v0, %v19892_v60 }
 0x955   :  { %v10208_v39 = vrot.slane %v9896_v6, %v19892_v60 }
 0x957   :  { %v10323_v38 = vsel %vm10273_vm2, %v10208_v39, %v10204_v34 }
 0x958   :  { %v10324_v58 = vsel %vm10275_vm3, %v10212_v51, %v10323_v38 }
 0x959   :  { %v10325_v54 = vsel %vm10277_vm4, %v10216_v42, %v10324_v58 }
 0x95a   :  { %v10326_v62 = vsel %vm10279_vm6, %v10220_v40, %v10325_v54 }
 0x95b   :  { %v10327_v25 = vsel %vm10281_vm8, %v10224_v17, %v10326_v62  ;;  %v10848_v2 = vpop.f32.mrb[60].mxu1 }
 0x95c   :  { %10360 = vst.msk [vmem:[%s20386_s5 + $0x48] sm:$0x3f] %vm10350_vm10, %v10327_v25  ;;  %v9026_v56 = vadd.f32 %v20253_v57, %v10848_v2  ;;  %v9020_v14 = vpop.f32.mrb[61].mxu1 }
 0x95d   :  { %v9021_v53 = vadd.f32 %v20253_v57, %v9020_v14 }
 0x95e   :  { %v9080_v1 = vmax.f32 %v9026_v56, 0.0 }
 0x95f   :  { %v9079_v41 = vmax.f32 %v9021_v53, 0.0 }
 0x960   :  { %v9152_v55 = vcombine.high %v9080_v1, %v9080_v1 }
 0x961   :  { %v9151_v50 = vcombine.high %v9079_v41, %v9079_v41 }
 0x962   :  { %v9223_v43 = vmax.f32 %v9079_v41, %v9152_v55 }
 0x964   :  { %v9511_v19 = vrot.slane %v9223_v43, %v15167_v5 }
 0x966   :  { %v9512_v46 = vcombine.high %v9511_v19, %v9511_v19  ;;  %v10515_v48 = vrot.slane %v9511_v19, 9 }
 0x968   :  { %v10851_v18 = vpop.f32.mrb[62].mxu1  ;;  %v10516_v63 = vrot.slane %v9512_v46, 9  ;;  %v9901_v35 = vmax.f32 %v9511_v19, %v10515_v48 }
 0x969   :  { %v9030_v3 = vpop.f32.mrb[63].mxu1  ;;  %v9036_v26 = vadd.f32 %v20253_v57, %v10851_v18 }
 0x96a   :  { %v9031_v47 = vadd.f32 %v20253_v57, %v9030_v3  ;;  %v9902_v21 = vmax.f32 %v9512_v46, %v10516_v63  ;;  %v10228_v61 = vrot.slane %v9901_v35, %v19892_v60 }
 0x96b   :  { %v9082_v29 = vmax.f32 %v9036_v26, 0.0 }
 0x96c   :  { %v9081_v32 = vmax.f32 %v9031_v47, 0.0  ;;  %v10232_v12 = vrot.slane %v9902_v21, %v19892_v60 }
 0x96d   :  { %v9154_v39 = vcombine.high %v9082_v29, %v9082_v29 }
 0x96e   :  { %v9153_v45 = vcombine.high %v9081_v32, %v9081_v32  ;;  %v9224_v44 = vmax.f32 %v9151_v50, %v9081_v32  ;;  %v10328_v30 = vsel %vm10273_vm2, %v10232_v12, %v10228_v61 }
 0x970   :  { %v9225_v31 = vmax.f32 %v9080_v1, %v9153_v45  ;;  %v9519_v11 = vrot.slane %v9224_v44, %v15167_v5 }
 0x972   :  { %v9520_v24 = vcombine.high %v9519_v11, %v9519_v11  ;;  %v9527_v10 = vrot.slane %v9225_v31, %v15167_v5  ;;  %v10517_v28 = vrot.slane %v9519_v11, 9 }
 0x974   :  { %v9528_v4 = vcombine.high %v9527_v10, %v9527_v10  ;;  %v10518_v22 = vrot.slane %v9520_v24, 9  ;;  %v10519_v59 = vrot.slane %v9527_v10, 9  ;;  %v9903_v15 = vmax.f32 %v9519_v11, %v10517_v28 }
 0x976   :  { %v10520_v37 = vrot.slane %v9528_v4, 9  ;;  %v9904_v13 = vmax.f32 %v9520_v24, %v10518_v22  ;;  %v9905_v52 = vmax.f32 %v9527_v10, %v10519_v59  ;;  %v10236_v36 = vrot.slane %v9903_v15, %v19892_v60 }
 0x978   :  { %v9906_v33 = vmax.f32 %v9528_v4, %v10520_v37  ;;  %v10240_v27 = vrot.slane %v9904_v13, %v19892_v60  ;;  %v10244_v23 = vrot.slane %v9905_v52, %v19892_v60  ;;  %v10329_v7 = vsel %vm10275_vm3, %v10236_v36, %v10328_v30 }
 0x97a   :  { %v10248_v49 = vrot.slane %v9906_v33, %v19892_v60  ;;  %v10330_v9 = vsel %vm10277_vm4, %v10240_v27, %v10329_v7 }
 0x97b   :  { %v10331_v20 = vsel %vm10279_vm6, %v10244_v23, %v10330_v9 }
 0x97c   :  { %v10854_v16 = vpop.f32.mrb[64].mxu1  ;;  %v10332_v6 = vsel %vm10281_vm8, %v10248_v49, %v10331_v20 }
 0x97d   :  { %v9046_v8 = vadd.f32 %v20253_v57, %v10854_v16  ;;  %v9040_v0 = vpop.f32.mrb[65].mxu1  ;;  %10361 = vst.msk [vmem:[%s20386_s5 + $0x50] sm:$0x3f] %vm10350_vm10, %v10332_v6 }
 0x97e   :  { %v9041_v34 = vadd.f32 %v20253_v57, %v9040_v0 }
 0x97f   :  { %v9084_v51 = vmax.f32 %v9046_v8, 0.0 }
 0x980   :  { %v9083_v42 = vmax.f32 %v9041_v34, 0.0 }
 0x981   :  { %v9156_v38 = vcombine.high %v9084_v51, %v9084_v51  ;;  %v9227_v40 = vmax.f32 %v9154_v39, %v9084_v51 }
 0x982   :  { %v9155_v58 = vcombine.high %v9083_v42, %v9083_v42 }
 0x983   :  { %v9543_v17 = vrot.slane %v9227_v40, %v15167_v5  ;;  %v9228_v54 = vmax.f32 %v9083_v42, %v9156_v38 }
 0x984   :  { %v9226_v62 = vmax.f32 %v9082_v29, %v9155_v58 }
 0x985   :  { %v9544_v25 = vcombine.high %v9543_v17, %v9543_v17  ;;  %v9551_v2 = vrot.slane %v9228_v54, %v15167_v5  ;;  %v10523_v14 = vrot.slane %v9543_v17, 9 }
 0x986   :  { %v9535_v56 = vrot.slane %v9226_v62, %v15167_v5 }
 0x987   :  { %v9552_v53 = vcombine.high %v9551_v2, %v9551_v2  ;;  %v10524_v1 = vrot.slane %v9544_v25, 9  ;;  %v10525_v55 = vrot.slane %v9551_v2, 9  ;;  %v9909_v18 = vmax.f32 %v9543_v17, %v10523_v14 }
 0x988   :  { %v9536_v41 = vcombine.high %v9535_v56, %v9535_v56  ;;  %v10521_v57 = vrot.slane %v9535_v56, 9 }
 0x989   :  { %v10526_v19 = vrot.slane %v9552_v53, 9  ;;  %v9910_v3 = vmax.f32 %v9544_v25, %v10524_v1  ;;  %v9911_v63 = vmax.f32 %v9551_v2, %v10525_v55  ;;  %v10260_v5 = vrot.slane %v9909_v18, %v19892_v60 }
 0x98a   :  { %v10522_v43 = vrot.slane %v9536_v41, 9  ;;  %v9907_v46 = vmax.f32 %v9535_v56, %v10521_v57 }
 0x98b   :  { %v9912_v50 = vmax.f32 %v9552_v53, %v10526_v19  ;;  %v10264_v45 = vrot.slane %v9910_v3, %v19892_v60  ;;  %v10268_v21 = vrot.slane %v9911_v63, %v19892_v60 }
 0x98c   :  { %v9908_v47 = vmax.f32 %v9536_v41, %v10522_v43  ;;  %v10252_v32 = vrot.slane %v9907_v46, %v19892_v60 }
 0x98d   :  { %v10272_v11 = vrot.slane %v9912_v50, %v19892_v60 }
 0x98e   :  { %v10256_v48 = vrot.slane %v9908_v47, %v19892_v60 }
 0x990   :  { %v10333_v44 = vsel %vm10273_vm2, %v10256_v48, %v10252_v32 }
 0x991   :  { %v10334_v31 = vsel %vm10275_vm3, %v10260_v5, %v10333_v44 }
 0x992   :  { %v10335_v35 = vsel %vm10277_vm4, %v10264_v45, %v10334_v31 }
 0x993   :  { %v10336_v24 = vsel %vm10279_vm6, %v10268_v21, %v10335_v35 }
 0x994   :  { %v10337_v10 = vsel %vm10281_vm8, %v10272_v11, %v10336_v24 }
 0x995   :  { %10362 = vst.msk [vmem:[%s20386_s5 + $0x58] sm:$0x3f] %vm10350_vm10, %v10337_v10 }

</bundles_post_ra>
